<compile_context>
chip_gen: v7x
topology: tpu7x:2x2x1
jax: 0.10.0
libtpu: 0.0.40
codegen_flags: <defaults>
</compile_context>

<pallas_src>
import math

import jax
import jax.numpy as jnp
from jax.experimental import pallas as pl
from jax.experimental.pallas import tpu as pltpu

# ----------------------- model hyper-parameters (small) ----------------------
VOCAB = 256
D_MODEL = 128
N_HEADS = 4
HEAD_DIM = D_MODEL // N_HEADS
D_FF = 256
N_ENC_LAYERS = 2
N_DEC_LAYERS = 2
MAX_POS = 64
NEG_INF = -1e9
LN_EPS = 1e-5

ENC_KEYS = ("wqkv", "bqkv", "wo", "bo", "ln1_g", "ln1_b",
            "wff1", "bff1", "wff2", "bff2", "ln2_g", "ln2_b")
DEC_KEYS = ("sa_wqkv", "sa_bqkv", "sa_wo", "sa_bo", "ln1_g", "ln1_b",
            "ca_wq", "ca_bq", "ca_wkv", "ca_bkv", "ca_wo", "ca_bo",
            "ln2_g", "ln2_b",
            "wff1", "bff1", "wff2", "bff2", "ln3_g", "ln3_b")


# --------------------------- in-kernel helper math ----------------------------
def _gelu(x):
    c = math.sqrt(2.0 / math.pi)
    return 0.5 * x * (1.0 + jnp.tanh(c * (x + 0.044715 * x * x * x)))


def _layernorm(x, g, b, eps=LN_EPS):
    mean = jnp.mean(x, axis=-1, keepdims=True)
    xc = x - mean
    var = jnp.mean(xc * xc, axis=-1, keepdims=True)
    return xc * jax.lax.rsqrt(var + eps) * g + b


def _proj(x_f32, w_bf16, b_f32):
    """bf16 MXU matmul with f32 accumulation; bias added in f32."""
    return jnp.dot(x_f32.astype(jnp.bfloat16), w_bf16,
                   preferred_element_type=jnp.float32) + b_f32


def _mha(q, k, v, add_mask, wo):
    """Multi-head attention with the head-merge folded into the out-projection.

    q:(Sq,D), k/v:(Sk,D) f32; add_mask broadcastable to (Sq,Sk); wo:(D,D) bf16.
    Returns (Sq,D) f32 = concat_h(softmax(q_h k_h^T / sqrt(hd)) v_h) @ Wo
    (output bias NOT added here).  All MXU matmuls are bf16 with f32 accumulate.
    """
    scale = 1.0 / math.sqrt(HEAD_DIM)
    qb = (q * scale).astype(jnp.bfloat16)
    kb = k.astype(jnp.bfloat16)
    vb = v.astype(jnp.bfloat16)
    out = None
    for h in range(N_HEADS):
        sl = slice(h * HEAD_DIM, (h + 1) * HEAD_DIM)
        # q @ k^T without materializing a transpose (bf16 in, f32 accumulate).
        s = jax.lax.dot_general(qb[:, sl], kb[:, sl], (((1,), (1,)), ((), ())),
                                preferred_element_type=jnp.float32)
        s = s + add_mask
        m = jnp.max(s, axis=-1, keepdims=True)
        p = jnp.exp(s - m)
        inv = pl.reciprocal(jnp.sum(p, axis=-1, keepdims=True), approx=True)
        pv = jnp.dot(p.astype(jnp.bfloat16), vb[:, sl],
                     preferred_element_type=jnp.float32) * inv       # (Sq, hd)
        # Fold the head merge into the output projection: no concatenate.
        out_h = jnp.dot(pv.astype(jnp.bfloat16), wo[sl, :],
                        preferred_element_type=jnp.float32)          # (Sq, D)
        out = out_h if out is None else out + out_h
    return out


def _enc_layer(x, pad_add, p):
    qkv = _proj(x, p["wqkv"], p["bqkv"])                   # fused QKV projection
    q = qkv[:, :D_MODEL]
    k = qkv[:, D_MODEL:2 * D_MODEL]
    v = qkv[:, 2 * D_MODEL:]
    a = _mha(q, k, v, pad_add, p["wo"]) + p["bo"]
    x = _layernorm(x + a, p["ln1_g"], p["ln1_b"])
    h = _gelu(_proj(x, p["wff1"], p["bff1"]))
    h = _proj(h, p["wff2"], p["bff2"])
    return _layernorm(x + h, p["ln2_g"], p["ln2_b"])


def _dec_layer(y, enc_out, cross_add, causal_add, p):
    # masked self-attention (fused QKV projection, in-kernel causal mask)
    qkv = _proj(y, p["sa_wqkv"], p["sa_bqkv"])
    q = qkv[:, :D_MODEL]
    k = qkv[:, D_MODEL:2 * D_MODEL]
    v = qkv[:, 2 * D_MODEL:]
    a = _mha(q, k, v, causal_add, p["sa_wo"]) + p["sa_bo"]
    y = _layernorm(y + a, p["ln1_g"], p["ln1_b"])

    # cross-attention over the encoder output (fused K/V projection)
    q = _proj(y, p["ca_wq"], p["ca_bq"])
    kv = _proj(enc_out, p["ca_wkv"], p["ca_bkv"])
    k = kv[:, :D_MODEL]
    v = kv[:, D_MODEL:]
    c = _mha(q, k, v, cross_add, p["ca_wo"]) + p["ca_bo"]
    y = _layernorm(y + c, p["ln2_g"], p["ln2_b"])

    # FFN
    h = _gelu(_proj(y, p["wff1"], p["bff1"]))
    h = _proj(h, p["wff2"], p["bff2"])
    return _layernorm(y + h, p["ln3_g"], p["ln3_b"])


# ------------------------ single fused forward kernel -------------------------
def _seq2seq_kernel(x_ref, y_ref, am_ref, lab_ref, *refs):
    n_e, n_d = len(ENC_KEYS), len(DEC_KEYS)
    enc_refs = dict(zip(ENC_KEYS, refs[:n_e]))
    dec_refs = dict(zip(DEC_KEYS, refs[n_e:n_e + n_d]))
    lm_w_ref, lm_b_ref, logits_ref, loss_ref = refs[n_e + n_d:]

    x = x_ref[0]                                       # (S_enc, D) f32
    y = y_ref[0]                                       # (S_dec, D) f32

    # Additive key-padding mask built in-kernel from the raw int mask.
    pad_add = jnp.where(am_ref[0] > 0, 0.0, NEG_INF).astype(jnp.float32)  # (1,S_enc)

    # ----- encoder stack (static in-kernel layer loop; weights stacked on L) -----
    for li in range(N_ENC_LAYERS):
        lp = {kname: enc_refs[kname][li] for kname in ENC_KEYS}
        x = _enc_layer(x, pad_add, lp)

    # ----- decoder stack -----
    s_dec = y.shape[0]
    row = jax.lax.broadcasted_iota(jnp.int32, (s_dec, s_dec), 0)
    col = jax.lax.broadcasted_iota(jnp.int32, (s_dec, s_dec), 1)
    causal_add = jnp.where(col <= row, 0.0, NEG_INF).astype(jnp.float32)

    for li in range(N_DEC_LAYERS):
        lp = {kname: dec_refs[kname][li] for kname in DEC_KEYS}
        y = _dec_layer(y, x, pad_add, causal_add, lp)

    # ----- LM head + masked cross-entropy (ignore_index = -100) -----
    logits = _proj(y, lm_w_ref[...], lm_b_ref[...])                  # (S_dec, V)
    logits_ref[0] = logits.astype(logits_ref.dtype)

    labels = lab_ref[0]                                              # (S_dec, 1) i32
    valid = labels != -100
    safe = jnp.where(valid, labels, 0)
    m = jnp.max(logits, axis=-1, keepdims=True)
    lse = jnp.log(jnp.sum(jnp.exp(logits - m), axis=-1, keepdims=True)) + m
    viota = jax.lax.broadcasted_iota(jnp.int32, logits.shape, 1)
    picked = jnp.sum(jnp.where(viota == safe, logits, 0.0), axis=-1, keepdims=True)
    # Per-token masked NLL; the mean normalization happens once in glue.
    loss_ref[0] = (lse - picked) * valid.astype(jnp.float32)         # (S_dec, 1)


def _const_spec(shape):
    nd = len(shape)
    return pl.BlockSpec(shape, lambda b, _nd=nd: (0,) * _nd)


def fused_seq2seq(x_emb, y_emb, att_mask_3d, labels_3d, params):
    B, s_enc, D = x_emb.shape
    s_dec = y_emb.shape[1]
    lm_w = params["lm_head"]["w"]
    lm_b = params["lm_head"]["b"]
    V = lm_w.shape[1]

    weight_args = ([params["enc"][k] for k in ENC_KEYS]
                   + [params["dec"][k] for k in DEC_KEYS]
                   + [lm_w, lm_b])

    in_specs = ([
        pl.BlockSpec((1, s_enc, D), lambda b: (b, 0, 0)),
        pl.BlockSpec((1, s_dec, D), lambda b: (b, 0, 0)),
        pl.BlockSpec((1, 1, s_enc), lambda b: (b, 0, 0)),
        pl.BlockSpec((1, s_dec, 1), lambda b: (b, 0, 0)),
    ] + [_const_spec(w.shape) for w in weight_args])

    out_shape = (jax.ShapeDtypeStruct((B, s_dec, V), jnp.float32),
                 jax.ShapeDtypeStruct((B, s_dec, 1), jnp.float32))
    out_specs = (pl.BlockSpec((1, s_dec, V), lambda b: (b, 0, 0)),
                 pl.BlockSpec((1, s_dec, 1), lambda b: (b, 0, 0)))

    return pl.pallas_call(
        _seq2seq_kernel,
        out_shape=out_shape,
        grid=(B,),
        in_specs=in_specs,
        out_specs=out_specs,
        compiler_params=pltpu.CompilerParams(
            dimension_semantics=("parallel",)),
    )(x_emb, y_emb, att_mask_3d, labels_3d, *weight_args)


# ------------------------------ parameter setup -------------------------------
def _init_dense(key, fan_in, fan_out):
    w = (jax.random.normal(key, (fan_in, fan_out), jnp.float32) * 0.02
         ).astype(jnp.bfloat16)                      # bf16 weights for the MXU
    b = jnp.zeros((1, fan_out), jnp.float32)
    return w, b


def _init_enc_layer(key):
    ks = jax.random.split(key, 4)
    wqkv, bqkv = _init_dense(ks[0], D_MODEL, 3 * D_MODEL)
    wo, bo = _init_dense(ks[1], D_MODEL, D_MODEL)
    wff1, bff1 = _init_dense(ks[2], D_MODEL, D_FF)
    wff2, bff2 = _init_dense(ks[3], D_FF, D_MODEL)
    ones = jnp.ones((1, D_MODEL), jnp.float32)
    zeros = jnp.zeros((1, D_MODEL), jnp.float32)
    return {"wqkv": wqkv, "bqkv": bqkv, "wo": wo, "bo": bo,
            "ln1_g": ones, "ln1_b": zeros,
            "wff1": wff1, "bff1": bff1, "wff2": wff2, "bff2": bff2,
            "ln2_g": ones, "ln2_b": zeros}


def _init_dec_layer(key):
    ks = jax.random.split(key, 7)
    sa_wqkv, sa_bqkv = _init_dense(ks[0], D_MODEL, 3 * D_MODEL)
    sa_wo, sa_bo = _init_dense(ks[1], D_MODEL, D_MODEL)
    ca_wq, ca_bq = _init_dense(ks[2], D_MODEL, D_MODEL)
    ca_wkv, ca_bkv = _init_dense(ks[3], D_MODEL, 2 * D_MODEL)
    ca_wo, ca_bo = _init_dense(ks[4], D_MODEL, D_MODEL)
    wff1, bff1 = _init_dense(ks[5], D_MODEL, D_FF)
    wff2, bff2 = _init_dense(ks[6], D_FF, D_MODEL)
    ones = jnp.ones((1, D_MODEL), jnp.float32)
    zeros = jnp.zeros((1, D_MODEL), jnp.float32)
    return {"sa_wqkv": sa_wqkv, "sa_bqkv": sa_bqkv, "sa_wo": sa_wo, "sa_bo": sa_bo,
            "ln1_g": ones, "ln1_b": zeros,
            "ca_wq": ca_wq, "ca_bq": ca_bq, "ca_wkv": ca_wkv, "ca_bkv": ca_bkv,
            "ca_wo": ca_wo, "ca_bo": ca_bo,
            "ln2_g": ones, "ln2_b": zeros,
            "wff1": wff1, "bff1": bff1, "wff2": wff2, "bff2": bff2,
            "ln3_g": ones, "ln3_b": zeros}


def _stack_layers(layer_dicts):
    """Stack per-layer param dicts on a leading L axis (indexed in-kernel)."""
    return jax.tree_util.tree_map(lambda *xs: jnp.stack(xs, axis=0), *layer_dicts)


def init_params(seed=0):
    key = jax.random.PRNGKey(seed)
    k_tok, k_pe, k_pd, k_lm, k_enc, k_dec = jax.random.split(key, 6)
    lm_w, lm_b = _init_dense(k_lm, D_MODEL, VOCAB)
    enc = _stack_layers([_init_enc_layer(k)
                         for k in jax.random.split(k_enc, N_ENC_LAYERS)])
    dec = _stack_layers([_init_dec_layer(k)
                         for k in jax.random.split(k_dec, N_DEC_LAYERS)])
    return {
        "tok_emb": jax.random.normal(k_tok, (VOCAB, D_MODEL), jnp.float32) * 0.02,
        "pos_emb_enc": jax.random.normal(k_pe, (MAX_POS, D_MODEL), jnp.float32) * 0.02,
        "pos_emb_dec": jax.random.normal(k_pd, (MAX_POS, D_MODEL), jnp.float32) * 0.02,
        "lm_head": {"w": lm_w, "b": lm_b},
        "enc": enc,
        "dec": dec,
    }


# ------------------------------- forward (glue) -------------------------------
def seq2seq_forward(params, input_ids, attention_mask, labels):
    """Mirrors HF seq2seq forward(input_ids, attention_mask, labels):
    encoder-decoder transformer with teacher forcing on right-shifted labels
    and masked cross-entropy (ignore_index=-100).  Returns (loss, logits)."""
    B, s_enc = input_ids.shape
    s_dec = labels.shape[1]

    # TODO(synk): token-embedding gather has no clean Pallas equivalent (XLA glue).
    x = jnp.take(params["tok_emb"], input_ids, axis=0) \
        + params["pos_emb_enc"][:s_enc][None]                      # (B,S_enc,D)

    # HF prepare_decoder_input_ids_from_labels: shift right, replace -100 by pad(0).
    dec_start = jnp.zeros((B, 1), jnp.int32)
    dec_ids = jnp.concatenate([dec_start, labels[:, :-1].astype(jnp.int32)], axis=1)
    dec_ids = jnp.where(dec_ids == -100, 0, dec_ids)
    y = jnp.take(params["tok_emb"], dec_ids, axis=0) \
        + params["pos_emb_dec"][:s_dec][None]                      # (B,S_dec,D)

    am3 = attention_mask.astype(jnp.int32).reshape(B, 1, s_enc)
    lab3 = labels.astype(jnp.int32).reshape(B, s_dec, 1)

    logits, tok_loss = fused_seq2seq(x, y, am3, lab3, params)

    valid = (labels != -100).astype(jnp.float32)
    loss = jnp.sum(tok_loss[..., 0]) / jnp.maximum(jnp.sum(valid), 1.0)
    return loss, logits


# ----------------------------------- driver -----------------------------------
if __name__ == "__main__":
    B, S_ENC, S_DEC = 2, 16, 8
    key = jax.random.PRNGKey(0)
    k1, k2 = jax.random.split(key)
    input_ids = jax.random.randint(k1, (B, S_ENC), 2, VOCAB, dtype=jnp.int32)
    attention_mask = jnp.ones((B, S_ENC), jnp.int32).at[1, 12:].set(0)  # padding
    labels = jax.random.randint(k2, (B, S_DEC), 2, VOCAB, dtype=jnp.int32)
    labels = labels.at[1, 6:].set(-100)                                  # ignored

    params = init_params(seed=0)
    fwd = jax.jit(seq2seq_forward)
    loss, logits = fwd(params, input_ids, attention_mask, labels)
    jax.block_until_ready((loss, logits))
    assert logits.shape == (B, S_DEC, VOCAB)
    assert bool(jnp.isfinite(loss))
    print("KERNEL_OK")
</pallas_src>

<mosaic_0001>
module attributes {stable_mosaic.version = 11 : i64} {
  func.func @_seq2seq_kernel(%arg0: i32, %arg1: memref<1x16x128xf32, #tpu.memory_space<vmem>>, %arg2: memref<1x8x128xf32, #tpu.memory_space<vmem>>, %arg3: memref<1x1x16xi32, #tpu.memory_space<vmem>>, %arg4: memref<1x8x1xi32, #tpu.memory_space<vmem>>, %arg5: memref<2x128x384xbf16, #tpu.memory_space<vmem>>, %arg6: memref<2x1x384xf32, #tpu.memory_space<vmem>>, %arg7: memref<2x128x128xbf16, #tpu.memory_space<vmem>>, %arg8: memref<2x1x128xf32, #tpu.memory_space<vmem>>, %arg9: memref<2x1x128xf32, #tpu.memory_space<vmem>>, %arg10: memref<2x1x128xf32, #tpu.memory_space<vmem>>, %arg11: memref<2x128x256xbf16, #tpu.memory_space<vmem>>, %arg12: memref<2x1x256xf32, #tpu.memory_space<vmem>>, %arg13: memref<2x256x128xbf16, #tpu.memory_space<vmem>>, %arg14: memref<2x1x128xf32, #tpu.memory_space<vmem>>, %arg15: memref<2x1x128xf32, #tpu.memory_space<vmem>>, %arg16: memref<2x1x128xf32, #tpu.memory_space<vmem>>, %arg17: memref<2x128x384xbf16, #tpu.memory_space<vmem>>, %arg18: memref<2x1x384xf32, #tpu.memory_space<vmem>>, %arg19: memref<2x128x128xbf16, #tpu.memory_space<vmem>>, %arg20: memref<2x1x128xf32, #tpu.memory_space<vmem>>, %arg21: memref<2x1x128xf32, #tpu.memory_space<vmem>>, %arg22: memref<2x1x128xf32, #tpu.memory_space<vmem>>, %arg23: memref<2x128x128xbf16, #tpu.memory_space<vmem>>, %arg24: memref<2x1x128xf32, #tpu.memory_space<vmem>>, %arg25: memref<2x128x256xbf16, #tpu.memory_space<vmem>>, %arg26: memref<2x1x256xf32, #tpu.memory_space<vmem>>, %arg27: memref<2x128x128xbf16, #tpu.memory_space<vmem>>, %arg28: memref<2x1x128xf32, #tpu.memory_space<vmem>>, %arg29: memref<2x1x128xf32, #tpu.memory_space<vmem>>, %arg30: memref<2x1x128xf32, #tpu.memory_space<vmem>>, %arg31: memref<2x128x256xbf16, #tpu.memory_space<vmem>>, %arg32: memref<2x1x256xf32, #tpu.memory_space<vmem>>, %arg33: memref<2x256x128xbf16, #tpu.memory_space<vmem>>, %arg34: memref<2x1x128xf32, #tpu.memory_space<vmem>>, %arg35: memref<2x1x128xf32, #tpu.memory_space<vmem>>, %arg36: memref<2x1x128xf32, #tpu.memory_space<vmem>>, %arg37: memref<128x256xbf16, #tpu.memory_space<vmem>>, %arg38: memref<1x256xf32, #tpu.memory_space<vmem>>, %arg39: memref<1x8x256xf32, #tpu.memory_space<vmem>>, %arg40: memref<1x8x1xf32, #tpu.memory_space<vmem>>) attributes {dimension_semantics = [#tpu.dimension_semantics<parallel>], iteration_bounds = array<i64: 2>, scalar_prefetch = 0 : i64, scratch_operands = 0 : i64, tpu.core_type = #tpu.core_type<tc>, window_params = [{transform_indices = @transform_0, window_bounds = array<i64: 1, 16, 128>}, {transform_indices = @transform_1, window_bounds = array<i64: 1, 8, 128>}, {transform_indices = @transform_2, window_bounds = array<i64: 1, 1, 16>}, {transform_indices = @transform_3, window_bounds = array<i64: 1, 8, 1>}, {pipeline_mode = #tpu.pipeline_mode<synchronous>, transform_indices = @transform_4, window_bounds = array<i64: 2, 128, 384>}, {pipeline_mode = #tpu.pipeline_mode<synchronous>, transform_indices = @transform_5, window_bounds = array<i64: 2, 1, 384>}, {pipeline_mode = #tpu.pipeline_mode<synchronous>, transform_indices = @transform_6, window_bounds = array<i64: 2, 128, 128>}, {pipeline_mode = #tpu.pipeline_mode<synchronous>, transform_indices = @transform_7, window_bounds = array<i64: 2, 1, 128>}, {pipeline_mode = #tpu.pipeline_mode<synchronous>, transform_indices = @transform_8, window_bounds = array<i64: 2, 1, 128>}, {pipeline_mode = #tpu.pipeline_mode<synchronous>, transform_indices = @transform_9, window_bounds = array<i64: 2, 1, 128>}, {pipeline_mode = #tpu.pipeline_mode<synchronous>, transform_indices = @transform_10, window_bounds = array<i64: 2, 128, 256>}, {pipeline_mode = #tpu.pipeline_mode<synchronous>, transform_indices = @transform_11, window_bounds = array<i64: 2, 1, 256>}, {pipeline_mode = #tpu.pipeline_mode<synchronous>, transform_indices = @transform_12, window_bounds = array<i64: 2, 256, 128>}, {pipeline_mode = #tpu.pipeline_mode<synchronous>, transform_indices = @transform_13, window_bounds = array<i64: 2, 1, 128>}, {pipeline_mode = #tpu.pipeline_mode<synchronous>, transform_indices = @transform_14, window_bounds = array<i64: 2, 1, 128>}, {pipeline_mode = #tpu.pipeline_mode<synchronous>, transform_indices = @transform_15, window_bounds = array<i64: 2, 1, 128>}, {pipeline_mode = #tpu.pipeline_mode<synchronous>, transform_indices = @transform_16, window_bounds = array<i64: 2, 128, 384>}, {pipeline_mode = #tpu.pipeline_mode<synchronous>, transform_indices = @transform_17, window_bounds = array<i64: 2, 1, 384>}, {pipeline_mode = #tpu.pipeline_mode<synchronous>, transform_indices = @transform_18, window_bounds = array<i64: 2, 128, 128>}, {pipeline_mode = #tpu.pipeline_mode<synchronous>, transform_indices = @transform_19, window_bounds = array<i64: 2, 1, 128>}, {pipeline_mode = #tpu.pipeline_mode<synchronous>, transform_indices = @transform_20, window_bounds = array<i64: 2, 1, 128>}, {pipeline_mode = #tpu.pipeline_mode<synchronous>, transform_indices = @transform_21, window_bounds = array<i64: 2, 1, 128>}, {pipeline_mode = #tpu.pipeline_mode<synchronous>, transform_indices = @transform_22, window_bounds = array<i64: 2, 128, 128>}, {pipeline_mode = #tpu.pipeline_mode<synchronous>, transform_indices = @transform_23, window_bounds = array<i64: 2, 1, 128>}, {pipeline_mode = #tpu.pipeline_mode<synchronous>, transform_indices = @transform_24, window_bounds = array<i64: 2, 128, 256>}, {pipeline_mode = #tpu.pipeline_mode<synchronous>, transform_indices = @transform_25, window_bounds = array<i64: 2, 1, 256>}, {pipeline_mode = #tpu.pipeline_mode<synchronous>, transform_indices = @transform_26, window_bounds = array<i64: 2, 128, 128>}, {pipeline_mode = #tpu.pipeline_mode<synchronous>, transform_indices = @transform_27, window_bounds = array<i64: 2, 1, 128>}, {pipeline_mode = #tpu.pipeline_mode<synchronous>, transform_indices = @transform_28, window_bounds = array<i64: 2, 1, 128>}, {pipeline_mode = #tpu.pipeline_mode<synchronous>, transform_indices = @transform_29, window_bounds = array<i64: 2, 1, 128>}, {pipeline_mode = #tpu.pipeline_mode<synchronous>, transform_indices = @transform_30, window_bounds = array<i64: 2, 128, 256>}, {pipeline_mode = #tpu.pipeline_mode<synchronous>, transform_indices = @transform_31, window_bounds = array<i64: 2, 1, 256>}, {pipeline_mode = #tpu.pipeline_mode<synchronous>, transform_indices = @transform_32, window_bounds = array<i64: 2, 256, 128>}, {pipeline_mode = #tpu.pipeline_mode<synchronous>, transform_indices = @transform_33, window_bounds = array<i64: 2, 1, 128>}, {pipeline_mode = #tpu.pipeline_mode<synchronous>, transform_indices = @transform_34, window_bounds = array<i64: 2, 1, 128>}, {pipeline_mode = #tpu.pipeline_mode<synchronous>, transform_indices = @transform_35, window_bounds = array<i64: 2, 1, 128>}, {pipeline_mode = #tpu.pipeline_mode<synchronous>, transform_indices = @transform_36, window_bounds = array<i64: 128, 256>}, {pipeline_mode = #tpu.pipeline_mode<synchronous>, transform_indices = @transform_37, window_bounds = array<i64: 1, 256>}, {transform_indices = @transform_38, window_bounds = array<i64: 1, 8, 256>}, {transform_indices = @transform_39, window_bounds = array<i64: 1, 8, 1>}]} {
    %c0 = arith.constant 0 : index
    %c0_0 = arith.constant 0 : index
    %c0_1 = arith.constant 0 : index
    %0 = vector.load %arg1[%c0, %c0_0, %c0_1] : memref<1x16x128xf32, #tpu.memory_space<vmem>>, vector<1x16x128xf32>
    %1 = vector.shape_cast %0 : vector<1x16x128xf32> to vector<16x128xf32>
    %c0_2 = arith.constant 0 : index
    %c0_3 = arith.constant 0 : index
    %c0_4 = arith.constant 0 : index
    %2 = vector.load %arg2[%c0_2, %c0_3, %c0_4] : memref<1x8x128xf32, #tpu.memory_space<vmem>>, vector<1x8x128xf32>
    %3 = vector.shape_cast %2 : vector<1x8x128xf32> to vector<8x128xf32>
    %c0_5 = arith.constant 0 : index
    %c0_6 = arith.constant 0 : index
    %c0_7 = arith.constant 0 : index
    %4 = vector.load %arg3[%c0_5, %c0_6, %c0_7] : memref<1x1x16xi32, #tpu.memory_space<vmem>>, vector<1x1x16xi32>
    %5 = vector.shape_cast %4 : vector<1x1x16xi32> to vector<1x16xi32>
    %c0_i32 = arith.constant 0 : i32
    %6 = vector.broadcast %c0_i32 : i32 to vector<1x16xi32>
    %7 = arith.cmpi sgt, %5, %6 : vector<1x16xi32>
    %cst = arith.constant 0.000000e+00 : f32
    %cst_8 = arith.constant -1.000000e+09 : f32
    %8 = vector.broadcast %cst : f32 to vector<1x16xf32>
    %9 = vector.broadcast %cst_8 : f32 to vector<1x16xf32>
    %10 = arith.select %7, %8, %9 : vector<1x16xi1>, vector<1x16xf32>
    %c0_9 = arith.constant 0 : index
    %c0_10 = arith.constant 0 : index
    %c0_11 = arith.constant 0 : index
    %11 = vector.load %arg5[%c0_9, %c0_10, %c0_11] : memref<2x128x384xbf16, #tpu.memory_space<vmem>>, vector<1x128x384xbf16>
    %12 = vector.shape_cast %11 : vector<1x128x384xbf16> to vector<128x384xbf16>
    %c0_12 = arith.constant 0 : index
    %c0_13 = arith.constant 0 : index
    %c0_14 = arith.constant 0 : index
    %13 = vector.load %arg6[%c0_12, %c0_13, %c0_14] : memref<2x1x384xf32, #tpu.memory_space<vmem>>, vector<1x1x384xf32>
    %14 = vector.shape_cast %13 : vector<1x1x384xf32> to vector<1x384xf32>
    %c0_15 = arith.constant 0 : index
    %c0_16 = arith.constant 0 : index
    %c0_17 = arith.constant 0 : index
    %15 = vector.load %arg7[%c0_15, %c0_16, %c0_17] : memref<2x128x128xbf16, #tpu.memory_space<vmem>>, vector<1x128x128xbf16>
    %16 = vector.shape_cast %15 : vector<1x128x128xbf16> to vector<128x128xbf16>
    %c0_18 = arith.constant 0 : index
    %c0_19 = arith.constant 0 : index
    %c0_20 = arith.constant 0 : index
    %17 = vector.load %arg8[%c0_18, %c0_19, %c0_20] : memref<2x1x128xf32, #tpu.memory_space<vmem>>, vector<1x1x128xf32>
    %18 = vector.shape_cast %17 : vector<1x1x128xf32> to vector<1x128xf32>
    %c0_21 = arith.constant 0 : index
    %c0_22 = arith.constant 0 : index
    %c0_23 = arith.constant 0 : index
    %19 = vector.load %arg9[%c0_21, %c0_22, %c0_23] : memref<2x1x128xf32, #tpu.memory_space<vmem>>, vector<1x1x128xf32>
    %20 = vector.shape_cast %19 : vector<1x1x128xf32> to vector<1x128xf32>
    %c0_24 = arith.constant 0 : index
    %c0_25 = arith.constant 0 : index
    %c0_26 = arith.constant 0 : index
    %21 = vector.load %arg10[%c0_24, %c0_25, %c0_26] : memref<2x1x128xf32, #tpu.memory_space<vmem>>, vector<1x1x128xf32>
    %22 = vector.shape_cast %21 : vector<1x1x128xf32> to vector<1x128xf32>
    %c0_27 = arith.constant 0 : index
    %c0_28 = arith.constant 0 : index
    %c0_29 = arith.constant 0 : index
    %23 = vector.load %arg11[%c0_27, %c0_28, %c0_29] : memref<2x128x256xbf16, #tpu.memory_space<vmem>>, vector<1x128x256xbf16>
    %24 = vector.shape_cast %23 : vector<1x128x256xbf16> to vector<128x256xbf16>
    %c0_30 = arith.constant 0 : index
    %c0_31 = arith.constant 0 : index
    %c0_32 = arith.constant 0 : index
    %25 = vector.load %arg12[%c0_30, %c0_31, %c0_32] : memref<2x1x256xf32, #tpu.memory_space<vmem>>, vector<1x1x256xf32>
    %26 = vector.shape_cast %25 : vector<1x1x256xf32> to vector<1x256xf32>
    %c0_33 = arith.constant 0 : index
    %c0_34 = arith.constant 0 : index
    %c0_35 = arith.constant 0 : index
    %27 = vector.load %arg13[%c0_33, %c0_34, %c0_35] : memref<2x256x128xbf16, #tpu.memory_space<vmem>>, vector<1x256x128xbf16>
    %28 = vector.shape_cast %27 : vector<1x256x128xbf16> to vector<256x128xbf16>
    %c0_36 = arith.constant 0 : index
    %c0_37 = arith.constant 0 : index
    %c0_38 = arith.constant 0 : index
    %29 = vector.load %arg14[%c0_36, %c0_37, %c0_38] : memref<2x1x128xf32, #tpu.memory_space<vmem>>, vector<1x1x128xf32>
    %30 = vector.shape_cast %29 : vector<1x1x128xf32> to vector<1x128xf32>
    %c0_39 = arith.constant 0 : index
    %c0_40 = arith.constant 0 : index
    %c0_41 = arith.constant 0 : index
    %31 = vector.load %arg15[%c0_39, %c0_40, %c0_41] : memref<2x1x128xf32, #tpu.memory_space<vmem>>, vector<1x1x128xf32>
    %32 = vector.shape_cast %31 : vector<1x1x128xf32> to vector<1x128xf32>
    %c0_42 = arith.constant 0 : index
    %c0_43 = arith.constant 0 : index
    %c0_44 = arith.constant 0 : index
    %33 = vector.load %arg16[%c0_42, %c0_43, %c0_44] : memref<2x1x128xf32, #tpu.memory_space<vmem>>, vector<1x1x128xf32>
    %34 = vector.shape_cast %33 : vector<1x1x128xf32> to vector<1x128xf32>
    %35 = arith.truncf %1 : vector<16x128xf32> to vector<16x128xbf16>
    %cst_45 = arith.constant dense<0.000000e+00> : vector<16x384xf32>
    %36 = tpu.matmul %35, %12, %cst_45 {dimension_numbers = #tpu.dot_dimension_numbers<[1], [0], [0], [1], [0, 0, 1, 1], [], []>} : vector<16x128xbf16>, vector<128x384xbf16>, vector<16x384xf32> -> vector<16x384xf32>
    %37 = vector.broadcast %14 : vector<1x384xf32> to vector<16x384xf32>
    %38 = arith.addf %36, %37 : vector<16x384xf32>
    %39 = vector.extract_strided_slice %38 {offsets = [0, 0], sizes = [16, 128], strides = [1, 1]} : vector<16x384xf32> to vector<16x128xf32>
    %40 = vector.extract_strided_slice %38 {offsets = [0, 128], sizes = [16, 128], strides = [1, 1]} : vector<16x384xf32> to vector<16x128xf32>
    %41 = vector.extract_strided_slice %38 {offsets = [0, 256], sizes = [16, 128], strides = [1, 1]} : vector<16x384xf32> to vector<16x128xf32>
    %cst_46 = arith.constant 0.176776692 : f32
    %42 = vector.broadcast %cst_46 : f32 to vector<16x128xf32>
    %43 = arith.mulf %39, %42 : vector<16x128xf32>
    %44 = arith.truncf %43 : vector<16x128xf32> to vector<16x128xbf16>
    %45 = arith.truncf %40 : vector<16x128xf32> to vector<16x128xbf16>
    %46 = arith.truncf %41 : vector<16x128xf32> to vector<16x128xbf16>
    %47 = vector.extract_strided_slice %44 {offsets = [0, 0], sizes = [16, 32], strides = [1, 1]} : vector<16x128xbf16> to vector<16x32xbf16>
    %48 = vector.extract_strided_slice %45 {offsets = [0, 0], sizes = [16, 32], strides = [1, 1]} : vector<16x128xbf16> to vector<16x32xbf16>
    %cst_47 = arith.constant dense<0.000000e+00> : vector<16x16xf32>
    %49 = tpu.matmul %47, %48, %cst_47 {dimension_numbers = #tpu.dot_dimension_numbers<[1], [1], [0], [0], [0, 0, 1, 0], [], []>} : vector<16x32xbf16>, vector<16x32xbf16>, vector<16x16xf32> -> vector<16x16xf32>
    %50 = vector.broadcast %10 : vector<1x16xf32> to vector<16x16xf32>
    %51 = arith.addf %49, %50 : vector<16x16xf32>
    %cst_48 = arith.constant dense<0xFF800000> : vector<16xf32>
    %52 = vector.multi_reduction <maximumf>, %51, %cst_48 [1] : vector<16x16xf32> to vector<16xf32>
    %53 = vector.shape_cast %52 : vector<16xf32> to vector<16x1xf32>
    %54 = vector.broadcast %53 : vector<16x1xf32> to vector<16x16xf32>
    %55 = arith.subf %51, %54 : vector<16x16xf32>
    %56 = math.exp %55 : vector<16x16xf32>
    %cst_49 = arith.constant dense<0.000000e+00> : vector<16xf32>
    %57 = vector.multi_reduction <add>, %56, %cst_49 [1] : vector<16x16xf32> to vector<16xf32>
    %58 = vector.shape_cast %57 : vector<16xf32> to vector<16x1xf32>
    %59 = tpu.reciprocal %58 {approx = true} : vector<16x1xf32> -> vector<16x1xf32>
    %60 = arith.truncf %56 : vector<16x16xf32> to vector<16x16xbf16>
    %61 = vector.extract_strided_slice %46 {offsets = [0, 0], sizes = [16, 32], strides = [1, 1]} : vector<16x128xbf16> to vector<16x32xbf16>
    %cst_50 = arith.constant dense<0.000000e+00> : vector<16x32xf32>
    %62 = tpu.matmul %60, %61, %cst_50 {dimension_numbers = #tpu.dot_dimension_numbers<[1], [0], [0], [1], [0, 0, 1, 1], [], []>} : vector<16x16xbf16>, vector<16x32xbf16>, vector<16x32xf32> -> vector<16x32xf32>
    %63 = vector.broadcast %59 : vector<16x1xf32> to vector<16x32xf32>
    %64 = arith.mulf %62, %63 : vector<16x32xf32>
    %65 = arith.truncf %64 : vector<16x32xf32> to vector<16x32xbf16>
    %66 = vector.extract_strided_slice %16 {offsets = [0, 0], sizes = [32, 128], strides = [1, 1]} : vector<128x128xbf16> to vector<32x128xbf16>
    %cst_51 = arith.constant dense<0.000000e+00> : vector<16x128xf32>
    %67 = tpu.matmul %65, %66, %cst_51 {dimension_numbers = #tpu.dot_dimension_numbers<[1], [0], [0], [1], [0, 0, 1, 1], [], []>} : vector<16x32xbf16>, vector<32x128xbf16>, vector<16x128xf32> -> vector<16x128xf32>
    %68 = vector.extract_strided_slice %44 {offsets = [0, 32], sizes = [16, 32], strides = [1, 1]} : vector<16x128xbf16> to vector<16x32xbf16>
    %69 = vector.extract_strided_slice %45 {offsets = [0, 32], sizes = [16, 32], strides = [1, 1]} : vector<16x128xbf16> to vector<16x32xbf16>
    %cst_52 = arith.constant dense<0.000000e+00> : vector<16x16xf32>
    %70 = tpu.matmul %68, %69, %cst_52 {dimension_numbers = #tpu.dot_dimension_numbers<[1], [1], [0], [0], [0, 0, 1, 0], [], []>} : vector<16x32xbf16>, vector<16x32xbf16>, vector<16x16xf32> -> vector<16x16xf32>
    %71 = vector.broadcast %10 : vector<1x16xf32> to vector<16x16xf32>
    %72 = arith.addf %70, %71 : vector<16x16xf32>
    %cst_53 = arith.constant dense<0xFF800000> : vector<16xf32>
    %73 = vector.multi_reduction <maximumf>, %72, %cst_53 [1] : vector<16x16xf32> to vector<16xf32>
    %74 = vector.shape_cast %73 : vector<16xf32> to vector<16x1xf32>
    %75 = vector.broadcast %74 : vector<16x1xf32> to vector<16x16xf32>
    %76 = arith.subf %72, %75 : vector<16x16xf32>
    %77 = math.exp %76 : vector<16x16xf32>
    %cst_54 = arith.constant dense<0.000000e+00> : vector<16xf32>
    %78 = vector.multi_reduction <add>, %77, %cst_54 [1] : vector<16x16xf32> to vector<16xf32>
    %79 = vector.shape_cast %78 : vector<16xf32> to vector<16x1xf32>
    %80 = tpu.reciprocal %79 {approx = true} : vector<16x1xf32> -> vector<16x1xf32>
    %81 = arith.truncf %77 : vector<16x16xf32> to vector<16x16xbf16>
    %82 = vector.extract_strided_slice %46 {offsets = [0, 32], sizes = [16, 32], strides = [1, 1]} : vector<16x128xbf16> to vector<16x32xbf16>
    %cst_55 = arith.constant dense<0.000000e+00> : vector<16x32xf32>
    %83 = tpu.matmul %81, %82, %cst_55 {dimension_numbers = #tpu.dot_dimension_numbers<[1], [0], [0], [1], [0, 0, 1, 1], [], []>} : vector<16x16xbf16>, vector<16x32xbf16>, vector<16x32xf32> -> vector<16x32xf32>
    %84 = vector.broadcast %80 : vector<16x1xf32> to vector<16x32xf32>
    %85 = arith.mulf %83, %84 : vector<16x32xf32>
    %86 = arith.truncf %85 : vector<16x32xf32> to vector<16x32xbf16>
    %87 = vector.extract_strided_slice %16 {offsets = [32, 0], sizes = [32, 128], strides = [1, 1]} : vector<128x128xbf16> to vector<32x128xbf16>
    %cst_56 = arith.constant dense<0.000000e+00> : vector<16x128xf32>
    %88 = tpu.matmul %86, %87, %cst_56 {dimension_numbers = #tpu.dot_dimension_numbers<[1], [0], [0], [1], [0, 0, 1, 1], [], []>} : vector<16x32xbf16>, vector<32x128xbf16>, vector<16x128xf32> -> vector<16x128xf32>
    %89 = arith.addf %67, %88 : vector<16x128xf32>
    %90 = vector.extract_strided_slice %44 {offsets = [0, 64], sizes = [16, 32], strides = [1, 1]} : vector<16x128xbf16> to vector<16x32xbf16>
    %91 = vector.extract_strided_slice %45 {offsets = [0, 64], sizes = [16, 32], strides = [1, 1]} : vector<16x128xbf16> to vector<16x32xbf16>
    %cst_57 = arith.constant dense<0.000000e+00> : vector<16x16xf32>
    %92 = tpu.matmul %90, %91, %cst_57 {dimension_numbers = #tpu.dot_dimension_numbers<[1], [1], [0], [0], [0, 0, 1, 0], [], []>} : vector<16x32xbf16>, vector<16x32xbf16>, vector<16x16xf32> -> vector<16x16xf32>
    %93 = vector.broadcast %10 : vector<1x16xf32> to vector<16x16xf32>
    %94 = arith.addf %92, %93 : vector<16x16xf32>
    %cst_58 = arith.constant dense<0xFF800000> : vector<16xf32>
    %95 = vector.multi_reduction <maximumf>, %94, %cst_58 [1] : vector<16x16xf32> to vector<16xf32>
    %96 = vector.shape_cast %95 : vector<16xf32> to vector<16x1xf32>
    %97 = vector.broadcast %96 : vector<16x1xf32> to vector<16x16xf32>
    %98 = arith.subf %94, %97 : vector<16x16xf32>
    %99 = math.exp %98 : vector<16x16xf32>
    %cst_59 = arith.constant dense<0.000000e+00> : vector<16xf32>
    %100 = vector.multi_reduction <add>, %99, %cst_59 [1] : vector<16x16xf32> to vector<16xf32>
    %101 = vector.shape_cast %100 : vector<16xf32> to vector<16x1xf32>
    %102 = tpu.reciprocal %101 {approx = true} : vector<16x1xf32> -> vector<16x1xf32>
    %103 = arith.truncf %99 : vector<16x16xf32> to vector<16x16xbf16>
    %104 = vector.extract_strided_slice %46 {offsets = [0, 64], sizes = [16, 32], strides = [1, 1]} : vector<16x128xbf16> to vector<16x32xbf16>
    %cst_60 = arith.constant dense<0.000000e+00> : vector<16x32xf32>
    %105 = tpu.matmul %103, %104, %cst_60 {dimension_numbers = #tpu.dot_dimension_numbers<[1], [0], [0], [1], [0, 0, 1, 1], [], []>} : vector<16x16xbf16>, vector<16x32xbf16>, vector<16x32xf32> -> vector<16x32xf32>
    %106 = vector.broadcast %102 : vector<16x1xf32> to vector<16x32xf32>
    %107 = arith.mulf %105, %106 : vector<16x32xf32>
    %108 = arith.truncf %107 : vector<16x32xf32> to vector<16x32xbf16>
    %109 = vector.extract_strided_slice %16 {offsets = [64, 0], sizes = [32, 128], strides = [1, 1]} : vector<128x128xbf16> to vector<32x128xbf16>
    %cst_61 = arith.constant dense<0.000000e+00> : vector<16x128xf32>
    %110 = tpu.matmul %108, %109, %cst_61 {dimension_numbers = #tpu.dot_dimension_numbers<[1], [0], [0], [1], [0, 0, 1, 1], [], []>} : vector<16x32xbf16>, vector<32x128xbf16>, vector<16x128xf32> -> vector<16x128xf32>
    %111 = arith.addf %89, %110 : vector<16x128xf32>
    %112 = vector.extract_strided_slice %44 {offsets = [0, 96], sizes = [16, 32], strides = [1, 1]} : vector<16x128xbf16> to vector<16x32xbf16>
    %113 = vector.extract_strided_slice %45 {offsets = [0, 96], sizes = [16, 32], strides = [1, 1]} : vector<16x128xbf16> to vector<16x32xbf16>
    %cst_62 = arith.constant dense<0.000000e+00> : vector<16x16xf32>
    %114 = tpu.matmul %112, %113, %cst_62 {dimension_numbers = #tpu.dot_dimension_numbers<[1], [1], [0], [0], [0, 0, 1, 0], [], []>} : vector<16x32xbf16>, vector<16x32xbf16>, vector<16x16xf32> -> vector<16x16xf32>
    %115 = vector.broadcast %10 : vector<1x16xf32> to vector<16x16xf32>
    %116 = arith.addf %114, %115 : vector<16x16xf32>
    %cst_63 = arith.constant dense<0xFF800000> : vector<16xf32>
    %117 = vector.multi_reduction <maximumf>, %116, %cst_63 [1] : vector<16x16xf32> to vector<16xf32>
    %118 = vector.shape_cast %117 : vector<16xf32> to vector<16x1xf32>
    %119 = vector.broadcast %118 : vector<16x1xf32> to vector<16x16xf32>
    %120 = arith.subf %116, %119 : vector<16x16xf32>
    %121 = math.exp %120 : vector<16x16xf32>
    %cst_64 = arith.constant dense<0.000000e+00> : vector<16xf32>
    %122 = vector.multi_reduction <add>, %121, %cst_64 [1] : vector<16x16xf32> to vector<16xf32>
    %123 = vector.shape_cast %122 : vector<16xf32> to vector<16x1xf32>
    %124 = tpu.reciprocal %123 {approx = true} : vector<16x1xf32> -> vector<16x1xf32>
    %125 = arith.truncf %121 : vector<16x16xf32> to vector<16x16xbf16>
    %126 = vector.extract_strided_slice %46 {offsets = [0, 96], sizes = [16, 32], strides = [1, 1]} : vector<16x128xbf16> to vector<16x32xbf16>
    %cst_65 = arith.constant dense<0.000000e+00> : vector<16x32xf32>
    %127 = tpu.matmul %125, %126, %cst_65 {dimension_numbers = #tpu.dot_dimension_numbers<[1], [0], [0], [1], [0, 0, 1, 1], [], []>} : vector<16x16xbf16>, vector<16x32xbf16>, vector<16x32xf32> -> vector<16x32xf32>
    %128 = vector.broadcast %124 : vector<16x1xf32> to vector<16x32xf32>
    %129 = arith.mulf %127, %128 : vector<16x32xf32>
    %130 = arith.truncf %129 : vector<16x32xf32> to vector<16x32xbf16>
    %131 = vector.extract_strided_slice %16 {offsets = [96, 0], sizes = [32, 128], strides = [1, 1]} : vector<128x128xbf16> to vector<32x128xbf16>
    %cst_66 = arith.constant dense<0.000000e+00> : vector<16x128xf32>
    %132 = tpu.matmul %130, %131, %cst_66 {dimension_numbers = #tpu.dot_dimension_numbers<[1], [0], [0], [1], [0, 0, 1, 1], [], []>} : vector<16x32xbf16>, vector<32x128xbf16>, vector<16x128xf32> -> vector<16x128xf32>
    %133 = arith.addf %111, %132 : vector<16x128xf32>
    %134 = vector.broadcast %18 : vector<1x128xf32> to vector<16x128xf32>
    %135 = arith.addf %133, %134 : vector<16x128xf32>
    %136 = arith.addf %1, %135 : vector<16x128xf32>
    %cst_67 = arith.constant dense<0.000000e+00> : vector<16xf32>
    %137 = vector.multi_reduction <add>, %136, %cst_67 [1] : vector<16x128xf32> to vector<16xf32>
    %138 = vector.shape_cast %137 : vector<16xf32> to vector<16x1xf32>
    %cst_68 = arith.constant 1.280000e+02 : f32
    %139 = vector.broadcast %cst_68 : f32 to vector<16x1xf32>
    %140 = arith.divf %138, %139 : vector<16x1xf32>
    %141 = vector.broadcast %140 : vector<16x1xf32> to vector<16x128xf32>
    %142 = arith.subf %136, %141 : vector<16x128xf32>
    %143 = arith.mulf %142, %142 : vector<16x128xf32>
    %cst_69 = arith.constant dense<0.000000e+00> : vector<16xf32>
    %144 = vector.multi_reduction <add>, %143, %cst_69 [1] : vector<16x128xf32> to vector<16xf32>
    %145 = vector.shape_cast %144 : vector<16xf32> to vector<16x1xf32>
    %cst_70 = arith.constant 1.280000e+02 : f32
    %146 = vector.broadcast %cst_70 : f32 to vector<16x1xf32>
    %147 = arith.divf %145, %146 : vector<16x1xf32>
    %cst_71 = arith.constant 9.99999974E-6 : f32
    %148 = vector.broadcast %cst_71 : f32 to vector<16x1xf32>
    %149 = arith.addf %147, %148 : vector<16x1xf32>
    %150 = math.rsqrt %149 : vector<16x1xf32>
    %151 = vector.broadcast %150 : vector<16x1xf32> to vector<16x128xf32>
    %152 = arith.mulf %142, %151 : vector<16x128xf32>
    %153 = vector.broadcast %20 : vector<1x128xf32> to vector<16x128xf32>
    %154 = arith.mulf %152, %153 : vector<16x128xf32>
    %155 = vector.broadcast %22 : vector<1x128xf32> to vector<16x128xf32>
    %156 = arith.addf %154, %155 : vector<16x128xf32>
    %157 = arith.truncf %156 : vector<16x128xf32> to vector<16x128xbf16>
    %cst_72 = arith.constant dense<0.000000e+00> : vector<16x256xf32>
    %158 = tpu.matmul %157, %24, %cst_72 {dimension_numbers = #tpu.dot_dimension_numbers<[1], [0], [0], [1], [0, 0, 1, 1], [], []>} : vector<16x128xbf16>, vector<128x256xbf16>, vector<16x256xf32> -> vector<16x256xf32>
    %159 = vector.broadcast %26 : vector<1x256xf32> to vector<16x256xf32>
    %160 = arith.addf %158, %159 : vector<16x256xf32>
    %cst_73 = arith.constant 5.000000e-01 : f32
    %161 = vector.broadcast %cst_73 : f32 to vector<16x256xf32>
    %162 = arith.mulf %161, %160 : vector<16x256xf32>
    %cst_74 = arith.constant 4.471500e-02 : f32
    %163 = vector.broadcast %cst_74 : f32 to vector<16x256xf32>
    %164 = arith.mulf %163, %160 : vector<16x256xf32>
    %165 = arith.mulf %164, %160 : vector<16x256xf32>
    %166 = arith.mulf %165, %160 : vector<16x256xf32>
    %167 = arith.addf %160, %166 : vector<16x256xf32>
    %cst_75 = arith.constant 0.797884583 : f32
    %168 = vector.broadcast %cst_75 : f32 to vector<16x256xf32>
    %169 = arith.mulf %168, %167 : vector<16x256xf32>
    %170 = math.tanh %169 : vector<16x256xf32>
    %cst_76 = arith.constant 1.000000e+00 : f32
    %171 = vector.broadcast %cst_76 : f32 to vector<16x256xf32>
    %172 = arith.addf %171, %170 : vector<16x256xf32>
    %173 = arith.mulf %162, %172 : vector<16x256xf32>
    %174 = arith.truncf %173 : vector<16x256xf32> to vector<16x256xbf16>
    %cst_77 = arith.constant dense<0.000000e+00> : vector<16x128xf32>
    %175 = tpu.matmul %174, %28, %cst_77 {dimension_numbers = #tpu.dot_dimension_numbers<[1], [0], [0], [1], [0, 0, 1, 1], [], []>} : vector<16x256xbf16>, vector<256x128xbf16>, vector<16x128xf32> -> vector<16x128xf32>
    %176 = vector.broadcast %30 : vector<1x128xf32> to vector<16x128xf32>
    %177 = arith.addf %175, %176 : vector<16x128xf32>
    %178 = arith.addf %156, %177 : vector<16x128xf32>
    %cst_78 = arith.constant dense<0.000000e+00> : vector<16xf32>
    %179 = vector.multi_reduction <add>, %178, %cst_78 [1] : vector<16x128xf32> to vector<16xf32>
    %180 = vector.shape_cast %179 : vector<16xf32> to vector<16x1xf32>
    %cst_79 = arith.constant 1.280000e+02 : f32
    %181 = vector.broadcast %cst_79 : f32 to vector<16x1xf32>
    %182 = arith.divf %180, %181 : vector<16x1xf32>
    %183 = vector.broadcast %182 : vector<16x1xf32> to vector<16x128xf32>
    %184 = arith.subf %178, %183 : vector<16x128xf32>
    %185 = arith.mulf %184, %184 : vector<16x128xf32>
    %cst_80 = arith.constant dense<0.000000e+00> : vector<16xf32>
    %186 = vector.multi_reduction <add>, %185, %cst_80 [1] : vector<16x128xf32> to vector<16xf32>
    %187 = vector.shape_cast %186 : vector<16xf32> to vector<16x1xf32>
    %cst_81 = arith.constant 1.280000e+02 : f32
    %188 = vector.broadcast %cst_81 : f32 to vector<16x1xf32>
    %189 = arith.divf %187, %188 : vector<16x1xf32>
    %cst_82 = arith.constant 9.99999974E-6 : f32
    %190 = vector.broadcast %cst_82 : f32 to vector<16x1xf32>
    %191 = arith.addf %189, %190 : vector<16x1xf32>
    %192 = math.rsqrt %191 : vector<16x1xf32>
    %193 = vector.broadcast %192 : vector<16x1xf32> to vector<16x128xf32>
    %194 = arith.mulf %184, %193 : vector<16x128xf32>
    %195 = vector.broadcast %32 : vector<1x128xf32> to vector<16x128xf32>
    %196 = arith.mulf %194, %195 : vector<16x128xf32>
    %197 = vector.broadcast %34 : vector<1x128xf32> to vector<16x128xf32>
    %198 = arith.addf %196, %197 : vector<16x128xf32>
    %c1 = arith.constant 1 : index
    %c0_83 = arith.constant 0 : index
    %c0_84 = arith.constant 0 : index
    %199 = vector.load %arg5[%c1, %c0_83, %c0_84] : memref<2x128x384xbf16, #tpu.memory_space<vmem>>, vector<1x128x384xbf16>
    %200 = vector.shape_cast %199 : vector<1x128x384xbf16> to vector<128x384xbf16>
    %c1_85 = arith.constant 1 : index
    %c0_86 = arith.constant 0 : index
    %c0_87 = arith.constant 0 : index
    %201 = vector.load %arg6[%c1_85, %c0_86, %c0_87] : memref<2x1x384xf32, #tpu.memory_space<vmem>>, vector<1x1x384xf32>
    %202 = vector.shape_cast %201 : vector<1x1x384xf32> to vector<1x384xf32>
    %c1_88 = arith.constant 1 : index
    %c0_89 = arith.constant 0 : index
    %c0_90 = arith.constant 0 : index
    %203 = vector.load %arg7[%c1_88, %c0_89, %c0_90] : memref<2x128x128xbf16, #tpu.memory_space<vmem>>, vector<1x128x128xbf16>
    %204 = vector.shape_cast %203 : vector<1x128x128xbf16> to vector<128x128xbf16>
    %c1_91 = arith.constant 1 : index
    %c0_92 = arith.constant 0 : index
    %c0_93 = arith.constant 0 : index
    %205 = vector.load %arg8[%c1_91, %c0_92, %c0_93] : memref<2x1x128xf32, #tpu.memory_space<vmem>>, vector<1x1x128xf32>
    %206 = vector.shape_cast %205 : vector<1x1x128xf32> to vector<1x128xf32>
    %c1_94 = arith.constant 1 : index
    %c0_95 = arith.constant 0 : index
    %c0_96 = arith.constant 0 : index
    %207 = vector.load %arg9[%c1_94, %c0_95, %c0_96] : memref<2x1x128xf32, #tpu.memory_space<vmem>>, vector<1x1x128xf32>
    %208 = vector.shape_cast %207 : vector<1x1x128xf32> to vector<1x128xf32>
    %c1_97 = arith.constant 1 : index
    %c0_98 = arith.constant 0 : index
    %c0_99 = arith.constant 0 : index
    %209 = vector.load %arg10[%c1_97, %c0_98, %c0_99] : memref<2x1x128xf32, #tpu.memory_space<vmem>>, vector<1x1x128xf32>
    %210 = vector.shape_cast %209 : vector<1x1x128xf32> to vector<1x128xf32>
    %c1_100 = arith.constant 1 : index
    %c0_101 = arith.constant 0 : index
    %c0_102 = arith.constant 0 : index
    %211 = vector.load %arg11[%c1_100, %c0_101, %c0_102] : memref<2x128x256xbf16, #tpu.memory_space<vmem>>, vector<1x128x256xbf16>
    %212 = vector.shape_cast %211 : vector<1x128x256xbf16> to vector<128x256xbf16>
    %c1_103 = arith.constant 1 : index
    %c0_104 = arith.constant 0 : index
    %c0_105 = arith.constant 0 : index
    %213 = vector.load %arg12[%c1_103, %c0_104, %c0_105] : memref<2x1x256xf32, #tpu.memory_space<vmem>>, vector<1x1x256xf32>
    %214 = vector.shape_cast %213 : vector<1x1x256xf32> to vector<1x256xf32>
    %c1_106 = arith.constant 1 : index
    %c0_107 = arith.constant 0 : index
    %c0_108 = arith.constant 0 : index
    %215 = vector.load %arg13[%c1_106, %c0_107, %c0_108] : memref<2x256x128xbf16, #tpu.memory_space<vmem>>, vector<1x256x128xbf16>
    %216 = vector.shape_cast %215 : vector<1x256x128xbf16> to vector<256x128xbf16>
    %c1_109 = arith.constant 1 : index
    %c0_110 = arith.constant 0 : index
    %c0_111 = arith.constant 0 : index
    %217 = vector.load %arg14[%c1_109, %c0_110, %c0_111] : memref<2x1x128xf32, #tpu.memory_space<vmem>>, vector<1x1x128xf32>
    %218 = vector.shape_cast %217 : vector<1x1x128xf32> to vector<1x128xf32>
    %c1_112 = arith.constant 1 : index
    %c0_113 = arith.constant 0 : index
    %c0_114 = arith.constant 0 : index
    %219 = vector.load %arg15[%c1_112, %c0_113, %c0_114] : memref<2x1x128xf32, #tpu.memory_space<vmem>>, vector<1x1x128xf32>
    %220 = vector.shape_cast %219 : vector<1x1x128xf32> to vector<1x128xf32>
    %c1_115 = arith.constant 1 : index
    %c0_116 = arith.constant 0 : index
    %c0_117 = arith.constant 0 : index
    %221 = vector.load %arg16[%c1_115, %c0_116, %c0_117] : memref<2x1x128xf32, #tpu.memory_space<vmem>>, vector<1x1x128xf32>
    %222 = vector.shape_cast %221 : vector<1x1x128xf32> to vector<1x128xf32>
    %223 = arith.truncf %198 : vector<16x128xf32> to vector<16x128xbf16>
    %cst_118 = arith.constant dense<0.000000e+00> : vector<16x384xf32>
    %224 = tpu.matmul %223, %200, %cst_118 {dimension_numbers = #tpu.dot_dimension_numbers<[1], [0], [0], [1], [0, 0, 1, 1], [], []>} : vector<16x128xbf16>, vector<128x384xbf16>, vector<16x384xf32> -> vector<16x384xf32>
    %225 = vector.broadcast %202 : vector<1x384xf32> to vector<16x384xf32>
    %226 = arith.addf %224, %225 : vector<16x384xf32>
    %227 = vector.extract_strided_slice %226 {offsets = [0, 0], sizes = [16, 128], strides = [1, 1]} : vector<16x384xf32> to vector<16x128xf32>
    %228 = vector.extract_strided_slice %226 {offsets = [0, 128], sizes = [16, 128], strides = [1, 1]} : vector<16x384xf32> to vector<16x128xf32>
    %229 = vector.extract_strided_slice %226 {offsets = [0, 256], sizes = [16, 128], strides = [1, 1]} : vector<16x384xf32> to vector<16x128xf32>
    %cst_119 = arith.constant 0.176776692 : f32
    %230 = vector.broadcast %cst_119 : f32 to vector<16x128xf32>
    %231 = arith.mulf %227, %230 : vector<16x128xf32>
    %232 = arith.truncf %231 : vector<16x128xf32> to vector<16x128xbf16>
    %233 = arith.truncf %228 : vector<16x128xf32> to vector<16x128xbf16>
    %234 = arith.truncf %229 : vector<16x128xf32> to vector<16x128xbf16>
    %235 = vector.extract_strided_slice %232 {offsets = [0, 0], sizes = [16, 32], strides = [1, 1]} : vector<16x128xbf16> to vector<16x32xbf16>
    %236 = vector.extract_strided_slice %233 {offsets = [0, 0], sizes = [16, 32], strides = [1, 1]} : vector<16x128xbf16> to vector<16x32xbf16>
    %cst_120 = arith.constant dense<0.000000e+00> : vector<16x16xf32>
    %237 = tpu.matmul %235, %236, %cst_120 {dimension_numbers = #tpu.dot_dimension_numbers<[1], [1], [0], [0], [0, 0, 1, 0], [], []>} : vector<16x32xbf16>, vector<16x32xbf16>, vector<16x16xf32> -> vector<16x16xf32>
    %238 = vector.broadcast %10 : vector<1x16xf32> to vector<16x16xf32>
    %239 = arith.addf %237, %238 : vector<16x16xf32>
    %cst_121 = arith.constant dense<0xFF800000> : vector<16xf32>
    %240 = vector.multi_reduction <maximumf>, %239, %cst_121 [1] : vector<16x16xf32> to vector<16xf32>
    %241 = vector.shape_cast %240 : vector<16xf32> to vector<16x1xf32>
    %242 = vector.broadcast %241 : vector<16x1xf32> to vector<16x16xf32>
    %243 = arith.subf %239, %242 : vector<16x16xf32>
    %244 = math.exp %243 : vector<16x16xf32>
    %cst_122 = arith.constant dense<0.000000e+00> : vector<16xf32>
    %245 = vector.multi_reduction <add>, %244, %cst_122 [1] : vector<16x16xf32> to vector<16xf32>
    %246 = vector.shape_cast %245 : vector<16xf32> to vector<16x1xf32>
    %247 = tpu.reciprocal %246 {approx = true} : vector<16x1xf32> -> vector<16x1xf32>
    %248 = arith.truncf %244 : vector<16x16xf32> to vector<16x16xbf16>
    %249 = vector.extract_strided_slice %234 {offsets = [0, 0], sizes = [16, 32], strides = [1, 1]} : vector<16x128xbf16> to vector<16x32xbf16>
    %cst_123 = arith.constant dense<0.000000e+00> : vector<16x32xf32>
    %250 = tpu.matmul %248, %249, %cst_123 {dimension_numbers = #tpu.dot_dimension_numbers<[1], [0], [0], [1], [0, 0, 1, 1], [], []>} : vector<16x16xbf16>, vector<16x32xbf16>, vector<16x32xf32> -> vector<16x32xf32>
    %251 = vector.broadcast %247 : vector<16x1xf32> to vector<16x32xf32>
    %252 = arith.mulf %250, %251 : vector<16x32xf32>
    %253 = arith.truncf %252 : vector<16x32xf32> to vector<16x32xbf16>
    %254 = vector.extract_strided_slice %204 {offsets = [0, 0], sizes = [32, 128], strides = [1, 1]} : vector<128x128xbf16> to vector<32x128xbf16>
    %cst_124 = arith.constant dense<0.000000e+00> : vector<16x128xf32>
    %255 = tpu.matmul %253, %254, %cst_124 {dimension_numbers = #tpu.dot_dimension_numbers<[1], [0], [0], [1], [0, 0, 1, 1], [], []>} : vector<16x32xbf16>, vector<32x128xbf16>, vector<16x128xf32> -> vector<16x128xf32>
    %256 = vector.extract_strided_slice %232 {offsets = [0, 32], sizes = [16, 32], strides = [1, 1]} : vector<16x128xbf16> to vector<16x32xbf16>
    %257 = vector.extract_strided_slice %233 {offsets = [0, 32], sizes = [16, 32], strides = [1, 1]} : vector<16x128xbf16> to vector<16x32xbf16>
    %cst_125 = arith.constant dense<0.000000e+00> : vector<16x16xf32>
    %258 = tpu.matmul %256, %257, %cst_125 {dimension_numbers = #tpu.dot_dimension_numbers<[1], [1], [0], [0], [0, 0, 1, 0], [], []>} : vector<16x32xbf16>, vector<16x32xbf16>, vector<16x16xf32> -> vector<16x16xf32>
    %259 = vector.broadcast %10 : vector<1x16xf32> to vector<16x16xf32>
    %260 = arith.addf %258, %259 : vector<16x16xf32>
    %cst_126 = arith.constant dense<0xFF800000> : vector<16xf32>
    %261 = vector.multi_reduction <maximumf>, %260, %cst_126 [1] : vector<16x16xf32> to vector<16xf32>
    %262 = vector.shape_cast %261 : vector<16xf32> to vector<16x1xf32>
    %263 = vector.broadcast %262 : vector<16x1xf32> to vector<16x16xf32>
    %264 = arith.subf %260, %263 : vector<16x16xf32>
    %265 = math.exp %264 : vector<16x16xf32>
    %cst_127 = arith.constant dense<0.000000e+00> : vector<16xf32>
    %266 = vector.multi_reduction <add>, %265, %cst_127 [1] : vector<16x16xf32> to vector<16xf32>
    %267 = vector.shape_cast %266 : vector<16xf32> to vector<16x1xf32>
    %268 = tpu.reciprocal %267 {approx = true} : vector<16x1xf32> -> vector<16x1xf32>
    %269 = arith.truncf %265 : vector<16x16xf32> to vector<16x16xbf16>
    %270 = vector.extract_strided_slice %234 {offsets = [0, 32], sizes = [16, 32], strides = [1, 1]} : vector<16x128xbf16> to vector<16x32xbf16>
    %cst_128 = arith.constant dense<0.000000e+00> : vector<16x32xf32>
    %271 = tpu.matmul %269, %270, %cst_128 {dimension_numbers = #tpu.dot_dimension_numbers<[1], [0], [0], [1], [0, 0, 1, 1], [], []>} : vector<16x16xbf16>, vector<16x32xbf16>, vector<16x32xf32> -> vector<16x32xf32>
    %272 = vector.broadcast %268 : vector<16x1xf32> to vector<16x32xf32>
    %273 = arith.mulf %271, %272 : vector<16x32xf32>
    %274 = arith.truncf %273 : vector<16x32xf32> to vector<16x32xbf16>
    %275 = vector.extract_strided_slice %204 {offsets = [32, 0], sizes = [32, 128], strides = [1, 1]} : vector<128x128xbf16> to vector<32x128xbf16>
    %cst_129 = arith.constant dense<0.000000e+00> : vector<16x128xf32>
    %276 = tpu.matmul %274, %275, %cst_129 {dimension_numbers = #tpu.dot_dimension_numbers<[1], [0], [0], [1], [0, 0, 1, 1], [], []>} : vector<16x32xbf16>, vector<32x128xbf16>, vector<16x128xf32> -> vector<16x128xf32>
    %277 = arith.addf %255, %276 : vector<16x128xf32>
    %278 = vector.extract_strided_slice %232 {offsets = [0, 64], sizes = [16, 32], strides = [1, 1]} : vector<16x128xbf16> to vector<16x32xbf16>
    %279 = vector.extract_strided_slice %233 {offsets = [0, 64], sizes = [16, 32], strides = [1, 1]} : vector<16x128xbf16> to vector<16x32xbf16>
    %cst_130 = arith.constant dense<0.000000e+00> : vector<16x16xf32>
    %280 = tpu.matmul %278, %279, %cst_130 {dimension_numbers = #tpu.dot_dimension_numbers<[1], [1], [0], [0], [0, 0, 1, 0], [], []>} : vector<16x32xbf16>, vector<16x32xbf16>, vector<16x16xf32> -> vector<16x16xf32>
    %281 = vector.broadcast %10 : vector<1x16xf32> to vector<16x16xf32>
    %282 = arith.addf %280, %281 : vector<16x16xf32>
    %cst_131 = arith.constant dense<0xFF800000> : vector<16xf32>
    %283 = vector.multi_reduction <maximumf>, %282, %cst_131 [1] : vector<16x16xf32> to vector<16xf32>
    %284 = vector.shape_cast %283 : vector<16xf32> to vector<16x1xf32>
    %285 = vector.broadcast %284 : vector<16x1xf32> to vector<16x16xf32>
    %286 = arith.subf %282, %285 : vector<16x16xf32>
    %287 = math.exp %286 : vector<16x16xf32>
    %cst_132 = arith.constant dense<0.000000e+00> : vector<16xf32>
    %288 = vector.multi_reduction <add>, %287, %cst_132 [1] : vector<16x16xf32> to vector<16xf32>
    %289 = vector.shape_cast %288 : vector<16xf32> to vector<16x1xf32>
    %290 = tpu.reciprocal %289 {approx = true} : vector<16x1xf32> -> vector<16x1xf32>
    %291 = arith.truncf %287 : vector<16x16xf32> to vector<16x16xbf16>
    %292 = vector.extract_strided_slice %234 {offsets = [0, 64], sizes = [16, 32], strides = [1, 1]} : vector<16x128xbf16> to vector<16x32xbf16>
    %cst_133 = arith.constant dense<0.000000e+00> : vector<16x32xf32>
    %293 = tpu.matmul %291, %292, %cst_133 {dimension_numbers = #tpu.dot_dimension_numbers<[1], [0], [0], [1], [0, 0, 1, 1], [], []>} : vector<16x16xbf16>, vector<16x32xbf16>, vector<16x32xf32> -> vector<16x32xf32>
    %294 = vector.broadcast %290 : vector<16x1xf32> to vector<16x32xf32>
    %295 = arith.mulf %293, %294 : vector<16x32xf32>
    %296 = arith.truncf %295 : vector<16x32xf32> to vector<16x32xbf16>
    %297 = vector.extract_strided_slice %204 {offsets = [64, 0], sizes = [32, 128], strides = [1, 1]} : vector<128x128xbf16> to vector<32x128xbf16>
    %cst_134 = arith.constant dense<0.000000e+00> : vector<16x128xf32>
    %298 = tpu.matmul %296, %297, %cst_134 {dimension_numbers = #tpu.dot_dimension_numbers<[1], [0], [0], [1], [0, 0, 1, 1], [], []>} : vector<16x32xbf16>, vector<32x128xbf16>, vector<16x128xf32> -> vector<16x128xf32>
    %299 = arith.addf %277, %298 : vector<16x128xf32>
    %300 = vector.extract_strided_slice %232 {offsets = [0, 96], sizes = [16, 32], strides = [1, 1]} : vector<16x128xbf16> to vector<16x32xbf16>
    %301 = vector.extract_strided_slice %233 {offsets = [0, 96], sizes = [16, 32], strides = [1, 1]} : vector<16x128xbf16> to vector<16x32xbf16>
    %cst_135 = arith.constant dense<0.000000e+00> : vector<16x16xf32>
    %302 = tpu.matmul %300, %301, %cst_135 {dimension_numbers = #tpu.dot_dimension_numbers<[1], [1], [0], [0], [0, 0, 1, 0], [], []>} : vector<16x32xbf16>, vector<16x32xbf16>, vector<16x16xf32> -> vector<16x16xf32>
    %303 = vector.broadcast %10 : vector<1x16xf32> to vector<16x16xf32>
    %304 = arith.addf %302, %303 : vector<16x16xf32>
    %cst_136 = arith.constant dense<0xFF800000> : vector<16xf32>
    %305 = vector.multi_reduction <maximumf>, %304, %cst_136 [1] : vector<16x16xf32> to vector<16xf32>
    %306 = vector.shape_cast %305 : vector<16xf32> to vector<16x1xf32>
    %307 = vector.broadcast %306 : vector<16x1xf32> to vector<16x16xf32>
    %308 = arith.subf %304, %307 : vector<16x16xf32>
    %309 = math.exp %308 : vector<16x16xf32>
    %cst_137 = arith.constant dense<0.000000e+00> : vector<16xf32>
    %310 = vector.multi_reduction <add>, %309, %cst_137 [1] : vector<16x16xf32> to vector<16xf32>
    %311 = vector.shape_cast %310 : vector<16xf32> to vector<16x1xf32>
    %312 = tpu.reciprocal %311 {approx = true} : vector<16x1xf32> -> vector<16x1xf32>
    %313 = arith.truncf %309 : vector<16x16xf32> to vector<16x16xbf16>
    %314 = vector.extract_strided_slice %234 {offsets = [0, 96], sizes = [16, 32], strides = [1, 1]} : vector<16x128xbf16> to vector<16x32xbf16>
    %cst_138 = arith.constant dense<0.000000e+00> : vector<16x32xf32>
    %315 = tpu.matmul %313, %314, %cst_138 {dimension_numbers = #tpu.dot_dimension_numbers<[1], [0], [0], [1], [0, 0, 1, 1], [], []>} : vector<16x16xbf16>, vector<16x32xbf16>, vector<16x32xf32> -> vector<16x32xf32>
    %316 = vector.broadcast %312 : vector<16x1xf32> to vector<16x32xf32>
    %317 = arith.mulf %315, %316 : vector<16x32xf32>
    %318 = arith.truncf %317 : vector<16x32xf32> to vector<16x32xbf16>
    %319 = vector.extract_strided_slice %204 {offsets = [96, 0], sizes = [32, 128], strides = [1, 1]} : vector<128x128xbf16> to vector<32x128xbf16>
    %cst_139 = arith.constant dense<0.000000e+00> : vector<16x128xf32>
    %320 = tpu.matmul %318, %319, %cst_139 {dimension_numbers = #tpu.dot_dimension_numbers<[1], [0], [0], [1], [0, 0, 1, 1], [], []>} : vector<16x32xbf16>, vector<32x128xbf16>, vector<16x128xf32> -> vector<16x128xf32>
    %321 = arith.addf %299, %320 : vector<16x128xf32>
    %322 = vector.broadcast %206 : vector<1x128xf32> to vector<16x128xf32>
    %323 = arith.addf %321, %322 : vector<16x128xf32>
    %324 = arith.addf %198, %323 : vector<16x128xf32>
    %cst_140 = arith.constant dense<0.000000e+00> : vector<16xf32>
    %325 = vector.multi_reduction <add>, %324, %cst_140 [1] : vector<16x128xf32> to vector<16xf32>
    %326 = vector.shape_cast %325 : vector<16xf32> to vector<16x1xf32>
    %cst_141 = arith.constant 1.280000e+02 : f32
    %327 = vector.broadcast %cst_141 : f32 to vector<16x1xf32>
    %328 = arith.divf %326, %327 : vector<16x1xf32>
    %329 = vector.broadcast %328 : vector<16x1xf32> to vector<16x128xf32>
    %330 = arith.subf %324, %329 : vector<16x128xf32>
    %331 = arith.mulf %330, %330 : vector<16x128xf32>
    %cst_142 = arith.constant dense<0.000000e+00> : vector<16xf32>
    %332 = vector.multi_reduction <add>, %331, %cst_142 [1] : vector<16x128xf32> to vector<16xf32>
    %333 = vector.shape_cast %332 : vector<16xf32> to vector<16x1xf32>
    %cst_143 = arith.constant 1.280000e+02 : f32
    %334 = vector.broadcast %cst_143 : f32 to vector<16x1xf32>
    %335 = arith.divf %333, %334 : vector<16x1xf32>
    %cst_144 = arith.constant 9.99999974E-6 : f32
    %336 = vector.broadcast %cst_144 : f32 to vector<16x1xf32>
    %337 = arith.addf %335, %336 : vector<16x1xf32>
    %338 = math.rsqrt %337 : vector<16x1xf32>
    %339 = vector.broadcast %338 : vector<16x1xf32> to vector<16x128xf32>
    %340 = arith.mulf %330, %339 : vector<16x128xf32>
    %341 = vector.broadcast %208 : vector<1x128xf32> to vector<16x128xf32>
    %342 = arith.mulf %340, %341 : vector<16x128xf32>
    %343 = vector.broadcast %210 : vector<1x128xf32> to vector<16x128xf32>
    %344 = arith.addf %342, %343 : vector<16x128xf32>
    %345 = arith.truncf %344 : vector<16x128xf32> to vector<16x128xbf16>
    %cst_145 = arith.constant dense<0.000000e+00> : vector<16x256xf32>
    %346 = tpu.matmul %345, %212, %cst_145 {dimension_numbers = #tpu.dot_dimension_numbers<[1], [0], [0], [1], [0, 0, 1, 1], [], []>} : vector<16x128xbf16>, vector<128x256xbf16>, vector<16x256xf32> -> vector<16x256xf32>
    %347 = vector.broadcast %214 : vector<1x256xf32> to vector<16x256xf32>
    %348 = arith.addf %346, %347 : vector<16x256xf32>
    %cst_146 = arith.constant 5.000000e-01 : f32
    %349 = vector.broadcast %cst_146 : f32 to vector<16x256xf32>
    %350 = arith.mulf %349, %348 : vector<16x256xf32>
    %cst_147 = arith.constant 4.471500e-02 : f32
    %351 = vector.broadcast %cst_147 : f32 to vector<16x256xf32>
    %352 = arith.mulf %351, %348 : vector<16x256xf32>
    %353 = arith.mulf %352, %348 : vector<16x256xf32>
    %354 = arith.mulf %353, %348 : vector<16x256xf32>
    %355 = arith.addf %348, %354 : vector<16x256xf32>
    %cst_148 = arith.constant 0.797884583 : f32
    %356 = vector.broadcast %cst_148 : f32 to vector<16x256xf32>
    %357 = arith.mulf %356, %355 : vector<16x256xf32>
    %358 = math.tanh %357 : vector<16x256xf32>
    %cst_149 = arith.constant 1.000000e+00 : f32
    %359 = vector.broadcast %cst_149 : f32 to vector<16x256xf32>
    %360 = arith.addf %359, %358 : vector<16x256xf32>
    %361 = arith.mulf %350, %360 : vector<16x256xf32>
    %362 = arith.truncf %361 : vector<16x256xf32> to vector<16x256xbf16>
    %cst_150 = arith.constant dense<0.000000e+00> : vector<16x128xf32>
    %363 = tpu.matmul %362, %216, %cst_150 {dimension_numbers = #tpu.dot_dimension_numbers<[1], [0], [0], [1], [0, 0, 1, 1], [], []>} : vector<16x256xbf16>, vector<256x128xbf16>, vector<16x128xf32> -> vector<16x128xf32>
    %364 = vector.broadcast %218 : vector<1x128xf32> to vector<16x128xf32>
    %365 = arith.addf %363, %364 : vector<16x128xf32>
    %366 = arith.addf %344, %365 : vector<16x128xf32>
    %cst_151 = arith.constant dense<0.000000e+00> : vector<16xf32>
    %367 = vector.multi_reduction <add>, %366, %cst_151 [1] : vector<16x128xf32> to vector<16xf32>
    %368 = vector.shape_cast %367 : vector<16xf32> to vector<16x1xf32>
    %cst_152 = arith.constant 1.280000e+02 : f32
    %369 = vector.broadcast %cst_152 : f32 to vector<16x1xf32>
    %370 = arith.divf %368, %369 : vector<16x1xf32>
    %371 = vector.broadcast %370 : vector<16x1xf32> to vector<16x128xf32>
    %372 = arith.subf %366, %371 : vector<16x128xf32>
    %373 = arith.mulf %372, %372 : vector<16x128xf32>
    %cst_153 = arith.constant dense<0.000000e+00> : vector<16xf32>
    %374 = vector.multi_reduction <add>, %373, %cst_153 [1] : vector<16x128xf32> to vector<16xf32>
    %375 = vector.shape_cast %374 : vector<16xf32> to vector<16x1xf32>
    %cst_154 = arith.constant 1.280000e+02 : f32
    %376 = vector.broadcast %cst_154 : f32 to vector<16x1xf32>
    %377 = arith.divf %375, %376 : vector<16x1xf32>
    %cst_155 = arith.constant 9.99999974E-6 : f32
    %378 = vector.broadcast %cst_155 : f32 to vector<16x1xf32>
    %379 = arith.addf %377, %378 : vector<16x1xf32>
    %380 = math.rsqrt %379 : vector<16x1xf32>
    %381 = vector.broadcast %380 : vector<16x1xf32> to vector<16x128xf32>
    %382 = arith.mulf %372, %381 : vector<16x128xf32>
    %383 = vector.broadcast %220 : vector<1x128xf32> to vector<16x128xf32>
    %384 = arith.mulf %382, %383 : vector<16x128xf32>
    %385 = vector.broadcast %222 : vector<1x128xf32> to vector<16x128xf32>
    %386 = arith.addf %384, %385 : vector<16x128xf32>
    %387 = tpu.iota {dimensions = array<i32: 0>} : vector<8x8xi32>
    %388 = tpu.iota {dimensions = array<i32: 1>} : vector<8x8xi32>
    %389 = arith.cmpi sle, %388, %387 : vector<8x8xi32>
    %cst_156 = arith.constant 0.000000e+00 : f32
    %cst_157 = arith.constant -1.000000e+09 : f32
    %390 = vector.broadcast %cst_156 : f32 to vector<8x8xf32>
    %391 = vector.broadcast %cst_157 : f32 to vector<8x8xf32>
    %392 = arith.select %389, %390, %391 : vector<8x8xi1>, vector<8x8xf32>
    %c0_158 = arith.constant 0 : index
    %c0_159 = arith.constant 0 : index
    %c0_160 = arith.constant 0 : index
    %393 = vector.load %arg17[%c0_158, %c0_159, %c0_160] : memref<2x128x384xbf16, #tpu.memory_space<vmem>>, vector<1x128x384xbf16>
    %394 = vector.shape_cast %393 : vector<1x128x384xbf16> to vector<128x384xbf16>
    %c0_161 = arith.constant 0 : index
    %c0_162 = arith.constant 0 : index
    %c0_163 = arith.constant 0 : index
    %395 = vector.load %arg18[%c0_161, %c0_162, %c0_163] : memref<2x1x384xf32, #tpu.memory_space<vmem>>, vector<1x1x384xf32>
    %396 = vector.shape_cast %395 : vector<1x1x384xf32> to vector<1x384xf32>
    %c0_164 = arith.constant 0 : index
    %c0_165 = arith.constant 0 : index
    %c0_166 = arith.constant 0 : index
    %397 = vector.load %arg19[%c0_164, %c0_165, %c0_166] : memref<2x128x128xbf16, #tpu.memory_space<vmem>>, vector<1x128x128xbf16>
    %398 = vector.shape_cast %397 : vector<1x128x128xbf16> to vector<128x128xbf16>
    %c0_167 = arith.constant 0 : index
    %c0_168 = arith.constant 0 : index
    %c0_169 = arith.constant 0 : index
    %399 = vector.load %arg20[%c0_167, %c0_168, %c0_169] : memref<2x1x128xf32, #tpu.memory_space<vmem>>, vector<1x1x128xf32>
    %400 = vector.shape_cast %399 : vector<1x1x128xf32> to vector<1x128xf32>
    %c0_170 = arith.constant 0 : index
    %c0_171 = arith.constant 0 : index
    %c0_172 = arith.constant 0 : index
    %401 = vector.load %arg21[%c0_170, %c0_171, %c0_172] : memref<2x1x128xf32, #tpu.memory_space<vmem>>, vector<1x1x128xf32>
    %402 = vector.shape_cast %401 : vector<1x1x128xf32> to vector<1x128xf32>
    %c0_173 = arith.constant 0 : index
    %c0_174 = arith.constant 0 : index
    %c0_175 = arith.constant 0 : index
    %403 = vector.load %arg22[%c0_173, %c0_174, %c0_175] : memref<2x1x128xf32, #tpu.memory_space<vmem>>, vector<1x1x128xf32>
    %404 = vector.shape_cast %403 : vector<1x1x128xf32> to vector<1x128xf32>
    %c0_176 = arith.constant 0 : index
    %c0_177 = arith.constant 0 : index
    %c0_178 = arith.constant 0 : index
    %405 = vector.load %arg23[%c0_176, %c0_177, %c0_178] : memref<2x128x128xbf16, #tpu.memory_space<vmem>>, vector<1x128x128xbf16>
    %406 = vector.shape_cast %405 : vector<1x128x128xbf16> to vector<128x128xbf16>
    %c0_179 = arith.constant 0 : index
    %c0_180 = arith.constant 0 : index
    %c0_181 = arith.constant 0 : index
    %407 = vector.load %arg24[%c0_179, %c0_180, %c0_181] : memref<2x1x128xf32, #tpu.memory_space<vmem>>, vector<1x1x128xf32>
    %408 = vector.shape_cast %407 : vector<1x1x128xf32> to vector<1x128xf32>
    %c0_182 = arith.constant 0 : index
    %c0_183 = arith.constant 0 : index
    %c0_184 = arith.constant 0 : index
    %409 = vector.load %arg25[%c0_182, %c0_183, %c0_184] : memref<2x128x256xbf16, #tpu.memory_space<vmem>>, vector<1x128x256xbf16>
    %410 = vector.shape_cast %409 : vector<1x128x256xbf16> to vector<128x256xbf16>
    %c0_185 = arith.constant 0 : index
    %c0_186 = arith.constant 0 : index
    %c0_187 = arith.constant 0 : index
    %411 = vector.load %arg26[%c0_185, %c0_186, %c0_187] : memref<2x1x256xf32, #tpu.memory_space<vmem>>, vector<1x1x256xf32>
    %412 = vector.shape_cast %411 : vector<1x1x256xf32> to vector<1x256xf32>
    %c0_188 = arith.constant 0 : index
    %c0_189 = arith.constant 0 : index
    %c0_190 = arith.constant 0 : index
    %413 = vector.load %arg27[%c0_188, %c0_189, %c0_190] : memref<2x128x128xbf16, #tpu.memory_space<vmem>>, vector<1x128x128xbf16>
    %414 = vector.shape_cast %413 : vector<1x128x128xbf16> to vector<128x128xbf16>
    %c0_191 = arith.constant 0 : index
    %c0_192 = arith.constant 0 : index
    %c0_193 = arith.constant 0 : index
    %415 = vector.load %arg28[%c0_191, %c0_192, %c0_193] : memref<2x1x128xf32, #tpu.memory_space<vmem>>, vector<1x1x128xf32>
    %416 = vector.shape_cast %415 : vector<1x1x128xf32> to vector<1x128xf32>
    %c0_194 = arith.constant 0 : index
    %c0_195 = arith.constant 0 : index
    %c0_196 = arith.constant 0 : index
    %417 = vector.load %arg29[%c0_194, %c0_195, %c0_196] : memref<2x1x128xf32, #tpu.memory_space<vmem>>, vector<1x1x128xf32>
    %418 = vector.shape_cast %417 : vector<1x1x128xf32> to vector<1x128xf32>
    %c0_197 = arith.constant 0 : index
    %c0_198 = arith.constant 0 : index
    %c0_199 = arith.constant 0 : index
    %419 = vector.load %arg30[%c0_197, %c0_198, %c0_199] : memref<2x1x128xf32, #tpu.memory_space<vmem>>, vector<1x1x128xf32>
    %420 = vector.shape_cast %419 : vector<1x1x128xf32> to vector<1x128xf32>
    %c0_200 = arith.constant 0 : index
    %c0_201 = arith.constant 0 : index
    %c0_202 = arith.constant 0 : index
    %421 = vector.load %arg31[%c0_200, %c0_201, %c0_202] : memref<2x128x256xbf16, #tpu.memory_space<vmem>>, vector<1x128x256xbf16>
    %422 = vector.shape_cast %421 : vector<1x128x256xbf16> to vector<128x256xbf16>
    %c0_203 = arith.constant 0 : index
    %c0_204 = arith.constant 0 : index
    %c0_205 = arith.constant 0 : index
    %423 = vector.load %arg32[%c0_203, %c0_204, %c0_205] : memref<2x1x256xf32, #tpu.memory_space<vmem>>, vector<1x1x256xf32>
    %424 = vector.shape_cast %423 : vector<1x1x256xf32> to vector<1x256xf32>
    %c0_206 = arith.constant 0 : index
    %c0_207 = arith.constant 0 : index
    %c0_208 = arith.constant 0 : index
    %425 = vector.load %arg33[%c0_206, %c0_207, %c0_208] : memref<2x256x128xbf16, #tpu.memory_space<vmem>>, vector<1x256x128xbf16>
    %426 = vector.shape_cast %425 : vector<1x256x128xbf16> to vector<256x128xbf16>
    %c0_209 = arith.constant 0 : index
    %c0_210 = arith.constant 0 : index
    %c0_211 = arith.constant 0 : index
    %427 = vector.load %arg34[%c0_209, %c0_210, %c0_211] : memref<2x1x128xf32, #tpu.memory_space<vmem>>, vector<1x1x128xf32>
    %428 = vector.shape_cast %427 : vector<1x1x128xf32> to vector<1x128xf32>
    %c0_212 = arith.constant 0 : index
    %c0_213 = arith.constant 0 : index
    %c0_214 = arith.constant 0 : index
    %429 = vector.load %arg35[%c0_212, %c0_213, %c0_214] : memref<2x1x128xf32, #tpu.memory_space<vmem>>, vector<1x1x128xf32>
    %430 = vector.shape_cast %429 : vector<1x1x128xf32> to vector<1x128xf32>
    %c0_215 = arith.constant 0 : index
    %c0_216 = arith.constant 0 : index
    %c0_217 = arith.constant 0 : index
    %431 = vector.load %arg36[%c0_215, %c0_216, %c0_217] : memref<2x1x128xf32, #tpu.memory_space<vmem>>, vector<1x1x128xf32>
    %432 = vector.shape_cast %431 : vector<1x1x128xf32> to vector<1x128xf32>
    %433 = arith.truncf %3 : vector<8x128xf32> to vector<8x128xbf16>
    %cst_218 = arith.constant dense<0.000000e+00> : vector<8x384xf32>
    %434 = tpu.matmul %433, %394, %cst_218 {dimension_numbers = #tpu.dot_dimension_numbers<[1], [0], [0], [1], [0, 0, 1, 1], [], []>} : vector<8x128xbf16>, vector<128x384xbf16>, vector<8x384xf32> -> vector<8x384xf32>
    %435 = vector.broadcast %396 : vector<1x384xf32> to vector<8x384xf32>
    %436 = arith.addf %434, %435 : vector<8x384xf32>
    %437 = vector.extract_strided_slice %436 {offsets = [0, 0], sizes = [8, 128], strides = [1, 1]} : vector<8x384xf32> to vector<8x128xf32>
    %438 = vector.extract_strided_slice %436 {offsets = [0, 128], sizes = [8, 128], strides = [1, 1]} : vector<8x384xf32> to vector<8x128xf32>
    %439 = vector.extract_strided_slice %436 {offsets = [0, 256], sizes = [8, 128], strides = [1, 1]} : vector<8x384xf32> to vector<8x128xf32>
    %cst_219 = arith.constant 0.176776692 : f32
    %440 = vector.broadcast %cst_219 : f32 to vector<8x128xf32>
    %441 = arith.mulf %437, %440 : vector<8x128xf32>
    %442 = arith.truncf %441 : vector<8x128xf32> to vector<8x128xbf16>
    %443 = arith.truncf %438 : vector<8x128xf32> to vector<8x128xbf16>
    %444 = arith.truncf %439 : vector<8x128xf32> to vector<8x128xbf16>
    %445 = vector.extract_strided_slice %442 {offsets = [0, 0], sizes = [8, 32], strides = [1, 1]} : vector<8x128xbf16> to vector<8x32xbf16>
    %446 = vector.extract_strided_slice %443 {offsets = [0, 0], sizes = [8, 32], strides = [1, 1]} : vector<8x128xbf16> to vector<8x32xbf16>
    %cst_220 = arith.constant dense<0.000000e+00> : vector<8x8xf32>
    %447 = tpu.matmul %445, %446, %cst_220 {dimension_numbers = #tpu.dot_dimension_numbers<[1], [1], [0], [0], [0, 0, 1, 0], [], []>} : vector<8x32xbf16>, vector<8x32xbf16>, vector<8x8xf32> -> vector<8x8xf32>
    %448 = arith.addf %447, %392 : vector<8x8xf32>
    %cst_221 = arith.constant dense<0xFF800000> : vector<8xf32>
    %449 = vector.multi_reduction <maximumf>, %448, %cst_221 [1] : vector<8x8xf32> to vector<8xf32>
    %450 = vector.shape_cast %449 : vector<8xf32> to vector<8x1xf32>
    %451 = vector.broadcast %450 : vector<8x1xf32> to vector<8x8xf32>
    %452 = arith.subf %448, %451 : vector<8x8xf32>
    %453 = math.exp %452 : vector<8x8xf32>
    %cst_222 = arith.constant dense<0.000000e+00> : vector<8xf32>
    %454 = vector.multi_reduction <add>, %453, %cst_222 [1] : vector<8x8xf32> to vector<8xf32>
    %455 = vector.shape_cast %454 : vector<8xf32> to vector<8x1xf32>
    %456 = tpu.reciprocal %455 {approx = true} : vector<8x1xf32> -> vector<8x1xf32>
    %457 = arith.truncf %453 : vector<8x8xf32> to vector<8x8xbf16>
    %458 = vector.extract_strided_slice %444 {offsets = [0, 0], sizes = [8, 32], strides = [1, 1]} : vector<8x128xbf16> to vector<8x32xbf16>
    %cst_223 = arith.constant dense<0.000000e+00> : vector<8x32xf32>
    %459 = tpu.matmul %457, %458, %cst_223 {dimension_numbers = #tpu.dot_dimension_numbers<[1], [0], [0], [1], [0, 0, 1, 1], [], []>} : vector<8x8xbf16>, vector<8x32xbf16>, vector<8x32xf32> -> vector<8x32xf32>
    %460 = vector.broadcast %456 : vector<8x1xf32> to vector<8x32xf32>
    %461 = arith.mulf %459, %460 : vector<8x32xf32>
    %462 = arith.truncf %461 : vector<8x32xf32> to vector<8x32xbf16>
    %463 = vector.extract_strided_slice %398 {offsets = [0, 0], sizes = [32, 128], strides = [1, 1]} : vector<128x128xbf16> to vector<32x128xbf16>
    %cst_224 = arith.constant dense<0.000000e+00> : vector<8x128xf32>
    %464 = tpu.matmul %462, %463, %cst_224 {dimension_numbers = #tpu.dot_dimension_numbers<[1], [0], [0], [1], [0, 0, 1, 1], [], []>} : vector<8x32xbf16>, vector<32x128xbf16>, vector<8x128xf32> -> vector<8x128xf32>
    %465 = vector.extract_strided_slice %442 {offsets = [0, 32], sizes = [8, 32], strides = [1, 1]} : vector<8x128xbf16> to vector<8x32xbf16>
    %466 = vector.extract_strided_slice %443 {offsets = [0, 32], sizes = [8, 32], strides = [1, 1]} : vector<8x128xbf16> to vector<8x32xbf16>
    %cst_225 = arith.constant dense<0.000000e+00> : vector<8x8xf32>
    %467 = tpu.matmul %465, %466, %cst_225 {dimension_numbers = #tpu.dot_dimension_numbers<[1], [1], [0], [0], [0, 0, 1, 0], [], []>} : vector<8x32xbf16>, vector<8x32xbf16>, vector<8x8xf32> -> vector<8x8xf32>
    %468 = arith.addf %467, %392 : vector<8x8xf32>
    %cst_226 = arith.constant dense<0xFF800000> : vector<8xf32>
    %469 = vector.multi_reduction <maximumf>, %468, %cst_226 [1] : vector<8x8xf32> to vector<8xf32>
    %470 = vector.shape_cast %469 : vector<8xf32> to vector<8x1xf32>
    %471 = vector.broadcast %470 : vector<8x1xf32> to vector<8x8xf32>
    %472 = arith.subf %468, %471 : vector<8x8xf32>
    %473 = math.exp %472 : vector<8x8xf32>
    %cst_227 = arith.constant dense<0.000000e+00> : vector<8xf32>
    %474 = vector.multi_reduction <add>, %473, %cst_227 [1] : vector<8x8xf32> to vector<8xf32>
    %475 = vector.shape_cast %474 : vector<8xf32> to vector<8x1xf32>
    %476 = tpu.reciprocal %475 {approx = true} : vector<8x1xf32> -> vector<8x1xf32>
    %477 = arith.truncf %473 : vector<8x8xf32> to vector<8x8xbf16>
    %478 = vector.extract_strided_slice %444 {offsets = [0, 32], sizes = [8, 32], strides = [1, 1]} : vector<8x128xbf16> to vector<8x32xbf16>
    %cst_228 = arith.constant dense<0.000000e+00> : vector<8x32xf32>
    %479 = tpu.matmul %477, %478, %cst_228 {dimension_numbers = #tpu.dot_dimension_numbers<[1], [0], [0], [1], [0, 0, 1, 1], [], []>} : vector<8x8xbf16>, vector<8x32xbf16>, vector<8x32xf32> -> vector<8x32xf32>
    %480 = vector.broadcast %476 : vector<8x1xf32> to vector<8x32xf32>
    %481 = arith.mulf %479, %480 : vector<8x32xf32>
    %482 = arith.truncf %481 : vector<8x32xf32> to vector<8x32xbf16>
    %483 = vector.extract_strided_slice %398 {offsets = [32, 0], sizes = [32, 128], strides = [1, 1]} : vector<128x128xbf16> to vector<32x128xbf16>
    %cst_229 = arith.constant dense<0.000000e+00> : vector<8x128xf32>
    %484 = tpu.matmul %482, %483, %cst_229 {dimension_numbers = #tpu.dot_dimension_numbers<[1], [0], [0], [1], [0, 0, 1, 1], [], []>} : vector<8x32xbf16>, vector<32x128xbf16>, vector<8x128xf32> -> vector<8x128xf32>
    %485 = arith.addf %464, %484 : vector<8x128xf32>
    %486 = vector.extract_strided_slice %442 {offsets = [0, 64], sizes = [8, 32], strides = [1, 1]} : vector<8x128xbf16> to vector<8x32xbf16>
    %487 = vector.extract_strided_slice %443 {offsets = [0, 64], sizes = [8, 32], strides = [1, 1]} : vector<8x128xbf16> to vector<8x32xbf16>
    %cst_230 = arith.constant dense<0.000000e+00> : vector<8x8xf32>
    %488 = tpu.matmul %486, %487, %cst_230 {dimension_numbers = #tpu.dot_dimension_numbers<[1], [1], [0], [0], [0, 0, 1, 0], [], []>} : vector<8x32xbf16>, vector<8x32xbf16>, vector<8x8xf32> -> vector<8x8xf32>
    %489 = arith.addf %488, %392 : vector<8x8xf32>
    %cst_231 = arith.constant dense<0xFF800000> : vector<8xf32>
    %490 = vector.multi_reduction <maximumf>, %489, %cst_231 [1] : vector<8x8xf32> to vector<8xf32>
    %491 = vector.shape_cast %490 : vector<8xf32> to vector<8x1xf32>
    %492 = vector.broadcast %491 : vector<8x1xf32> to vector<8x8xf32>
    %493 = arith.subf %489, %492 : vector<8x8xf32>
    %494 = math.exp %493 : vector<8x8xf32>
    %cst_232 = arith.constant dense<0.000000e+00> : vector<8xf32>
    %495 = vector.multi_reduction <add>, %494, %cst_232 [1] : vector<8x8xf32> to vector<8xf32>
    %496 = vector.shape_cast %495 : vector<8xf32> to vector<8x1xf32>
    %497 = tpu.reciprocal %496 {approx = true} : vector<8x1xf32> -> vector<8x1xf32>
    %498 = arith.truncf %494 : vector<8x8xf32> to vector<8x8xbf16>
    %499 = vector.extract_strided_slice %444 {offsets = [0, 64], sizes = [8, 32], strides = [1, 1]} : vector<8x128xbf16> to vector<8x32xbf16>
    %cst_233 = arith.constant dense<0.000000e+00> : vector<8x32xf32>
    %500 = tpu.matmul %498, %499, %cst_233 {dimension_numbers = #tpu.dot_dimension_numbers<[1], [0], [0], [1], [0, 0, 1, 1], [], []>} : vector<8x8xbf16>, vector<8x32xbf16>, vector<8x32xf32> -> vector<8x32xf32>
    %501 = vector.broadcast %497 : vector<8x1xf32> to vector<8x32xf32>
    %502 = arith.mulf %500, %501 : vector<8x32xf32>
    %503 = arith.truncf %502 : vector<8x32xf32> to vector<8x32xbf16>
    %504 = vector.extract_strided_slice %398 {offsets = [64, 0], sizes = [32, 128], strides = [1, 1]} : vector<128x128xbf16> to vector<32x128xbf16>
    %cst_234 = arith.constant dense<0.000000e+00> : vector<8x128xf32>
    %505 = tpu.matmul %503, %504, %cst_234 {dimension_numbers = #tpu.dot_dimension_numbers<[1], [0], [0], [1], [0, 0, 1, 1], [], []>} : vector<8x32xbf16>, vector<32x128xbf16>, vector<8x128xf32> -> vector<8x128xf32>
    %506 = arith.addf %485, %505 : vector<8x128xf32>
    %507 = vector.extract_strided_slice %442 {offsets = [0, 96], sizes = [8, 32], strides = [1, 1]} : vector<8x128xbf16> to vector<8x32xbf16>
    %508 = vector.extract_strided_slice %443 {offsets = [0, 96], sizes = [8, 32], strides = [1, 1]} : vector<8x128xbf16> to vector<8x32xbf16>
    %cst_235 = arith.constant dense<0.000000e+00> : vector<8x8xf32>
    %509 = tpu.matmul %507, %508, %cst_235 {dimension_numbers = #tpu.dot_dimension_numbers<[1], [1], [0], [0], [0, 0, 1, 0], [], []>} : vector<8x32xbf16>, vector<8x32xbf16>, vector<8x8xf32> -> vector<8x8xf32>
    %510 = arith.addf %509, %392 : vector<8x8xf32>
    %cst_236 = arith.constant dense<0xFF800000> : vector<8xf32>
    %511 = vector.multi_reduction <maximumf>, %510, %cst_236 [1] : vector<8x8xf32> to vector<8xf32>
    %512 = vector.shape_cast %511 : vector<8xf32> to vector<8x1xf32>
    %513 = vector.broadcast %512 : vector<8x1xf32> to vector<8x8xf32>
    %514 = arith.subf %510, %513 : vector<8x8xf32>
    %515 = math.exp %514 : vector<8x8xf32>
    %cst_237 = arith.constant dense<0.000000e+00> : vector<8xf32>
    %516 = vector.multi_reduction <add>, %515, %cst_237 [1] : vector<8x8xf32> to vector<8xf32>
    %517 = vector.shape_cast %516 : vector<8xf32> to vector<8x1xf32>
    %518 = tpu.reciprocal %517 {approx = true} : vector<8x1xf32> -> vector<8x1xf32>
    %519 = arith.truncf %515 : vector<8x8xf32> to vector<8x8xbf16>
    %520 = vector.extract_strided_slice %444 {offsets = [0, 96], sizes = [8, 32], strides = [1, 1]} : vector<8x128xbf16> to vector<8x32xbf16>
    %cst_238 = arith.constant dense<0.000000e+00> : vector<8x32xf32>
    %521 = tpu.matmul %519, %520, %cst_238 {dimension_numbers = #tpu.dot_dimension_numbers<[1], [0], [0], [1], [0, 0, 1, 1], [], []>} : vector<8x8xbf16>, vector<8x32xbf16>, vector<8x32xf32> -> vector<8x32xf32>
    %522 = vector.broadcast %518 : vector<8x1xf32> to vector<8x32xf32>
    %523 = arith.mulf %521, %522 : vector<8x32xf32>
    %524 = arith.truncf %523 : vector<8x32xf32> to vector<8x32xbf16>
    %525 = vector.extract_strided_slice %398 {offsets = [96, 0], sizes = [32, 128], strides = [1, 1]} : vector<128x128xbf16> to vector<32x128xbf16>
    %cst_239 = arith.constant dense<0.000000e+00> : vector<8x128xf32>
    %526 = tpu.matmul %524, %525, %cst_239 {dimension_numbers = #tpu.dot_dimension_numbers<[1], [0], [0], [1], [0, 0, 1, 1], [], []>} : vector<8x32xbf16>, vector<32x128xbf16>, vector<8x128xf32> -> vector<8x128xf32>
    %527 = arith.addf %506, %526 : vector<8x128xf32>
    %528 = vector.broadcast %400 : vector<1x128xf32> to vector<8x128xf32>
    %529 = arith.addf %527, %528 : vector<8x128xf32>
    %530 = arith.addf %3, %529 : vector<8x128xf32>
    %cst_240 = arith.constant dense<0.000000e+00> : vector<8xf32>
    %531 = vector.multi_reduction <add>, %530, %cst_240 [1] : vector<8x128xf32> to vector<8xf32>
    %532 = vector.shape_cast %531 : vector<8xf32> to vector<8x1xf32>
    %cst_241 = arith.constant 1.280000e+02 : f32
    %533 = vector.broadcast %cst_241 : f32 to vector<8x1xf32>
    %534 = arith.divf %532, %533 : vector<8x1xf32>
    %535 = vector.broadcast %534 : vector<8x1xf32> to vector<8x128xf32>
    %536 = arith.subf %530, %535 : vector<8x128xf32>
    %537 = arith.mulf %536, %536 : vector<8x128xf32>
    %cst_242 = arith.constant dense<0.000000e+00> : vector<8xf32>
    %538 = vector.multi_reduction <add>, %537, %cst_242 [1] : vector<8x128xf32> to vector<8xf32>
    %539 = vector.shape_cast %538 : vector<8xf32> to vector<8x1xf32>
    %cst_243 = arith.constant 1.280000e+02 : f32
    %540 = vector.broadcast %cst_243 : f32 to vector<8x1xf32>
    %541 = arith.divf %539, %540 : vector<8x1xf32>
    %cst_244 = arith.constant 9.99999974E-6 : f32
    %542 = vector.broadcast %cst_244 : f32 to vector<8x1xf32>
    %543 = arith.addf %541, %542 : vector<8x1xf32>
    %544 = math.rsqrt %543 : vector<8x1xf32>
    %545 = vector.broadcast %544 : vector<8x1xf32> to vector<8x128xf32>
    %546 = arith.mulf %536, %545 : vector<8x128xf32>
    %547 = vector.broadcast %402 : vector<1x128xf32> to vector<8x128xf32>
    %548 = arith.mulf %546, %547 : vector<8x128xf32>
    %549 = vector.broadcast %404 : vector<1x128xf32> to vector<8x128xf32>
    %550 = arith.addf %548, %549 : vector<8x128xf32>
    %551 = arith.truncf %550 : vector<8x128xf32> to vector<8x128xbf16>
    %cst_245 = arith.constant dense<0.000000e+00> : vector<8x128xf32>
    %552 = tpu.matmul %551, %406, %cst_245 {dimension_numbers = #tpu.dot_dimension_numbers<[1], [0], [0], [1], [0, 0, 1, 1], [], []>} : vector<8x128xbf16>, vector<128x128xbf16>, vector<8x128xf32> -> vector<8x128xf32>
    %553 = vector.broadcast %408 : vector<1x128xf32> to vector<8x128xf32>
    %554 = arith.addf %552, %553 : vector<8x128xf32>
    %555 = arith.truncf %386 : vector<16x128xf32> to vector<16x128xbf16>
    %cst_246 = arith.constant dense<0.000000e+00> : vector<16x256xf32>
    %556 = tpu.matmul %555, %410, %cst_246 {dimension_numbers = #tpu.dot_dimension_numbers<[1], [0], [0], [1], [0, 0, 1, 1], [], []>} : vector<16x128xbf16>, vector<128x256xbf16>, vector<16x256xf32> -> vector<16x256xf32>
    %557 = vector.broadcast %412 : vector<1x256xf32> to vector<16x256xf32>
    %558 = arith.addf %556, %557 : vector<16x256xf32>
    %559 = vector.extract_strided_slice %558 {offsets = [0, 0], sizes = [16, 128], strides = [1, 1]} : vector<16x256xf32> to vector<16x128xf32>
    %560 = vector.extract_strided_slice %558 {offsets = [0, 128], sizes = [16, 128], strides = [1, 1]} : vector<16x256xf32> to vector<16x128xf32>
    %cst_247 = arith.constant 0.176776692 : f32
    %561 = vector.broadcast %cst_247 : f32 to vector<8x128xf32>
    %562 = arith.mulf %554, %561 : vector<8x128xf32>
    %563 = arith.truncf %562 : vector<8x128xf32> to vector<8x128xbf16>
    %564 = arith.truncf %559 : vector<16x128xf32> to vector<16x128xbf16>
    %565 = arith.truncf %560 : vector<16x128xf32> to vector<16x128xbf16>
    %566 = vector.extract_strided_slice %563 {offsets = [0, 0], sizes = [8, 32], strides = [1, 1]} : vector<8x128xbf16> to vector<8x32xbf16>
    %567 = vector.extract_strided_slice %564 {offsets = [0, 0], sizes = [16, 32], strides = [1, 1]} : vector<16x128xbf16> to vector<16x32xbf16>
    %cst_248 = arith.constant dense<0.000000e+00> : vector<8x16xf32>
    %568 = tpu.matmul %566, %567, %cst_248 {dimension_numbers = #tpu.dot_dimension_numbers<[1], [1], [0], [0], [0, 0, 1, 0], [], []>} : vector<8x32xbf16>, vector<16x32xbf16>, vector<8x16xf32> -> vector<8x16xf32>
    %569 = vector.broadcast %10 : vector<1x16xf32> to vector<8x16xf32>
    %570 = arith.addf %568, %569 : vector<8x16xf32>
    %cst_249 = arith.constant dense<0xFF800000> : vector<8xf32>
    %571 = vector.multi_reduction <maximumf>, %570, %cst_249 [1] : vector<8x16xf32> to vector<8xf32>
    %572 = vector.shape_cast %571 : vector<8xf32> to vector<8x1xf32>
    %573 = vector.broadcast %572 : vector<8x1xf32> to vector<8x16xf32>
    %574 = arith.subf %570, %573 : vector<8x16xf32>
    %575 = math.exp %574 : vector<8x16xf32>
    %cst_250 = arith.constant dense<0.000000e+00> : vector<8xf32>
    %576 = vector.multi_reduction <add>, %575, %cst_250 [1] : vector<8x16xf32> to vector<8xf32>
    %577 = vector.shape_cast %576 : vector<8xf32> to vector<8x1xf32>
    %578 = tpu.reciprocal %577 {approx = true} : vector<8x1xf32> -> vector<8x1xf32>
    %579 = arith.truncf %575 : vector<8x16xf32> to vector<8x16xbf16>
    %580 = vector.extract_strided_slice %565 {offsets = [0, 0], sizes = [16, 32], strides = [1, 1]} : vector<16x128xbf16> to vector<16x32xbf16>
    %cst_251 = arith.constant dense<0.000000e+00> : vector<8x32xf32>
    %581 = tpu.matmul %579, %580, %cst_251 {dimension_numbers = #tpu.dot_dimension_numbers<[1], [0], [0], [1], [0, 0, 1, 1], [], []>} : vector<8x16xbf16>, vector<16x32xbf16>, vector<8x32xf32> -> vector<8x32xf32>
    %582 = vector.broadcast %578 : vector<8x1xf32> to vector<8x32xf32>
    %583 = arith.mulf %581, %582 : vector<8x32xf32>
    %584 = arith.truncf %583 : vector<8x32xf32> to vector<8x32xbf16>
    %585 = vector.extract_strided_slice %414 {offsets = [0, 0], sizes = [32, 128], strides = [1, 1]} : vector<128x128xbf16> to vector<32x128xbf16>
    %cst_252 = arith.constant dense<0.000000e+00> : vector<8x128xf32>
    %586 = tpu.matmul %584, %585, %cst_252 {dimension_numbers = #tpu.dot_dimension_numbers<[1], [0], [0], [1], [0, 0, 1, 1], [], []>} : vector<8x32xbf16>, vector<32x128xbf16>, vector<8x128xf32> -> vector<8x128xf32>
    %587 = vector.extract_strided_slice %563 {offsets = [0, 32], sizes = [8, 32], strides = [1, 1]} : vector<8x128xbf16> to vector<8x32xbf16>
    %588 = vector.extract_strided_slice %564 {offsets = [0, 32], sizes = [16, 32], strides = [1, 1]} : vector<16x128xbf16> to vector<16x32xbf16>
    %cst_253 = arith.constant dense<0.000000e+00> : vector<8x16xf32>
    %589 = tpu.matmul %587, %588, %cst_253 {dimension_numbers = #tpu.dot_dimension_numbers<[1], [1], [0], [0], [0, 0, 1, 0], [], []>} : vector<8x32xbf16>, vector<16x32xbf16>, vector<8x16xf32> -> vector<8x16xf32>
    %590 = vector.broadcast %10 : vector<1x16xf32> to vector<8x16xf32>
    %591 = arith.addf %589, %590 : vector<8x16xf32>
    %cst_254 = arith.constant dense<0xFF800000> : vector<8xf32>
    %592 = vector.multi_reduction <maximumf>, %591, %cst_254 [1] : vector<8x16xf32> to vector<8xf32>
    %593 = vector.shape_cast %592 : vector<8xf32> to vector<8x1xf32>
    %594 = vector.broadcast %593 : vector<8x1xf32> to vector<8x16xf32>
    %595 = arith.subf %591, %594 : vector<8x16xf32>
    %596 = math.exp %595 : vector<8x16xf32>
    %cst_255 = arith.constant dense<0.000000e+00> : vector<8xf32>
    %597 = vector.multi_reduction <add>, %596, %cst_255 [1] : vector<8x16xf32> to vector<8xf32>
    %598 = vector.shape_cast %597 : vector<8xf32> to vector<8x1xf32>
    %599 = tpu.reciprocal %598 {approx = true} : vector<8x1xf32> -> vector<8x1xf32>
    %600 = arith.truncf %596 : vector<8x16xf32> to vector<8x16xbf16>
    %601 = vector.extract_strided_slice %565 {offsets = [0, 32], sizes = [16, 32], strides = [1, 1]} : vector<16x128xbf16> to vector<16x32xbf16>
    %cst_256 = arith.constant dense<0.000000e+00> : vector<8x32xf32>
    %602 = tpu.matmul %600, %601, %cst_256 {dimension_numbers = #tpu.dot_dimension_numbers<[1], [0], [0], [1], [0, 0, 1, 1], [], []>} : vector<8x16xbf16>, vector<16x32xbf16>, vector<8x32xf32> -> vector<8x32xf32>
    %603 = vector.broadcast %599 : vector<8x1xf32> to vector<8x32xf32>
    %604 = arith.mulf %602, %603 : vector<8x32xf32>
    %605 = arith.truncf %604 : vector<8x32xf32> to vector<8x32xbf16>
    %606 = vector.extract_strided_slice %414 {offsets = [32, 0], sizes = [32, 128], strides = [1, 1]} : vector<128x128xbf16> to vector<32x128xbf16>
    %cst_257 = arith.constant dense<0.000000e+00> : vector<8x128xf32>
    %607 = tpu.matmul %605, %606, %cst_257 {dimension_numbers = #tpu.dot_dimension_numbers<[1], [0], [0], [1], [0, 0, 1, 1], [], []>} : vector<8x32xbf16>, vector<32x128xbf16>, vector<8x128xf32> -> vector<8x128xf32>
    %608 = arith.addf %586, %607 : vector<8x128xf32>
    %609 = vector.extract_strided_slice %563 {offsets = [0, 64], sizes = [8, 32], strides = [1, 1]} : vector<8x128xbf16> to vector<8x32xbf16>
    %610 = vector.extract_strided_slice %564 {offsets = [0, 64], sizes = [16, 32], strides = [1, 1]} : vector<16x128xbf16> to vector<16x32xbf16>
    %cst_258 = arith.constant dense<0.000000e+00> : vector<8x16xf32>
    %611 = tpu.matmul %609, %610, %cst_258 {dimension_numbers = #tpu.dot_dimension_numbers<[1], [1], [0], [0], [0, 0, 1, 0], [], []>} : vector<8x32xbf16>, vector<16x32xbf16>, vector<8x16xf32> -> vector<8x16xf32>
    %612 = vector.broadcast %10 : vector<1x16xf32> to vector<8x16xf32>
    %613 = arith.addf %611, %612 : vector<8x16xf32>
    %cst_259 = arith.constant dense<0xFF800000> : vector<8xf32>
    %614 = vector.multi_reduction <maximumf>, %613, %cst_259 [1] : vector<8x16xf32> to vector<8xf32>
    %615 = vector.shape_cast %614 : vector<8xf32> to vector<8x1xf32>
    %616 = vector.broadcast %615 : vector<8x1xf32> to vector<8x16xf32>
    %617 = arith.subf %613, %616 : vector<8x16xf32>
    %618 = math.exp %617 : vector<8x16xf32>
    %cst_260 = arith.constant dense<0.000000e+00> : vector<8xf32>
    %619 = vector.multi_reduction <add>, %618, %cst_260 [1] : vector<8x16xf32> to vector<8xf32>
    %620 = vector.shape_cast %619 : vector<8xf32> to vector<8x1xf32>
    %621 = tpu.reciprocal %620 {approx = true} : vector<8x1xf32> -> vector<8x1xf32>
    %622 = arith.truncf %618 : vector<8x16xf32> to vector<8x16xbf16>
    %623 = vector.extract_strided_slice %565 {offsets = [0, 64], sizes = [16, 32], strides = [1, 1]} : vector<16x128xbf16> to vector<16x32xbf16>
    %cst_261 = arith.constant dense<0.000000e+00> : vector<8x32xf32>
    %624 = tpu.matmul %622, %623, %cst_261 {dimension_numbers = #tpu.dot_dimension_numbers<[1], [0], [0], [1], [0, 0, 1, 1], [], []>} : vector<8x16xbf16>, vector<16x32xbf16>, vector<8x32xf32> -> vector<8x32xf32>
    %625 = vector.broadcast %621 : vector<8x1xf32> to vector<8x32xf32>
    %626 = arith.mulf %624, %625 : vector<8x32xf32>
    %627 = arith.truncf %626 : vector<8x32xf32> to vector<8x32xbf16>
    %628 = vector.extract_strided_slice %414 {offsets = [64, 0], sizes = [32, 128], strides = [1, 1]} : vector<128x128xbf16> to vector<32x128xbf16>
    %cst_262 = arith.constant dense<0.000000e+00> : vector<8x128xf32>
    %629 = tpu.matmul %627, %628, %cst_262 {dimension_numbers = #tpu.dot_dimension_numbers<[1], [0], [0], [1], [0, 0, 1, 1], [], []>} : vector<8x32xbf16>, vector<32x128xbf16>, vector<8x128xf32> -> vector<8x128xf32>
    %630 = arith.addf %608, %629 : vector<8x128xf32>
    %631 = vector.extract_strided_slice %563 {offsets = [0, 96], sizes = [8, 32], strides = [1, 1]} : vector<8x128xbf16> to vector<8x32xbf16>
    %632 = vector.extract_strided_slice %564 {offsets = [0, 96], sizes = [16, 32], strides = [1, 1]} : vector<16x128xbf16> to vector<16x32xbf16>
    %cst_263 = arith.constant dense<0.000000e+00> : vector<8x16xf32>
    %633 = tpu.matmul %631, %632, %cst_263 {dimension_numbers = #tpu.dot_dimension_numbers<[1], [1], [0], [0], [0, 0, 1, 0], [], []>} : vector<8x32xbf16>, vector<16x32xbf16>, vector<8x16xf32> -> vector<8x16xf32>
    %634 = vector.broadcast %10 : vector<1x16xf32> to vector<8x16xf32>
    %635 = arith.addf %633, %634 : vector<8x16xf32>
    %cst_264 = arith.constant dense<0xFF800000> : vector<8xf32>
    %636 = vector.multi_reduction <maximumf>, %635, %cst_264 [1] : vector<8x16xf32> to vector<8xf32>
    %637 = vector.shape_cast %636 : vector<8xf32> to vector<8x1xf32>
    %638 = vector.broadcast %637 : vector<8x1xf32> to vector<8x16xf32>
    %639 = arith.subf %635, %638 : vector<8x16xf32>
    %640 = math.exp %639 : vector<8x16xf32>
    %cst_265 = arith.constant dense<0.000000e+00> : vector<8xf32>
    %641 = vector.multi_reduction <add>, %640, %cst_265 [1] : vector<8x16xf32> to vector<8xf32>
    %642 = vector.shape_cast %641 : vector<8xf32> to vector<8x1xf32>
    %643 = tpu.reciprocal %642 {approx = true} : vector<8x1xf32> -> vector<8x1xf32>
    %644 = arith.truncf %640 : vector<8x16xf32> to vector<8x16xbf16>
    %645 = vector.extract_strided_slice %565 {offsets = [0, 96], sizes = [16, 32], strides = [1, 1]} : vector<16x128xbf16> to vector<16x32xbf16>
    %cst_266 = arith.constant dense<0.000000e+00> : vector<8x32xf32>
    %646 = tpu.matmul %644, %645, %cst_266 {dimension_numbers = #tpu.dot_dimension_numbers<[1], [0], [0], [1], [0, 0, 1, 1], [], []>} : vector<8x16xbf16>, vector<16x32xbf16>, vector<8x32xf32> -> vector<8x32xf32>
    %647 = vector.broadcast %643 : vector<8x1xf32> to vector<8x32xf32>
    %648 = arith.mulf %646, %647 : vector<8x32xf32>
    %649 = arith.truncf %648 : vector<8x32xf32> to vector<8x32xbf16>
    %650 = vector.extract_strided_slice %414 {offsets = [96, 0], sizes = [32, 128], strides = [1, 1]} : vector<128x128xbf16> to vector<32x128xbf16>
    %cst_267 = arith.constant dense<0.000000e+00> : vector<8x128xf32>
    %651 = tpu.matmul %649, %650, %cst_267 {dimension_numbers = #tpu.dot_dimension_numbers<[1], [0], [0], [1], [0, 0, 1, 1], [], []>} : vector<8x32xbf16>, vector<32x128xbf16>, vector<8x128xf32> -> vector<8x128xf32>
    %652 = arith.addf %630, %651 : vector<8x128xf32>
    %653 = vector.broadcast %416 : vector<1x128xf32> to vector<8x128xf32>
    %654 = arith.addf %652, %653 : vector<8x128xf32>
    %655 = arith.addf %550, %654 : vector<8x128xf32>
    %cst_268 = arith.constant dense<0.000000e+00> : vector<8xf32>
    %656 = vector.multi_reduction <add>, %655, %cst_268 [1] : vector<8x128xf32> to vector<8xf32>
    %657 = vector.shape_cast %656 : vector<8xf32> to vector<8x1xf32>
    %cst_269 = arith.constant 1.280000e+02 : f32
    %658 = vector.broadcast %cst_269 : f32 to vector<8x1xf32>
    %659 = arith.divf %657, %658 : vector<8x1xf32>
    %660 = vector.broadcast %659 : vector<8x1xf32> to vector<8x128xf32>
    %661 = arith.subf %655, %660 : vector<8x128xf32>
    %662 = arith.mulf %661, %661 : vector<8x128xf32>
    %cst_270 = arith.constant dense<0.000000e+00> : vector<8xf32>
    %663 = vector.multi_reduction <add>, %662, %cst_270 [1] : vector<8x128xf32> to vector<8xf32>
    %664 = vector.shape_cast %663 : vector<8xf32> to vector<8x1xf32>
    %cst_271 = arith.constant 1.280000e+02 : f32
    %665 = vector.broadcast %cst_271 : f32 to vector<8x1xf32>
    %666 = arith.divf %664, %665 : vector<8x1xf32>
    %cst_272 = arith.constant 9.99999974E-6 : f32
    %667 = vector.broadcast %cst_272 : f32 to vector<8x1xf32>
    %668 = arith.addf %666, %667 : vector<8x1xf32>
    %669 = math.rsqrt %668 : vector<8x1xf32>
    %670 = vector.broadcast %669 : vector<8x1xf32> to vector<8x128xf32>
    %671 = arith.mulf %661, %670 : vector<8x128xf32>
    %672 = vector.broadcast %418 : vector<1x128xf32> to vector<8x128xf32>
    %673 = arith.mulf %671, %672 : vector<8x128xf32>
    %674 = vector.broadcast %420 : vector<1x128xf32> to vector<8x128xf32>
    %675 = arith.addf %673, %674 : vector<8x128xf32>
    %676 = arith.truncf %675 : vector<8x128xf32> to vector<8x128xbf16>
    %cst_273 = arith.constant dense<0.000000e+00> : vector<8x256xf32>
    %677 = tpu.matmul %676, %422, %cst_273 {dimension_numbers = #tpu.dot_dimension_numbers<[1], [0], [0], [1], [0, 0, 1, 1], [], []>} : vector<8x128xbf16>, vector<128x256xbf16>, vector<8x256xf32> -> vector<8x256xf32>
    %678 = vector.broadcast %424 : vector<1x256xf32> to vector<8x256xf32>
    %679 = arith.addf %677, %678 : vector<8x256xf32>
    %cst_274 = arith.constant 5.000000e-01 : f32
    %680 = vector.broadcast %cst_274 : f32 to vector<8x256xf32>
    %681 = arith.mulf %680, %679 : vector<8x256xf32>
    %cst_275 = arith.constant 4.471500e-02 : f32
    %682 = vector.broadcast %cst_275 : f32 to vector<8x256xf32>
    %683 = arith.mulf %682, %679 : vector<8x256xf32>
    %684 = arith.mulf %683, %679 : vector<8x256xf32>
    %685 = arith.mulf %684, %679 : vector<8x256xf32>
    %686 = arith.addf %679, %685 : vector<8x256xf32>
    %cst_276 = arith.constant 0.797884583 : f32
    %687 = vector.broadcast %cst_276 : f32 to vector<8x256xf32>
    %688 = arith.mulf %687, %686 : vector<8x256xf32>
    %689 = math.tanh %688 : vector<8x256xf32>
    %cst_277 = arith.constant 1.000000e+00 : f32
    %690 = vector.broadcast %cst_277 : f32 to vector<8x256xf32>
    %691 = arith.addf %690, %689 : vector<8x256xf32>
    %692 = arith.mulf %681, %691 : vector<8x256xf32>
    %693 = arith.truncf %692 : vector<8x256xf32> to vector<8x256xbf16>
    %cst_278 = arith.constant dense<0.000000e+00> : vector<8x128xf32>
    %694 = tpu.matmul %693, %426, %cst_278 {dimension_numbers = #tpu.dot_dimension_numbers<[1], [0], [0], [1], [0, 0, 1, 1], [], []>} : vector<8x256xbf16>, vector<256x128xbf16>, vector<8x128xf32> -> vector<8x128xf32>
    %695 = vector.broadcast %428 : vector<1x128xf32> to vector<8x128xf32>
    %696 = arith.addf %694, %695 : vector<8x128xf32>
    %697 = arith.addf %675, %696 : vector<8x128xf32>
    %cst_279 = arith.constant dense<0.000000e+00> : vector<8xf32>
    %698 = vector.multi_reduction <add>, %697, %cst_279 [1] : vector<8x128xf32> to vector<8xf32>
    %699 = vector.shape_cast %698 : vector<8xf32> to vector<8x1xf32>
    %cst_280 = arith.constant 1.280000e+02 : f32
    %700 = vector.broadcast %cst_280 : f32 to vector<8x1xf32>
    %701 = arith.divf %699, %700 : vector<8x1xf32>
    %702 = vector.broadcast %701 : vector<8x1xf32> to vector<8x128xf32>
    %703 = arith.subf %697, %702 : vector<8x128xf32>
    %704 = arith.mulf %703, %703 : vector<8x128xf32>
    %cst_281 = arith.constant dense<0.000000e+00> : vector<8xf32>
    %705 = vector.multi_reduction <add>, %704, %cst_281 [1] : vector<8x128xf32> to vector<8xf32>
    %706 = vector.shape_cast %705 : vector<8xf32> to vector<8x1xf32>
    %cst_282 = arith.constant 1.280000e+02 : f32
    %707 = vector.broadcast %cst_282 : f32 to vector<8x1xf32>
    %708 = arith.divf %706, %707 : vector<8x1xf32>
    %cst_283 = arith.constant 9.99999974E-6 : f32
    %709 = vector.broadcast %cst_283 : f32 to vector<8x1xf32>
    %710 = arith.addf %708, %709 : vector<8x1xf32>
    %711 = math.rsqrt %710 : vector<8x1xf32>
    %712 = vector.broadcast %711 : vector<8x1xf32> to vector<8x128xf32>
    %713 = arith.mulf %703, %712 : vector<8x128xf32>
    %714 = vector.broadcast %430 : vector<1x128xf32> to vector<8x128xf32>
    %715 = arith.mulf %713, %714 : vector<8x128xf32>
    %716 = vector.broadcast %432 : vector<1x128xf32> to vector<8x128xf32>
    %717 = arith.addf %715, %716 : vector<8x128xf32>
    %c1_284 = arith.constant 1 : index
    %c0_285 = arith.constant 0 : index
    %c0_286 = arith.constant 0 : index
    %718 = vector.load %arg17[%c1_284, %c0_285, %c0_286] : memref<2x128x384xbf16, #tpu.memory_space<vmem>>, vector<1x128x384xbf16>
    %719 = vector.shape_cast %718 : vector<1x128x384xbf16> to vector<128x384xbf16>
    %c1_287 = arith.constant 1 : index
    %c0_288 = arith.constant 0 : index
    %c0_289 = arith.constant 0 : index
    %720 = vector.load %arg18[%c1_287, %c0_288, %c0_289] : memref<2x1x384xf32, #tpu.memory_space<vmem>>, vector<1x1x384xf32>
    %721 = vector.shape_cast %720 : vector<1x1x384xf32> to vector<1x384xf32>
    %c1_290 = arith.constant 1 : index
    %c0_291 = arith.constant 0 : index
    %c0_292 = arith.constant 0 : index
    %722 = vector.load %arg19[%c1_290, %c0_291, %c0_292] : memref<2x128x128xbf16, #tpu.memory_space<vmem>>, vector<1x128x128xbf16>
    %723 = vector.shape_cast %722 : vector<1x128x128xbf16> to vector<128x128xbf16>
    %c1_293 = arith.constant 1 : index
    %c0_294 = arith.constant 0 : index
    %c0_295 = arith.constant 0 : index
    %724 = vector.load %arg20[%c1_293, %c0_294, %c0_295] : memref<2x1x128xf32, #tpu.memory_space<vmem>>, vector<1x1x128xf32>
    %725 = vector.shape_cast %724 : vector<1x1x128xf32> to vector<1x128xf32>
    %c1_296 = arith.constant 1 : index
    %c0_297 = arith.constant 0 : index
    %c0_298 = arith.constant 0 : index
    %726 = vector.load %arg21[%c1_296, %c0_297, %c0_298] : memref<2x1x128xf32, #tpu.memory_space<vmem>>, vector<1x1x128xf32>
    %727 = vector.shape_cast %726 : vector<1x1x128xf32> to vector<1x128xf32>
    %c1_299 = arith.constant 1 : index
    %c0_300 = arith.constant 0 : index
    %c0_301 = arith.constant 0 : index
    %728 = vector.load %arg22[%c1_299, %c0_300, %c0_301] : memref<2x1x128xf32, #tpu.memory_space<vmem>>, vector<1x1x128xf32>
    %729 = vector.shape_cast %728 : vector<1x1x128xf32> to vector<1x128xf32>
    %c1_302 = arith.constant 1 : index
    %c0_303 = arith.constant 0 : index
    %c0_304 = arith.constant 0 : index
    %730 = vector.load %arg23[%c1_302, %c0_303, %c0_304] : memref<2x128x128xbf16, #tpu.memory_space<vmem>>, vector<1x128x128xbf16>
    %731 = vector.shape_cast %730 : vector<1x128x128xbf16> to vector<128x128xbf16>
    %c1_305 = arith.constant 1 : index
    %c0_306 = arith.constant 0 : index
    %c0_307 = arith.constant 0 : index
    %732 = vector.load %arg24[%c1_305, %c0_306, %c0_307] : memref<2x1x128xf32, #tpu.memory_space<vmem>>, vector<1x1x128xf32>
    %733 = vector.shape_cast %732 : vector<1x1x128xf32> to vector<1x128xf32>
    %c1_308 = arith.constant 1 : index
    %c0_309 = arith.constant 0 : index
    %c0_310 = arith.constant 0 : index
    %734 = vector.load %arg25[%c1_308, %c0_309, %c0_310] : memref<2x128x256xbf16, #tpu.memory_space<vmem>>, vector<1x128x256xbf16>
    %735 = vector.shape_cast %734 : vector<1x128x256xbf16> to vector<128x256xbf16>
    %c1_311 = arith.constant 1 : index
    %c0_312 = arith.constant 0 : index
    %c0_313 = arith.constant 0 : index
    %736 = vector.load %arg26[%c1_311, %c0_312, %c0_313] : memref<2x1x256xf32, #tpu.memory_space<vmem>>, vector<1x1x256xf32>
    %737 = vector.shape_cast %736 : vector<1x1x256xf32> to vector<1x256xf32>
    %c1_314 = arith.constant 1 : index
    %c0_315 = arith.constant 0 : index
    %c0_316 = arith.constant 0 : index
    %738 = vector.load %arg27[%c1_314, %c0_315, %c0_316] : memref<2x128x128xbf16, #tpu.memory_space<vmem>>, vector<1x128x128xbf16>
    %739 = vector.shape_cast %738 : vector<1x128x128xbf16> to vector<128x128xbf16>
    %c1_317 = arith.constant 1 : index
    %c0_318 = arith.constant 0 : index
    %c0_319 = arith.constant 0 : index
    %740 = vector.load %arg28[%c1_317, %c0_318, %c0_319] : memref<2x1x128xf32, #tpu.memory_space<vmem>>, vector<1x1x128xf32>
    %741 = vector.shape_cast %740 : vector<1x1x128xf32> to vector<1x128xf32>
    %c1_320 = arith.constant 1 : index
    %c0_321 = arith.constant 0 : index
    %c0_322 = arith.constant 0 : index
    %742 = vector.load %arg29[%c1_320, %c0_321, %c0_322] : memref<2x1x128xf32, #tpu.memory_space<vmem>>, vector<1x1x128xf32>
    %743 = vector.shape_cast %742 : vector<1x1x128xf32> to vector<1x128xf32>
    %c1_323 = arith.constant 1 : index
    %c0_324 = arith.constant 0 : index
    %c0_325 = arith.constant 0 : index
    %744 = vector.load %arg30[%c1_323, %c0_324, %c0_325] : memref<2x1x128xf32, #tpu.memory_space<vmem>>, vector<1x1x128xf32>
    %745 = vector.shape_cast %744 : vector<1x1x128xf32> to vector<1x128xf32>
    %c1_326 = arith.constant 1 : index
    %c0_327 = arith.constant 0 : index
    %c0_328 = arith.constant 0 : index
    %746 = vector.load %arg31[%c1_326, %c0_327, %c0_328] : memref<2x128x256xbf16, #tpu.memory_space<vmem>>, vector<1x128x256xbf16>
    %747 = vector.shape_cast %746 : vector<1x128x256xbf16> to vector<128x256xbf16>
    %c1_329 = arith.constant 1 : index
    %c0_330 = arith.constant 0 : index
    %c0_331 = arith.constant 0 : index
    %748 = vector.load %arg32[%c1_329, %c0_330, %c0_331] : memref<2x1x256xf32, #tpu.memory_space<vmem>>, vector<1x1x256xf32>
    %749 = vector.shape_cast %748 : vector<1x1x256xf32> to vector<1x256xf32>
    %c1_332 = arith.constant 1 : index
    %c0_333 = arith.constant 0 : index
    %c0_334 = arith.constant 0 : index
    %750 = vector.load %arg33[%c1_332, %c0_333, %c0_334] : memref<2x256x128xbf16, #tpu.memory_space<vmem>>, vector<1x256x128xbf16>
    %751 = vector.shape_cast %750 : vector<1x256x128xbf16> to vector<256x128xbf16>
    %c1_335 = arith.constant 1 : index
    %c0_336 = arith.constant 0 : index
    %c0_337 = arith.constant 0 : index
    %752 = vector.load %arg34[%c1_335, %c0_336, %c0_337] : memref<2x1x128xf32, #tpu.memory_space<vmem>>, vector<1x1x128xf32>
    %753 = vector.shape_cast %752 : vector<1x1x128xf32> to vector<1x128xf32>
    %c1_338 = arith.constant 1 : index
    %c0_339 = arith.constant 0 : index
    %c0_340 = arith.constant 0 : index
    %754 = vector.load %arg35[%c1_338, %c0_339, %c0_340] : memref<2x1x128xf32, #tpu.memory_space<vmem>>, vector<1x1x128xf32>
    %755 = vector.shape_cast %754 : vector<1x1x128xf32> to vector<1x128xf32>
    %c1_341 = arith.constant 1 : index
    %c0_342 = arith.constant 0 : index
    %c0_343 = arith.constant 0 : index
    %756 = vector.load %arg36[%c1_341, %c0_342, %c0_343] : memref<2x1x128xf32, #tpu.memory_space<vmem>>, vector<1x1x128xf32>
    %757 = vector.shape_cast %756 : vector<1x1x128xf32> to vector<1x128xf32>
    %758 = arith.truncf %717 : vector<8x128xf32> to vector<8x128xbf16>
    %cst_344 = arith.constant dense<0.000000e+00> : vector<8x384xf32>
    %759 = tpu.matmul %758, %719, %cst_344 {dimension_numbers = #tpu.dot_dimension_numbers<[1], [0], [0], [1], [0, 0, 1, 1], [], []>} : vector<8x128xbf16>, vector<128x384xbf16>, vector<8x384xf32> -> vector<8x384xf32>
    %760 = vector.broadcast %721 : vector<1x384xf32> to vector<8x384xf32>
    %761 = arith.addf %759, %760 : vector<8x384xf32>
    %762 = vector.extract_strided_slice %761 {offsets = [0, 0], sizes = [8, 128], strides = [1, 1]} : vector<8x384xf32> to vector<8x128xf32>
    %763 = vector.extract_strided_slice %761 {offsets = [0, 128], sizes = [8, 128], strides = [1, 1]} : vector<8x384xf32> to vector<8x128xf32>
    %764 = vector.extract_strided_slice %761 {offsets = [0, 256], sizes = [8, 128], strides = [1, 1]} : vector<8x384xf32> to vector<8x128xf32>
    %cst_345 = arith.constant 0.176776692 : f32
    %765 = vector.broadcast %cst_345 : f32 to vector<8x128xf32>
    %766 = arith.mulf %762, %765 : vector<8x128xf32>
    %767 = arith.truncf %766 : vector<8x128xf32> to vector<8x128xbf16>
    %768 = arith.truncf %763 : vector<8x128xf32> to vector<8x128xbf16>
    %769 = arith.truncf %764 : vector<8x128xf32> to vector<8x128xbf16>
    %770 = vector.extract_strided_slice %767 {offsets = [0, 0], sizes = [8, 32], strides = [1, 1]} : vector<8x128xbf16> to vector<8x32xbf16>
    %771 = vector.extract_strided_slice %768 {offsets = [0, 0], sizes = [8, 32], strides = [1, 1]} : vector<8x128xbf16> to vector<8x32xbf16>
    %cst_346 = arith.constant dense<0.000000e+00> : vector<8x8xf32>
    %772 = tpu.matmul %770, %771, %cst_346 {dimension_numbers = #tpu.dot_dimension_numbers<[1], [1], [0], [0], [0, 0, 1, 0], [], []>} : vector<8x32xbf16>, vector<8x32xbf16>, vector<8x8xf32> -> vector<8x8xf32>
    %773 = arith.addf %772, %392 : vector<8x8xf32>
    %cst_347 = arith.constant dense<0xFF800000> : vector<8xf32>
    %774 = vector.multi_reduction <maximumf>, %773, %cst_347 [1] : vector<8x8xf32> to vector<8xf32>
    %775 = vector.shape_cast %774 : vector<8xf32> to vector<8x1xf32>
    %776 = vector.broadcast %775 : vector<8x1xf32> to vector<8x8xf32>
    %777 = arith.subf %773, %776 : vector<8x8xf32>
    %778 = math.exp %777 : vector<8x8xf32>
    %cst_348 = arith.constant dense<0.000000e+00> : vector<8xf32>
    %779 = vector.multi_reduction <add>, %778, %cst_348 [1] : vector<8x8xf32> to vector<8xf32>
    %780 = vector.shape_cast %779 : vector<8xf32> to vector<8x1xf32>
    %781 = tpu.reciprocal %780 {approx = true} : vector<8x1xf32> -> vector<8x1xf32>
    %782 = arith.truncf %778 : vector<8x8xf32> to vector<8x8xbf16>
    %783 = vector.extract_strided_slice %769 {offsets = [0, 0], sizes = [8, 32], strides = [1, 1]} : vector<8x128xbf16> to vector<8x32xbf16>
    %cst_349 = arith.constant dense<0.000000e+00> : vector<8x32xf32>
    %784 = tpu.matmul %782, %783, %cst_349 {dimension_numbers = #tpu.dot_dimension_numbers<[1], [0], [0], [1], [0, 0, 1, 1], [], []>} : vector<8x8xbf16>, vector<8x32xbf16>, vector<8x32xf32> -> vector<8x32xf32>
    %785 = vector.broadcast %781 : vector<8x1xf32> to vector<8x32xf32>
    %786 = arith.mulf %784, %785 : vector<8x32xf32>
    %787 = arith.truncf %786 : vector<8x32xf32> to vector<8x32xbf16>
    %788 = vector.extract_strided_slice %723 {offsets = [0, 0], sizes = [32, 128], strides = [1, 1]} : vector<128x128xbf16> to vector<32x128xbf16>
    %cst_350 = arith.constant dense<0.000000e+00> : vector<8x128xf32>
    %789 = tpu.matmul %787, %788, %cst_350 {dimension_numbers = #tpu.dot_dimension_numbers<[1], [0], [0], [1], [0, 0, 1, 1], [], []>} : vector<8x32xbf16>, vector<32x128xbf16>, vector<8x128xf32> -> vector<8x128xf32>
    %790 = vector.extract_strided_slice %767 {offsets = [0, 32], sizes = [8, 32], strides = [1, 1]} : vector<8x128xbf16> to vector<8x32xbf16>
    %791 = vector.extract_strided_slice %768 {offsets = [0, 32], sizes = [8, 32], strides = [1, 1]} : vector<8x128xbf16> to vector<8x32xbf16>
    %cst_351 = arith.constant dense<0.000000e+00> : vector<8x8xf32>
    %792 = tpu.matmul %790, %791, %cst_351 {dimension_numbers = #tpu.dot_dimension_numbers<[1], [1], [0], [0], [0, 0, 1, 0], [], []>} : vector<8x32xbf16>, vector<8x32xbf16>, vector<8x8xf32> -> vector<8x8xf32>
    %793 = arith.addf %792, %392 : vector<8x8xf32>
    %cst_352 = arith.constant dense<0xFF800000> : vector<8xf32>
    %794 = vector.multi_reduction <maximumf>, %793, %cst_352 [1] : vector<8x8xf32> to vector<8xf32>
    %795 = vector.shape_cast %794 : vector<8xf32> to vector<8x1xf32>
    %796 = vector.broadcast %795 : vector<8x1xf32> to vector<8x8xf32>
    %797 = arith.subf %793, %796 : vector<8x8xf32>
    %798 = math.exp %797 : vector<8x8xf32>
    %cst_353 = arith.constant dense<0.000000e+00> : vector<8xf32>
    %799 = vector.multi_reduction <add>, %798, %cst_353 [1] : vector<8x8xf32> to vector<8xf32>
    %800 = vector.shape_cast %799 : vector<8xf32> to vector<8x1xf32>
    %801 = tpu.reciprocal %800 {approx = true} : vector<8x1xf32> -> vector<8x1xf32>
    %802 = arith.truncf %798 : vector<8x8xf32> to vector<8x8xbf16>
    %803 = vector.extract_strided_slice %769 {offsets = [0, 32], sizes = [8, 32], strides = [1, 1]} : vector<8x128xbf16> to vector<8x32xbf16>
    %cst_354 = arith.constant dense<0.000000e+00> : vector<8x32xf32>
    %804 = tpu.matmul %802, %803, %cst_354 {dimension_numbers = #tpu.dot_dimension_numbers<[1], [0], [0], [1], [0, 0, 1, 1], [], []>} : vector<8x8xbf16>, vector<8x32xbf16>, vector<8x32xf32> -> vector<8x32xf32>
    %805 = vector.broadcast %801 : vector<8x1xf32> to vector<8x32xf32>
    %806 = arith.mulf %804, %805 : vector<8x32xf32>
    %807 = arith.truncf %806 : vector<8x32xf32> to vector<8x32xbf16>
    %808 = vector.extract_strided_slice %723 {offsets = [32, 0], sizes = [32, 128], strides = [1, 1]} : vector<128x128xbf16> to vector<32x128xbf16>
    %cst_355 = arith.constant dense<0.000000e+00> : vector<8x128xf32>
    %809 = tpu.matmul %807, %808, %cst_355 {dimension_numbers = #tpu.dot_dimension_numbers<[1], [0], [0], [1], [0, 0, 1, 1], [], []>} : vector<8x32xbf16>, vector<32x128xbf16>, vector<8x128xf32> -> vector<8x128xf32>
    %810 = arith.addf %789, %809 : vector<8x128xf32>
    %811 = vector.extract_strided_slice %767 {offsets = [0, 64], sizes = [8, 32], strides = [1, 1]} : vector<8x128xbf16> to vector<8x32xbf16>
    %812 = vector.extract_strided_slice %768 {offsets = [0, 64], sizes = [8, 32], strides = [1, 1]} : vector<8x128xbf16> to vector<8x32xbf16>
    %cst_356 = arith.constant dense<0.000000e+00> : vector<8x8xf32>
    %813 = tpu.matmul %811, %812, %cst_356 {dimension_numbers = #tpu.dot_dimension_numbers<[1], [1], [0], [0], [0, 0, 1, 0], [], []>} : vector<8x32xbf16>, vector<8x32xbf16>, vector<8x8xf32> -> vector<8x8xf32>
    %814 = arith.addf %813, %392 : vector<8x8xf32>
    %cst_357 = arith.constant dense<0xFF800000> : vector<8xf32>
    %815 = vector.multi_reduction <maximumf>, %814, %cst_357 [1] : vector<8x8xf32> to vector<8xf32>
    %816 = vector.shape_cast %815 : vector<8xf32> to vector<8x1xf32>
    %817 = vector.broadcast %816 : vector<8x1xf32> to vector<8x8xf32>
    %818 = arith.subf %814, %817 : vector<8x8xf32>
    %819 = math.exp %818 : vector<8x8xf32>
    %cst_358 = arith.constant dense<0.000000e+00> : vector<8xf32>
    %820 = vector.multi_reduction <add>, %819, %cst_358 [1] : vector<8x8xf32> to vector<8xf32>
    %821 = vector.shape_cast %820 : vector<8xf32> to vector<8x1xf32>
    %822 = tpu.reciprocal %821 {approx = true} : vector<8x1xf32> -> vector<8x1xf32>
    %823 = arith.truncf %819 : vector<8x8xf32> to vector<8x8xbf16>
    %824 = vector.extract_strided_slice %769 {offsets = [0, 64], sizes = [8, 32], strides = [1, 1]} : vector<8x128xbf16> to vector<8x32xbf16>
    %cst_359 = arith.constant dense<0.000000e+00> : vector<8x32xf32>
    %825 = tpu.matmul %823, %824, %cst_359 {dimension_numbers = #tpu.dot_dimension_numbers<[1], [0], [0], [1], [0, 0, 1, 1], [], []>} : vector<8x8xbf16>, vector<8x32xbf16>, vector<8x32xf32> -> vector<8x32xf32>
    %826 = vector.broadcast %822 : vector<8x1xf32> to vector<8x32xf32>
    %827 = arith.mulf %825, %826 : vector<8x32xf32>
    %828 = arith.truncf %827 : vector<8x32xf32> to vector<8x32xbf16>
    %829 = vector.extract_strided_slice %723 {offsets = [64, 0], sizes = [32, 128], strides = [1, 1]} : vector<128x128xbf16> to vector<32x128xbf16>
    %cst_360 = arith.constant dense<0.000000e+00> : vector<8x128xf32>
    %830 = tpu.matmul %828, %829, %cst_360 {dimension_numbers = #tpu.dot_dimension_numbers<[1], [0], [0], [1], [0, 0, 1, 1], [], []>} : vector<8x32xbf16>, vector<32x128xbf16>, vector<8x128xf32> -> vector<8x128xf32>
    %831 = arith.addf %810, %830 : vector<8x128xf32>
    %832 = vector.extract_strided_slice %767 {offsets = [0, 96], sizes = [8, 32], strides = [1, 1]} : vector<8x128xbf16> to vector<8x32xbf16>
    %833 = vector.extract_strided_slice %768 {offsets = [0, 96], sizes = [8, 32], strides = [1, 1]} : vector<8x128xbf16> to vector<8x32xbf16>
    %cst_361 = arith.constant dense<0.000000e+00> : vector<8x8xf32>
    %834 = tpu.matmul %832, %833, %cst_361 {dimension_numbers = #tpu.dot_dimension_numbers<[1], [1], [0], [0], [0, 0, 1, 0], [], []>} : vector<8x32xbf16>, vector<8x32xbf16>, vector<8x8xf32> -> vector<8x8xf32>
    %835 = arith.addf %834, %392 : vector<8x8xf32>
    %cst_362 = arith.constant dense<0xFF800000> : vector<8xf32>
    %836 = vector.multi_reduction <maximumf>, %835, %cst_362 [1] : vector<8x8xf32> to vector<8xf32>
    %837 = vector.shape_cast %836 : vector<8xf32> to vector<8x1xf32>
    %838 = vector.broadcast %837 : vector<8x1xf32> to vector<8x8xf32>
    %839 = arith.subf %835, %838 : vector<8x8xf32>
    %840 = math.exp %839 : vector<8x8xf32>
    %cst_363 = arith.constant dense<0.000000e+00> : vector<8xf32>
    %841 = vector.multi_reduction <add>, %840, %cst_363 [1] : vector<8x8xf32> to vector<8xf32>
    %842 = vector.shape_cast %841 : vector<8xf32> to vector<8x1xf32>
    %843 = tpu.reciprocal %842 {approx = true} : vector<8x1xf32> -> vector<8x1xf32>
    %844 = arith.truncf %840 : vector<8x8xf32> to vector<8x8xbf16>
    %845 = vector.extract_strided_slice %769 {offsets = [0, 96], sizes = [8, 32], strides = [1, 1]} : vector<8x128xbf16> to vector<8x32xbf16>
    %cst_364 = arith.constant dense<0.000000e+00> : vector<8x32xf32>
    %846 = tpu.matmul %844, %845, %cst_364 {dimension_numbers = #tpu.dot_dimension_numbers<[1], [0], [0], [1], [0, 0, 1, 1], [], []>} : vector<8x8xbf16>, vector<8x32xbf16>, vector<8x32xf32> -> vector<8x32xf32>
    %847 = vector.broadcast %843 : vector<8x1xf32> to vector<8x32xf32>
    %848 = arith.mulf %846, %847 : vector<8x32xf32>
    %849 = arith.truncf %848 : vector<8x32xf32> to vector<8x32xbf16>
    %850 = vector.extract_strided_slice %723 {offsets = [96, 0], sizes = [32, 128], strides = [1, 1]} : vector<128x128xbf16> to vector<32x128xbf16>
    %cst_365 = arith.constant dense<0.000000e+00> : vector<8x128xf32>
    %851 = tpu.matmul %849, %850, %cst_365 {dimension_numbers = #tpu.dot_dimension_numbers<[1], [0], [0], [1], [0, 0, 1, 1], [], []>} : vector<8x32xbf16>, vector<32x128xbf16>, vector<8x128xf32> -> vector<8x128xf32>
    %852 = arith.addf %831, %851 : vector<8x128xf32>
    %853 = vector.broadcast %725 : vector<1x128xf32> to vector<8x128xf32>
    %854 = arith.addf %852, %853 : vector<8x128xf32>
    %855 = arith.addf %717, %854 : vector<8x128xf32>
    %cst_366 = arith.constant dense<0.000000e+00> : vector<8xf32>
    %856 = vector.multi_reduction <add>, %855, %cst_366 [1] : vector<8x128xf32> to vector<8xf32>
    %857 = vector.shape_cast %856 : vector<8xf32> to vector<8x1xf32>
    %cst_367 = arith.constant 1.280000e+02 : f32
    %858 = vector.broadcast %cst_367 : f32 to vector<8x1xf32>
    %859 = arith.divf %857, %858 : vector<8x1xf32>
    %860 = vector.broadcast %859 : vector<8x1xf32> to vector<8x128xf32>
    %861 = arith.subf %855, %860 : vector<8x128xf32>
    %862 = arith.mulf %861, %861 : vector<8x128xf32>
    %cst_368 = arith.constant dense<0.000000e+00> : vector<8xf32>
    %863 = vector.multi_reduction <add>, %862, %cst_368 [1] : vector<8x128xf32> to vector<8xf32>
    %864 = vector.shape_cast %863 : vector<8xf32> to vector<8x1xf32>
    %cst_369 = arith.constant 1.280000e+02 : f32
    %865 = vector.broadcast %cst_369 : f32 to vector<8x1xf32>
    %866 = arith.divf %864, %865 : vector<8x1xf32>
    %cst_370 = arith.constant 9.99999974E-6 : f32
    %867 = vector.broadcast %cst_370 : f32 to vector<8x1xf32>
    %868 = arith.addf %866, %867 : vector<8x1xf32>
    %869 = math.rsqrt %868 : vector<8x1xf32>
    %870 = vector.broadcast %869 : vector<8x1xf32> to vector<8x128xf32>
    %871 = arith.mulf %861, %870 : vector<8x128xf32>
    %872 = vector.broadcast %727 : vector<1x128xf32> to vector<8x128xf32>
    %873 = arith.mulf %871, %872 : vector<8x128xf32>
    %874 = vector.broadcast %729 : vector<1x128xf32> to vector<8x128xf32>
    %875 = arith.addf %873, %874 : vector<8x128xf32>
    %876 = arith.truncf %875 : vector<8x128xf32> to vector<8x128xbf16>
    %cst_371 = arith.constant dense<0.000000e+00> : vector<8x128xf32>
    %877 = tpu.matmul %876, %731, %cst_371 {dimension_numbers = #tpu.dot_dimension_numbers<[1], [0], [0], [1], [0, 0, 1, 1], [], []>} : vector<8x128xbf16>, vector<128x128xbf16>, vector<8x128xf32> -> vector<8x128xf32>
    %878 = vector.broadcast %733 : vector<1x128xf32> to vector<8x128xf32>
    %879 = arith.addf %877, %878 : vector<8x128xf32>
    %880 = arith.truncf %386 : vector<16x128xf32> to vector<16x128xbf16>
    %cst_372 = arith.constant dense<0.000000e+00> : vector<16x256xf32>
    %881 = tpu.matmul %880, %735, %cst_372 {dimension_numbers = #tpu.dot_dimension_numbers<[1], [0], [0], [1], [0, 0, 1, 1], [], []>} : vector<16x128xbf16>, vector<128x256xbf16>, vector<16x256xf32> -> vector<16x256xf32>
    %882 = vector.broadcast %737 : vector<1x256xf32> to vector<16x256xf32>
    %883 = arith.addf %881, %882 : vector<16x256xf32>
    %884 = vector.extract_strided_slice %883 {offsets = [0, 0], sizes = [16, 128], strides = [1, 1]} : vector<16x256xf32> to vector<16x128xf32>
    %885 = vector.extract_strided_slice %883 {offsets = [0, 128], sizes = [16, 128], strides = [1, 1]} : vector<16x256xf32> to vector<16x128xf32>
    %cst_373 = arith.constant 0.176776692 : f32
    %886 = vector.broadcast %cst_373 : f32 to vector<8x128xf32>
    %887 = arith.mulf %879, %886 : vector<8x128xf32>
    %888 = arith.truncf %887 : vector<8x128xf32> to vector<8x128xbf16>
    %889 = arith.truncf %884 : vector<16x128xf32> to vector<16x128xbf16>
    %890 = arith.truncf %885 : vector<16x128xf32> to vector<16x128xbf16>
    %891 = vector.extract_strided_slice %888 {offsets = [0, 0], sizes = [8, 32], strides = [1, 1]} : vector<8x128xbf16> to vector<8x32xbf16>
    %892 = vector.extract_strided_slice %889 {offsets = [0, 0], sizes = [16, 32], strides = [1, 1]} : vector<16x128xbf16> to vector<16x32xbf16>
    %cst_374 = arith.constant dense<0.000000e+00> : vector<8x16xf32>
    %893 = tpu.matmul %891, %892, %cst_374 {dimension_numbers = #tpu.dot_dimension_numbers<[1], [1], [0], [0], [0, 0, 1, 0], [], []>} : vector<8x32xbf16>, vector<16x32xbf16>, vector<8x16xf32> -> vector<8x16xf32>
    %894 = vector.broadcast %10 : vector<1x16xf32> to vector<8x16xf32>
    %895 = arith.addf %893, %894 : vector<8x16xf32>
    %cst_375 = arith.constant dense<0xFF800000> : vector<8xf32>
    %896 = vector.multi_reduction <maximumf>, %895, %cst_375 [1] : vector<8x16xf32> to vector<8xf32>
    %897 = vector.shape_cast %896 : vector<8xf32> to vector<8x1xf32>
    %898 = vector.broadcast %897 : vector<8x1xf32> to vector<8x16xf32>
    %899 = arith.subf %895, %898 : vector<8x16xf32>
    %900 = math.exp %899 : vector<8x16xf32>
    %cst_376 = arith.constant dense<0.000000e+00> : vector<8xf32>
    %901 = vector.multi_reduction <add>, %900, %cst_376 [1] : vector<8x16xf32> to vector<8xf32>
    %902 = vector.shape_cast %901 : vector<8xf32> to vector<8x1xf32>
    %903 = tpu.reciprocal %902 {approx = true} : vector<8x1xf32> -> vector<8x1xf32>
    %904 = arith.truncf %900 : vector<8x16xf32> to vector<8x16xbf16>
    %905 = vector.extract_strided_slice %890 {offsets = [0, 0], sizes = [16, 32], strides = [1, 1]} : vector<16x128xbf16> to vector<16x32xbf16>
    %cst_377 = arith.constant dense<0.000000e+00> : vector<8x32xf32>
    %906 = tpu.matmul %904, %905, %cst_377 {dimension_numbers = #tpu.dot_dimension_numbers<[1], [0], [0], [1], [0, 0, 1, 1], [], []>} : vector<8x16xbf16>, vector<16x32xbf16>, vector<8x32xf32> -> vector<8x32xf32>
    %907 = vector.broadcast %903 : vector<8x1xf32> to vector<8x32xf32>
    %908 = arith.mulf %906, %907 : vector<8x32xf32>
    %909 = arith.truncf %908 : vector<8x32xf32> to vector<8x32xbf16>
    %910 = vector.extract_strided_slice %739 {offsets = [0, 0], sizes = [32, 128], strides = [1, 1]} : vector<128x128xbf16> to vector<32x128xbf16>
    %cst_378 = arith.constant dense<0.000000e+00> : vector<8x128xf32>
    %911 = tpu.matmul %909, %910, %cst_378 {dimension_numbers = #tpu.dot_dimension_numbers<[1], [0], [0], [1], [0, 0, 1, 1], [], []>} : vector<8x32xbf16>, vector<32x128xbf16>, vector<8x128xf32> -> vector<8x128xf32>
    %912 = vector.extract_strided_slice %888 {offsets = [0, 32], sizes = [8, 32], strides = [1, 1]} : vector<8x128xbf16> to vector<8x32xbf16>
    %913 = vector.extract_strided_slice %889 {offsets = [0, 32], sizes = [16, 32], strides = [1, 1]} : vector<16x128xbf16> to vector<16x32xbf16>
    %cst_379 = arith.constant dense<0.000000e+00> : vector<8x16xf32>
    %914 = tpu.matmul %912, %913, %cst_379 {dimension_numbers = #tpu.dot_dimension_numbers<[1], [1], [0], [0], [0, 0, 1, 0], [], []>} : vector<8x32xbf16>, vector<16x32xbf16>, vector<8x16xf32> -> vector<8x16xf32>
    %915 = vector.broadcast %10 : vector<1x16xf32> to vector<8x16xf32>
    %916 = arith.addf %914, %915 : vector<8x16xf32>
    %cst_380 = arith.constant dense<0xFF800000> : vector<8xf32>
    %917 = vector.multi_reduction <maximumf>, %916, %cst_380 [1] : vector<8x16xf32> to vector<8xf32>
    %918 = vector.shape_cast %917 : vector<8xf32> to vector<8x1xf32>
    %919 = vector.broadcast %918 : vector<8x1xf32> to vector<8x16xf32>
    %920 = arith.subf %916, %919 : vector<8x16xf32>
    %921 = math.exp %920 : vector<8x16xf32>
    %cst_381 = arith.constant dense<0.000000e+00> : vector<8xf32>
    %922 = vector.multi_reduction <add>, %921, %cst_381 [1] : vector<8x16xf32> to vector<8xf32>
    %923 = vector.shape_cast %922 : vector<8xf32> to vector<8x1xf32>
    %924 = tpu.reciprocal %923 {approx = true} : vector<8x1xf32> -> vector<8x1xf32>
    %925 = arith.truncf %921 : vector<8x16xf32> to vector<8x16xbf16>
    %926 = vector.extract_strided_slice %890 {offsets = [0, 32], sizes = [16, 32], strides = [1, 1]} : vector<16x128xbf16> to vector<16x32xbf16>
    %cst_382 = arith.constant dense<0.000000e+00> : vector<8x32xf32>
    %927 = tpu.matmul %925, %926, %cst_382 {dimension_numbers = #tpu.dot_dimension_numbers<[1], [0], [0], [1], [0, 0, 1, 1], [], []>} : vector<8x16xbf16>, vector<16x32xbf16>, vector<8x32xf32> -> vector<8x32xf32>
    %928 = vector.broadcast %924 : vector<8x1xf32> to vector<8x32xf32>
    %929 = arith.mulf %927, %928 : vector<8x32xf32>
    %930 = arith.truncf %929 : vector<8x32xf32> to vector<8x32xbf16>
    %931 = vector.extract_strided_slice %739 {offsets = [32, 0], sizes = [32, 128], strides = [1, 1]} : vector<128x128xbf16> to vector<32x128xbf16>
    %cst_383 = arith.constant dense<0.000000e+00> : vector<8x128xf32>
    %932 = tpu.matmul %930, %931, %cst_383 {dimension_numbers = #tpu.dot_dimension_numbers<[1], [0], [0], [1], [0, 0, 1, 1], [], []>} : vector<8x32xbf16>, vector<32x128xbf16>, vector<8x128xf32> -> vector<8x128xf32>
    %933 = arith.addf %911, %932 : vector<8x128xf32>
    %934 = vector.extract_strided_slice %888 {offsets = [0, 64], sizes = [8, 32], strides = [1, 1]} : vector<8x128xbf16> to vector<8x32xbf16>
    %935 = vector.extract_strided_slice %889 {offsets = [0, 64], sizes = [16, 32], strides = [1, 1]} : vector<16x128xbf16> to vector<16x32xbf16>
    %cst_384 = arith.constant dense<0.000000e+00> : vector<8x16xf32>
    %936 = tpu.matmul %934, %935, %cst_384 {dimension_numbers = #tpu.dot_dimension_numbers<[1], [1], [0], [0], [0, 0, 1, 0], [], []>} : vector<8x32xbf16>, vector<16x32xbf16>, vector<8x16xf32> -> vector<8x16xf32>
    %937 = vector.broadcast %10 : vector<1x16xf32> to vector<8x16xf32>
    %938 = arith.addf %936, %937 : vector<8x16xf32>
    %cst_385 = arith.constant dense<0xFF800000> : vector<8xf32>
    %939 = vector.multi_reduction <maximumf>, %938, %cst_385 [1] : vector<8x16xf32> to vector<8xf32>
    %940 = vector.shape_cast %939 : vector<8xf32> to vector<8x1xf32>
    %941 = vector.broadcast %940 : vector<8x1xf32> to vector<8x16xf32>
    %942 = arith.subf %938, %941 : vector<8x16xf32>
    %943 = math.exp %942 : vector<8x16xf32>
    %cst_386 = arith.constant dense<0.000000e+00> : vector<8xf32>
    %944 = vector.multi_reduction <add>, %943, %cst_386 [1] : vector<8x16xf32> to vector<8xf32>
    %945 = vector.shape_cast %944 : vector<8xf32> to vector<8x1xf32>
    %946 = tpu.reciprocal %945 {approx = true} : vector<8x1xf32> -> vector<8x1xf32>
    %947 = arith.truncf %943 : vector<8x16xf32> to vector<8x16xbf16>
    %948 = vector.extract_strided_slice %890 {offsets = [0, 64], sizes = [16, 32], strides = [1, 1]} : vector<16x128xbf16> to vector<16x32xbf16>
    %cst_387 = arith.constant dense<0.000000e+00> : vector<8x32xf32>
    %949 = tpu.matmul %947, %948, %cst_387 {dimension_numbers = #tpu.dot_dimension_numbers<[1], [0], [0], [1], [0, 0, 1, 1], [], []>} : vector<8x16xbf16>, vector<16x32xbf16>, vector<8x32xf32> -> vector<8x32xf32>
    %950 = vector.broadcast %946 : vector<8x1xf32> to vector<8x32xf32>
    %951 = arith.mulf %949, %950 : vector<8x32xf32>
    %952 = arith.truncf %951 : vector<8x32xf32> to vector<8x32xbf16>
    %953 = vector.extract_strided_slice %739 {offsets = [64, 0], sizes = [32, 128], strides = [1, 1]} : vector<128x128xbf16> to vector<32x128xbf16>
    %cst_388 = arith.constant dense<0.000000e+00> : vector<8x128xf32>
    %954 = tpu.matmul %952, %953, %cst_388 {dimension_numbers = #tpu.dot_dimension_numbers<[1], [0], [0], [1], [0, 0, 1, 1], [], []>} : vector<8x32xbf16>, vector<32x128xbf16>, vector<8x128xf32> -> vector<8x128xf32>
    %955 = arith.addf %933, %954 : vector<8x128xf32>
    %956 = vector.extract_strided_slice %888 {offsets = [0, 96], sizes = [8, 32], strides = [1, 1]} : vector<8x128xbf16> to vector<8x32xbf16>
    %957 = vector.extract_strided_slice %889 {offsets = [0, 96], sizes = [16, 32], strides = [1, 1]} : vector<16x128xbf16> to vector<16x32xbf16>
    %cst_389 = arith.constant dense<0.000000e+00> : vector<8x16xf32>
    %958 = tpu.matmul %956, %957, %cst_389 {dimension_numbers = #tpu.dot_dimension_numbers<[1], [1], [0], [0], [0, 0, 1, 0], [], []>} : vector<8x32xbf16>, vector<16x32xbf16>, vector<8x16xf32> -> vector<8x16xf32>
    %959 = vector.broadcast %10 : vector<1x16xf32> to vector<8x16xf32>
    %960 = arith.addf %958, %959 : vector<8x16xf32>
    %cst_390 = arith.constant dense<0xFF800000> : vector<8xf32>
    %961 = vector.multi_reduction <maximumf>, %960, %cst_390 [1] : vector<8x16xf32> to vector<8xf32>
    %962 = vector.shape_cast %961 : vector<8xf32> to vector<8x1xf32>
    %963 = vector.broadcast %962 : vector<8x1xf32> to vector<8x16xf32>
    %964 = arith.subf %960, %963 : vector<8x16xf32>
    %965 = math.exp %964 : vector<8x16xf32>
    %cst_391 = arith.constant dense<0.000000e+00> : vector<8xf32>
    %966 = vector.multi_reduction <add>, %965, %cst_391 [1] : vector<8x16xf32> to vector<8xf32>
    %967 = vector.shape_cast %966 : vector<8xf32> to vector<8x1xf32>
    %968 = tpu.reciprocal %967 {approx = true} : vector<8x1xf32> -> vector<8x1xf32>
    %969 = arith.truncf %965 : vector<8x16xf32> to vector<8x16xbf16>
    %970 = vector.extract_strided_slice %890 {offsets = [0, 96], sizes = [16, 32], strides = [1, 1]} : vector<16x128xbf16> to vector<16x32xbf16>
    %cst_392 = arith.constant dense<0.000000e+00> : vector<8x32xf32>
    %971 = tpu.matmul %969, %970, %cst_392 {dimension_numbers = #tpu.dot_dimension_numbers<[1], [0], [0], [1], [0, 0, 1, 1], [], []>} : vector<8x16xbf16>, vector<16x32xbf16>, vector<8x32xf32> -> vector<8x32xf32>
    %972 = vector.broadcast %968 : vector<8x1xf32> to vector<8x32xf32>
    %973 = arith.mulf %971, %972 : vector<8x32xf32>
    %974 = arith.truncf %973 : vector<8x32xf32> to vector<8x32xbf16>
    %975 = vector.extract_strided_slice %739 {offsets = [96, 0], sizes = [32, 128], strides = [1, 1]} : vector<128x128xbf16> to vector<32x128xbf16>
    %cst_393 = arith.constant dense<0.000000e+00> : vector<8x128xf32>
    %976 = tpu.matmul %974, %975, %cst_393 {dimension_numbers = #tpu.dot_dimension_numbers<[1], [0], [0], [1], [0, 0, 1, 1], [], []>} : vector<8x32xbf16>, vector<32x128xbf16>, vector<8x128xf32> -> vector<8x128xf32>
    %977 = arith.addf %955, %976 : vector<8x128xf32>
    %978 = vector.broadcast %741 : vector<1x128xf32> to vector<8x128xf32>
    %979 = arith.addf %977, %978 : vector<8x128xf32>
    %980 = arith.addf %875, %979 : vector<8x128xf32>
    %cst_394 = arith.constant dense<0.000000e+00> : vector<8xf32>
    %981 = vector.multi_reduction <add>, %980, %cst_394 [1] : vector<8x128xf32> to vector<8xf32>
    %982 = vector.shape_cast %981 : vector<8xf32> to vector<8x1xf32>
    %cst_395 = arith.constant 1.280000e+02 : f32
    %983 = vector.broadcast %cst_395 : f32 to vector<8x1xf32>
    %984 = arith.divf %982, %983 : vector<8x1xf32>
    %985 = vector.broadcast %984 : vector<8x1xf32> to vector<8x128xf32>
    %986 = arith.subf %980, %985 : vector<8x128xf32>
    %987 = arith.mulf %986, %986 : vector<8x128xf32>
    %cst_396 = arith.constant dense<0.000000e+00> : vector<8xf32>
    %988 = vector.multi_reduction <add>, %987, %cst_396 [1] : vector<8x128xf32> to vector<8xf32>
    %989 = vector.shape_cast %988 : vector<8xf32> to vector<8x1xf32>
    %cst_397 = arith.constant 1.280000e+02 : f32
    %990 = vector.broadcast %cst_397 : f32 to vector<8x1xf32>
    %991 = arith.divf %989, %990 : vector<8x1xf32>
    %cst_398 = arith.constant 9.99999974E-6 : f32
    %992 = vector.broadcast %cst_398 : f32 to vector<8x1xf32>
    %993 = arith.addf %991, %992 : vector<8x1xf32>
    %994 = math.rsqrt %993 : vector<8x1xf32>
    %995 = vector.broadcast %994 : vector<8x1xf32> to vector<8x128xf32>
    %996 = arith.mulf %986, %995 : vector<8x128xf32>
    %997 = vector.broadcast %743 : vector<1x128xf32> to vector<8x128xf32>
    %998 = arith.mulf %996, %997 : vector<8x128xf32>
    %999 = vector.broadcast %745 : vector<1x128xf32> to vector<8x128xf32>
    %1000 = arith.addf %998, %999 : vector<8x128xf32>
    %1001 = arith.truncf %1000 : vector<8x128xf32> to vector<8x128xbf16>
    %cst_399 = arith.constant dense<0.000000e+00> : vector<8x256xf32>
    %1002 = tpu.matmul %1001, %747, %cst_399 {dimension_numbers = #tpu.dot_dimension_numbers<[1], [0], [0], [1], [0, 0, 1, 1], [], []>} : vector<8x128xbf16>, vector<128x256xbf16>, vector<8x256xf32> -> vector<8x256xf32>
    %1003 = vector.broadcast %749 : vector<1x256xf32> to vector<8x256xf32>
    %1004 = arith.addf %1002, %1003 : vector<8x256xf32>
    %cst_400 = arith.constant 5.000000e-01 : f32
    %1005 = vector.broadcast %cst_400 : f32 to vector<8x256xf32>
    %1006 = arith.mulf %1005, %1004 : vector<8x256xf32>
    %cst_401 = arith.constant 4.471500e-02 : f32
    %1007 = vector.broadcast %cst_401 : f32 to vector<8x256xf32>
    %1008 = arith.mulf %1007, %1004 : vector<8x256xf32>
    %1009 = arith.mulf %1008, %1004 : vector<8x256xf32>
    %1010 = arith.mulf %1009, %1004 : vector<8x256xf32>
    %1011 = arith.addf %1004, %1010 : vector<8x256xf32>
    %cst_402 = arith.constant 0.797884583 : f32
    %1012 = vector.broadcast %cst_402 : f32 to vector<8x256xf32>
    %1013 = arith.mulf %1012, %1011 : vector<8x256xf32>
    %1014 = math.tanh %1013 : vector<8x256xf32>
    %cst_403 = arith.constant 1.000000e+00 : f32
    %1015 = vector.broadcast %cst_403 : f32 to vector<8x256xf32>
    %1016 = arith.addf %1015, %1014 : vector<8x256xf32>
    %1017 = arith.mulf %1006, %1016 : vector<8x256xf32>
    %1018 = arith.truncf %1017 : vector<8x256xf32> to vector<8x256xbf16>
    %cst_404 = arith.constant dense<0.000000e+00> : vector<8x128xf32>
    %1019 = tpu.matmul %1018, %751, %cst_404 {dimension_numbers = #tpu.dot_dimension_numbers<[1], [0], [0], [1], [0, 0, 1, 1], [], []>} : vector<8x256xbf16>, vector<256x128xbf16>, vector<8x128xf32> -> vector<8x128xf32>
    %1020 = vector.broadcast %753 : vector<1x128xf32> to vector<8x128xf32>
    %1021 = arith.addf %1019, %1020 : vector<8x128xf32>
    %1022 = arith.addf %1000, %1021 : vector<8x128xf32>
    %cst_405 = arith.constant dense<0.000000e+00> : vector<8xf32>
    %1023 = vector.multi_reduction <add>, %1022, %cst_405 [1] : vector<8x128xf32> to vector<8xf32>
    %1024 = vector.shape_cast %1023 : vector<8xf32> to vector<8x1xf32>
    %cst_406 = arith.constant 1.280000e+02 : f32
    %1025 = vector.broadcast %cst_406 : f32 to vector<8x1xf32>
    %1026 = arith.divf %1024, %1025 : vector<8x1xf32>
    %1027 = vector.broadcast %1026 : vector<8x1xf32> to vector<8x128xf32>
    %1028 = arith.subf %1022, %1027 : vector<8x128xf32>
    %1029 = arith.mulf %1028, %1028 : vector<8x128xf32>
    %cst_407 = arith.constant dense<0.000000e+00> : vector<8xf32>
    %1030 = vector.multi_reduction <add>, %1029, %cst_407 [1] : vector<8x128xf32> to vector<8xf32>
    %1031 = vector.shape_cast %1030 : vector<8xf32> to vector<8x1xf32>
    %cst_408 = arith.constant 1.280000e+02 : f32
    %1032 = vector.broadcast %cst_408 : f32 to vector<8x1xf32>
    %1033 = arith.divf %1031, %1032 : vector<8x1xf32>
    %cst_409 = arith.constant 9.99999974E-6 : f32
    %1034 = vector.broadcast %cst_409 : f32 to vector<8x1xf32>
    %1035 = arith.addf %1033, %1034 : vector<8x1xf32>
    %1036 = math.rsqrt %1035 : vector<8x1xf32>
    %1037 = vector.broadcast %1036 : vector<8x1xf32> to vector<8x128xf32>
    %1038 = arith.mulf %1028, %1037 : vector<8x128xf32>
    %1039 = vector.broadcast %755 : vector<1x128xf32> to vector<8x128xf32>
    %1040 = arith.mulf %1038, %1039 : vector<8x128xf32>
    %1041 = vector.broadcast %757 : vector<1x128xf32> to vector<8x128xf32>
    %1042 = arith.addf %1040, %1041 : vector<8x128xf32>
    %c0_410 = arith.constant 0 : index
    %c0_411 = arith.constant 0 : index
    %1043 = vector.load %arg37[%c0_410, %c0_411] : memref<128x256xbf16, #tpu.memory_space<vmem>>, vector<128x256xbf16>
    %c0_412 = arith.constant 0 : index
    %c0_413 = arith.constant 0 : index
    %1044 = vector.load %arg38[%c0_412, %c0_413] : memref<1x256xf32, #tpu.memory_space<vmem>>, vector<1x256xf32>
    %1045 = arith.truncf %1042 : vector<8x128xf32> to vector<8x128xbf16>
    %cst_414 = arith.constant dense<0.000000e+00> : vector<8x256xf32>
    %1046 = tpu.matmul %1045, %1043, %cst_414 {dimension_numbers = #tpu.dot_dimension_numbers<[1], [0], [0], [1], [0, 0, 1, 1], [], []>} : vector<8x128xbf16>, vector<128x256xbf16>, vector<8x256xf32> -> vector<8x256xf32>
    %1047 = vector.broadcast %1044 : vector<1x256xf32> to vector<8x256xf32>
    %1048 = arith.addf %1046, %1047 : vector<8x256xf32>
    %c0_415 = arith.constant 0 : index
    %c0_416 = arith.constant 0 : index
    %c0_417 = arith.constant 0 : index
    %1049 = vector.load %arg39[%c0_415, %c0_416, %c0_417] : memref<1x8x256xf32, #tpu.memory_space<vmem>>, vector<1x8x256xf32>
    %1050 = vector.shape_cast %1049 : vector<1x8x256xf32> to vector<8x256xf32>
    %1051 = vector.shape_cast %1048 : vector<8x256xf32> to vector<1x8x256xf32>
    tpu.vector_store %arg39[%c0_415, %c0_416, %c0_417], %1051 {strides = array<i32>} : memref<1x8x256xf32, #tpu.memory_space<vmem>>, vector<1x8x256xf32>,
    %c0_418 = arith.constant 0 : index
    %c0_419 = arith.constant 0 : index
    %c0_420 = arith.constant 0 : index
    %1052 = vector.load %arg4[%c0_418, %c0_419, %c0_420] : memref<1x8x1xi32, #tpu.memory_space<vmem>>, vector<1x8x1xi32>
    %1053 = vector.shape_cast %1052 : vector<1x8x1xi32> to vector<8x1xi32>
    %c-100_i32 = arith.constant -100 : i32
    %1054 = vector.broadcast %c-100_i32 : i32 to vector<8x1xi32>
    %1055 = arith.cmpi ne, %1053, %1054 : vector<8x1xi32>
    %c0_i32_421 = arith.constant 0 : i32
    %1056 = vector.broadcast %c0_i32_421 : i32 to vector<8x1xi32>
    %1057 = arith.select %1055, %1053, %1056 : vector<8x1xi1>, vector<8x1xi32>
    %cst_422 = arith.constant dense<0xFF800000> : vector<8xf32>
    %1058 = vector.multi_reduction <maximumf>, %1048, %cst_422 [1] : vector<8x256xf32> to vector<8xf32>
    %1059 = vector.shape_cast %1058 : vector<8xf32> to vector<8x1xf32>
    %1060 = vector.broadcast %1059 : vector<8x1xf32> to vector<8x256xf32>
    %1061 = arith.subf %1048, %1060 : vector<8x256xf32>
    %1062 = math.exp %1061 : vector<8x256xf32>
    %cst_423 = arith.constant dense<0.000000e+00> : vector<8xf32>
    %1063 = vector.multi_reduction <add>, %1062, %cst_423 [1] : vector<8x256xf32> to vector<8xf32>
    %1064 = vector.shape_cast %1063 : vector<8xf32> to vector<8x1xf32>
    %1065 = math.log %1064 : vector<8x1xf32>
    %1066 = arith.addf %1065, %1059 : vector<8x1xf32>
    %1067 = tpu.iota {dimensions = array<i32: 1>} : vector<8x256xi32>
    %1068 = vector.broadcast %1057 : vector<8x1xi32> to vector<8x256xi32>
    %1069 = arith.cmpi eq, %1067, %1068 : vector<8x256xi32>
    %cst_424 = arith.constant 0.000000e+00 : f32
    %1070 = vector.broadcast %cst_424 : f32 to vector<8x256xf32>
    %1071 = arith.select %1069, %1048, %1070 : vector<8x256xi1>, vector<8x256xf32>
    %cst_425 = arith.constant dense<0.000000e+00> : vector<8xf32>
    %1072 = vector.multi_reduction <add>, %1071, %cst_425 [1] : vector<8x256xf32> to vector<8xf32>
    %1073 = vector.shape_cast %1072 : vector<8xf32> to vector<8x1xf32>
    %1074 = arith.subf %1066, %1073 : vector<8x1xf32>
    %1075 = arith.extui %1055 : vector<8x1xi1> to vector<8x1xi32>
    %1076 = arith.sitofp %1075 : vector<8x1xi32> to vector<8x1xf32>
    %1077 = arith.mulf %1074, %1076 : vector<8x1xf32>
    %c0_426 = arith.constant 0 : index
    %c0_427 = arith.constant 0 : index
    %c0_428 = arith.constant 0 : index
    %1078 = vector.load %arg40[%c0_426, %c0_427, %c0_428] : memref<1x8x1xf32, #tpu.memory_space<vmem>>, vector<1x8x1xf32>
    %1079 = vector.shape_cast %1078 : vector<1x8x1xf32> to vector<8x1xf32>
    %1080 = vector.shape_cast %1077 : vector<8x1xf32> to vector<1x8x1xf32>
    tpu.vector_store %arg40[%c0_426, %c0_427, %c0_428], %1080 {strides = array<i32>} : memref<1x8x1xf32, #tpu.memory_space<vmem>>, vector<1x8x1xf32>,
    return
  }
  func.func @transform_0(%arg0: i32) -> (i32, i32, i32) {
    %c0_i32 = arith.constant 0 : i32
    %c0_i32_0 = arith.constant 0 : i32
    %c0_i32_1 = arith.constant 0 : i32
    return %arg0, %c0_i32, %c0_i32_0 : i32, i32, i32
  }
  func.func @transform_1(%arg0: i32) -> (i32, i32, i32) {
    %c0_i32 = arith.constant 0 : i32
    %c0_i32_0 = arith.constant 0 : i32
    %c0_i32_1 = arith.constant 0 : i32
    return %arg0, %c0_i32, %c0_i32_0 : i32, i32, i32
  }
  func.func @transform_2(%arg0: i32) -> (i32, i32, i32) {
    %c0_i32 = arith.constant 0 : i32
    %c0_i32_0 = arith.constant 0 : i32
    %c0_i32_1 = arith.constant 0 : i32
    return %arg0, %c0_i32, %c0_i32_0 : i32, i32, i32
  }
  func.func @transform_3(%arg0: i32) -> (i32, i32, i32) {
    %c0_i32 = arith.constant 0 : i32
    %c0_i32_0 = arith.constant 0 : i32
    %c0_i32_1 = arith.constant 0 : i32
    return %arg0, %c0_i32, %c0_i32_0 : i32, i32, i32
  }
  func.func @transform_4(%arg0: i32) -> (i32, i32, i32) {
    %c0_i32 = arith.constant 0 : i32
    %c0_i32_0 = arith.constant 0 : i32
    %c0_i32_1 = arith.constant 0 : i32
    %c0_i32_2 = arith.constant 0 : i32
    return %c0_i32, %c0_i32_0, %c0_i32_1 : i32, i32, i32
  }
  func.func @transform_5(%arg0: i32) -> (i32, i32, i32) {
    %c0_i32 = arith.constant 0 : i32
    %c0_i32_0 = arith.constant 0 : i32
    %c0_i32_1 = arith.constant 0 : i32
    %c0_i32_2 = arith.constant 0 : i32
    return %c0_i32, %c0_i32_0, %c0_i32_1 : i32, i32, i32
  }
  func.func @transform_6(%arg0: i32) -> (i32, i32, i32) {
    %c0_i32 = arith.constant 0 : i32
    %c0_i32_0 = arith.constant 0 : i32
    %c0_i32_1 = arith.constant 0 : i32
    %c0_i32_2 = arith.constant 0 : i32
    return %c0_i32, %c0_i32_0, %c0_i32_1 : i32, i32, i32
  }
  func.func @transform_7(%arg0: i32) -> (i32, i32, i32) {
    %c0_i32 = arith.constant 0 : i32
    %c0_i32_0 = arith.constant 0 : i32
    %c0_i32_1 = arith.constant 0 : i32
    %c0_i32_2 = arith.constant 0 : i32
    return %c0_i32, %c0_i32_0, %c0_i32_1 : i32, i32, i32
  }
  func.func @transform_8(%arg0: i32) -> (i32, i32, i32) {
    %c0_i32 = arith.constant 0 : i32
    %c0_i32_0 = arith.constant 0 : i32
    %c0_i32_1 = arith.constant 0 : i32
    %c0_i32_2 = arith.constant 0 : i32
    return %c0_i32, %c0_i32_0, %c0_i32_1 : i32, i32, i32
  }
  func.func @transform_9(%arg0: i32) -> (i32, i32, i32) {
    %c0_i32 = arith.constant 0 : i32
    %c0_i32_0 = arith.constant 0 : i32
    %c0_i32_1 = arith.constant 0 : i32
    %c0_i32_2 = arith.constant 0 : i32
    return %c0_i32, %c0_i32_0, %c0_i32_1 : i32, i32, i32
  }
  func.func @transform_10(%arg0: i32) -> (i32, i32, i32) {
    %c0_i32 = arith.constant 0 : i32
    %c0_i32_0 = arith.constant 0 : i32
    %c0_i32_1 = arith.constant 0 : i32
    %c0_i32_2 = arith.constant 0 : i32
    return %c0_i32, %c0_i32_0, %c0_i32_1 : i32, i32, i32
  }
  func.func @transform_11(%arg0: i32) -> (i32, i32, i32) {
    %c0_i32 = arith.constant 0 : i32
    %c0_i32_0 = arith.constant 0 : i32
    %c0_i32_1 = arith.constant 0 : i32
    %c0_i32_2 = arith.constant 0 : i32
    return %c0_i32, %c0_i32_0, %c0_i32_1 : i32, i32, i32
  }
  func.func @transform_12(%arg0: i32) -> (i32, i32, i32) {
    %c0_i32 = arith.constant 0 : i32
    %c0_i32_0 = arith.constant 0 : i32
    %c0_i32_1 = arith.constant 0 : i32
    %c0_i32_2 = arith.constant 0 : i32
    return %c0_i32, %c0_i32_0, %c0_i32_1 : i32, i32, i32
  }
  func.func @transform_13(%arg0: i32) -> (i32, i32, i32) {
    %c0_i32 = arith.constant 0 : i32
    %c0_i32_0 = arith.constant 0 : i32
    %c0_i32_1 = arith.constant 0 : i32
    %c0_i32_2 = arith.constant 0 : i32
    return %c0_i32, %c0_i32_0, %c0_i32_1 : i32, i32, i32
  }
  func.func @transform_14(%arg0: i32) -> (i32, i32, i32) {
    %c0_i32 = arith.constant 0 : i32
    %c0_i32_0 = arith.constant 0 : i32
    %c0_i32_1 = arith.constant 0 : i32
    %c0_i32_2 = arith.constant 0 : i32
    return %c0_i32, %c0_i32_0, %c0_i32_1 : i32, i32, i32
  }
  func.func @transform_15(%arg0: i32) -> (i32, i32, i32) {
    %c0_i32 = arith.constant 0 : i32
    %c0_i32_0 = arith.constant 0 : i32
    %c0_i32_1 = arith.constant 0 : i32
    %c0_i32_2 = arith.constant 0 : i32
    return %c0_i32, %c0_i32_0, %c0_i32_1 : i32, i32, i32
  }
  func.func @transform_16(%arg0: i32) -> (i32, i32, i32) {
    %c0_i32 = arith.constant 0 : i32
    %c0_i32_0 = arith.constant 0 : i32
    %c0_i32_1 = arith.constant 0 : i32
    %c0_i32_2 = arith.constant 0 : i32
    return %c0_i32, %c0_i32_0, %c0_i32_1 : i32, i32, i32
  }
  func.func @transform_17(%arg0: i32) -> (i32, i32, i32) {
    %c0_i32 = arith.constant 0 : i32
    %c0_i32_0 = arith.constant 0 : i32
    %c0_i32_1 = arith.constant 0 : i32
    %c0_i32_2 = arith.constant 0 : i32
    return %c0_i32, %c0_i32_0, %c0_i32_1 : i32, i32, i32
  }
  func.func @transform_18(%arg0: i32) -> (i32, i32, i32) {
    %c0_i32 = arith.constant 0 : i32
    %c0_i32_0 = arith.constant 0 : i32
    %c0_i32_1 = arith.constant 0 : i32
    %c0_i32_2 = arith.constant 0 : i32
    return %c0_i32, %c0_i32_0, %c0_i32_1 : i32, i32, i32
  }
  func.func @transform_19(%arg0: i32) -> (i32, i32, i32) {
    %c0_i32 = arith.constant 0 : i32
    %c0_i32_0 = arith.constant 0 : i32
    %c0_i32_1 = arith.constant 0 : i32
    %c0_i32_2 = arith.constant 0 : i32
    return %c0_i32, %c0_i32_0, %c0_i32_1 : i32, i32, i32
  }
  func.func @transform_20(%arg0: i32) -> (i32, i32, i32) {
    %c0_i32 = arith.constant 0 : i32
    %c0_i32_0 = arith.constant 0 : i32
    %c0_i32_1 = arith.constant 0 : i32
    %c0_i32_2 = arith.constant 0 : i32
    return %c0_i32, %c0_i32_0, %c0_i32_1 : i32, i32, i32
  }
  func.func @transform_21(%arg0: i32) -> (i32, i32, i32) {
    %c0_i32 = arith.constant 0 : i32
    %c0_i32_0 = arith.constant 0 : i32
    %c0_i32_1 = arith.constant 0 : i32
    %c0_i32_2 = arith.constant 0 : i32
    return %c0_i32, %c0_i32_0, %c0_i32_1 : i32, i32, i32
  }
  func.func @transform_22(%arg0: i32) -> (i32, i32, i32) {
    %c0_i32 = arith.constant 0 : i32
    %c0_i32_0 = arith.constant 0 : i32
    %c0_i32_1 = arith.constant 0 : i32
    %c0_i32_2 = arith.constant 0 : i32
    return %c0_i32, %c0_i32_0, %c0_i32_1 : i32, i32, i32
  }
  func.func @transform_23(%arg0: i32) -> (i32, i32, i32) {
    %c0_i32 = arith.constant 0 : i32
    %c0_i32_0 = arith.constant 0 : i32
    %c0_i32_1 = arith.constant 0 : i32
    %c0_i32_2 = arith.constant 0 : i32
    return %c0_i32, %c0_i32_0, %c0_i32_1 : i32, i32, i32
  }
  func.func @transform_24(%arg0: i32) -> (i32, i32, i32) {
    %c0_i32 = arith.constant 0 : i32
    %c0_i32_0 = arith.constant 0 : i32
    %c0_i32_1 = arith.constant 0 : i32
    %c0_i32_2 = arith.constant 0 : i32
    return %c0_i32, %c0_i32_0, %c0_i32_1 : i32, i32, i32
  }
  func.func @transform_25(%arg0: i32) -> (i32, i32, i32) {
    %c0_i32 = arith.constant 0 : i32
    %c0_i32_0 = arith.constant 0 : i32
    %c0_i32_1 = arith.constant 0 : i32
    %c0_i32_2 = arith.constant 0 : i32
    return %c0_i32, %c0_i32_0, %c0_i32_1 : i32, i32, i32
  }
  func.func @transform_26(%arg0: i32) -> (i32, i32, i32) {
    %c0_i32 = arith.constant 0 : i32
    %c0_i32_0 = arith.constant 0 : i32
    %c0_i32_1 = arith.constant 0 : i32
    %c0_i32_2 = arith.constant 0 : i32
    return %c0_i32, %c0_i32_0, %c0_i32_1 : i32, i32, i32
  }
  func.func @transform_27(%arg0: i32) -> (i32, i32, i32) {
    %c0_i32 = arith.constant 0 : i32
    %c0_i32_0 = arith.constant 0 : i32
    %c0_i32_1 = arith.constant 0 : i32
    %c0_i32_2 = arith.constant 0 : i32
    return %c0_i32, %c0_i32_0, %c0_i32_1 : i32, i32, i32
  }
  func.func @transform_28(%arg0: i32) -> (i32, i32, i32) {
    %c0_i32 = arith.constant 0 : i32
    %c0_i32_0 = arith.constant 0 : i32
    %c0_i32_1 = arith.constant 0 : i32
    %c0_i32_2 = arith.constant 0 : i32
    return %c0_i32, %c0_i32_0, %c0_i32_1 : i32, i32, i32
  }
  func.func @transform_29(%arg0: i32) -> (i32, i32, i32) {
    %c0_i32 = arith.constant 0 : i32
    %c0_i32_0 = arith.constant 0 : i32
    %c0_i32_1 = arith.constant 0 : i32
    %c0_i32_2 = arith.constant 0 : i32
    return %c0_i32, %c0_i32_0, %c0_i32_1 : i32, i32, i32
  }
  func.func @transform_30(%arg0: i32) -> (i32, i32, i32) {
    %c0_i32 = arith.constant 0 : i32
    %c0_i32_0 = arith.constant 0 : i32
    %c0_i32_1 = arith.constant 0 : i32
    %c0_i32_2 = arith.constant 0 : i32
    return %c0_i32, %c0_i32_0, %c0_i32_1 : i32, i32, i32
  }
  func.func @transform_31(%arg0: i32) -> (i32, i32, i32) {
    %c0_i32 = arith.constant 0 : i32
    %c0_i32_0 = arith.constant 0 : i32
    %c0_i32_1 = arith.constant 0 : i32
    %c0_i32_2 = arith.constant 0 : i32
    return %c0_i32, %c0_i32_0, %c0_i32_1 : i32, i32, i32
  }
  func.func @transform_32(%arg0: i32) -> (i32, i32, i32) {
    %c0_i32 = arith.constant 0 : i32
    %c0_i32_0 = arith.constant 0 : i32
    %c0_i32_1 = arith.constant 0 : i32
    %c0_i32_2 = arith.constant 0 : i32
    return %c0_i32, %c0_i32_0, %c0_i32_1 : i32, i32, i32
  }
  func.func @transform_33(%arg0: i32) -> (i32, i32, i32) {
    %c0_i32 = arith.constant 0 : i32
    %c0_i32_0 = arith.constant 0 : i32
    %c0_i32_1 = arith.constant 0 : i32
    %c0_i32_2 = arith.constant 0 : i32
    return %c0_i32, %c0_i32_0, %c0_i32_1 : i32, i32, i32
  }
  func.func @transform_34(%arg0: i32) -> (i32, i32, i32) {
    %c0_i32 = arith.constant 0 : i32
    %c0_i32_0 = arith.constant 0 : i32
    %c0_i32_1 = arith.constant 0 : i32
    %c0_i32_2 = arith.constant 0 : i32
    return %c0_i32, %c0_i32_0, %c0_i32_1 : i32, i32, i32
  }
  func.func @transform_35(%arg0: i32) -> (i32, i32, i32) {
    %c0_i32 = arith.constant 0 : i32
    %c0_i32_0 = arith.constant 0 : i32
    %c0_i32_1 = arith.constant 0 : i32
    %c0_i32_2 = arith.constant 0 : i32
    return %c0_i32, %c0_i32_0, %c0_i32_1 : i32, i32, i32
  }
  func.func @transform_36(%arg0: i32) -> (i32, i32) {
    %c0_i32 = arith.constant 0 : i32
    %c0_i32_0 = arith.constant 0 : i32
    %c0_i32_1 = arith.constant 0 : i32
    return %c0_i32, %c0_i32_0 : i32, i32
  }
  func.func @transform_37(%arg0: i32) -> (i32, i32) {
    %c0_i32 = arith.constant 0 : i32
    %c0_i32_0 = arith.constant 0 : i32
    %c0_i32_1 = arith.constant 0 : i32
    return %c0_i32, %c0_i32_0 : i32, i32
  }
  func.func @transform_38(%arg0: i32) -> (i32, i32, i32) {
    %c0_i32 = arith.constant 0 : i32
    %c0_i32_0 = arith.constant 0 : i32
    %c0_i32_1 = arith.constant 0 : i32
    return %arg0, %c0_i32, %c0_i32_0 : i32, i32, i32
  }
  func.func @transform_39(%arg0: i32) -> (i32, i32, i32) {
    %c0_i32 = arith.constant 0 : i32
    %c0_i32_0 = arith.constant 0 : i32
    %c0_i32_1 = arith.constant 0 : i32
    return %arg0, %c0_i32, %c0_i32_0 : i32, i32, i32
  }
}

</mosaic_0001>

<bundles_post_ra>
// kernel: seq2seq_forward.1
= control target key start
LH: loop header
LB: loop body
LE: loop exit
PB: predicated region body
PF: predicated region fallthrough
CT: control target
= control target key end

     0   :  { %s13343_s6 = smov 1   ;;  %s13344_s10 = smov 2   ;;  %s15164_s0 = inlined_call_operand.smem [shape: u32[40], index: -1, kind: input, shape index: {}] }
   0x1   :  { %s13439_s5 = sld [smem:[%s15164_s0]]   ;;  %s13345_s14 = smov 3  }
   0x2   :  { %s13444_s9 = sld [smem:[%s15164_s0 + %s13343_s6]]   ;;  %s13346_s18 = smov 4  }
   0x3   :  { %s13449_s13 = sld [smem:[%s15164_s0 + %s13344_s10]]   ;;  %s13347_s22 = smov 5  }
   0x4   :  { %s13454_s17 = sld [smem:[%s15164_s0 + %s13345_s14]]   ;;  %s13348_s26 = smov 6  }
   0x5   :  { %s13459_s21 = sld [smem:[%s15164_s0 + %s13346_s18]]   ;;  %s13349_s30 = smov 7  }
   0x6   :  { %s13464_s25 = sld [smem:[%s15164_s0 + %s13347_s22]]   ;;  %s13350_s4 = smov 8  }
   0x7   :  { %15226 = sst [smem:[#allocation64_spill]] %s13439_s5  ;;  %s13351_s10 = smov 9  }
   0x8   :  { %15227 = sst [smem:[#allocation65_spill]] %s13444_s9  ;;  %s13352_s15 = smov 10  }
   0x9   :  { %15228 = sst [smem:[#allocation66_spill]] %s13449_s13  ;;  %s13353_s20 = smov 11  }
   0xa   :  { %15229 = sst [smem:[#allocation67_spill]] %s13454_s17  ;;  %s13355_s1 = smov 13  }
   0xb   :  { %15230 = sst [smem:[#allocation68_spill]] %s13459_s21  ;;  %s13356_s7 = smov 14  }
   0xc   :  { %s13469_s29 = sld [smem:[%s15164_s0 + %s13348_s26]]   ;;  %s13354_s26 = smov 12  }
   0xd   :  { %s13474_s3 = sld [smem:[%s15164_s0 + %s13349_s30]]   ;;  %s13358_s22 = smov 16  }
   0xe   :  { %s13479_s8 = sld [smem:[%s15164_s0 + %s13350_s4]]   ;;  %s13359_s28 = smov 17  }
   0xf   :  { %s13484_s14 = sld [smem:[%s15164_s0 + %s13351_s10]]  }
  0x10   :  { %s13489_s19 = sld [smem:[%s15164_s0 + %s13352_s15]]   ;;  %s13357_s15 = smov 15  }
  0x11   :  { %s13494_s24 = sld [smem:[%s15164_s0 + %s13353_s20]]  }
  0x12   :  { %s13499_s30 = sld [smem:[%s15164_s0 + %s13354_s26]]  }
  0x13   :  { %15231 = sst [smem:[#allocation69_spill]] %s13474_s3 }
  0x14   :  { %15232 = sst [smem:[#allocation70_spill]] %s13479_s8 }
  0x15   :  { %15233 = sst [smem:[#allocation71_spill]] %s13484_s14 }
  0x16   :  { %15234 = sst [smem:[#allocation72_spill]] %s13489_s19 }
  0x17   :  { %s13504_s6 = sld [smem:[%s15164_s0 + %s13355_s1]]  }
  0x18   :  { %15235 = sst [smem:[#allocation73_spill]] %s13499_s30 }
  0x19   :  { %s13509_s12 = sld [smem:[%s15164_s0 + %s13356_s7]]   ;;  %s13360_s7 = smov 18  }
  0x1a   :  { %s13514_s20 = sld [smem:[%s15164_s0 + %s13357_s15]]   ;;  %s13361_s15 = smov 19  }
  0x1b   :  { %s13519_s27 = sld [smem:[%s15164_s0 + %s13358_s22]]   ;;  %s13362_s22 = smov 20  }
  0x1c   :  { %s13524_s4 = sld [smem:[%s15164_s0 + %s13359_s28]]   ;;  %s13363_s28 = smov 21  }
  0x1d   :  { %15236 = sst [smem:[#allocation74_spill]] %s13504_s6 }
  0x1e   :  { %s13529_s17 = sld [smem:[%s15164_s0 + %s13360_s7]]   ;;  %s13364_s7 = smov 22  }
  0x1f   :  { %15237 = sst [smem:[#allocation75_spill]] %s13509_s12 }
  0x20   :  { %s13534_s9 = sld [smem:[%s15164_s0 + %s13361_s15]]   ;;  %s13365_s15 = smov 23  }
  0x21   :  { %15238 = sst [smem:[#allocation76_spill]] %s13519_s27 }
  0x22   :  { %15239 = sst [smem:[#allocation77_spill]] %s13524_s4 }
  0x23   :  { %s13539_s19 = sld [smem:[%s15164_s0 + %s13362_s22]]   ;;  %s13366_s22 = smov 24  }
  0x24   :  { %15240 = sst [smem:[#allocation78_spill]] %s13529_s17 }
  0x25   :  { %s13544_s13 = sld [smem:[%s15164_s0 + %s13363_s28]]   ;;  %s13367_s28 = smov 25  }
  0x26   :  { %15241 = sst [smem:[#allocation79_spill]] %s13534_s9 }
  0x27   :  { %s13549_s5 = sld [smem:[%s15164_s0 + %s13364_s7]]   ;;  %s13368_s7 = smov 26  }
  0x28   :  { %s13554_s21 = sld [smem:[%s15164_s0 + %s13365_s15]]   ;;  %s13369_s15 = smov 27  }
  0x29   :  { %15242 = sst [smem:[#allocation80_spill]] %s13539_s19 }
  0x2a   :  { %s13559_s19 = sld [smem:[%s15164_s0 + %s13366_s22]]   ;;  %s13370_s22 = smov 28  }
  0x2b   :  { %15243 = sst [smem:[#allocation81_spill]] %s13544_s13 }
  0x2c   :  { %s13564_s17 = sld [smem:[%s15164_s0 + %s13367_s28]]   ;;  %s13371_s28 = smov 29  }
  0x2d   :  { %15244 = sst [smem:[#allocation82_spill]] %s13549_s5 }
  0x2e   :  { %15245 = sst [smem:[#allocation83_spill]] %s13554_s21 }
  0x2f   :  { %s13569_s5 = sld [smem:[%s15164_s0 + %s13368_s7]]   ;;  %s13372_s7 = smov 30  }
  0x30   :  { %s13574_s21 = sld [smem:[%s15164_s0 + %s13369_s15]]   ;;  %s13373_s15 = smov 31  }
  0x31   :  { %s13579_s27 = sld [smem:[%s15164_s0 + %s13370_s22]]   ;;  %s13374_s22 = smov 32  }
  0x32   :  { %15246 = sst [smem:[#allocation84_spill]] %s13564_s17 }
  0x33   :  { %s13584_s17 = sld [smem:[%s15164_s0 + %s13371_s28]]   ;;  %s13375_s28 = smov 33  }
  0x34   :  { %s13589_s12 = sld [smem:[%s15164_s0 + %s13372_s7]]   ;;  %s13376_s7 = smov 34  }
  0x35   :  { %15247 = sst [smem:[#allocation85_spill]] %s13569_s5 }
  0x36   :  { %15248 = sst [smem:[#allocation86_spill]] %s13574_s21 }
  0x37   :  { %s13594_s21 = sld [smem:[%s15164_s0 + %s13373_s15]]   ;;  %s13377_s15 = smov 35  }
  0x38   :  { %s13599_s30 = sld [smem:[%s15164_s0 + %s13374_s22]]   ;;  %s13378_s22 = smov 36  }
  0x39   :  { %15249 = sst [smem:[#allocation87_spill]] %s13584_s17 }
  0x3a   :  { %15250 = sst [smem:[#allocation88_spill]] %s13589_s12 }
  0x3b   :  { %s13604_s17 = sld [smem:[%s15164_s0 + %s13375_s28]]   ;;  %s13379_s28 = smov 37  }
  0x3c   :  { %s13609_s14 = sld [smem:[%s15164_s0 + %s13376_s7]]   ;;  %s13380_s7 = smov 38  }
  0x3d   :  { %15251 = sst [smem:[#allocation89_spill]] %s13594_s21 }
  0x3e   :  { %15252 = sst [smem:[#allocation90_spill]] %s13599_s30 }
  0x3f   :  { %s13614_s21 = sld [smem:[%s15164_s0 + %s13377_s15]]   ;;  %s13381_s15 = smov 39  }
  0x40   :  { %s13619_s30 = sld [smem:[%s15164_s0 + %s13378_s22]]  }
  0x41   :  { %15253 = sst [smem:[#allocation91_spill]] %s13604_s17 }
  0x42   :  { %15254 = sst [smem:[#allocation92_spill]] %s13609_s14 }
  0x43   :  { %s13624_s17 = sld [smem:[%s15164_s0 + %s13379_s28]]  }
  0x44   :  { %s13629_s3 = sld [smem:[%s15164_s0 + %s13380_s7]]  }
  0x45   :  { %15255 = sst [smem:[#allocation93_spill]] %s13614_s21 }
  0x46   :  { %s13634_s21 = sld [smem:[%s15164_s0 + %s13381_s15]]  }
  0x4c   :  { %15256 = sst [smem:[#allocation94_spill]] %s13634_s21 }
  0x4d   :  { %85 = vsyncpa [#allocation3], 0 }
  0x4e   :  { %86 = vsyncpa [#allocation6], 0 }
  0x4f   :  { %87 = vsyncpa [#allocation9], 0 }
  0x50   :  { %88 = vsyncpa [#allocation12], 0 }
  0x51   :  { %89 = vsyncpa [#allocation15], 0 }
  0x52   :  { %90 = vsyncpa [#allocation18], 0 }
  0x53   :  { %91 = vsyncpa [#allocation21], 0 }
  0x54   :  { %92 = vsyncpa [#allocation24], 0 }
  0x55   :  { %93 = vsyncpa [#allocation27], 0 }
  0x56   :  { %94 = vsyncpa [#allocation30], 0 }
  0x57   :  { %95 = vsyncpa [#allocation33], 0 }
  0x58   :  { %96 = vsyncpa [#allocation36], 0 }
  0x59   :  { %97 = vsyncpa [#allocation39], 0 }
  0x5a   :  { %98 = vsyncpa [#allocation42], 0 }
  0x5b   :  { %99 = vsyncpa [#allocation45], 0 }
  0x5c   :  { %100 = vsyncpa [#allocation4], 0 }
  0x5d   :  { %102 = vsyncpa [#allocation4 + $0x1], 0  ;;  %s13636_s22 = smov 0   ;;  %s13638_s0 = smov 0  }
  0x5e   :  { %s13640_s23 = smov 0   ;;  %s13642_s26 = smov 0  }
  0x5f LB: > { %s15257_s14 = sld [smem:[#allocation92_spill]]  ;;  %s15258_s13 = sld [smem:[#allocation81_spill]]  ;;  %s13341_s26 = sphi %s13642_s26, %s15347_s26   ;;  %s13337_s23 = sphi %s13640_s23, %s15349_s23   ;;  %s13333_s0 = sphi %s13638_s0, %s15351_s0   ;;  %s13329_s22 = sphi %s13636_s22, %s15350_s22  }
  0x60   : > { %s15259_s12 = sld [smem:[#allocation88_spill]]  ;;  %s15260_s9 = sld [smem:[#allocation79_spill]] }
  0x61   : > { %s15261_s5 = sld [smem:[#allocation85_spill]]  ;;  %s15262_s6 = sld [smem:[#allocation74_spill]] }
  0x62   : > { %s15263_s4 = sld [smem:[#allocation77_spill]]  ;;  %s15264_s8 = sld [smem:[#allocation70_spill]] }
  0x63   : > { %15265 = sst [smem:[#allocation95_spill]] %s13329_s22  ;;  %s13657_s28 = sadd.s32 4294967295, %s13341_s26  }
  0x64   : > { %15266 = sst [smem:[#allocation96_spill]] %s13337_s23  ;;  %s9914_s1 = sadd.s32 4294967294, %s13341_s26  }
  0x65   : > { %15267 = sst [smem:[#allocation97_spill]] %s13341_s26  ;;  %s13661_s2 = sadd.s32 1, %s13341_s26  }
  0x66   : > { %15268 = sst [smem:[#allocation98_spill]] %s13661_s2  ;;  %s933_s7 = sadd.s32 1, %s13337_s23 }
  0x67   : > { %s930_s10 = ssub.s32 %s13341_s26, %s13661_s2  ;;  %p943_p0 = scmp.ne.s32.totalorder %s13337_s23, %s13333_s0 }
  0x68   : > { %p931_p1 = scmp.eq.s32.totalorder %s930_s10, 0  ;;  %p944_p2 = scmp.eq.s32.totalorder %s13657_s28, 1 }
  0x69   : > { %p949_p3 = scmp.ne.s32.totalorder %s13333_s0, %s13329_s22  ;;  %p950_p4 = scmp.eq.s32.totalorder %s9914_s1, 1 }
  0x6a   : > { %s13672_s11 = scalar_select %p931_p1, %s13337_s23, %s933_s7  }
  0x6b   : > { %p13674_p5 = por %p944_p2, %p943_p0  ;;  %p13678_p6 = por %p950_p4, %p949_p3 }
  0x6c   : > { %15269 = sst [smem:[#allocation99_spill]] %s13672_s11  ;;  %p9915_p7 = scmp.ge.s32.totalorder %s13341_s26, 1 }
  0x6d   : > { %s15270_s15 = scalar_select %p13674_p5, 1, 0 }
  0x6e   : > { %s15271_s16 = scalar_select %p13678_p6, 1, 0 }
  0x6f   : > { %p983_p8 = scmp.lt.s32.totalorder %s13341_s26, 3  ;;  %p15187_p9 = scmp.eq.s32.totalorder %s13657_s28, 0 }
  0x70   : > { %15272 = sst [smem:[#allocation100_spill]] %s15271_s16  ;;  %s13382_s1 = smov [#allocation5]  }
  0x71   : > { %p13685_p10 = pnand %p9915_p7, %p983_p8  ;;  %s1011_s7 = sshll.u32 %s13382_s1, 4  ;;  %s1012_s7 = int_to_ptr.vmem [resolvable:$true] %s1011_s7 }
  0x72   : > { %s13383_s11 = smov [#allocation8]   ;;  %s12407_s2 = scalar_lea.hbm %s13469_s29, 2048 }
  0x73   : > { %s15273_s18 = scalar_select %p13685_p10, 1, 0 }
  0x74   : > { %p11524_p11 = pneg %p13685_p10  ;;  %s1037_s23 = sshll.u32 %s13383_s11, 4  ;;  %s1038_s23 = int_to_ptr.vmem [resolvable:$true] %s1037_s23 }
  0x75   : > { %p12408_p13 = scmp.ne.s32.totalorder %s13469_s29, %s12407_s2  ;;  %p12414_p3 = scmp.lt.u32.totalorder %s12407_s2, %s13469_s29 }
  0x76   : > { %p13693_p12 = pnand %p15187_p9, %p11524_p11 }
  0x78   : > { %p13701_p0 = pneg %p13693_p12 }
  0x7a   : > { %p12410_p1 = pnand %p13701_p0, %p12408_p13 }
  0x7c   : > { %p12411_p2 = pneg %p12410_p1 }
  0x7e   : > { %p12416_p4 = pnand %p12414_p3, %p12411_p2 }
  0x80   : > { %12419 = shalt.err (!%p12416_p4)
}
  0x81   : > { %s12420_s1 = scalar_lea.vmem %s1012_s7, 2048  ;;  %p12428_p9 = scmp.lt.s32.totalorder %s1012_s7, %s1012_s7 }
  0x82   : > { %p12421_p7 = scmp.ne.s32.totalorder %s1012_s7, %s12420_s1  ;;  %p12429_p6 = scmp.lt.s32.totalorder %s12420_s1, %s12420_s1 }
  0x84   : > { %p12423_p8 = pnand %p12421_p7, %p13701_p0  ;;  %p12430_p5 = por %p12429_p6, %p12428_p9 }
  0x86   : > { %p12424_p11 = pneg %p12423_p8 }
  0x88   : > { %p12431_p10 = pnand %p12430_p5, %p12424_p11 }
  0x8a   : > { %12434 = shalt.err (!%p12431_p10)
}
  0x8b   : > { %s15192_s11 = smov 64   ;;  %s15194_s2 = smov 4  }
  0x8c   : > { %11530 = dma.hbm_to_vmem [thread:$0]  (!%p13693_p12), %s13469_s29, 2048, %s1012_s7, [#allocation6], %s15192_s11, %s15192_s11, %s15194_s2  }
  0x8d   : > { %s13386_s22 = smov [#allocation11]   ;;  %s12435_s1 = scalar_lea.hbm %s15264_s8, 32 }
  0x8e   : > { %s1066_s26 = sshll.u32 %s13386_s22, 4  ;;  %p12436_p6 = scmp.ne.s32.totalorder %s15264_s8, %s12435_s1  ;;  %s1067_s26 = int_to_ptr.vmem [resolvable:$true] %s1066_s26 }
  0x8f   : > { %p12442_p10 = scmp.lt.u32.totalorder %s12435_s1, %s15264_s8 }
  0x90   : > { %p12438_p5 = pnand %p12436_p6, %p13701_p0 }
  0x92   : > { %p12439_p9 = pneg %p12438_p5 }
  0x94   : > { %p12444_p13 = pnand %p12442_p10, %p12439_p9 }
  0x96   : > { %12447 = shalt.err (!%p12444_p13)
}
  0x97   : > { %s12448_s21 = scalar_lea.vmem %s1038_s23, 32  ;;  %p12456_p4 = scmp.lt.s32.totalorder %s1038_s23, %s1038_s23 }
  0x98   : > { %p12449_p1 = scmp.ne.s32.totalorder %s1038_s23, %s12448_s21  ;;  %p12457_p7 = scmp.lt.s32.totalorder %s12448_s21, %s12448_s21 }
  0x9a   : > { %p12451_p2 = pnand %p12449_p1, %p13701_p0  ;;  %p12458_p8 = por %p12457_p7, %p12456_p4 }
  0x9c   : > { %p12452_p3 = pneg %p12451_p2 }
  0x9e   : > { %p12459_p11 = pnand %p12458_p8, %p12452_p3 }
  0xa0   : > { %12462 = shalt.err (!%p12459_p11)
}
  0xa1   : > { %s15196_s22 = smov 16   ;;  %s15198_s7 = smov 1  }
  0xa2   : > { %11536 = dma.hbm_to_vmem [thread:$0]  (!%p13693_p12), %s15264_s8, 32, %s1038_s23, [#allocation9], %s15196_s22, %s15196_s22, %s15198_s7  }
  0xa3   : > { %s12463_s1 = scalar_lea.hbm %s13494_s24, 64 }
  0xa4   : > { %p12464_p6 = scmp.ne.s32.totalorder %s13494_s24, %s12463_s1  ;;  %p12470_p10 = scmp.lt.u32.totalorder %s12463_s1, %s13494_s24 }
  0xa6   : > { %p12466_p5 = pnand %p12464_p6, %p13701_p0 }
  0xa8   : > { %p12467_p9 = pneg %p12466_p5 }
  0xaa   : > { %p12472_p13 = pnand %p12470_p10, %p12467_p9 }
  0xac   : > { %12475 = shalt.err (!%p12472_p13)
}
  0xad   : > { %s12476_s21 = scalar_lea.vmem %s1067_s26, 64  ;;  %p12484_p4 = scmp.lt.s32.totalorder %s1067_s26, %s1067_s26 }
  0xae   : > { %p12477_p1 = scmp.ne.s32.totalorder %s1067_s26, %s12476_s21  ;;  %p12485_p7 = scmp.lt.s32.totalorder %s12476_s21, %s12476_s21 }
  0xb0   : > { %p12479_p2 = pnand %p12477_p1, %p13701_p0  ;;  %p12486_p8 = por %p12485_p7, %p12484_p4 }
  0xb2   : > { %p12480_p3 = pneg %p12479_p2 }
  0xb4   : > { %p12487_p11 = pnand %p12486_p8, %p12480_p3 }
  0xb6   : > { %12490 = shalt.err (!%p12487_p11)
}
  0xb7   : > { %s15201_s23 = smov 32   ;;  %s15202_s1 = smov 2  }
  0xb8   : > { %11542 = dma.hbm_to_vmem [thread:$0]  (!%p13693_p12), %s13494_s24, 64, %s1067_s26, [#allocation12], %s15201_s23, %s15201_s23, %s15202_s1  }
  0xb9   : > { %s13391_s11 = smov [#allocation14]   ;;  %s13392_s21 = smov [#allocation17]  }
  0xba   : > { %s1092_s2 = sshll.u32 %s13391_s11, 4  ;;  %s1118_s22 = sshll.u32 %s13392_s21, 4  ;;  %s1093_s2 = int_to_ptr.vmem [resolvable:$true] %s1092_s2  ;;  %s1119_s22 = int_to_ptr.vmem [resolvable:$true] %s1118_s22 }
  0xbb   : > { %s12491_s7 = scalar_lea.hbm %s15262_s6, 32 }
  0xbc   : > { %p12492_p6 = scmp.ne.s32.totalorder %s15262_s6, %s12491_s7  ;;  %p12498_p10 = scmp.lt.u32.totalorder %s12491_s7, %s15262_s6 }
  0xbe   : > { %p12494_p5 = pnand %p12492_p6, %p13701_p0 }
  0xc0   : > { %p12495_p9 = pneg %p12494_p5 }
  0xc2   : > { %p12500_p13 = pnand %p12498_p10, %p12495_p9 }
  0xc4   : > { %12503 = shalt.err (!%p12500_p13)
}
  0xc5   : > { %s12504_s8 = scalar_lea.vmem %s1093_s2, 32  ;;  %p12512_p4 = scmp.lt.s32.totalorder %s1093_s2, %s1093_s2 }
  0xc6   : > { %p12505_p1 = scmp.ne.s32.totalorder %s1093_s2, %s12504_s8  ;;  %p12513_p7 = scmp.lt.s32.totalorder %s12504_s8, %s12504_s8 }
  0xc8   : > { %p12507_p2 = pnand %p12505_p1, %p13701_p0  ;;  %p12514_p8 = por %p12513_p7, %p12512_p4 }
  0xca   : > { %p12508_p3 = pneg %p12507_p2 }
  0xcc   : > { %p12515_p11 = pnand %p12514_p8, %p12508_p3 }
  0xce   : > { %12518 = shalt.err (!%p12515_p11)
}
  0xcf   : > { %s15276_s26 = smov 1   ;;  %s15277_s11 = smov 16  }
  0xd0   : > { %11548 = dma.hbm_to_vmem [thread:$0]  (!%p13693_p12), %s15262_s6, 32, %s1093_s2, [#allocation15], %s15277_s11, %s15277_s11, %s15276_s26  }
  0xd1   : > { %s12519_s7 = scalar_lea.hbm %s13514_s20, 32 }
  0xd2   : > { %p12520_p6 = scmp.ne.s32.totalorder %s13514_s20, %s12519_s7  ;;  %p12526_p10 = scmp.lt.u32.totalorder %s12519_s7, %s13514_s20 }
  0xd4   : > { %p12522_p5 = pnand %p12520_p6, %p13701_p0 }
  0xd6   : > { %p12523_p9 = pneg %p12522_p5 }
  0xd8   : > { %p12528_p13 = pnand %p12526_p10, %p12523_p9 }
  0xda   : > { %12531 = shalt.err (!%p12528_p13)
}
  0xdb   : > { %s12532_s8 = scalar_lea.vmem %s1119_s22, 32  ;;  %p12540_p4 = scmp.lt.s32.totalorder %s1119_s22, %s1119_s22 }
  0xdc   : > { %p12533_p1 = scmp.ne.s32.totalorder %s1119_s22, %s12532_s8  ;;  %p12541_p7 = scmp.lt.s32.totalorder %s12532_s8, %s12532_s8 }
  0xde   : > { %p12535_p2 = pnand %p12533_p1, %p13701_p0  ;;  %p12542_p8 = por %p12541_p7, %p12540_p4 }
  0xe0   : > { %p12536_p3 = pneg %p12535_p2 }
  0xe2   : > { %p12543_p11 = pnand %p12542_p8, %p12536_p3 }
  0xe4   : > { %12546 = shalt.err (!%p12543_p11)
}
  0xe5   : > { %11554 = dma.hbm_to_vmem [thread:$0]  (!%p13693_p12), %s13514_s20, 32, %s1119_s22, [#allocation18], %s15277_s11, %s15277_s11, %s15276_s26  }
  0xe6   : > { %s13393_s2 = smov [#allocation20]   ;;  %s13394_s7 = smov [#allocation23]  }
  0xe7   : > { %s1144_s21 = sshll.u32 %s13393_s2, 4  ;;  %s1170_s23 = sshll.u32 %s13394_s7, 4  ;;  %s1145_s21 = int_to_ptr.vmem [resolvable:$true] %s1144_s21  ;;  %s1171_s23 = int_to_ptr.vmem [resolvable:$true] %s1170_s23 }
  0xe8   : > { %s12547_s8 = scalar_lea.hbm %s15263_s4, 96 }
  0xe9   : > { %p12548_p6 = scmp.ne.s32.totalorder %s15263_s4, %s12547_s8  ;;  %p12554_p10 = scmp.lt.u32.totalorder %s12547_s8, %s15263_s4 }
  0xeb   : > { %p12550_p5 = pnand %p12548_p6, %p13701_p0 }
  0xed   : > { %p12551_p9 = pneg %p12550_p5 }
  0xef   : > { %p12556_p13 = pnand %p12554_p10, %p12551_p9 }
  0xf1   : > { %12559 = shalt.err (!%p12556_p13)
}
  0xf2   : > { %s12560_s1 = scalar_lea.vmem %s1145_s21, 96  ;;  %p12568_p4 = scmp.lt.s32.totalorder %s1145_s21, %s1145_s21 }
  0xf3   : > { %p12561_p1 = scmp.ne.s32.totalorder %s1145_s21, %s12560_s1  ;;  %p12569_p7 = scmp.lt.s32.totalorder %s12560_s1, %s12560_s1 }
  0xf5   : > { %p12563_p2 = pnand %p12561_p1, %p13701_p0  ;;  %p12570_p8 = por %p12569_p7, %p12568_p4 }
  0xf7   : > { %p12564_p3 = pneg %p12563_p2 }
  0xf9   : > { %p12571_p11 = pnand %p12570_p8, %p12564_p3 }
  0xfb   : > { %12574 = shalt.err (!%p12571_p11)
}
  0xfc   : > { %s15203_s22 = smov 48   ;;  %s15204_s2 = smov 3  }
  0xfd   : > { %11560 = dma.hbm_to_vmem [thread:$0]  (!%p13693_p12), %s15263_s4, 96, %s1145_s21, [#allocation21], %s15203_s22, %s15203_s22, %s15204_s2  }
  0xfe   : > { %s12575_s7 = scalar_lea.hbm %s15260_s9, 32 }
  0xff   : > { %p12576_p6 = scmp.ne.s32.totalorder %s15260_s9, %s12575_s7  ;;  %p12582_p10 = scmp.lt.u32.totalorder %s12575_s7, %s15260_s9 }
 0x101   : > { %p12578_p5 = pnand %p12576_p6, %p13701_p0 }
 0x103   : > { %p12579_p9 = pneg %p12578_p5 }
 0x105   : > { %p12584_p13 = pnand %p12582_p10, %p12579_p9 }
 0x107   : > { %12587 = shalt.err (!%p12584_p13)
}
 0x108   : > { %s12588_s1 = scalar_lea.vmem %s1171_s23, 32  ;;  %p12596_p4 = scmp.lt.s32.totalorder %s1171_s23, %s1171_s23 }
 0x109   : > { %p12589_p1 = scmp.ne.s32.totalorder %s1171_s23, %s12588_s1  ;;  %p12597_p7 = scmp.lt.s32.totalorder %s12588_s1, %s12588_s1 }
 0x10b   : > { %p12591_p2 = pnand %p12589_p1, %p13701_p0  ;;  %p12598_p8 = por %p12597_p7, %p12596_p4 }
 0x10d   : > { %p12592_p3 = pneg %p12591_p2 }
 0x10f   : > { %p12599_p11 = pnand %p12598_p8, %p12592_p3 }
 0x111   : > { %12602 = shalt.err (!%p12599_p11)
}
 0x112   : > { %11566 = dma.hbm_to_vmem [thread:$0]  (!%p13693_p12), %s15260_s9, 32, %s1171_s23, [#allocation24], %s15277_s11, %s15277_s11, %s15276_s26  }
 0x113   : > { %s13397_s21 = smov [#allocation26]   ;;  %s13398_s7 = smov [#allocation29]  }
 0x114   : > { %s1196_s8 = sshll.u32 %s13397_s21, 4  ;;  %s1225_s22 = sshll.u32 %s13398_s7, 4  ;;  %s1197_s8 = int_to_ptr.vmem [resolvable:$true] %s1196_s8  ;;  %s1226_s22 = int_to_ptr.vmem [resolvable:$true] %s1225_s22 }
 0x115   : > { %s12603_s1 = scalar_lea.hbm %s15258_s13, 32 }
 0x116   : > { %p12604_p6 = scmp.ne.s32.totalorder %s15258_s13, %s12603_s1  ;;  %p12610_p10 = scmp.lt.u32.totalorder %s12603_s1, %s15258_s13 }
 0x118   : > { %p12606_p5 = pnand %p12604_p6, %p13701_p0 }
 0x11a   : > { %p12607_p9 = pneg %p12606_p5 }
 0x11c   : > { %p12612_p13 = pnand %p12610_p10, %p12607_p9 }
 0x11e   : > { %12615 = shalt.err (!%p12612_p13)
}
 0x11f   : > { %s12616_s2 = scalar_lea.vmem %s1197_s8, 32  ;;  %p12624_p4 = scmp.lt.s32.totalorder %s1197_s8, %s1197_s8 }
 0x120   : > { %p12617_p1 = scmp.ne.s32.totalorder %s1197_s8, %s12616_s2  ;;  %p12625_p7 = scmp.lt.s32.totalorder %s12616_s2, %s12616_s2 }
 0x122   : > { %p12619_p2 = pnand %p12617_p1, %p13701_p0  ;;  %p12626_p8 = por %p12625_p7, %p12624_p4 }
 0x124   : > { %p12620_p3 = pneg %p12619_p2 }
 0x126   : > { %p12627_p11 = pnand %p12626_p8, %p12620_p3 }
 0x128   : > { %12630 = shalt.err (!%p12627_p11)
}
 0x129   : > { %11572 = dma.hbm_to_vmem [thread:$0]  (!%p13693_p12), %s15258_s13, 32, %s1197_s8, [#allocation27], %s15277_s11, %s15277_s11, %s15276_s26  }
 0x12a   : > { %s12631_s23 = scalar_lea.hbm %s13559_s19, 4096 }
 0x12b   : > { %p12632_p6 = scmp.ne.s32.totalorder %s13559_s19, %s12631_s23  ;;  %p12638_p10 = scmp.lt.u32.totalorder %s12631_s23, %s13559_s19 }
 0x12d   : > { %p12634_p5 = pnand %p12632_p6, %p13701_p0 }
 0x12f   : > { %p12635_p9 = pneg %p12634_p5 }
 0x131   : > { %p12640_p13 = pnand %p12638_p10, %p12635_p9 }
 0x133   : > { %12643 = shalt.err (!%p12640_p13)
}
 0x134   : > { %s12644_s2 = scalar_lea.vmem %s1226_s22, 4096  ;;  %p12652_p4 = scmp.lt.s32.totalorder %s1226_s22, %s1226_s22 }
 0x135   : > { %p12645_p1 = scmp.ne.s32.totalorder %s1226_s22, %s12644_s2  ;;  %p12653_p7 = scmp.lt.s32.totalorder %s12644_s2, %s12644_s2 }
 0x137   : > { %p12647_p2 = pnand %p12645_p1, %p13701_p0  ;;  %p12654_p8 = por %p12653_p7, %p12652_p4 }
 0x139   : > { %p12648_p3 = pneg %p12647_p2 }
 0x13b   : > { %p12655_p11 = pnand %p12654_p8, %p12648_p3 }
 0x13d   : > { %12658 = shalt.err (!%p12655_p11)
}
 0x13e   : > { %s15207_s21 = smov 128   ;;  %s15209_s8 = smov 8  }
 0x13f   : > { %11578 = dma.hbm_to_vmem [thread:$0]  (!%p13693_p12), %s13559_s19, 4096, %s1226_s22, [#allocation30], %s15207_s21, %s15207_s21, %s15209_s8  }
 0x140   : > { %s13401_s7 = smov [#allocation32]   ;;  %s13402_s23 = smov [#allocation35]  }
 0x141   : > { %s1251_s1 = sshll.u32 %s13401_s7, 4  ;;  %s1277_s2 = sshll.u32 %s13402_s23, 4  ;;  %s1252_s1 = int_to_ptr.vmem [resolvable:$true] %s1251_s1  ;;  %s1278_s2 = int_to_ptr.vmem [resolvable:$true] %s1277_s2 }
 0x142   : > { %s12659_s4 = scalar_lea.hbm %s15261_s5, 2048 }
 0x143   : > { %p12660_p6 = scmp.ne.s32.totalorder %s15261_s5, %s12659_s4  ;;  %p12666_p10 = scmp.lt.u32.totalorder %s12659_s4, %s15261_s5 }
 0x145   : > { %p12662_p5 = pnand %p12660_p6, %p13701_p0 }
 0x147   : > { %p12663_p9 = pneg %p12662_p5 }
 0x149   : > { %p12668_p13 = pnand %p12666_p10, %p12663_p9 }
 0x14b   : > { %12671 = shalt.err (!%p12668_p13)
}
 0x14c   : > { %s12672_s6 = scalar_lea.vmem %s1252_s1, 2048  ;;  %p12680_p4 = scmp.lt.s32.totalorder %s1252_s1, %s1252_s1 }
 0x14d   : > { %p12673_p1 = scmp.ne.s32.totalorder %s1252_s1, %s12672_s6  ;;  %p12681_p7 = scmp.lt.s32.totalorder %s12672_s6, %s12672_s6 }
 0x14f   : > { %p12675_p2 = pnand %p12673_p1, %p13701_p0  ;;  %p12682_p8 = por %p12681_p7, %p12680_p4 }
 0x151   : > { %p12676_p3 = pneg %p12675_p2 }
 0x153   : > { %p12683_p11 = pnand %p12682_p8, %p12676_p3 }
 0x155   : > { %12686 = shalt.err (!%p12683_p11)
}
 0x156   : > { %s15278_s22 = smov 4   ;;  %s15279_s7 = smov 64  }
 0x157   : > { %11584 = dma.hbm_to_vmem [thread:$0]  (!%p13693_p12), %s15261_s5, 2048, %s1252_s1, [#allocation33], %s15279_s7, %s15279_s7, %s15278_s22  }
 0x158   : > { %s12687_s4 = scalar_lea.hbm %s13579_s27, 32 }
 0x159   : > { %p12688_p6 = scmp.ne.s32.totalorder %s13579_s27, %s12687_s4  ;;  %p12694_p10 = scmp.lt.u32.totalorder %s12687_s4, %s13579_s27 }
 0x15b   : > { %p12690_p5 = pnand %p12688_p6, %p13701_p0 }
 0x15d   : > { %p12691_p9 = pneg %p12690_p5 }
 0x15f   : > { %p12696_p13 = pnand %p12694_p10, %p12691_p9 }
 0x161   : > { %12699 = shalt.err (!%p12696_p13)
}
 0x162   : > { %s12700_s6 = scalar_lea.vmem %s1278_s2, 32  ;;  %p12708_p4 = scmp.lt.s32.totalorder %s1278_s2, %s1278_s2 }
 0x163   : > { %p12701_p1 = scmp.ne.s32.totalorder %s1278_s2, %s12700_s6  ;;  %p12709_p7 = scmp.lt.s32.totalorder %s12700_s6, %s12700_s6 }
 0x165   : > { %p12703_p2 = pnand %p12701_p1, %p13701_p0  ;;  %p12710_p8 = por %p12709_p7, %p12708_p4 }
 0x167   : > { %p12704_p3 = pneg %p12703_p2 }
 0x169   : > { %p12711_p11 = pnand %p12710_p8, %p12704_p3 }
 0x16b   : > { %12714 = shalt.err (!%p12711_p11)
}
 0x16c   : > { %11590 = dma.hbm_to_vmem [thread:$0]  (!%p13693_p12), %s13579_s27, 32, %s1278_s2, [#allocation36], %s15277_s11, %s15277_s11, %s15276_s26  }
 0x16d   : > { %s13403_s1 = smov [#allocation38]   ;;  %s13404_s4 = smov [#allocation41]  }
 0x16e   : > { %s1303_s23 = sshll.u32 %s13403_s1, 4  ;;  %s1335_s21 = sshll.u32 %s13404_s4, 4  ;;  %s1304_s23 = int_to_ptr.vmem [resolvable:$true] %s1303_s23  ;;  %s1336_s21 = int_to_ptr.vmem [resolvable:$true] %s1335_s21 }
 0x16f   : > { %s12715_s6 = scalar_lea.hbm %s15259_s12, 4096 }
 0x170   : > { %p12716_p6 = scmp.ne.s32.totalorder %s15259_s12, %s12715_s6  ;;  %p12722_p10 = scmp.lt.u32.totalorder %s12715_s6, %s15259_s12 }
 0x172   : > { %p12718_p5 = pnand %p12716_p6, %p13701_p0 }
 0x174   : > { %p12719_p9 = pneg %p12718_p5 }
 0x176   : > { %p12724_p13 = pnand %p12722_p10, %p12719_p9 }
 0x178   : > { %12727 = shalt.err (!%p12724_p13)
}
 0x179   : > { %s12728_s8 = scalar_lea.vmem %s1304_s23, 4096  ;;  %p12736_p4 = scmp.lt.s32.totalorder %s1304_s23, %s1304_s23 }
 0x17a   : > { %p12729_p1 = scmp.ne.s32.totalorder %s1304_s23, %s12728_s8  ;;  %p12737_p7 = scmp.lt.s32.totalorder %s12728_s8, %s12728_s8 }
 0x17c   : > { %p12731_p2 = pnand %p12729_p1, %p13701_p0  ;;  %p12738_p8 = por %p12737_p7, %p12736_p4 }
 0x17e   : > { %p12732_p3 = pneg %p12731_p2 }
 0x180   : > { %p12739_p11 = pnand %p12738_p8, %p12732_p3 }
 0x182   : > { %12742 = shalt.err (!%p12739_p11)
}
 0x183   : > { %s15280_s2 = smov 8   ;;  %s15281_s1 = smov 128  }
 0x184   : > { %11596 = dma.hbm_to_vmem [thread:$0]  (!%p13693_p12), %s15259_s12, 4096, %s1304_s23, [#allocation39], %s15281_s1, %s15281_s1, %s15280_s2  }
 0x185   : > { %s12743_s4 = scalar_lea.hbm %s15257_s14, 32 }
 0x186   : > { %p12744_p6 = scmp.ne.s32.totalorder %s15257_s14, %s12743_s4  ;;  %p12750_p10 = scmp.lt.u32.totalorder %s12743_s4, %s15257_s14 }
 0x188   : > { %p12746_p5 = pnand %p12744_p6, %p13701_p0 }
 0x18a   : > { %p12747_p9 = pneg %p12746_p5 }
 0x18c   : > { %p12752_p13 = pnand %p12750_p10, %p12747_p9 }
 0x18e   : > { %12755 = shalt.err (!%p12752_p13)
}
 0x18f   : > { %s12756_s8 = scalar_lea.vmem %s1336_s21, 32  ;;  %p12764_p4 = scmp.lt.s32.totalorder %s1336_s21, %s1336_s21 }
 0x190   : > { %p12757_p1 = scmp.ne.s32.totalorder %s1336_s21, %s12756_s8  ;;  %p12765_p7 = scmp.lt.s32.totalorder %s12756_s8, %s12756_s8 }
 0x192   : > { %p12759_p2 = pnand %p12757_p1, %p13701_p0  ;;  %p12766_p8 = por %p12765_p7, %p12764_p4 }
 0x194   : > { %p12760_p3 = pneg %p12759_p2 }
 0x196   : > { %p12767_p11 = pnand %p12766_p8, %p12760_p3 }
 0x198   : > { %12770 = shalt.err (!%p12767_p11)
}
 0x199   : > { %11602 = dma.hbm_to_vmem [thread:$0]  (!%p13693_p12), %s15257_s14, 32, %s1336_s21, [#allocation42], %s15277_s11, %s15277_s11, %s15276_s26  }
 0x19a   : > { %s13405_s23 = smov [#allocation44]   ;;  %s13406_s4 = smov [#allocation2]  }
 0x19b   : > { %s1361_s6 = sshll.u32 %s13405_s23, 4  ;;  %s998_s5 = sshll.u32 %s13406_s4, 4  ;;  %s1362_s6 = int_to_ptr.vmem [resolvable:$true] %s1361_s6  ;;  %s999_s5 = int_to_ptr.vmem [resolvable:$true] %s998_s5 }
 0x19c   : > { %s12771_s8 = scalar_lea.hbm %s13619_s30, 2048 }
 0x19d   : > { %p12772_p6 = scmp.ne.s32.totalorder %s13619_s30, %s12771_s8  ;;  %p12778_p10 = scmp.lt.u32.totalorder %s12771_s8, %s13619_s30 }
 0x19f   : > { %p12774_p5 = pnand %p12772_p6, %p13701_p0 }
 0x1a1   : > { %p12775_p9 = pneg %p12774_p5 }
 0x1a3   : > { %p12780_p13 = pnand %p12778_p10, %p12775_p9 }
 0x1a5   : > { %12783 = shalt.err (!%p12780_p13)
}
 0x1a6   : > { %s12784_s9 = scalar_lea.vmem %s1362_s6, 2048  ;;  %p12792_p4 = scmp.lt.s32.totalorder %s1362_s6, %s1362_s6 }
 0x1a7   : > { %p12785_p1 = scmp.ne.s32.totalorder %s1362_s6, %s12784_s9  ;;  %p12793_p7 = scmp.lt.s32.totalorder %s12784_s9, %s12784_s9 }
 0x1a9   : > { %p12787_p2 = pnand %p12785_p1, %p13701_p0  ;;  %p12794_p8 = por %p12793_p7, %p12792_p4 }
 0x1ab   : > { %p12788_p3 = pneg %p12787_p2 }
 0x1ad   : > { %p12795_p11 = pnand %p12794_p8, %p12788_p3 }
 0x1af   : > { %12798 = shalt.err (!%p12795_p11)
}
 0x1b0   : > { %11608 = dma.hbm_to_vmem [thread:$0]  (!%p13693_p12), %s13619_s30, 2048, %s1362_s6, [#allocation45], %s15281_s1, %s15281_s1, %s15280_s2  }
 0x1b1   : > { %s12799_s21 = scalar_lea.hbm %s13464_s25, 96 }
 0x1b2   : > { %p12800_p6 = scmp.ne.s32.totalorder %s13464_s25, %s12799_s21  ;;  %p12806_p10 = scmp.lt.u32.totalorder %s12799_s21, %s13464_s25 }
 0x1b4   : > { %p12802_p5 = pnand %p12800_p6, %p13701_p0 }
 0x1b6   : > { %p12803_p9 = pneg %p12802_p5 }
 0x1b8   : > { %p12808_p13 = pnand %p12806_p10, %p12803_p9 }
 0x1ba   : > { %12811 = shalt.err (!%p12808_p13)
}
 0x1bb   : > { %s12812_s9 = scalar_lea.vmem %s999_s5, 96  ;;  %p12820_p4 = scmp.lt.s32.totalorder %s999_s5, %s999_s5 }
 0x1bc   : > { %p12813_p1 = scmp.ne.s32.totalorder %s999_s5, %s12812_s9  ;;  %p12821_p7 = scmp.lt.s32.totalorder %s12812_s9, %s12812_s9 }
 0x1be   : > { %p12815_p2 = pnand %p12813_p1, %p13701_p0  ;;  %p12822_p8 = por %p12821_p7, %p12820_p4 }
 0x1c0   : > { %p12816_p3 = pneg %p12815_p2 }
 0x1c2   : > { %p12823_p11 = pnand %p12822_p8, %p12816_p3 }
 0x1c4   : > { %12826 = shalt.err (!%p12823_p11)
}
 0x1c5   : > { %s15282_s2 = smov 3   ;;  %s15283_s1 = smov 48  }
 0x1c6   : > { %s15284_s23 = sld [smem:[#allocation69_spill]]  ;;  %s13407_s4 = smov [#allocation7]  }
 0x1c7   : > { %11527 = dma.hbm_to_vmem [thread:$0]  (!%p13693_p12), %s13464_s25, 96, %s999_s5, [#allocation3], %s15283_s1, %s15283_s1, %s15282_s2  }
 0x1c8   : > { %s1024_s8 = sshll.u32 %s13407_s4, 4  ;;  %s13408_s21 = smov [#allocation10]   ;;  %s1025_s8 = int_to_ptr.vmem [resolvable:$true] %s1024_s8 }
 0x1c9   : > { %s1050_s12 = sshll.u32 %s13408_s21, 4  ;;  %s1051_s12 = int_to_ptr.vmem [resolvable:$true] %s1050_s12 }
 0x1cc   : > { %s15285_s6 = smov %s15284_s23  ;;  %s12827_s9 = scalar_lea.hbm %s15284_s23, 32 }
 0x1cd   : > { %p12828_p6 = scmp.ne.s32.totalorder %s15285_s6, %s12827_s9  ;;  %p12834_p10 = scmp.lt.u32.totalorder %s12827_s9, %s15285_s6 }
 0x1cf   : > { %p12830_p5 = pnand %p12828_p6, %p13701_p0 }
 0x1d1   : > { %p12831_p9 = pneg %p12830_p5 }
 0x1d3   : > { %p12836_p13 = pnand %p12834_p10, %p12831_p9 }
 0x1d5   : > { %12839 = shalt.err (!%p12836_p13)
}
 0x1d6   : > { %s12840_s13 = scalar_lea.vmem %s1025_s8, 32  ;;  %p12848_p4 = scmp.lt.s32.totalorder %s1025_s8, %s1025_s8 }
 0x1d7   : > { %p12841_p1 = scmp.ne.s32.totalorder %s1025_s8, %s12840_s13  ;;  %p12849_p7 = scmp.lt.s32.totalorder %s12840_s13, %s12840_s13 }
 0x1d9   : > { %p12843_p2 = pnand %p12841_p1, %p13701_p0  ;;  %p12850_p8 = por %p12849_p7, %p12848_p4 }
 0x1db   : > { %p12844_p3 = pneg %p12843_p2 }
 0x1dd   : > { %p12851_p11 = pnand %p12850_p8, %p12844_p3 }
 0x1df   : > { %12854 = shalt.err (!%p12851_p11)
}
 0x1e0   : > { %s15286_s5 = sld [smem:[#allocation71_spill]] }
 0x1e1   : > { %11533 = dma.hbm_to_vmem [thread:$0]  (!%p13693_p12), %s15285_s6, 32, %s1025_s8, [#allocation6], %s15277_s11, %s15277_s11, %s15276_s26  }
 0x1e6   : > { %s12855_s2 = scalar_lea.hbm %s15286_s5, 32 }
 0x1e7   : > { %p12856_p6 = scmp.ne.s32.totalorder %s15286_s5, %s12855_s2  ;;  %p12862_p10 = scmp.lt.u32.totalorder %s12855_s2, %s15286_s5 }
 0x1e9   : > { %p12858_p5 = pnand %p12856_p6, %p13701_p0 }
 0x1eb   : > { %p12859_p9 = pneg %p12858_p5 }
 0x1ed   : > { %p12864_p13 = pnand %p12862_p10, %p12859_p9 }
 0x1ef   : > { %12867 = shalt.err (!%p12864_p13)
}
 0x1f0   : > { %s12868_s13 = scalar_lea.vmem %s1051_s12, 32  ;;  %p12876_p4 = scmp.lt.s32.totalorder %s1051_s12, %s1051_s12 }
 0x1f1   : > { %p12869_p1 = scmp.ne.s32.totalorder %s1051_s12, %s12868_s13  ;;  %p12877_p7 = scmp.lt.s32.totalorder %s12868_s13, %s12868_s13 }
 0x1f3   : > { %p12871_p2 = pnand %p12869_p1, %p13701_p0  ;;  %p12878_p8 = por %p12877_p7, %p12876_p4 }
 0x1f5   : > { %p12872_p3 = pneg %p12871_p2 }
 0x1f7   : > { %p12879_p11 = pnand %p12878_p8, %p12872_p3 }
 0x1f9   : > { %12882 = shalt.err (!%p12879_p11)
}
 0x1fa   : > { %s15287_s1 = sld [smem:[#allocation73_spill]]  ;;  %s13409_s23 = smov [#allocation13]  }
 0x1fb   : > { %11539 = dma.hbm_to_vmem [thread:$0]  (!%p13693_p12), %s15286_s5, 32, %s1051_s12, [#allocation9], %s15277_s11, %s15277_s11, %s15276_s26  }
 0x1fc   : > { %s1079_s4 = sshll.u32 %s13409_s23, 4  ;;  %s13410_s8 = smov [#allocation16]   ;;  %s1080_s4 = int_to_ptr.vmem [resolvable:$true] %s1079_s4 }
 0x1fd   : > { %s1105_s21 = sshll.u32 %s13410_s8, 4  ;;  %s1106_s21 = int_to_ptr.vmem [resolvable:$true] %s1105_s21 }
 0x200   : > { %s12883_s9 = scalar_lea.hbm %s15287_s1, 4096 }
 0x201   : > { %p12884_p6 = scmp.ne.s32.totalorder %s15287_s1, %s12883_s9  ;;  %p12890_p10 = scmp.lt.u32.totalorder %s12883_s9, %s15287_s1 }
 0x203   : > { %p12886_p5 = pnand %p12884_p6, %p13701_p0 }
 0x205   : > { %p12887_p9 = pneg %p12886_p5 }
 0x207   : > { %p12892_p13 = pnand %p12890_p10, %p12887_p9 }
 0x209   : > { %12895 = shalt.err (!%p12892_p13)
}
 0x20a   : > { %s12896_s2 = scalar_lea.vmem %s1080_s4, 4096  ;;  %p12904_p4 = scmp.lt.s32.totalorder %s1080_s4, %s1080_s4 }
 0x20b   : > { %p12897_p1 = scmp.ne.s32.totalorder %s1080_s4, %s12896_s2  ;;  %p12905_p7 = scmp.lt.s32.totalorder %s12896_s2, %s12896_s2 }
 0x20d   : > { %p12899_p2 = pnand %p12897_p1, %p13701_p0  ;;  %p12906_p8 = por %p12905_p7, %p12904_p4 }
 0x20f   : > { %p12900_p3 = pneg %p12899_p2 }
 0x211   : > { %p12907_p11 = pnand %p12906_p8, %p12900_p3 }
 0x213   : > { %12910 = shalt.err (!%p12907_p11)
}
 0x214   : > { %s15288_s12 = sld [smem:[#allocation75_spill]] }
 0x215   : > { %11545 = dma.hbm_to_vmem [thread:$0]  (!%p13693_p12), %s15287_s1, 4096, %s1080_s4, [#allocation12], %s15279_s7, %s15279_s7, %s15278_s22  }
 0x21a   : > { %s12911_s13 = scalar_lea.hbm %s15288_s12, 32 }
 0x21b   : > { %p12912_p6 = scmp.ne.s32.totalorder %s15288_s12, %s12911_s13  ;;  %p12918_p10 = scmp.lt.u32.totalorder %s12911_s13, %s15288_s12 }
 0x21d   : > { %p12914_p5 = pnand %p12912_p6, %p13701_p0 }
 0x21f   : > { %p12915_p9 = pneg %p12914_p5 }
 0x221   : > { %p12920_p13 = pnand %p12918_p10, %p12915_p9 }
 0x223   : > { %12923 = shalt.err (!%p12920_p13)
}
 0x224   : > { %s12924_s23 = scalar_lea.vmem %s1106_s21, 32  ;;  %p12932_p4 = scmp.lt.s32.totalorder %s1106_s21, %s1106_s21 }
 0x225   : > { %p12925_p1 = scmp.ne.s32.totalorder %s1106_s21, %s12924_s23  ;;  %p12933_p7 = scmp.lt.s32.totalorder %s12924_s23, %s12924_s23 }
 0x227   : > { %p12927_p2 = pnand %p12925_p1, %p13701_p0  ;;  %p12934_p8 = por %p12933_p7, %p12932_p4 }
 0x229   : > { %p12928_p3 = pneg %p12927_p2 }
 0x22b   : > { %p12935_p11 = pnand %p12934_p8, %p12928_p3 }
 0x22d   : > { %12938 = shalt.err (!%p12935_p11)
}
 0x22e   : > { %s15289_s4 = sld [smem:[#allocation76_spill]]  ;;  %s13411_s8 = smov [#allocation19]  }
 0x22f   : > { %11551 = dma.hbm_to_vmem [thread:$0]  (!%p13693_p12), %s15288_s12, 32, %s1106_s21, [#allocation15], %s15277_s11, %s15277_s11, %s15276_s26  }
 0x230   : > { %s1131_s9 = sshll.u32 %s13411_s8, 4  ;;  %s1132_s9 = int_to_ptr.vmem [resolvable:$true] %s1131_s9 }
 0x234   : > { %s12939_s2 = scalar_lea.hbm %s15289_s4, 6144 }
 0x235   : > { %p12940_p6 = scmp.ne.s32.totalorder %s15289_s4, %s12939_s2  ;;  %p12946_p10 = scmp.lt.u32.totalorder %s12939_s2, %s15289_s4 }
 0x237   : > { %p12942_p5 = pnand %p12940_p6, %p13701_p0 }
 0x239   : > { %p12943_p9 = pneg %p12942_p5 }
 0x23b   : > { %p12948_p13 = pnand %p12946_p10, %p12943_p9 }
 0x23d   : > { %12951 = shalt.err (!%p12948_p13)
}
 0x23e   : > { %s12952_s13 = scalar_lea.vmem %s1132_s9, 6144  ;;  %p12960_p4 = scmp.lt.s32.totalorder %s1132_s9, %s1132_s9 }
 0x23f   : > { %p12953_p1 = scmp.ne.s32.totalorder %s1132_s9, %s12952_s13  ;;  %p12961_p7 = scmp.lt.s32.totalorder %s12952_s13, %s12952_s13 }
 0x241   : > { %p12955_p2 = pnand %p12953_p1, %p13701_p0  ;;  %p12962_p8 = por %p12961_p7, %p12960_p4 }
 0x243   : > { %p12956_p3 = pneg %p12955_p2 }
 0x245   : > { %p12963_p11 = pnand %p12962_p8, %p12956_p3 }
 0x247   : > { %12966 = shalt.err (!%p12963_p11)
}
 0x248   : > { %s13412_s21 = smov 192   ;;  %s15290_s23 = sld [smem:[#allocation78_spill]] }
 0x249   : > { %s13413_s2 = smov 12   ;;  %s13414_s1 = smov [#allocation22]  }
 0x24a   : > { %11557 = dma.hbm_to_vmem [thread:$0]  (!%p13693_p12), %s15289_s4, 6144, %s1132_s9, [#allocation18], %s13412_s21, %s13412_s21, %s13413_s2  }
 0x24b   : > { %s1157_s5 = sshll.u32 %s13414_s1, 4  ;;  %s13415_s6 = smov [#allocation25]   ;;  %s1158_s5 = int_to_ptr.vmem [resolvable:$true] %s1157_s5 }
 0x24c   : > { %s1183_s12 = sshll.u32 %s13415_s6, 4  ;;  %s13960_s12 = int_to_ptr.vmem [resolvable:$true] %s1183_s12 }
 0x24e   : > { %s15291_s8 = smov %s15290_s23  ;;  %s12967_s13 = scalar_lea.hbm %s15290_s23, 2048 }
 0x24f   : > { %p12968_p6 = scmp.ne.s32.totalorder %s15291_s8, %s12967_s13  ;;  %p12974_p10 = scmp.lt.u32.totalorder %s12967_s13, %s15291_s8 }
 0x251   : > { %p12970_p5 = pnand %p12968_p6, %p13701_p0 }
 0x253   : > { %p12971_p9 = pneg %p12970_p5 }
 0x255   : > { %p12976_p13 = pnand %p12974_p10, %p12971_p9 }
 0x257   : > { %12979 = shalt.err (!%p12976_p13)
}
 0x258   : > { %s12980_s14 = scalar_lea.vmem %s1158_s5, 2048  ;;  %p12988_p4 = scmp.lt.s32.totalorder %s1158_s5, %s1158_s5 }
 0x259   : > { %p12981_p1 = scmp.ne.s32.totalorder %s1158_s5, %s12980_s14  ;;  %p12989_p7 = scmp.lt.s32.totalorder %s12980_s14, %s12980_s14 }
 0x25b   : > { %p12983_p2 = pnand %p12981_p1, %p13701_p0  ;;  %p12990_p8 = por %p12989_p7, %p12988_p4 }
 0x25d   : > { %p12984_p3 = pneg %p12983_p2 }
 0x25f   : > { %p12991_p11 = pnand %p12990_p8, %p12984_p3 }
 0x261   : > { %12994 = shalt.err (!%p12991_p11)
}
 0x262   : > { %s15292_s6 = sld [smem:[#allocation80_spill]] }
 0x263   : > { %11563 = dma.hbm_to_vmem [thread:$0]  (!%p13693_p12), %s15291_s8, 2048, %s1158_s5, [#allocation21], %s15279_s7, %s15279_s7, %s15278_s22  }
 0x268   : > { %s12995_s1 = scalar_lea.hbm %s15292_s6, 32 }
 0x269   : > { %p12996_p6 = scmp.ne.s32.totalorder %s15292_s6, %s12995_s1  ;;  %p13002_p10 = scmp.lt.u32.totalorder %s12995_s1, %s15292_s6 }
 0x26b   : > { %p12998_p5 = pnand %p12996_p6, %p13701_p0 }
 0x26d   : > { %p12999_p9 = pneg %p12998_p5 }
 0x26f   : > { %p13004_p13 = pnand %p13002_p10, %p12999_p9 }
 0x271   : > { %13007 = shalt.err (!%p13004_p13)
}
 0x272   : > { %s13008_s14 = scalar_lea.vmem %s13960_s12, 32  ;;  %p13016_p4 = scmp.lt.s32.totalorder %s13960_s12, %s13960_s12 }
 0x273   : > { %p13009_p1 = scmp.ne.s32.totalorder %s13960_s12, %s13008_s14  ;;  %p13017_p7 = scmp.lt.s32.totalorder %s13008_s14, %s13008_s14 }
 0x275   : > { %p13011_p2 = pnand %p13009_p1, %p13701_p0  ;;  %p13018_p8 = por %p13017_p7, %p13016_p4 }
 0x277   : > { %p13012_p3 = pneg %p13011_p2 }
 0x279   : > { %p13019_p11 = pnand %p13018_p8, %p13012_p3 }
 0x27b   : > { %13022 = shalt.err (!%p13019_p11)
}
 0x27c   : > { %s15293_s5 = sld [smem:[#allocation83_spill]]  ;;  %s13416_s9 = smov [#allocation28]  }
 0x27d   : > { %11569 = dma.hbm_to_vmem [thread:$0]  (!%p13693_p12), %s15292_s6, 32, %s13960_s12, [#allocation24], %s15277_s11, %s15277_s11, %s15276_s26  }
 0x27e   : > { %s1212_s21 = sshll.u32 %s13416_s9, 4  ;;  %s13417_s23 = smov [#allocation31]   ;;  %s1213_s21 = int_to_ptr.vmem [resolvable:$true] %s1212_s21 }
 0x27f   : > { %s1238_s2 = sshll.u32 %s13417_s23, 4  ;;  %s13993_s2 = int_to_ptr.vmem [resolvable:$true] %s1238_s2 }
 0x282   : > { %s13023_s13 = scalar_lea.hbm %s15293_s5, 32 }
 0x283   : > { %p13024_p6 = scmp.ne.s32.totalorder %s15293_s5, %s13023_s13  ;;  %p13030_p10 = scmp.lt.u32.totalorder %s13023_s13, %s15293_s5 }
 0x285   : > { %p13026_p5 = pnand %p13024_p6, %p13701_p0 }
 0x287   : > { %p13027_p9 = pneg %p13026_p5 }
 0x289   : > { %p13032_p13 = pnand %p13030_p10, %p13027_p9 }
 0x28b   : > { %13035 = shalt.err (!%p13032_p13)
}
 0x28c   : > { %s13036_s1 = scalar_lea.vmem %s1213_s21, 32  ;;  %p13044_p4 = scmp.lt.s32.totalorder %s1213_s21, %s1213_s21 }
 0x28d   : > { %p13037_p1 = scmp.ne.s32.totalorder %s1213_s21, %s13036_s1  ;;  %p13045_p7 = scmp.lt.s32.totalorder %s13036_s1, %s13036_s1 }
 0x28f   : > { %p13039_p2 = pnand %p13037_p1, %p13701_p0  ;;  %p13046_p8 = por %p13045_p7, %p13044_p4 }
 0x291   : > { %p13040_p3 = pneg %p13039_p2 }
 0x293   : > { %p13047_p11 = pnand %p13046_p8, %p13040_p3 }
 0x295   : > { %13050 = shalt.err (!%p13047_p11)
}
 0x296   : > { %s15294_s12 = sld [smem:[#allocation84_spill]] }
 0x297   : > { %11575 = dma.hbm_to_vmem [thread:$0]  (!%p13693_p12), %s15293_s5, 32, %s1213_s21, [#allocation27], %s15277_s11, %s15277_s11, %s15276_s26  }
 0x29c   : > { %s13051_s14 = scalar_lea.hbm %s15294_s12, 64 }
 0x29d   : > { %p13052_p6 = scmp.ne.s32.totalorder %s15294_s12, %s13051_s14  ;;  %p13058_p10 = scmp.lt.u32.totalorder %s13051_s14, %s15294_s12 }
 0x29f   : > { %p13054_p5 = pnand %p13052_p6, %p13701_p0 }
 0x2a1   : > { %p13055_p9 = pneg %p13054_p5 }
 0x2a3   : > { %p13060_p13 = pnand %p13058_p10, %p13055_p9 }
 0x2a5   : > { %13063 = shalt.err (!%p13060_p13)
}
 0x2a6   : > { %s13064_s9 = scalar_lea.vmem %s13993_s2, 64  ;;  %p13072_p4 = scmp.lt.s32.totalorder %s13993_s2, %s13993_s2 }
 0x2a7   : > { %p13065_p1 = scmp.ne.s32.totalorder %s13993_s2, %s13064_s9  ;;  %p13073_p7 = scmp.lt.s32.totalorder %s13064_s9, %s13064_s9 }
 0x2a9   : > { %p13067_p2 = pnand %p13065_p1, %p13701_p0  ;;  %p13074_p8 = por %p13073_p7, %p13072_p4 }
 0x2ab   : > { %p13068_p3 = pneg %p13067_p2 }
 0x2ad   : > { %p13075_p11 = pnand %p13074_p8, %p13068_p3 }
 0x2af   : > { %13078 = shalt.err (!%p13075_p11)
}
 0x2b0   : > { %s15295_s21 = smov 2   ;;  %s15296_s23 = smov 32  }
 0x2b1   : > { %s15297_s13 = sld [smem:[#allocation86_spill]]  ;;  %s13418_s1 = smov [#allocation34]  }
 0x2b2   : > { %11581 = dma.hbm_to_vmem [thread:$0]  (!%p13693_p12), %s15294_s12, 64, %s13993_s2, [#allocation30], %s15296_s23, %s15296_s23, %s15295_s21  }
 0x2b3   : > { %s1264_s14 = sshll.u32 %s13418_s1, 4  ;;  %s13419_s4 = smov [#allocation37]   ;;  %s1265_s14 = int_to_ptr.vmem [resolvable:$true] %s1264_s14 }
 0x2b4   : > { %s1290_s5 = sshll.u32 %s13419_s4, 4  ;;  %s14026_s5 = int_to_ptr.vmem [resolvable:$true] %s1290_s5 }
 0x2b7   : > { %s13079_s9 = scalar_lea.hbm %s15297_s13, 32 }
 0x2b8   : > { %p13080_p6 = scmp.ne.s32.totalorder %s15297_s13, %s13079_s9  ;;  %p13086_p10 = scmp.lt.u32.totalorder %s13079_s9, %s15297_s13 }
 0x2ba   : > { %p13082_p5 = pnand %p13080_p6, %p13701_p0 }
 0x2bc   : > { %p13083_p9 = pneg %p13082_p5 }
 0x2be   : > { %p13088_p13 = pnand %p13086_p10, %p13083_p9 }
 0x2c0   : > { %13091 = shalt.err (!%p13088_p13)
}
 0x2c1   : > { %s13092_s6 = scalar_lea.vmem %s1265_s14, 32  ;;  %p13100_p4 = scmp.lt.s32.totalorder %s1265_s14, %s1265_s14 }
 0x2c2   : > { %p13093_p1 = scmp.ne.s32.totalorder %s1265_s14, %s13092_s6  ;;  %p13101_p7 = scmp.lt.s32.totalorder %s13092_s6, %s13092_s6 }
 0x2c4   : > { %p13095_p2 = pnand %p13093_p1, %p13701_p0  ;;  %p13102_p8 = por %p13101_p7, %p13100_p4 }
 0x2c6   : > { %p13096_p3 = pneg %p13095_p2 }
 0x2c8   : > { %p13103_p11 = pnand %p13102_p8, %p13096_p3 }
 0x2ca   : > { %13106 = shalt.err (!%p13103_p11)
}
 0x2cb   : > { %s15298_s4 = sld [smem:[#allocation87_spill]] }
 0x2cc   : > { %11587 = dma.hbm_to_vmem [thread:$0]  (!%p13693_p12), %s15297_s13, 32, %s1265_s14, [#allocation33], %s15277_s11, %s15277_s11, %s15276_s26  }
 0x2d1   : > { %s13107_s2 = scalar_lea.hbm %s15298_s4, 32 }
 0x2d2   : > { %p13108_p6 = scmp.ne.s32.totalorder %s15298_s4, %s13107_s2  ;;  %p13114_p10 = scmp.lt.u32.totalorder %s13107_s2, %s15298_s4 }
 0x2d4   : > { %p13110_p5 = pnand %p13108_p6, %p13701_p0 }
 0x2d6   : > { %p13111_p9 = pneg %p13110_p5 }
 0x2d8   : > { %p13116_p13 = pnand %p13114_p10, %p13111_p9 }
 0x2da   : > { %13119 = shalt.err (!%p13116_p13)
}
 0x2db   : > { %s13120_s6 = scalar_lea.vmem %s14026_s5, 32  ;;  %p13128_p4 = scmp.lt.s32.totalorder %s14026_s5, %s14026_s5 }
 0x2dc   : > { %p13121_p1 = scmp.ne.s32.totalorder %s14026_s5, %s13120_s6  ;;  %p13129_p7 = scmp.lt.s32.totalorder %s13120_s6, %s13120_s6 }
 0x2de   : > { %p13123_p2 = pnand %p13121_p1, %p13701_p0  ;;  %p13130_p8 = por %p13129_p7, %p13128_p4 }
 0x2e0   : > { %p13124_p3 = pneg %p13123_p2 }
 0x2e2   : > { %p13131_p11 = pnand %p13130_p8, %p13124_p3 }
 0x2e4   : > { %13134 = shalt.err (!%p13131_p11)
}
 0x2e5   : > { %s15299_s21 = sld [smem:[#allocation90_spill]]  ;;  %s13420_s23 = smov [#allocation40]  }
 0x2e6   : > { %11593 = dma.hbm_to_vmem [thread:$0]  (!%p13693_p12), %s15298_s4, 32, %s14026_s5, [#allocation36], %s15277_s11, %s15277_s11, %s15276_s26  }
 0x2e7   : > { %s1319_s1 = sshll.u32 %s13420_s23, 4  ;;  %s13421_s14 = smov [#allocation43]   ;;  %s1320_s1 = int_to_ptr.vmem [resolvable:$true] %s1319_s1 }
 0x2e8   : > { %s1348_s9 = sshll.u32 %s13421_s14, 4  ;;  %s14059_s9 = int_to_ptr.vmem [resolvable:$true] %s1348_s9 }
 0x2eb   : > { %s13135_s2 = scalar_lea.hbm %s15299_s21, 4096 }
 0x2ec   : > { %p13136_p6 = scmp.ne.s32.totalorder %s15299_s21, %s13135_s2  ;;  %p13142_p10 = scmp.lt.u32.totalorder %s13135_s2, %s15299_s21 }
 0x2ee   : > { %p13138_p5 = pnand %p13136_p6, %p13701_p0 }
 0x2f0   : > { %p13139_p9 = pneg %p13138_p5 }
 0x2f2   : > { %p13144_p13 = pnand %p13142_p10, %p13139_p9 }
 0x2f4   : > { %13147 = shalt.err (!%p13144_p13)
}
 0x2f5   : > { %s13148_s6 = scalar_lea.vmem %s1320_s1, 4096  ;;  %p13156_p4 = scmp.lt.s32.totalorder %s1320_s1, %s1320_s1 }
 0x2f6   : > { %p13149_p1 = scmp.ne.s32.totalorder %s1320_s1, %s13148_s6  ;;  %p13157_p7 = scmp.lt.s32.totalorder %s13148_s6, %s13148_s6 }
 0x2f8   : > { %p13151_p2 = pnand %p13149_p1, %p13701_p0  ;;  %p13158_p8 = por %p13157_p7, %p13156_p4 }
 0x2fa   : > { %p13152_p3 = pneg %p13151_p2 }
 0x2fc   : > { %p13159_p11 = pnand %p13158_p8, %p13152_p3 }
 0x2fe   : > { %13162 = shalt.err (!%p13159_p11)
}
 0x2ff   : > { %s15300_s5 = sld [smem:[#allocation93_spill]] }
 0x300   : > { %11599 = dma.hbm_to_vmem [thread:$0]  (!%p13693_p12), %s15299_s21, 4096, %s1320_s1, [#allocation39], %s15279_s7, %s15279_s7, %s15278_s22  }
 0x305   : > { %s13163_s23 = scalar_lea.hbm %s15300_s5, 32 }
 0x306   : > { %p13164_p6 = scmp.ne.s32.totalorder %s15300_s5, %s13163_s23  ;;  %p13170_p10 = scmp.lt.u32.totalorder %s13163_s23, %s15300_s5 }
 0x308   : > { %p13166_p5 = pnand %p13164_p6, %p13701_p0 }
 0x30a   : > { %p13167_p9 = pneg %p13166_p5 }
 0x30c   : > { %p13172_p13 = pnand %p13170_p10, %p13167_p9 }
 0x30e   : > { %13175 = shalt.err (!%p13172_p13)
}
 0x30f   : > { %s13176_s14 = scalar_lea.vmem %s14059_s9, 32  ;;  %p13184_p4 = scmp.lt.s32.totalorder %s14059_s9, %s14059_s9 }
 0x310   : > { %p13177_p1 = scmp.ne.s32.totalorder %s14059_s9, %s13176_s14  ;;  %p13185_p7 = scmp.lt.s32.totalorder %s13176_s14, %s13176_s14 }
 0x312   : > { %p13179_p2 = pnand %p13177_p1, %p13701_p0  ;;  %p13186_p8 = por %p13185_p7, %p13184_p4 }
 0x314   : > { %p13180_p3 = pneg %p13179_p2 }
 0x316   : > { %p13187_p11 = pnand %p13186_p8, %p13180_p3 }
 0x318   : > { %13190 = shalt.err (!%p13187_p11)
}
 0x319   : > { %11605 = dma.hbm_to_vmem [thread:$0]  (!%p13693_p12), %s15300_s5, 32, %s14059_s9, [#allocation42], %s15277_s11, %s15277_s11, %s15276_s26  }
 0x31a   : > { %s13422_s22 = smov [#allocation46]   ;;  %s13191_s1 = scalar_lea.hbm %s13624_s17, 32 }
 0x31b   : > { %s1375_s7 = sshll.u32 %s13422_s22, 4  ;;  %p13192_p6 = scmp.ne.s32.totalorder %s13624_s17, %s13191_s1  ;;  %s1376_s7 = int_to_ptr.vmem [resolvable:$true] %s1375_s7 }
 0x31c   : > { %p13198_p10 = scmp.lt.u32.totalorder %s13191_s1, %s13624_s17 }
 0x31d   : > { %p13194_p5 = pnand %p13192_p6, %p13701_p0 }
 0x31f   : > { %p13195_p9 = pneg %p13194_p5 }
 0x321   : > { %p13200_p13 = pnand %p13198_p10, %p13195_p9 }
 0x323   : > { %13203 = shalt.err (!%p13200_p13)
}
 0x324   : > { %s13204_s2 = scalar_lea.vmem %s1376_s7, 32  ;;  %p13212_p4 = scmp.lt.s32.totalorder %s1376_s7, %s1376_s7 }
 0x325   : > { %p13205_p1 = scmp.ne.s32.totalorder %s1376_s7, %s13204_s2  ;;  %p13213_p7 = scmp.lt.s32.totalorder %s13204_s2, %s13204_s2 }
 0x327   : > { %p13207_p2 = pnand %p13205_p1, %p13701_p0  ;;  %p13214_p8 = por %p13213_p7, %p13212_p4 }
 0x329   : > { %p13208_p3 = pneg %p13207_p2 }
 0x32b   : > { %p13215_p11 = pnand %p13214_p8, %p13208_p3 }
 0x32d   : > { %13218 = shalt.err (!%p13215_p11)
}
 0x32e   : > { %11611 = dma.hbm_to_vmem [thread:$0]  (!%p13693_p12), %s13624_s17, 32, %s1376_s7, [#allocation45]  }
 0x32f   : > { %p15301_p6 = scmp.ne.s32.totalorder %s15273_s18, 0 }
 0x330   : > { %p15302_p5 = scmp.eq.s32.totalorder (!%p15301_p6), %s13657_s28, 0 }
 0x331   : > { %1416 = sbr.rel (%p15301_p6) target bundleno = 18751 (0x493f), region = 172 }
 0x338   : > { %13264 = dma.done.wait (%p15302_p5), [#allocation3], 96   ;;  %p15303_p9 = pmov %p15302_p5 }
 0x339   : > { %p15304_p0 = pmov %p15302_p5 }
 0x33a   : > { %13266 = vsyncadd (%p15303_p9), [#allocation3], 4294967200 }
 0x33b   : > { %13268 = dma.done.wait (%p15304_p0), [#allocation6], 2080   ;;  %p15305_p10 = pmov %p15304_p0 }
 0x33c   : > { %p15306_p13 = pmov %p15304_p0 }
 0x33d   : > { %13270 = vsyncadd (%p15305_p10), [#allocation6], 4294965216 }
 0x33e   : > { %13272 = dma.done.wait (%p15306_p13), [#allocation9], 64   ;;  %p15307_p12 = pmov %p15304_p0 }
 0x33f   : > { %p15308_p1 = pmov %p15304_p0 }
 0x340   : > { %13274 = vsyncadd (%p15307_p12), [#allocation9], 4294967232 }
 0x341   : > { %13276 = dma.done.wait (%p15308_p1), [#allocation12], 4160   ;;  %p15309_p2 = pmov %p15304_p0 }
 0x342   : > { %p15310_p3 = pmov %p15304_p0 }
 0x343   : > { %13278 = vsyncadd (%p15309_p2), [#allocation12], 4294963136 }
 0x344   : > { %13280 = dma.done.wait (%p15310_p3), [#allocation15], 64   ;;  %p15311_p4 = pmov %p15304_p0 }
 0x345   : > { %p15312_p7 = pmov %p15304_p0 }
 0x346   : > { %13282 = vsyncadd (%p15311_p4), [#allocation15], 4294967232 }
 0x347   : > { %13284 = dma.done.wait (%p15312_p7), [#allocation18], 6176   ;;  %p15313_p8 = pmov %p15304_p0 }
 0x348   : > { %p15314_p11 = pmov %p15304_p0 }
 0x349   : > { %13286 = vsyncadd (%p15313_p8), [#allocation18], 4294961120 }
 0x34a   : > { %13288 = dma.done.wait (%p15314_p11), [#allocation21], 2144   ;;  %p15315_p6 = pmov %p15304_p0 }
 0x34b   : > { %p15316_p5 = pmov %p15304_p0 }
 0x34c   : > { %13290 = vsyncadd (%p15315_p6), [#allocation21], 4294965152 }
 0x34d   : > { %13292 = dma.done.wait (%p15316_p5), [#allocation24], 64   ;;  %p15317_p9 = pmov %p15304_p0 }
 0x34f   : > { %13294 = vsyncadd (%p15317_p9), [#allocation24], 4294967232 }
 0x350   : > { %13296 = dma.done.wait (%p15304_p0), [#allocation27], 64   ;;  %p15318_p10 = pmov %p15304_p0 }
 0x351   : > { %p15319_p13 = pmov %p15304_p0 }
 0x352   : > { %13298 = vsyncadd (%p15318_p10), [#allocation27], 4294967232 }
 0x353   : > { %13300 = dma.done.wait (%p15319_p13), [#allocation30], 4160   ;;  %p15320_p12 = pmov %p15304_p0 }
 0x354   : > { %p15321_p1 = pmov %p15304_p0 }
 0x355   : > { %13302 = vsyncadd (%p15320_p12), [#allocation30], 4294963136 }
 0x356   : > { %13304 = dma.done.wait (%p15321_p1), [#allocation33], 2080   ;;  %p15322_p2 = pmov %p15304_p0 }
 0x357   : > { %p15323_p3 = pmov %p15304_p0 }
 0x358   : > { %13306 = vsyncadd (%p15322_p2), [#allocation33], 4294965216 }
 0x359   : > { %13308 = dma.done.wait (%p15323_p3), [#allocation36], 64   ;;  %p15324_p4 = pmov %p15304_p0 }
 0x35a   : > { %p15325_p7 = pmov %p15304_p0 }
 0x35b   : > { %13310 = vsyncadd (%p15324_p4), [#allocation36], 4294967232 }
 0x35c   : > { %13312 = dma.done.wait (%p15325_p7), [#allocation39], 8192   ;;  %p15326_p8 = pmov %p15304_p0 }
 0x35d   : > { %p15327_p11 = pmov %p15304_p0 }
 0x35e   : > { %13314 = vsyncadd (%p15326_p8), [#allocation39], 4294959104 }
 0x35f   : > { %13316 = dma.done.wait (%p15327_p11), [#allocation42], 64   ;;  %p15328_p6 = pmov %p15304_p0 }
 0x360   : > { %p15329_p5 = pmov %p15304_p0 }
 0x361   : > { %13318 = vsyncadd (%p15328_p6), [#allocation42], 4294967232 }
 0x362   : > { %13320 = dma.done.wait (%p15329_p5), [#allocation45], 2080   ;;  %p15330_p9 = pmov %p15304_p0 }
 0x363   : > { %s15331_s16 = sld [smem:[#allocation68_spill]]  ;;  %v13423_v0 = vmov 0   ;;  %v13424_v1 = vmov 0.0   ;;  %p1639_p0 = scmp.lt.s32.totalorder %s13657_s28, 1  ;;  %vm13425_vm0 = vmmov 0   ;;  %v1772_v29 = vlaneseq }
 0x364   : > { %13322 = vsyncadd (%p15330_p9), [#allocation45], 4294965216  ;;  %1947 = vmatprep.mubr.bf16.mxu0 %v13423_v0  ;;  %11794 = vset.pattern.permute.xlu0 %v13423_v0  ;;  %s15332_s10 = sld [smem:[#allocation64_spill]]  ;;  %v1698_v32 = vld [vmem:[#allocation2] sm:$0x7]  ;;  %vm2010_vm1 = vcmask 261120  }
 0x365   : > { %10806 = vmatprep.subr.bf16.mxu1 %v13424_v1  ;;  %s14179_s18 = scalar_select %p1639_p0, %s13657_s28, 1  ;;  %10822 = vmatprep.mubr.msk.bf16.mxu1 %vm13425_vm0, %v13424_v1  ;;  %v14217_v30 = vshrl.u32 %v1772_v29, 7  ;;  %v13427_v59 = vmov -1e+09   ;;  %vm2058_vm3 = vcmask 130048   ;;  %vm5034_vm5 = vcmask 64512  }
 0x366   : > { %s13426_s9 = smov 96   ;;  %s15333_s6 = sld [smem:[#allocation66_spill]]  ;;  %vm5049_vm6 = vcmask 1043456  }
 0x367   : > { %s10494_s26 = sshll.u32 %s14179_s18, 4  ;;  %v14220_v31 = vsub.s32 0, %v14217_v30  ;;  %v14223_v33 = vsub.s32 1, %v14217_v30  ;;  %v14243_v49 = vsub.s32 2, %v14217_v30  ;;  %s13428_s14 = smov 64  }
 0x368   : > { %s13429_s22 = smov 32   ;;  %s15334_s7 = sld [smem:[#allocation72_spill]] }
 0x369   : > { %v11795_v2 = vld [vmem:[%s15331_s16 + $0x4] ss:$12 sps:$4 sm:$0xff]   ;;  %v11797_v3 = vld [vmem:[%s15331_s16] ss:$12 sps:$4 sm:$0xff]   ;;  %v11798_v4 = vld [vmem:[%s15331_s16 + $0x1c] ss:$12 sps:$4 sm:$0xff]   ;;  %v1775_v34 = vrot.slane %v1698_v32, %v14220_v31  ;;  %v1779_v36 = vrot.slane %v1698_v32, %v14223_v33  ;;  %v1783_v50 = vrot.slane %v1698_v32, %v14243_v49 }
 0x36a   : > { %1915 = vmatprep.subr.bf16.mxu0 %v11795_v2  ;;  %v11800_v5 = vld [vmem:[%s15331_s16 + $0x18] ss:$12 sps:$4 sm:$0xff]   ;;  %v11801_v6 = vld [vmem:[%s15331_s16 + $0x34] ss:$12 sps:$4 sm:$0xff]   ;;  %v11803_v7 = vld [vmem:[%s15331_s16 + $0x30] ss:$12 sps:$4 sm:$0xff]   ;;  %s14194_s11 = scalar_lea.vmem %s15332_s10, %s10494_s26 }
 0x36b   : > { %1916 = vmatpush1.bf16.msra.mxu0 %v11797_v3  ;;  %v11804_v8 = vld [vmem:[%s15331_s16 + $0x4c] ss:$12 sps:$4 sm:$0xff]   ;;  %v11806_v9 = vld [vmem:[%s15331_s16 + $0x48] ss:$12 sps:$4 sm:$0xff]   ;;  %v11807_v10 = vld [vmem:[%s15331_s16 + $0x64] ss:$12 sps:$4 sm:$0xff]  }
 0x36c   : > { %1917 = vmatprep.subr.bf16.mxu0 %v11798_v4  ;;  %v11819_v11 = vld [vmem:[%s15331_s16 + $0x8] ss:$12 sps:$4 sm:$0xff]   ;;  %v11820_v12 = vld [vmem:[%s15331_s16 + $0x20] ss:$12 sps:$4 sm:$0xff]   ;;  %v11821_v15 = vld [vmem:[%s15331_s16 + $0x38] ss:$12 sps:$4 sm:$0xff]   ;;  %s1650_s23 = scalar_lea.vmem %s15333_s6, %s14179_s18 }
 0x36d   : > { %10807 = vmatpush3.bf16.msra.mxu1 %v11819_v11  ;;  %v11809_v13 = vld [vmem:[%s15331_s16 + $0x60] ss:$12 sps:$4 sm:$0xff]   ;;  %v11810_v14 = vld [vmem:[%s15331_s16 + $0x7c] ss:$12 sps:$4 sm:$0xff]   ;;  %v11812_v16 = vld [vmem:[%s15331_s16 + $0x78] ss:$12 sps:$4 sm:$0xff]  }
 0x36e   : > { %10808 = vmatprep.subr.bf16.mxu1 %v13424_v1  ;;  %v11813_v17 = vld [vmem:[%s15331_s16 + $0x94] ss:$12 sps:$4 sm:$0xff]   ;;  %v11822_v18 = vld [vmem:[%s15331_s16 + $0x50] ss:$12 sps:$4 sm:$0xff]   ;;  %v11816_v20 = vld [vmem:[%s15331_s16 + $0xac] ss:$12 sps:$4 sm:$0xff]  }
 0x36f   : > { %1918 = vmatpush1.bf16.msra.mxu0 %v11800_v5  ;;  %v11815_v19 = vld [vmem:[%s15331_s16 + $0x90] ss:$12 sps:$4 sm:$0xff]   ;;  %v11823_v21 = vld [vmem:[%s15331_s16 + $0x68] ss:$12 sps:$4 sm:$0xff]   ;;  %v1660_v23 = vld [vmem:[%s14194_s11] sm:$0xff]  ;;  %s15335_s1 = sld [smem:[#allocation65_spill]] }
 0x370   : > { %1919 = vmatprep.subr.bf16.mxu0 %v11801_v6  ;;  %v11818_v22 = vld [vmem:[%s15331_s16 + $0xa8] ss:$12 sps:$4 sm:$0xff]   ;;  %v11824_v25 = vld [vmem:[%s15331_s16 + $0x80] ss:$12 sps:$4 sm:$0xff]   ;;  %v11825_v27 = vld [vmem:[%s15331_s16 + $0x98] ss:$12 sps:$4 sm:$0xff]  }
 0x371   : > { %10809 = vmatpush3.bf16.msra.mxu1 %v11820_v12  ;;  %v1661_v24 = vld [vmem:[%s14194_s11 + $0x8] sm:$0xff]  ;;  %v11826_v28 = vld [vmem:[%s15331_s16 + $0xb0] ss:$12 sps:$4 sm:$0xff]   ;;  %v1663_v58 = vld [vmem:[%s1650_s23] sm:$0x1]  ;;  %s14568_s2 = sshll.u32 %s14179_s18, 3 }
 0x372   : > { %10810 = vmatprep.subr.bf16.mxu1 %v13424_v1  ;;  %v1770_v26 = vpack.c.bf16 %v1661_v24, %v1660_v23  ;;  %vm1664_vm2 = vcmp.gt.s32.totalorder %v1663_v58, 0  ;;  %s15336_s18 = sld [smem:[#allocation82_spill]]  ;;  %s15337_s26 = sld [smem:[#allocation89_spill]] }
 0x373   : > { %1920 = vmatpush1.bf16.msra.mxu0 %v11803_v7  ;;  %v1665_v60 = vsel %vm1664_vm2, 0.0, %v13427_v59  ;;  %s15339_s6 = sld [smem:[#allocation91_spill]]  ;;  %s1630_s23 = sand.u32 1, %s13333_s0  }
 0x374   : > { %1921 = vmatprep.subr.bf16.mxu0 %v11804_v8  ;;  %v14254_v61 = vrot.slane %v1665_v60, %v14220_v31  ;;  %p15341_p13 = scmp.ne.s32.totalorder %s15270_s15, 0  ;;  %s13430_s4 = smov [#allocation47]  }
 0x375   : > { %10811 = vmatpush3.bf16.msra.mxu1 %v11821_v15  ;;  %s1647_s10 = scalar_lea.vmem %s15335_s1, %s14568_s2  ;;  %s13223_s5 = sshll.u32 %s13430_s4, 4  ;;  %s13224_s5 = int_to_ptr.vmem [resolvable:$false] %s13223_s5 }
 0x376   : > { %10812 = vmatprep.subr.bf16.mxu1 %v13424_v1 }
 0x377   : > { %1922 = vmatpush1.bf16.msra.mxu0 %v11806_v9 }
 0x378   : > { %1923 = vmatprep.subr.bf16.mxu0 %v11807_v10 }
 0x379   : > { %10813 = vmatpush3.bf16.msra.mxu1 %v11822_v18 }
 0x37a   : > { %10814 = vmatprep.subr.bf16.mxu1 %v13424_v1 }
 0x37b   : > { %1924 = vmatpush1.bf16.msra.mxu0 %v11809_v13 }
 0x37c   : > { %1925 = vmatprep.subr.bf16.mxu0 %v11810_v14 }
 0x37d   : > { %10815 = vmatpush3.bf16.msra.mxu1 %v11823_v21 }
 0x37e   : > { %10816 = vmatprep.subr.bf16.mxu1 %v13424_v1 }
 0x37f   : > { %1926 = vmatpush1.bf16.msra.mxu0 %v11812_v16 }
 0x380   : > { %1927 = vmatprep.subr.bf16.mxu0 %v11813_v17 }
 0x381   : > { %10817 = vmatpush3.bf16.msra.mxu1 %v11824_v25 }
 0x382   : > { %10818 = vmatprep.subr.bf16.mxu1 %v13424_v1 }
 0x383   : > { %1928 = vmatpush1.bf16.msra.mxu0 %v11815_v19 }
 0x384   : > { %1929 = vmatprep.subr.bf16.mxu0 %v11816_v20 }
 0x385   : > { %10819 = vmatpush3.bf16.msra.mxu1 %v11825_v27 }
 0x386   : > { %10820 = vmatprep.subr.bf16.mxu1 %v13424_v1 }
 0x387   : > { %1930 = vmatpush1.bf16.msra.mxu0 %v11818_v22 }
 0x388   : > { %10850 = vmatprep.subr.bf16.mxu0 %v13424_v1 }
 0x389   : > { %10821 = vmatpush3.bf16.msra.mxu1 %v11826_v28 }
 0x38a   : > { %1948 = vmatmul.mubr.bf16.vlgmr.msra.gmra.mrb[0].mxu0 %v1770_v26  ;;  %10826 = vmatprep.subr.bf16.mxu1 %v13424_v1 }
 0x38b   : > { %10854 = vmatprep.mubr.msk.bf16.mxu0 %vm13425_vm0, %v13424_v1 }
 0x38c   : > { %10823 = vmatmul.mubr.bf16.vlgmr.msra.gmra.mrb[0].mxu1 %v1770_v26 }
 0x38d   : > { %10828 = vmatprep.mubr.msk.bf16.mxu1 %vm13425_vm0, %v13424_v1 }
 0x45d   : > { %v1949_v35 = vpop.f32.mrb[0].mxu0 }
 0x45e   : > { %v1950_v37 = vadd.f32 %v1949_v35, %v1775_v34  ;;  %v1951_v38 = vpop.f32.mrb[1].mxu0 }
 0x45f   : > { %v1953_v39 = vpop.f32.mrb[2].mxu0  ;;  %v1952_v42 = vadd.f32 %v1951_v38, %v1779_v36  ;;  %v1992_v51 = vpop.f32.mrb[0].mxu1 }
 0x460   : > { %v1954_v40 = vadd.f32 %v1953_v39, %v1775_v34  ;;  %v1955_v41 = vpop.f32.mrb[3].mxu0  ;;  %v1999_v44 = vmul.f32 0.17677669, %v1950_v37  ;;  %v1993_v52 = vadd.f32 %v1992_v51, %v1783_v50  ;;  %v10824_v53 = vpop.f32.mrb[1].mxu1 }
 0x461   : > { %v1956_v43 = vadd.f32 %v1955_v41, %v1779_v36  ;;  %v1995_v54 = vpop.f32.mrb[2].mxu1  ;;  %v11827_v53 = vld [vmem:[#allocation5] sm:$0xff]  }
 0x462   : > { %v2000_v45 = vmul.f32 0.17677669, %v1954_v40  ;;  %v1996_v55 = vadd.f32 %v1995_v54, %v1783_v50  ;;  %v10825_v56 = vpop.f32.mrb[3].mxu1  ;;  %v11828_v54 = vld [vmem:[#allocation5 + $0x10] sm:$0xff]  }
 0x463   : > { %v14227_v46 = vpack.c.bf16 %v1956_v43, %v1952_v42  ;;  %10851 = vmatpush3.bf16.msra.mxu0 %v11828_v54  ;;  %v11830_v56 = vld [vmem:[#allocation5 + $0x18] sm:$0xff]  }
 0x464   : > { %v14229_v47 = vpack.c.bf16 %v2000_v45, %v1999_v44  ;;  %v14246_v57 = vpack.c.bf16 %v1996_v55, %v1993_v52  ;;  %v11829_v55 = vld [vmem:[#allocation5 + $0x8] sm:$0xff]   ;;  %10852 = vmatprep.subr.bf16.mxu0 %v13424_v1 }
 0x465   : > { %2131 = vrot.lane.b32.xlu1 %v14227_v46, %s13426_s9  ;;  %v2015_v48 = vsel %vm2010_vm1, %v14227_v46, 0 }
 0x466   : > { %10827 = vmatpush3.bf16.xpose.msra.mxu1 %v2015_v48 }
 0x467   : > { %10832 = vmatprep.subr.bf16.mxu1 %v13424_v1  ;;  %10853 = vmatpush3.bf16.msra.mxu0 %v11830_v56 }
 0x468   : > { %10866 = vmatprep.subr.bf16.mxu0 %v13424_v1 }
 0x469   : > { %2128 = vrot.lane.b32.xlu1 %v14229_v47, %s13426_s9 }
 0x46d   : > { %10829 = vmatmul.mubr.msk.bf16.vlgmr.msra.gmra.mrb[4].mxu1 %vm2010_vm1, %v14229_v47 }
 0x46e   : > { %10834 = vmatprep.mubr.msk.bf16.mxu1 %vm13425_vm0, %v13424_v1  ;;  %10833 = vmatpush3.bf16.msra.mxu1 %v14246_v57 }
 0x46f   : > { %10838 = vmatprep.subr.bf16.mxu1 %v13424_v1 }
 0x4d7   : > { %v2132_v16 = vpop.permute.xlu1 %2131 }
 0x4d8   : > { %v2137_v18 = vsel %vm2010_vm1, %v2132_v16, 0 }
 0x4db   : > { %v2129_v19 = vpop.permute.xlu1 %2128 }
 0x540   : > { %v2051_v62 = vpop.f32.mrb[4].mxu1 }
 0x541   : > { %v2052_v63 = vadd.f32 %v2051_v62, %v14254_v61  ;;  %v10830_v2 = vpop.f32.mrb[5].mxu1 }
 0x542   : > { %v2054_v3 = vpop.f32.mrb[6].mxu1 }
 0x543   : > { %v2055_v4 = vadd.f32 %v2054_v3, %v14254_v61  ;;  %v10831_v5 = vpop.f32.mrb[7].mxu1  ;;  %v2059_v6 = vsel %vm2058_vm3, %v2052_v63, -inf }
 0x544   : > { %2060 = vmax.xlane.f32.xlu0 %v2059_v6 }
 0x545   : > { %v2062_v7 = vsel %vm2058_vm3, %v2055_v4, -inf }
 0x548   : > { %2063 = vmax.xlane.f32.xlu0 %v2062_v7 }
 0x5d1   : > { %v2061_v8 = vpop.xlane.xlu0 %2060 }
 0x5d2   : > { %v2065_v9 = vsub.f32 %v2052_v63, %v2061_v8 }
 0x5d4   : > { %v2067_v10 = vmul.f32 1.442695, %v2065_v9 }
 0x5d5   : > { %v2064_v11 = vpop.xlane.xlu0 %2063 }
 0x5d6   : > { %v2066_v12 = vsub.f32 %v2055_v4, %v2064_v11  ;;  %12219 = vpow2.f32 %v2067_v10 }
 0x5d8   : > { %v2069_v13 = vmul.f32 1.442695, %v2066_v12 }
 0x5da   : > { %12221 = vpow2.f32 %v2069_v13 }
 0x5e0   : > { %v12220_v14 = vpop.eup %12219 }
 0x5e1   : > { %v2071_v52 = vsel %vm2058_vm3, %v12220_v14, 0.0 }
 0x5e4   : > { %v12222_v15 = vpop.eup %12221 }
 0x5e5   : > { %v2079_v17 = vpack.c.bf16 %v12222_v15, %v12220_v14  ;;  %v2074_v51 = vsel %vm2058_vm3, %v12222_v15, 0.0 }
 0x5e7   : > { %10835 = vmatmul.mubr.msk.bf16.vlgmr.msra.gmra.mrb[8].mxu1 %vm2058_vm3, %v2079_v17 }
 0x5e8   : > { %10839 = vmatpush3.bf16.xpose.msra.mxu1 %v2137_v18  ;;  %10840 = vmatprep.mubr.msk.bf16.mxu1 %vm13425_vm0, %v13424_v1 }
 0x5e9   : > { %10844 = vmatprep.subr.bf16.mxu1 %v13424_v1 }
 0x5ef   : > { %10841 = vmatmul.mubr.msk.bf16.vlgmr.msra.gmra.mrb[12].mxu1 %vm2010_vm1, %v2129_v19 }
 0x5f0   : > { %10846 = vmatprep.mubr.msk.bf16.mxu1 %vm13425_vm0, %v13424_v1 }
 0x6ba   : > { %v14268_v20 = vpop.f32.mrb[8].mxu1 }
 0x6bb   : > { %v10836_v21 = vpop.f32.mrb[9].mxu1 }
 0x6bc   : > { %v14270_v22 = vpop.f32.mrb[10].mxu1 }
 0x6bd   : > { %v10837_v23 = vpop.f32.mrb[11].mxu1 }
 0x6c2   : > { %v2173_v24 = vpop.f32.mrb[12].mxu1 }
 0x6c3   : > { %v2174_v25 = vadd.f32 %v2173_v24, %v14254_v61  ;;  %v10842_v26 = vpop.f32.mrb[13].mxu1 }
 0x6c4   : > { %v2176_v27 = vpop.f32.mrb[14].mxu1 }
 0x6c5   : > { %v2177_v28 = vadd.f32 %v2176_v27, %v14254_v61  ;;  %v10843_v32 = vpop.f32.mrb[15].mxu1  ;;  %v2180_v34 = vsel %vm2058_vm3, %v2174_v25, -inf }
 0x6c6   : > { %2181 = vmax.xlane.f32.xlu0 %v2180_v34 }
 0x6c7   : > { %v2183_v35 = vsel %vm2058_vm3, %v2177_v28, -inf }
 0x6c8   : > { %2184 = vmax.xlane.f32.xlu1 %v2183_v35 }
 0x6dc   : > { %2202 = vrot.lane.b32.xlu0 %v14246_v57, %s13426_s9 }
 0x753   : > { %v2182_v36 = vpop.xlane.xlu0 %2181 }
 0x754   : > { %v2186_v37 = vsub.f32 %v2174_v25, %v2182_v36 }
 0x755   : > { %v2185_v38 = vpop.xlane.xlu1 %2184 }
 0x756   : > { %v2188_v39 = vmul.f32 1.442695, %v2186_v37  ;;  %v2187_v40 = vsub.f32 %v2177_v28, %v2185_v38 }
 0x757   : > { %v2203_v41 = vpop.permute.xlu0 %2202 }
 0x758   : > { %12223 = vpow2.f32 %v2188_v39  ;;  %v2190_v42 = vmul.f32 1.442695, %v2187_v40  ;;  %10845 = vmatpush3.bf16.msra.mxu1 %v2203_v41 }
 0x759   : > { %10858 = vmatprep.subr.bf16.mxu1 %v13424_v1 }
 0x75a   : > { %12225 = vpow2.f32 %v2190_v42 }
 0x762   : > { %v12224_v43 = vpop.eup %12223 }
 0x763   : > { %v2192_v44 = vsel %vm2058_vm3, %v12224_v43, 0.0 }
 0x764   : > { %v12226_v45 = vpop.eup %12225  ;;  %2193 = vadd.xlane.f32.xlu0 %v2192_v44 }
 0x765   : > { %v2195_v48 = vsel %vm2058_vm3, %v12226_v45, 0.0  ;;  %v2200_v50 = vpack.c.bf16 %v12226_v45, %v12224_v43 }
 0x766   : > { %2196 = vadd.xlane.f32.xlu1 %v2195_v48 }
 0x767   : > { %10847 = vmatmul.mubr.msk.bf16.vlgmr.msra.gmra.mrb[16].mxu1 %vm2058_vm3, %v2200_v50 }
 0x768   : > { %10862 = vmatprep.mubr.msk.bf16.mxu1 %vm13425_vm0, %v13424_v1  ;;  %10859 = vmatpush3.bf16.msra.mxu1 %v11827_v53 }
 0x769   : > { %10860 = vmatprep.subr.bf16.mxu1 %v13424_v1 }
 0x76c   : > { %10861 = vmatpush3.bf16.msra.mxu1 %v11829_v55 }
 0x76d   : > { %10872 = vmatprep.subr.bf16.mxu1 %v13424_v1 }
 0x777   : > { %2366 = vrot.lane.b32.xlu1 %v14227_v46, %s13428_s14 }
 0x77a   : > { %2364 = vrot.lane.b32.xlu0 %v14229_v47, %s13428_s14 }
 0x799   : > { %2075 = vadd.xlane.f32.xlu0 %v2074_v51 }
 0x79b   : > { %2072 = vadd.xlane.f32.xlu1 %v2071_v52 }
 0x7af   : > { %2546 = vrot.lane.b32.xlu0 %v14227_v46, %s13429_s22 }
 0x7f1   : > { %v2194_v58 = vpop.xlane.xlu0 %2193 }
 0x7f3   : > { %v2197_v60 = vpop.xlane.xlu1 %2196 }
 0x7f5   : > { %v2365_v62 = vpop.permute.xlu0 %2364 }
 0x7f7   : > { %v2367_v46 = vpop.permute.xlu1 %2366 }
 0x7f8   : > { %v2372_v17 = vsel %vm2010_vm1, %v2367_v46, 0 }
 0x826   : > { %v2076_v63 = vpop.xlane.xlu0 %2075 }
 0x827   : > { %12227 = vrcp.f32 %v2076_v63 }
 0x828   : > { %v2073_v2 = vpop.xlane.xlu1 %2072 }
 0x829   : > { %12229 = vrcp.f32 %v2073_v2 }
 0x82a   : > { %12231 = vrcp.f32 %v2194_v58  ;;  %v2547_v53 = vpop.permute.xlu0 %2546  ;;  %v11831_v58 = vld [vmem:[#allocation5 + $0x20] sm:$0xff]  }
 0x82b   : > { %12233 = vrcp.f32 %v2197_v60  ;;  %v2552_v55 = vsel %vm2010_vm1, %v2547_v53, 0  ;;  %v11832_v60 = vld [vmem:[#allocation5 + $0x28] sm:$0xff]  }
 0x831   : > { %v12228_v3 = vpop.eup %12227 }
 0x832   : > { %v2125_v5 = vmul.f32 %v12228_v3, %v14270_v22 }
 0x833   : > { %v12230_v4 = vpop.eup %12229 }
 0x834   : > { %v2124_v6 = vmul.f32 %v12230_v4, %v14268_v20  ;;  %v12232_v9 = vpop.eup %12231 }
 0x835   : > { %v12234_v11 = vpop.eup %12233 }
 0x836   : > { %v2126_v7 = vpack.c.bf16 %v2125_v5, %v2124_v6 }
 0x838   : > { %10863 = vmatmul.mubr.msk.bf16.vlgmr.msra.gmra.mrb[20].mxu1 %vm2010_vm1, %v2126_v7 }
 0x839   : > { %10874 = vmatprep.mubr.msk.bf16.mxu1 %vm13425_vm0, %v13424_v1 }
 0x83a   : > { %v2242_v8 = vpop.f32.mrb[16].mxu1 }
 0x83b   : > { %v10848_v10 = vpop.f32.mrb[17].mxu1  ;;  %v2249_v13 = vmul.f32 %v12232_v9, %v2242_v8 }
 0x83c   : > { %v2245_v12 = vpop.f32.mrb[18].mxu1 }
 0x83d   : > { %v2250_v14 = vmul.f32 %v12234_v11, %v2245_v12  ;;  %v10849_v15 = vpop.f32.mrb[19].mxu1 }
 0x83f   : > { %v2251_v16 = vpack.c.bf16 %v2250_v14, %v2249_v13 }
 0x841   : > { %10855 = vmatmul.mubr.msk.bf16.vlgmr.msra.gmra.mrb[4].mxu0 %vm2010_vm1, %v2251_v16 }
 0x842   : > { %10867 = vmatpush3.bf16.xpose.msra.mxu0 %v2372_v17  ;;  %10868 = vmatprep.mubr.msk.bf16.mxu0 %vm13425_vm0, %v13424_v1 }
 0x843   : > { %10878 = vmatprep.subr.bf16.mxu0 %v13424_v1 }
 0x849   : > { %10869 = vmatmul.mubr.msk.bf16.vlgmr.msra.gmra.mrb[8].mxu0 %vm2010_vm1, %v2365_v62 }
 0x84a   : > { %10882 = vmatprep.mubr.msk.bf16.mxu0 %vm13425_vm0, %v13424_v1  ;;  %10879 = vmatpush3.bf16.msra.mxu0 %v11831_v58 }
 0x84b   : > { %10880 = vmatprep.subr.bf16.mxu0 %v13424_v1 }
 0x84e   : > { %10881 = vmatpush3.bf16.msra.mxu0 %v11832_v60 }
 0x84f   : > { %10892 = vmatprep.subr.bf16.mxu0 %v13424_v1 }
 0x90b   : > { %v2357_v18 = vpop.f32.mrb[20].mxu1 }
 0x90c   : > { %v10864_v19 = vpop.f32.mrb[21].mxu1 }
 0x90d   : > { %v2360_v20 = vpop.f32.mrb[22].mxu1 }
 0x90e   : > { %v10865_v21 = vpop.f32.mrb[23].mxu1 }
 0x914   : > { %v2301_v22 = vpop.f32.mrb[4].mxu0 }
 0x915   : > { %v14309_v23 = vadd.f32 %v2357_v18, %v2301_v22  ;;  %v10856_v24 = vpop.f32.mrb[5].mxu0 }
 0x916   : > { %v2304_v25 = vpop.f32.mrb[6].mxu0 }
 0x917   : > { %v14311_v26 = vadd.f32 %v2360_v20, %v2304_v25  ;;  %v10857_v27 = vpop.f32.mrb[7].mxu0 }
 0x91c   : > { %v2408_v28 = vpop.f32.mrb[8].mxu0 }
 0x91d   : > { %v2409_v32 = vadd.f32 %v2408_v28, %v14254_v61  ;;  %v10870_v34 = vpop.f32.mrb[9].mxu0 }
 0x91e   : > { %v2411_v35 = vpop.f32.mrb[10].mxu0 }
 0x91f   : > { %v2412_v36 = vadd.f32 %v2411_v35, %v14254_v61  ;;  %v10871_v37 = vpop.f32.mrb[11].mxu0  ;;  %v2415_v38 = vsel %vm2058_vm3, %v2409_v32, -inf }
 0x920   : > { %2416 = vmax.xlane.f32.xlu1 %v2415_v38 }
 0x921   : > { %v2418_v39 = vsel %vm2058_vm3, %v2412_v36, -inf }
 0x924   : > { %2419 = vmax.xlane.f32.xlu1 %v2418_v39 }
 0x935   : > { %2436 = vrot.lane.b32.xlu1 %v14246_v57, %s13428_s14 }
 0x939   : > { %2544 = vrot.lane.b32.xlu1 %v14229_v47, %s13429_s22 }
 0x9ad   : > { %v2417_v40 = vpop.xlane.xlu1 %2416 }
 0x9ae   : > { %v2421_v41 = vsub.f32 %v2409_v32, %v2417_v40 }
 0x9b0   : > { %v2423_v42 = vmul.f32 1.442695, %v2421_v41  ;;  %v11833_v41 = vld [vmem:[#allocation5 + $0x30] sm:$0xff]  }
 0x9b1   : > { %v2420_v43 = vpop.xlane.xlu1 %2419 }
 0x9b2   : > { %12235 = vpow2.f32 %v2423_v42  ;;  %v2422_v44 = vsub.f32 %v2412_v36, %v2420_v43  ;;  %v11834_v42 = vld [vmem:[#allocation5 + $0x38] sm:$0xff]  }
 0x9b4   : > { %v2425_v45 = vmul.f32 1.442695, %v2422_v44 }
 0x9b5   : > { %v2437_v48 = vpop.permute.xlu1 %2436 }
 0x9b6   : > { %12237 = vpow2.f32 %v2425_v45  ;;  %10873 = vmatpush3.bf16.msra.mxu1 %v2437_v48 }
 0x9b7   : > { %10886 = vmatprep.subr.bf16.mxu1 %v13424_v1 }
 0x9b9   : > { %v2545_v56 = vpop.permute.xlu1 %2544 }
 0x9bc   : > { %v12236_v50 = vpop.eup %12235 }
 0x9bd   : > { %v2427_v51 = vsel %vm2058_vm3, %v12236_v50, 0.0 }
 0x9be   : > { %2428 = vadd.xlane.f32.xlu1 %v2427_v51 }
 0x9c0   : > { %v12238_v52 = vpop.eup %12237 }
 0x9c1   : > { %v2430_v47 = vsel %vm2058_vm3, %v12238_v52, 0.0  ;;  %v2435_v54 = vpack.c.bf16 %v12238_v52, %v12236_v50 }
 0x9c2   : > { %2431 = vadd.xlane.f32.xlu0 %v2430_v47 }
 0x9c3   : > { %10875 = vmatmul.mubr.msk.bf16.vlgmr.msra.gmra.mrb[24].mxu1 %vm2058_vm3, %v2435_v54  ;;  %v10026_v54 = vld [vmem:[#allocation7] ss:$0 sm:$0xff] }
 0x9c4   : > { %10887 = vmatpush3.bf16.xpose.msra.mxu1 %v2552_v55  ;;  %10888 = vmatprep.mubr.msk.bf16.mxu1 %vm13425_vm0, %v13424_v1 }
 0x9c5   : > { %10898 = vmatprep.subr.bf16.mxu1 %v13424_v1 }
 0x9cb   : > { %10889 = vmatmul.mubr.msk.bf16.vlgmr.msra.gmra.mrb[28].mxu1 %vm2010_vm1, %v2545_v56 }
 0x9cc   : > { %10902 = vmatprep.mubr.msk.bf16.mxu1 %vm13425_vm0, %v13424_v1  ;;  %10899 = vmatpush3.bf16.msra.mxu1 %v11833_v41 }
 0x9cd   : > { %10900 = vmatprep.subr.bf16.mxu1 %v13424_v1 }
 0x9d0   : > { %10901 = vmatpush3.bf16.msra.mxu1 %v11834_v42 }
 0x9d8   : > { %2616 = vrot.lane.b32.xlu0 %v14246_v57, %s13429_s22 }
 0xa4b   : > { %v2429_v62 = vpop.xlane.xlu1 %2428 }
 0xa4c   : > { %12239 = vrcp.f32 %v2429_v62 }
 0xa4f   : > { %v2432_v46 = vpop.xlane.xlu0 %2431 }
 0xa50   : > { %12241 = vrcp.f32 %v2432_v46 }
 0xa53   : > { %v2617_v10 = vpop.permute.xlu0 %2616 }
 0xa56   : > { %v12240_v2 = vpop.eup %12239 }
 0xa5a   : > { %v12242_v4 = vpop.eup %12241 }
 0xa96   : > { %v2476_v63 = vpop.f32.mrb[24].mxu1 }
 0xa97   : > { %v10876_v3 = vpop.f32.mrb[25].mxu1  ;;  %v2483_v6 = vmul.f32 %v12240_v2, %v2476_v63 }
 0xa98   : > { %v2479_v5 = vpop.f32.mrb[26].mxu1  ;;  %v12405_v3 = vld [vmem:[%s14194_s11] sm:$0xff] }
 0xa99   : > { %v2484_v7 = vmul.f32 %v12242_v4, %v2479_v5  ;;  %v10877_v8 = vpop.f32.mrb[27].mxu1  ;;  %v12406_v5 = vld [vmem:[%s14194_s11 + $0x8] sm:$0xff]  ;;  %s15338_s11 = smov %s15337_s26 }
 0xa9a   : > { %v11837_v8 = vld [vmem:[%s15334_s7 + $0x4] ss:$8 sps:$4 sm:$0xff]  }
 0xa9b   : > { %v2485_v9 = vpack.c.bf16 %v2484_v7, %v2483_v6  ;;  %v11835_v7 = vld [vmem:[%s15334_s7] ss:$8 sps:$4 sm:$0xff]  }
 0xa9d   : > { %10883 = vmatmul.mubr.msk.bf16.vlgmr.msra.gmra.mrb[12].mxu0 %vm2010_vm1, %v2485_v9  ;;  %v11840_v9 = vld [vmem:[%s15334_s7 + $0x14] ss:$8 sps:$4 sm:$0xff]  }
 0xa9e   : > { %10893 = vmatpush3.bf16.msra.mxu0 %v2617_v10  ;;  %v2588_v57 = vpop.f32.mrb[28].mxu1  ;;  %10894 = vmatprep.mubr.msk.bf16.mxu0 %vm13425_vm0, %v13424_v1  ;;  %v11838_v10 = vld [vmem:[%s15334_s7 + $0x10] ss:$8 sps:$4 sm:$0xff]  }
 0xa9f   : > { %v2589_v11 = vadd.f32 %v2588_v57, %v14254_v61  ;;  %v10890_v12 = vpop.f32.mrb[29].mxu1  ;;  %2865 = vmatprep.subr.bf16.mxu0 %v11837_v8  ;;  %v11874_v8 = vld [vmem:[#allocation13 + $0x38] sm:$0xff]  }
 0xaa0   : > { %v2591_v13 = vpop.f32.mrb[30].mxu1 }
 0xaa1   : > { %v2592_v14 = vadd.f32 %v2591_v13, %v14254_v61  ;;  %v10891_v15 = vpop.f32.mrb[31].mxu1  ;;  %v2595_v16 = vsel %vm2058_vm3, %v2589_v11, -inf }
 0xaa2   : > { %2596 = vmax.xlane.f32.xlu1 %v2595_v16 }
 0xaa3   : > { %v2598_v17 = vsel %vm2058_vm3, %v2592_v14, -inf }
 0xaa6   : > { %2599 = vmax.xlane.f32.xlu1 %v2598_v17 }
 0xb2f   : > { %v2597_v18 = vpop.xlane.xlu1 %2596 }
 0xb30   : > { %v2601_v19 = vsub.f32 %v2589_v11, %v2597_v18  ;;  %v11843_v18 = vld [vmem:[%s15334_s7 + $0x24] ss:$8 sps:$4 sm:$0xff]  }
 0xb32   : > { %v2603_v20 = vmul.f32 1.442695, %v2601_v19  ;;  %v11841_v19 = vld [vmem:[%s15334_s7 + $0x20] ss:$8 sps:$4 sm:$0xff]  }
 0xb33   : > { %v2600_v21 = vpop.xlane.xlu1 %2599 }
 0xb34   : > { %12243 = vpow2.f32 %v2603_v20  ;;  %v2602_v22 = vsub.f32 %v2592_v14, %v2600_v21  ;;  %v11846_v20 = vld [vmem:[%s15334_s7 + $0x34] ss:$8 sps:$4 sm:$0xff]   ;;  %v11844_v21 = vld [vmem:[%s15334_s7 + $0x30] ss:$8 sps:$4 sm:$0xff]  }
 0xb36   : > { %v2605_v24 = vmul.f32 1.442695, %v2602_v22  ;;  %v11849_v22 = vld [vmem:[%s15334_s7 + $0x44] ss:$8 sps:$4 sm:$0xff]  }
 0xb38   : > { %12245 = vpow2.f32 %v2605_v24  ;;  %v11847_v24 = vld [vmem:[%s15334_s7 + $0x40] ss:$8 sps:$4 sm:$0xff]  }
 0xb3e   : > { %v12244_v25 = vpop.eup %12243 }
 0xb3f   : > { %v2607_v27 = vsel %vm2058_vm3, %v12244_v25, 0.0 }
 0xb40   : > { %2608 = vadd.xlane.f32.xlu1 %v2607_v27  ;;  %v11850_v27 = vld [vmem:[%s15334_s7 + $0x50] ss:$8 sps:$4 sm:$0xff]  }
 0xb42   : > { %v12246_v28 = vpop.eup %12245 }
 0xb43   : > { %v2610_v32 = vsel %vm2058_vm3, %v12246_v28, 0.0  ;;  %v2615_v34 = vpack.c.bf16 %v12246_v28, %v12244_v25  ;;  %v11852_v25 = vld [vmem:[%s15334_s7 + $0x54] ss:$8 sps:$4 sm:$0xff]   ;;  %v11855_v28 = vld [vmem:[%s15334_s7 + $0x64] ss:$8 sps:$4 sm:$0xff]  }
 0xb44   : > { %2611 = vadd.xlane.f32.xlu1 %v2610_v32  ;;  %v11853_v32 = vld [vmem:[%s15334_s7 + $0x60] ss:$8 sps:$4 sm:$0xff]  }
 0xb45   : > { %10895 = vmatmul.mubr.msk.bf16.vlgmr.msra.gmra.mrb[16].mxu0 %vm2058_vm3, %v2615_v34  ;;  %v11858_v34 = vld [vmem:[%s15334_s7 + $0x74] ss:$8 sps:$4 sm:$0xff]  }
 0xb46   : > { %2897 = vmatprep.mubr.bf16.mxu0 %v13423_v0  ;;  %2866 = vmatpush1.bf16.msra.mxu0 %v11835_v7  ;;  %v11873_v7 = vld [vmem:[#allocation13 + $0x78] sm:$0xff]  }
 0xb47   : > { %2867 = vmatprep.subr.bf16.mxu0 %v11840_v9  ;;  %v1734_v9 = vld [vmem:[#allocation11] sm:$0x3] }
 0xb4a   : > { %2868 = vmatpush1.bf16.msra.mxu0 %v11838_v10  ;;  %v2778_v10 = vrot.slane %v1734_v9, %v14220_v31 }
 0xb4b   : > { %2869 = vmatprep.subr.bf16.mxu0 %v11843_v18 }
 0xb4e   : > { %2870 = vmatpush1.bf16.msra.mxu0 %v11841_v19 }
 0xb4f   : > { %2871 = vmatprep.subr.bf16.mxu0 %v11846_v20 }
 0xb52   : > { %2872 = vmatpush1.bf16.msra.mxu0 %v11844_v21 }
 0xb53   : > { %2873 = vmatprep.subr.bf16.mxu0 %v11849_v22 }
 0xb56   : > { %2874 = vmatpush1.bf16.msra.mxu0 %v11847_v24 }
 0xb57   : > { %2875 = vmatprep.subr.bf16.mxu0 %v11852_v25 }
 0xb5a   : > { %2876 = vmatpush1.bf16.msra.mxu0 %v11850_v27 }
 0xb5b   : > { %2877 = vmatprep.subr.bf16.mxu0 %v11855_v28 }
 0xb5e   : > { %2878 = vmatpush1.bf16.msra.mxu0 %v11853_v32 }
 0xb5f   : > { %2879 = vmatprep.subr.bf16.mxu0 %v11858_v34 }
 0xb70   : > { %v2535_v35 = vpop.f32.mrb[12].mxu0 }
 0xb71   : > { %v2542_v36 = vadd.f32 %v2535_v35, %v14309_v23  ;;  %v10884_v37 = vpop.f32.mrb[13].mxu0  ;;  %v11856_v35 = vld [vmem:[%s15334_s7 + $0x70] ss:$8 sps:$4 sm:$0xff]  }
 0xb72   : > { %v2538_v38 = vpop.f32.mrb[14].mxu0  ;;  %2880 = vmatpush1.bf16.msra.mxu0 %v11856_v35 }
 0xb73   : > { %v2543_v39 = vadd.f32 %v2538_v38, %v14311_v26  ;;  %v10885_v40 = vpop.f32.mrb[15].mxu0 }
 0xbcd   : > { %v2609_v43 = vpop.xlane.xlu1 %2608 }
 0xbce   : > { %12247 = vrcp.f32 %v2609_v43 }
 0xbd1   : > { %v2612_v44 = vpop.xlane.xlu1 %2611 }
 0xbd2   : > { %12249 = vrcp.f32 %v2612_v44  ;;  %v10027_v44 = vld [vmem:[#allocation8] ss:$0 sm:$0xff] }
 0xbd8   : > { %v12248_v48 = vpop.eup %12247 }
 0xbdc   : > { %v12250_v51 = vpop.eup %12249 }
 0xc18   : > { %v2656_v45 = vpop.f32.mrb[16].mxu0 }
 0xc19   : > { %v10896_v50 = vpop.f32.mrb[17].mxu0  ;;  %v2663_v52 = vmul.f32 %v12248_v48, %v2656_v45 }
 0xc1a   : > { %v2659_v23 = vpop.f32.mrb[18].mxu0 }
 0xc1b   : > { %v2664_v53 = vmul.f32 %v12250_v51, %v2659_v23  ;;  %v10897_v26 = vpop.f32.mrb[19].mxu0  ;;  %v10028_v51 = vld [vmem:[#allocation10] ss:$0 sm:$0xff] }
 0xc1d   : > { %v2665_v47 = vpack.c.bf16 %v2664_v53, %v2663_v52 }
 0xc1f   : > { %10903 = vmatmul.mubr.msk.bf16.vlgmr.msra.gmra.mrb[32].mxu1 %vm2010_vm1, %v2665_v47  ;;  %v11859_v47 = vld [vmem:[#allocation13 + $0x40] sm:$0xff]  }
 0xc20   : > { %10533 = vmatprep.subr.bf16.mxu1 %v11859_v47 }
 0xcf2   : > { %v2715_v55 = vpop.f32.mrb[32].mxu1 }
 0xcf3   : > { %v2722_v56 = vadd.f32 %v2715_v55, %v2542_v36  ;;  %v10904_v58 = vpop.f32.mrb[33].mxu1  ;;  %v11861_v55 = vld [vmem:[#allocation13 + $0x48] sm:$0xff]  }
 0xcf4   : > { %v2718_v60 = vpop.f32.mrb[34].mxu1  ;;  %v11863_v58 = vld [vmem:[#allocation13 + $0x50] sm:$0xff]  }
 0xcf5   : > { %v2730_v62 = vadd.f32 %v10026_v54, %v2722_v56  ;;  %v2723_v46 = vadd.f32 %v2718_v60, %v2543_v39  ;;  %v10905_v63 = vpop.f32.mrb[35].mxu1  ;;  %v11862_v56 = vld [vmem:[#allocation13 + $0x8] sm:$0xff]   ;;  %v11864_v60 = vld [vmem:[#allocation13 + $0x10] sm:$0xff]  }
 0xcf6   : > { %v11867_v63 = vld [vmem:[#allocation13 + $0x60] sm:$0xff]  }
 0xcf7   : > { %v2731_v2 = vadd.f32 %v10026_v54, %v2723_v46  ;;  %v2732_v4 = vadd.f32 %v12405_v3, %v2730_v62  ;;  %v11860_v54 = vld [vmem:[#allocation13] sm:$0xff]   ;;  %v11865_v62 = vld [vmem:[#allocation13 + $0x58] sm:$0xff]   ;;  %v11869_v3 = vld [vmem:[#allocation13 + $0x68] sm:$0xff]  }
 0xcf8   : > { %10534 = vmatpush3.bf16.msra.mxu1 %v11860_v54  ;;  %v11866_v46 = vld [vmem:[#allocation13 + $0x18] sm:$0xff]  }
 0xcf9   : > { %2734 = vadd.xlane.f32.xlu1 %v2732_v4  ;;  %v2733_v6 = vadd.f32 %v12406_v5, %v2731_v2  ;;  %10535 = vmatprep.subr.bf16.mxu1 %v11861_v55  ;;  %v11868_v2 = vld [vmem:[#allocation13 + $0x20] sm:$0xff]   ;;  %v11871_v5 = vld [vmem:[#allocation13 + $0x70] sm:$0xff]  }
 0xcfc   : > { %10536 = vmatpush3.bf16.msra.mxu1 %v11862_v56 }
 0xcfd   : > { %2736 = vadd.xlane.f32.xlu1 %v2733_v6  ;;  %10537 = vmatprep.subr.bf16.mxu1 %v11863_v58 }
 0xd00   : > { %10538 = vmatpush3.bf16.msra.mxu1 %v11864_v60 }
 0xd01   : > { %10539 = vmatprep.subr.bf16.mxu1 %v11865_v62 }
 0xd04   : > { %10540 = vmatpush3.bf16.msra.mxu1 %v11866_v46 }
 0xd05   : > { %10541 = vmatprep.subr.bf16.mxu1 %v11867_v63 }
 0xd08   : > { %10542 = vmatpush3.bf16.msra.mxu1 %v11868_v2 }
 0xd09   : > { %10543 = vmatprep.subr.bf16.mxu1 %v11869_v3 }
 0xd86   : > { %v2735_v57 = vpop.xlane.xlu1 %2734 }
 0xd87   : > { %v2739_v11 = vmul.f32 0.0078125, %v2735_v57  ;;  %v2782_v57 = vrot.slane %v1734_v9, %v14223_v33 }
 0xd89   : > { %v2741_v12 = vsub.f32 %v2732_v4, %v2739_v11  ;;  %v11870_v4 = vld [vmem:[#allocation13 + $0x28] sm:$0xff]  }
 0xd8a   : > { %v2737_v13 = vpop.xlane.xlu1 %2736  ;;  %10544 = vmatpush3.bf16.msra.mxu1 %v11870_v4 }
 0xd8b   : > { %v2740_v14 = vmul.f32 0.0078125, %v2737_v13  ;;  %v2743_v15 = vmul.f32 %v2741_v12, %v2741_v12  ;;  %10545 = vmatprep.subr.bf16.mxu1 %v11871_v5 }
 0xd8d   : > { %2745 = vadd.xlane.f32.xlu1 %v2743_v15  ;;  %v2742_v16 = vsub.f32 %v2733_v6, %v2740_v14  ;;  %v11872_v6 = vld [vmem:[#allocation13 + $0x30] sm:$0xff]  }
 0xd8e   : > { %10546 = vmatpush3.bf16.msra.mxu1 %v11872_v6  ;;  %v10045_v6 = vld [vmem:[#allocation14] ss:$0 sm:$0xff] }
 0xd8f   : > { %v2744_v17 = vmul.f32 %v2742_v16, %v2742_v16  ;;  %10547 = vmatprep.subr.bf16.mxu1 %v11873_v7 }
 0xd91   : > { %2747 = vadd.xlane.f32.xlu0 %v2744_v17 }
 0xd92   : > { %10548 = vmatpush3.bf16.msra.mxu1 %v11874_v8 }
 0xd93   : > { %10906 = vmatprep.subr.bf16.mxu1 %v13424_v1 }
 0xe1a   : > { %v2746_v36 = vpop.xlane.xlu1 %2745 }
 0xe1b   : > { %v2749_v37 = vmul.f32 0.0078125, %v2746_v36 }
 0xe1d   : > { %v2751_v38 = vadd.f32 1e-05, %v2749_v37 }
 0xe1e   : > { %v2748_v39 = vpop.xlane.xlu0 %2747 }
 0xe1f   : > { %12251 = vrsqrt.f32 %v2751_v38  ;;  %v2750_v40 = vmul.f32 0.0078125, %v2748_v39 }
 0xe21   : > { %v2752_v41 = vadd.f32 1e-05, %v2750_v40 }
 0xe23   : > { %12253 = vrsqrt.f32 %v2752_v41 }
 0xe29   : > { %v12252_v42 = vpop.eup %12251 }
 0xe2a   : > { %v2755_v43 = vmul.f32 %v12252_v42, %v2741_v12 }
 0xe2c   : > { %v2763_v50 = vmul.f32 %v10027_v44, %v2755_v43 }
 0xe2d   : > { %v12254_v45 = vpop.eup %12253 }
 0xe2e   : > { %v2756_v48 = vmul.f32 %v12254_v45, %v2742_v16  ;;  %v14369_v52 = vadd.f32 %v10028_v51, %v2763_v50 }
 0xe30   : > { %v2764_v23 = vmul.f32 %v10027_v44, %v2756_v48 }
 0xe32   : > { %v14371_v53 = vadd.f32 %v10028_v51, %v2764_v23 }
 0xe34   : > { %v2773_v26 = vpack.c.bf16 %v14371_v53, %v14369_v52 }
 0xe36   : > { %2898 = vmatmul.mubr.bf16.vlgmr.msra.gmra.mrb[20].mxu0 %v2773_v26 }
 0xe37   : > { %3422 = vmatprep.mubr.bf16.mxu0 %v13423_v0 }
 0xf09   : > { %v2899_v11 = vpop.f32.mrb[20].mxu0 }
 0xf0a   : > { %v2900_v12 = vadd.f32 %v2899_v11, %v2778_v10  ;;  %v2901_v13 = vpop.f32.mrb[21].mxu0 }
 0xf0b   : > { %v2902_v14 = vadd.f32 %v2901_v13, %v2782_v57  ;;  %v2903_v15 = vpop.f32.mrb[22].mxu0 }
 0xf0c   : > { %v2912_v16 = vmul.f32 0.044715, %v2900_v12  ;;  %v2904_v17 = vadd.f32 %v2903_v15, %v2778_v10  ;;  %v2905_v18 = vpop.f32.mrb[23].mxu0  ;;  %v2908_v47 = vmul.f32 0.5, %v2900_v12  ;;  %v11875_v15 = vld [vmem:[%s15331_s16 + $0xc0] ss:$12 sps:$4 sm:$0xff]  }
 0xf0d   : > { %v2913_v19 = vmul.f32 0.044715, %v2902_v14  ;;  %v2906_v20 = vadd.f32 %v2905_v18, %v2782_v57  ;;  %v2909_v56 = vmul.f32 0.5, %v2902_v14  ;;  %v11881_v18 = vld [vmem:[%s15331_s16 + $0xdc] ss:$12 sps:$4 sm:$0xff]  }
 0xf0e   : > { %v2916_v21 = vmul.f32 %v2912_v16, %v2900_v12  ;;  %v2914_v22 = vmul.f32 0.044715, %v2904_v17  ;;  %v2910_v54 = vmul.f32 0.5, %v2904_v17  ;;  %v11877_v16 = vld [vmem:[%s15331_s16 + $0xc4] ss:$12 sps:$4 sm:$0xff]  }
 0xf0f   : > { %v2917_v24 = vmul.f32 %v2913_v19, %v2902_v14  ;;  %v2915_v25 = vmul.f32 0.044715, %v2906_v20  ;;  %v2911_v58 = vmul.f32 0.5, %v2906_v20  ;;  %3390 = vmatprep.subr.bf16.mxu0 %v11877_v16  ;;  %v11879_v19 = vld [vmem:[%s15331_s16 + $0xd8] ss:$12 sps:$4 sm:$0xff]  }
 0xf10   : > { %v2920_v27 = vmul.f32 %v2916_v21, %v2900_v12  ;;  %v2918_v28 = vmul.f32 %v2914_v22, %v2904_v17  ;;  %3391 = vmatpush1.bf16.msra.mxu0 %v11875_v15 }
 0xf11   : > { %v2921_v32 = vmul.f32 %v2917_v24, %v2902_v14  ;;  %v2919_v34 = vmul.f32 %v2915_v25, %v2906_v20  ;;  %3392 = vmatprep.subr.bf16.mxu0 %v11881_v18 }
 0xf12   : > { %v2924_v35 = vadd.f32 %v2920_v27, %v2900_v12  ;;  %v2922_v36 = vmul.f32 %v2918_v28, %v2904_v17  ;;  %v11882_v28 = vld [vmem:[%s15331_s16 + $0xe0] ss:$12 sps:$4 sm:$0xff]  }
 0xf13   : > { %v2923_v37 = vmul.f32 %v2919_v34, %v2906_v20  ;;  %v2925_v38 = vadd.f32 %v2921_v32, %v2902_v14  ;;  %v11885_v32 = vld [vmem:[%s15331_s16 + $0xf4] ss:$12 sps:$4 sm:$0xff]   ;;  %v11883_v34 = vld [vmem:[%s15331_s16 + $0xf0] ss:$12 sps:$4 sm:$0xff]  }
 0xf14   : > { %v2928_v39 = vmul.f32 0.7978846, %v2924_v35  ;;  %v2926_v40 = vadd.f32 %v2922_v36, %v2904_v17  ;;  %v11878_v17 = vld [vmem:[%s15331_s16 + $0xc8] ss:$12 sps:$4 sm:$0xff]   ;;  %3393 = vmatpush1.bf16.msra.mxu0 %v11879_v19  ;;  %v11886_v35 = vld [vmem:[%s15331_s16 + $0xf8] ss:$12 sps:$4 sm:$0xff]  }
 0xf15   : > { %v2927_v41 = vadd.f32 %v2923_v37, %v2906_v20  ;;  %v2929_v42 = vmul.f32 0.7978846, %v2925_v38  ;;  %3394 = vmatprep.subr.bf16.mxu0 %v11885_v32  ;;  %v11889_v36 = vld [vmem:[%s15331_s16 + $0x10c] ss:$12 sps:$4 sm:$0xff]   ;;  %v11887_v37 = vld [vmem:[%s15331_s16 + $0x108] ss:$12 sps:$4 sm:$0xff]  }
 0xf16   : > { %12255 = vtanh.f32 %v2928_v39  ;;  %v2930_v43 = vmul.f32 0.7978846, %v2926_v40  ;;  %v11890_v38 = vld [vmem:[%s15331_s16 + $0x110] ss:$12 sps:$4 sm:$0xff]   ;;  %v11891_v40 = vld [vmem:[%s15331_s16 + $0x120] ss:$12 sps:$4 sm:$0xff]  }
 0xf17   : > { %v2931_v44 = vmul.f32 0.7978846, %v2927_v41  ;;  %12257 = vtanh.f32 %v2929_v42  ;;  %v11893_v39 = vld [vmem:[%s15331_s16 + $0x124] ss:$12 sps:$4 sm:$0xff]   ;;  %v11894_v41 = vld [vmem:[%s15331_s16 + $0x128] ss:$12 sps:$4 sm:$0xff]  }
 0xf18   : > { %12259 = vtanh.f32 %v2930_v43  ;;  %3395 = vmatpush1.bf16.msra.mxu0 %v11883_v34  ;;  %v11897_v42 = vld [vmem:[%s15331_s16 + $0x13c] ss:$12 sps:$4 sm:$0xff]   ;;  %v11895_v43 = vld [vmem:[%s15331_s16 + $0x138] ss:$12 sps:$4 sm:$0xff]  }
 0xf19   : > { %12261 = vtanh.f32 %v2931_v44  ;;  %3396 = vmatprep.subr.bf16.mxu0 %v11889_v36  ;;  %v11898_v44 = vld [vmem:[%s15331_s16 + $0x140] ss:$12 sps:$4 sm:$0xff]  }
 0xf1c   : > { %3397 = vmatpush1.bf16.msra.mxu0 %v11887_v37 }
 0xf1d   : > { %3398 = vmatprep.subr.bf16.mxu0 %v11893_v39 }
 0xf20   : > { %v12256_v45 = vpop.eup %12255  ;;  %3399 = vmatpush1.bf16.msra.mxu0 %v11891_v40 }
 0xf21   : > { %v12258_v48 = vpop.eup %12257  ;;  %v2936_v50 = vadd.f32 1.0, %v12256_v45  ;;  %3400 = vmatprep.subr.bf16.mxu0 %v11897_v42  ;;  %v11901_v45 = vld [vmem:[%s15331_s16 + $0x154] ss:$12 sps:$4 sm:$0xff]  }
 0xf22   : > { %v12260_v51 = vpop.eup %12259  ;;  %v2937_v23 = vadd.f32 1.0, %v12258_v48  ;;  %v11899_v48 = vld [vmem:[%s15331_s16 + $0x150] ss:$12 sps:$4 sm:$0xff]  }
 0xf23   : > { %v12262_v26 = vpop.eup %12261  ;;  %v2938_v55 = vadd.f32 1.0, %v12260_v51  ;;  %v2940_v62 = vmul.f32 %v2936_v50, %v2908_v47  ;;  %v11902_v50 = vld [vmem:[%s15331_s16 + $0x158] ss:$12 sps:$4 sm:$0xff]  }
 0xf24   : > { %v2939_v60 = vadd.f32 1.0, %v12262_v26  ;;  %v2941_v63 = vmul.f32 %v2937_v23, %v2909_v56  ;;  %3401 = vmatpush1.bf16.msra.mxu0 %v11895_v43  ;;  %v11905_v51 = vld [vmem:[%s15331_s16 + $0x16c] ss:$12 sps:$4 sm:$0xff]   ;;  %v11903_v23 = vld [vmem:[%s15331_s16 + $0x168] ss:$12 sps:$4 sm:$0xff]  }
 0xf25   : > { %v2942_v46 = vmul.f32 %v2938_v55, %v2910_v54  ;;  %3402 = vmatprep.subr.bf16.mxu0 %v11901_v45  ;;  %v11906_v26 = vld [vmem:[%s15331_s16 + $0x170] ss:$12 sps:$4 sm:$0xff]  }
 0xf26   : > { %v2943_v2 = vmul.f32 %v2939_v60, %v2911_v58 }
 0xf27   : > { %v2944_v3 = vpack.c.bf16 %v2942_v46, %v2940_v62 }
 0xf28   : > { %v2945_v4 = vpack.c.bf16 %v2943_v2, %v2941_v63  ;;  %3403 = vmatpush1.bf16.msra.mxu0 %v11899_v48  ;;  %v10062_v63 = vld [vmem:[#allocation16] ss:$0 sm:$0xff] }
 0xf29   : > { %3404 = vmatprep.subr.bf16.mxu0 %v11905_v51 }
 0xf2a   : > { %3080 = vmatprep.mubr.bf16.mxu1 %v2945_v4 }
 0xf2b   : > { %3081 = vmatmul.mubr.bf16.vlgmr.msra.gmra.mrb[36].mxu1 %v2944_v3 }
 0xf2c   : > { %10922 = vmatprep.mubr.msk.bf16.mxu1 %vm13425_vm0, %v13424_v1  ;;  %10907 = vmatpush3.bf16.msra.mxu1 %v11878_v17 }
 0xf2d   : > { %10908 = vmatprep.subr.bf16.mxu1 %v13424_v1  ;;  %3405 = vmatpush1.bf16.msra.mxu0 %v11903_v23 }
 0xf2e   : > { %10926 = vmatprep.subr.bf16.mxu0 %v13424_v1 }
 0xf30   : > { %10909 = vmatpush3.bf16.msra.mxu1 %v11882_v28 }
 0xf31   : > { %10910 = vmatprep.subr.bf16.mxu1 %v13424_v1 }
 0xf34   : > { %10911 = vmatpush3.bf16.msra.mxu1 %v11886_v35 }
 0xf35   : > { %10912 = vmatprep.subr.bf16.mxu1 %v13424_v1 }
 0xf38   : > { %10913 = vmatpush3.bf16.msra.mxu1 %v11890_v38 }
 0xf39   : > { %10914 = vmatprep.subr.bf16.mxu1 %v13424_v1 }
 0xf3c   : > { %10915 = vmatpush3.bf16.msra.mxu1 %v11894_v41 }
 0xf3d   : > { %10916 = vmatprep.subr.bf16.mxu1 %v13424_v1 }
 0xf40   : > { %10917 = vmatpush3.bf16.msra.mxu1 %v11898_v44 }
 0xf41   : > { %10918 = vmatprep.subr.bf16.mxu1 %v13424_v1 }
 0xf44   : > { %10919 = vmatpush3.bf16.msra.mxu1 %v11902_v50 }
 0xf45   : > { %10920 = vmatprep.subr.bf16.mxu1 %v13424_v1 }
 0xf48   : > { %10921 = vmatpush3.bf16.msra.mxu1 %v11906_v26 }
 0xf49   : > { %10932 = vmatprep.subr.bf16.mxu1 %v13424_v1 }
 0xffe   : > { %v10549_v5 = vpop.f32.mrb[36].mxu1 }
 0xfff   : > { %v10550_v7 = vpop.f32.mrb[37].mxu1 }
0x1000   : > { %v10551_v8 = vadd.f32 %v10550_v7, %v10549_v5  ;;  %v10552_v9 = vpop.f32.mrb[38].mxu1  ;;  %v10063_v5 = vld [vmem:[#allocation17] ss:$0 sm:$0xff] }
0x1001   : > { %v10553_v10 = vpop.f32.mrb[39].mxu1 }
0x1002   : > { %v3083_v57 = vadd.f32 %v10551_v8, %v10045_v6  ;;  %v10554_v11 = vadd.f32 %v10553_v10, %v10552_v9  ;;  %v3163_v10 = vld [vmem:[#allocation2 + $0x3] sm:$0x7] }
0x1004   : > { %v3086_v12 = vadd.f32 %v10554_v11, %v10045_v6  ;;  %v3089_v13 = vadd.f32 %v3083_v57, %v14369_v52  ;;  %v3250_v57 = vrot.slane %v3163_v10, %v14220_v31  ;;  %v3258_v11 = vrot.slane %v3163_v10, %v14243_v49 }
0x1006   : > { %3091 = vadd.xlane.f32.xlu1 %v3089_v13  ;;  %v3090_v14 = vadd.f32 %v3086_v12, %v14371_v53 }
0x100a   : > { %3093 = vadd.xlane.f32.xlu1 %v3090_v14 }
0x1093   : > { %v3092_v52 = vpop.xlane.xlu1 %3091 }
0x1094   : > { %v3095_v20 = vmul.f32 0.0078125, %v3092_v52 }
0x1096   : > { %v14389_v53 = vsub.f32 %v3089_v13, %v3095_v20 }
0x1097   : > { %v3094_v21 = vpop.xlane.xlu1 %3093 }
0x1098   : > { %v3096_v22 = vmul.f32 0.0078125, %v3094_v21  ;;  %v3099_v24 = vmul.f32 %v14389_v53, %v14389_v53 }
0x109a   : > { %3101 = vadd.xlane.f32.xlu1 %v3099_v24  ;;  %v3098_v25 = vsub.f32 %v3090_v14, %v3096_v22  ;;  %v3254_v14 = vrot.slane %v3163_v10, %v14223_v33 }
0x109c   : > { %v3100_v27 = vmul.f32 %v3098_v25, %v3098_v25 }
0x109e   : > { %3103 = vadd.xlane.f32.xlu1 %v3100_v27 }
0x1127   : > { %v3102_v47 = vpop.xlane.xlu1 %3101 }
0x1128   : > { %v3105_v54 = vmul.f32 0.0078125, %v3102_v47 }
0x112a   : > { %v3107_v55 = vadd.f32 1e-05, %v3105_v54 }
0x112b   : > { %v3104_v56 = vpop.xlane.xlu1 %3103 }
0x112c   : > { %12263 = vrsqrt.f32 %v3107_v55  ;;  %v3106_v58 = vmul.f32 0.0078125, %v3104_v56 }
0x112e   : > { %v3108_v60 = vadd.f32 1e-05, %v3106_v58 }
0x1130   : > { %12265 = vrsqrt.f32 %v3108_v60 }
0x1136   : > { %v12264_v62 = vpop.eup %12263 }
0x1137   : > { %v3111_v46 = vmul.f32 %v12264_v62, %v14389_v53 }
0x1139   : > { %v3119_v4 = vmul.f32 %v10062_v63, %v3111_v46 }
0x113a   : > { %v12266_v2 = vpop.eup %12265 }
0x113b   : > { %v3112_v3 = vmul.f32 %v12266_v2, %v3098_v25  ;;  %v14421_v7 = vadd.f32 %v10063_v5, %v3119_v4 }
0x113d   : > { %v3120_v6 = vmul.f32 %v10062_v63, %v3112_v3 }
0x113f   : > { %v14423_v8 = vadd.f32 %v10063_v5, %v3120_v6 }
0x1141   : > { %v3245_v9 = vpack.c.bf16 %v14423_v8, %v14421_v7 }
0x1143   : > { %3423 = vmatmul.mubr.bf16.vlgmr.msra.gmra.mrb[24].mxu0 %v3245_v9  ;;  %10923 = vmatmul.mubr.bf16.vlgmr.msra.gmra.mrb[40].mxu1 %v3245_v9 }
0x1144   : > { %10928 = vmatprep.mubr.msk.bf16.mxu0 %vm13425_vm0, %v13424_v1  ;;  %10934 = vmatprep.mubr.msk.bf16.mxu1 %vm13425_vm0, %v13424_v1 }
0x1216   : > { %v3424_v12 = vpop.f32.mrb[24].mxu0  ;;  %v3467_v13 = vpop.f32.mrb[40].mxu1 }
0x1217   : > { %v3425_v15 = vadd.f32 %v3424_v12, %v3250_v57  ;;  %v3426_v16 = vpop.f32.mrb[25].mxu0  ;;  %v10924_v17 = vpop.f32.mrb[41].mxu1  ;;  %v3468_v52 = vadd.f32 %v3467_v13, %v3258_v11 }
0x1218   : > { %v3428_v18 = vpop.f32.mrb[26].mxu0  ;;  %v3470_v19 = vpop.f32.mrb[42].mxu1  ;;  %v3427_v24 = vadd.f32 %v3426_v16, %v3254_v14 }
0x1219   : > { %v3429_v20 = vadd.f32 %v3428_v18, %v3250_v57  ;;  %v3471_v53 = vadd.f32 %v3470_v19, %v3258_v11  ;;  %v3430_v21 = vpop.f32.mrb[27].mxu0  ;;  %v10925_v22 = vpop.f32.mrb[43].mxu1  ;;  %v3474_v27 = vmul.f32 0.17677669, %v3425_v15 }
0x121a   : > { %v3431_v25 = vadd.f32 %v3430_v21, %v3254_v14  ;;  %v11908_v21 = vld [vmem:[#allocation5 + $0x50] sm:$0xff]   ;;  %v11909_v22 = vld [vmem:[#allocation5 + $0x48] sm:$0xff]  }
0x121b   : > { %v3475_v28 = vmul.f32 0.17677669, %v3429_v20  ;;  %v14434_v32 = vpack.c.bf16 %v3471_v53, %v3468_v52  ;;  %v11907_v53 = vld [vmem:[#allocation5 + $0x40] sm:$0xff]  }
0x121c   : > { %v14436_v34 = vpack.c.bf16 %v3431_v25, %v3427_v24  ;;  %v11910_v24 = vld [vmem:[#allocation5 + $0x58] sm:$0xff]  }
0x121d   : > { %v14438_v35 = vpack.c.bf16 %v3475_v28, %v3474_v27  ;;  %10933 = vmatpush3.bf16.msra.mxu1 %v14434_v32 }
0x121e   : > { %3598 = vrot.lane.b32.xlu1 %v14436_v34, %s13426_s9  ;;  %v3483_v36 = vsel %vm2010_vm1, %v14436_v34, 0  ;;  %10944 = vmatprep.subr.bf16.mxu1 %v13424_v1 }
0x121f   : > { %10927 = vmatpush3.bf16.xpose.msra.mxu0 %v3483_v36  ;;  %3595 = vrot.lane.b32.xlu0 %v14438_v35, %s13426_s9 }
0x1220   : > { %10938 = vmatprep.subr.bf16.mxu0 %v13424_v1 }
0x1226   : > { %10929 = vmatmul.mubr.msk.bf16.vlgmr.msra.gmra.mrb[28].mxu0 %vm2010_vm1, %v14438_v35 }
0x1227   : > { %10940 = vmatprep.mubr.msk.bf16.mxu0 %vm13425_vm0, %v13424_v1 }
0x1290   : > { %v3599_v37 = vpop.permute.xlu1 %3598 }
0x1291   : > { %v3604_v38 = vsel %vm2010_vm1, %v3599_v37, 0  ;;  %v3596_v39 = vpop.permute.xlu0 %3595 }
0x1292   : > { %10939 = vmatpush3.bf16.xpose.msra.mxu0 %v3604_v38 }
0x1293   : > { %10950 = vmatprep.subr.bf16.mxu0 %v13424_v1 }
0x1299   : > { %10941 = vmatmul.mubr.msk.bf16.vlgmr.msra.gmra.mrb[32].mxu0 %vm2010_vm1, %v3596_v39 }
0x129a   : > { %10954 = vmatprep.mubr.msk.bf16.mxu0 %vm13425_vm0, %v13424_v1  ;;  %10951 = vmatpush3.bf16.msra.mxu0 %v11908_v21 }
0x129b   : > { %10952 = vmatprep.subr.bf16.mxu0 %v13424_v1 }
0x129e   : > { %10953 = vmatpush3.bf16.msra.mxu0 %v11910_v24 }
0x129f   : > { %10966 = vmatprep.subr.bf16.mxu0 %v13424_v1 }
0x12f9   : > { %v3519_v40 = vpop.f32.mrb[28].mxu0 }
0x12fa   : > { %v3520_v41 = vadd.f32 %v3519_v40, %v14254_v61  ;;  %v10930_v42 = vpop.f32.mrb[29].mxu0 }
0x12fb   : > { %v3522_v43 = vpop.f32.mrb[30].mxu0 }
0x12fc   : > { %v3523_v44 = vadd.f32 %v3522_v43, %v14254_v61  ;;  %v10931_v45 = vpop.f32.mrb[31].mxu0  ;;  %v3526_v48 = vsel %vm2058_vm3, %v3520_v41, -inf }
0x12fd   : > { %3527 = vmax.xlane.f32.xlu1 %v3526_v48 }
0x12fe   : > { %v3529_v50 = vsel %vm2058_vm3, %v3523_v44, -inf }
0x12ff   : > { %3530 = vmax.xlane.f32.xlu0 %v3529_v50 }
0x136c   : > { %v3640_v51 = vpop.f32.mrb[32].mxu0 }
0x136d   : > { %v3641_v23 = vadd.f32 %v3640_v51, %v14254_v61  ;;  %v10942_v26 = vpop.f32.mrb[33].mxu0 }
0x136e   : > { %v3643_v47 = vpop.f32.mrb[34].mxu0 }
0x136f   : > { %v3644_v54 = vadd.f32 %v3643_v47, %v14254_v61  ;;  %v10943_v55 = vpop.f32.mrb[35].mxu0  ;;  %v3647_v56 = vsel %vm2058_vm3, %v3641_v23, -inf }
0x1370   : > { %3648 = vmax.xlane.f32.xlu1 %v3647_v56 }
0x1371   : > { %v3650_v58 = vsel %vm2058_vm3, %v3644_v54, -inf }
0x1374   : > { %3651 = vmax.xlane.f32.xlu1 %v3650_v58 }
0x1385   : > { %3669 = vrot.lane.b32.xlu1 %v14434_v32, %s13426_s9 }
0x1389   : > { %3831 = vrot.lane.b32.xlu1 %v14438_v35, %s13428_s14 }
0x138a   : > { %v3528_v60 = vpop.xlane.xlu1 %3527 }
0x138b   : > { %v3532_v62 = vsub.f32 %v3520_v41, %v3528_v60 }
0x138c   : > { %v3531_v46 = vpop.xlane.xlu0 %3530 }
0x138d   : > { %v3534_v63 = vmul.f32 1.442695, %v3532_v62  ;;  %v3533_v2 = vsub.f32 %v3523_v44, %v3531_v46 }
0x138f   : > { %v3536_v3 = vmul.f32 1.442695, %v3533_v2  ;;  %12267 = vpow2.f32 %v3534_v63 }
0x1391   : > { %12269 = vpow2.f32 %v3536_v3 }
0x1399   : > { %v12268_v4 = vpop.eup %12267 }
0x139a   : > { %v3538_v9 = vsel %vm2058_vm3, %v12268_v4, 0.0 }
0x139b   : > { %v12270_v5 = vpop.eup %12269 }
0x139c   : > { %v3546_v6 = vpack.c.bf16 %v12270_v5, %v12268_v4  ;;  %v3541_v20 = vsel %vm2058_vm3, %v12270_v5, 0.0 }
0x139e   : > { %10935 = vmatmul.mubr.msk.bf16.vlgmr.msra.gmra.mrb[44].mxu1 %vm2058_vm3, %v3546_v6 }
0x139f   : > { %10946 = vmatprep.mubr.msk.bf16.mxu1 %vm13425_vm0, %v13424_v1 }
0x13ad   : > { %3539 = vadd.xlane.f32.xlu1 %v3538_v9 }
0x13fd   : > { %v3649_v10 = vpop.xlane.xlu1 %3648 }
0x13fe   : > { %v3653_v57 = vsub.f32 %v3641_v23, %v3649_v10 }
0x1400   : > { %v3655_v11 = vmul.f32 1.442695, %v3653_v57 }
0x1401   : > { %v3652_v12 = vpop.xlane.xlu1 %3651 }
0x1402   : > { %12271 = vpow2.f32 %v3655_v11  ;;  %v3654_v13 = vsub.f32 %v3644_v54, %v3652_v12 }
0x1404   : > { %v3657_v14 = vmul.f32 1.442695, %v3654_v13 }
0x1405   : > { %v3670_v15 = vpop.permute.xlu1 %3669 }
0x1406   : > { %12273 = vpow2.f32 %v3657_v14  ;;  %10945 = vmatpush3.bf16.msra.mxu1 %v3670_v15 }
0x1407   : > { %10958 = vmatprep.subr.bf16.mxu1 %v13424_v1 }
0x1409   : > { %v3832_v38 = vpop.permute.xlu1 %3831 }
0x140c   : > { %v12272_v16 = vpop.eup %12271 }
0x140d   : > { %v3659_v17 = vsel %vm2058_vm3, %v12272_v16, 0.0 }
0x140e   : > { %3660 = vadd.xlane.f32.xlu0 %v3659_v17 }
0x1410   : > { %v12274_v18 = vpop.eup %12273 }
0x1411   : > { %v3662_v19 = vsel %vm2058_vm3, %v12274_v18, 0.0  ;;  %v3667_v52 = vpack.c.bf16 %v12274_v18, %v12272_v16 }
0x1412   : > { %3663 = vadd.xlane.f32.xlu0 %v3662_v19 }
0x1413   : > { %10947 = vmatmul.mubr.msk.bf16.vlgmr.msra.gmra.mrb[48].mxu1 %vm2058_vm3, %v3667_v52 }
0x1414   : > { %10962 = vmatprep.mubr.msk.bf16.mxu1 %vm13425_vm0, %v13424_v1  ;;  %10959 = vmatpush3.bf16.msra.mxu1 %v11907_v53 }
0x1415   : > { %10960 = vmatprep.subr.bf16.mxu1 %v13424_v1 }
0x1418   : > { %10961 = vmatpush3.bf16.msra.mxu1 %v11909_v22 }
0x1419   : > { %10972 = vmatprep.subr.bf16.mxu1 %v13424_v1 }
0x1428   : > { %3833 = vrot.lane.b32.xlu0 %v14436_v34, %s13428_s14 }
0x143a   : > { %v3540_v40 = vpop.xlane.xlu1 %3539 }
0x143b   : > { %12275 = vrcp.f32 %v3540_v40 }
0x1445   : > { %v12276_v42 = vpop.eup %12275 }
0x1447   : > { %3542 = vadd.xlane.f32.xlu0 %v3541_v20 }
0x145d   : > { %4013 = vrot.lane.b32.xlu0 %v14436_v34, %s13429_s22 }
0x1471   : > { %v3584_v25 = vpop.f32.mrb[44].mxu1 }
0x1472   : > { %v10936_v27 = vpop.f32.mrb[45].mxu1  ;;  %v3591_v44 = vmul.f32 %v12276_v42, %v3584_v25 }
0x1473   : > { %v3587_v28 = vpop.f32.mrb[46].mxu1 }
0x1474   : > { %v10937_v36 = vpop.f32.mrb[47].mxu1 }
0x149b   : > { %v3661_v34 = vpop.xlane.xlu0 %3660 }
0x149f   : > { %v3664_v37 = vpop.xlane.xlu0 %3663 }
0x14a3   : > { %v3834_v39 = vpop.permute.xlu0 %3833 }
0x14a4   : > { %v3839_v60 = vsel %vm2010_vm1, %v3834_v39, 0  ;;  %v11912_v39 = vld [vmem:[#allocation5 + $0x68] sm:$0xff]  }
0x14d4   : > { %v3543_v41 = vpop.xlane.xlu0 %3542 }
0x14d5   : > { %12277 = vrcp.f32 %v3543_v41 }
0x14d6   : > { %12279 = vrcp.f32 %v3661_v34 }
0x14d7   : > { %12281 = vrcp.f32 %v3664_v37 }
0x14df   : > { %v12278_v43 = vpop.eup %12277 }
0x14e0   : > { %v3592_v45 = vmul.f32 %v12278_v43, %v3587_v28  ;;  %v12280_v51 = vpop.eup %12279  ;;  %v4014_v28 = vpop.permute.xlu0 %4013 }
0x14e1   : > { %v12282_v26 = vpop.eup %12281  ;;  %v4019_v34 = vsel %vm2010_vm1, %v4014_v28, 0 }
0x14e2   : > { %v3593_v48 = vpack.c.bf16 %v3592_v45, %v3591_v44 }
0x14e4   : > { %10963 = vmatmul.mubr.msk.bf16.vlgmr.msra.gmra.mrb[52].mxu1 %vm2010_vm1, %v3593_v48 }
0x14e5   : > { %10974 = vmatprep.mubr.msk.bf16.mxu1 %vm13425_vm0, %v13424_v1 }
0x14e6   : > { %v3709_v50 = vpop.f32.mrb[48].mxu1 }
0x14e7   : > { %v10948_v23 = vpop.f32.mrb[49].mxu1  ;;  %v3716_v54 = vmul.f32 %v12280_v51, %v3709_v50 }
0x14e8   : > { %v3712_v47 = vpop.f32.mrb[50].mxu1 }
0x14e9   : > { %v3717_v55 = vmul.f32 %v12282_v26, %v3712_v47  ;;  %v10949_v56 = vpop.f32.mrb[51].mxu1 }
0x14eb   : > { %v3718_v58 = vpack.c.bf16 %v3717_v55, %v3716_v54 }
0x14ed   : > { %10955 = vmatmul.mubr.msk.bf16.vlgmr.msra.gmra.mrb[36].mxu0 %vm2010_vm1, %v3718_v58 }
0x14ee   : > { %10967 = vmatpush3.bf16.xpose.msra.mxu0 %v3839_v60  ;;  %10968 = vmatprep.mubr.msk.bf16.mxu0 %vm13425_vm0, %v13424_v1 }
0x14ef   : > { %10978 = vmatprep.subr.bf16.mxu0 %v13424_v1 }
0x14f5   : > { %10969 = vmatmul.mubr.msk.bf16.vlgmr.msra.gmra.mrb[40].mxu0 %vm2010_vm1, %v3832_v38  ;;  %v11911_v38 = vld [vmem:[#allocation5 + $0x60] sm:$0xff]  }
0x14f6   : > { %10982 = vmatprep.mubr.msk.bf16.mxu0 %vm13425_vm0, %v13424_v1  ;;  %10979 = vmatpush3.bf16.msra.mxu0 %v11911_v38 }
0x14f7   : > { %10980 = vmatprep.subr.bf16.mxu0 %v13424_v1 }
0x14fa   : > { %10981 = vmatpush3.bf16.msra.mxu0 %v11912_v39 }
0x14fb   : > { %10992 = vmatprep.subr.bf16.mxu0 %v13424_v1 }
0x15b7   : > { %v3824_v62 = vpop.f32.mrb[52].mxu1 }
0x15b8   : > { %v10964_v46 = vpop.f32.mrb[53].mxu1 }
0x15b9   : > { %v3827_v63 = vpop.f32.mrb[54].mxu1 }
0x15ba   : > { %v10965_v2 = vpop.f32.mrb[55].mxu1 }
0x15c0   : > { %v3768_v3 = vpop.f32.mrb[36].mxu0 }
0x15c1   : > { %v14500_v4 = vadd.f32 %v3824_v62, %v3768_v3  ;;  %v10956_v5 = vpop.f32.mrb[37].mxu0 }
0x15c2   : > { %v3771_v6 = vpop.f32.mrb[38].mxu0 }
0x15c3   : > { %v14502_v9 = vadd.f32 %v3827_v63, %v3771_v6  ;;  %v10957_v10 = vpop.f32.mrb[39].mxu0 }
0x15c8   : > { %v3875_v57 = vpop.f32.mrb[40].mxu0 }
0x15c9   : > { %v3876_v11 = vadd.f32 %v3875_v57, %v14254_v61  ;;  %v10970_v12 = vpop.f32.mrb[41].mxu0 }
0x15ca   : > { %v3878_v13 = vpop.f32.mrb[42].mxu0 }
0x15cb   : > { %v3879_v14 = vadd.f32 %v3878_v13, %v14254_v61  ;;  %v10971_v15 = vpop.f32.mrb[43].mxu0  ;;  %v3882_v16 = vsel %vm2058_vm3, %v3876_v11, -inf }
0x15cc   : > { %3883 = vmax.xlane.f32.xlu1 %v3882_v16 }
0x15cd   : > { %v3885_v17 = vsel %vm2058_vm3, %v3879_v14, -inf }
0x15d0   : > { %3886 = vmax.xlane.f32.xlu1 %v3885_v17 }
0x15e1   : > { %3903 = vrot.lane.b32.xlu1 %v14434_v32, %s13428_s14 }
0x15e5   : > { %4011 = vrot.lane.b32.xlu1 %v14438_v35, %s13429_s22 }
0x1659   : > { %v3884_v18 = vpop.xlane.xlu1 %3883 }
0x165a   : > { %v3888_v19 = vsub.f32 %v3876_v11, %v3884_v18 }
0x165c   : > { %v3890_v52 = vmul.f32 1.442695, %v3888_v19 }
0x165d   : > { %v3887_v20 = vpop.xlane.xlu1 %3886 }
0x165e   : > { %12283 = vpow2.f32 %v3890_v52  ;;  %v3889_v53 = vsub.f32 %v3879_v14, %v3887_v20  ;;  %v11913_v20 = vld [vmem:[#allocation5 + $0x70] sm:$0xff]  }
0x1660   : > { %v3892_v21 = vmul.f32 1.442695, %v3889_v53  ;;  %v11914_v53 = vld [vmem:[#allocation5 + $0x78] sm:$0xff]  }
0x1661   : > { %v3904_v22 = vpop.permute.xlu1 %3903 }
0x1662   : > { %12285 = vpow2.f32 %v3892_v21  ;;  %10973 = vmatpush3.bf16.msra.mxu1 %v3904_v22 }
0x1663   : > { %10986 = vmatprep.subr.bf16.mxu1 %v13424_v1 }
0x1665   : > { %v4012_v37 = vpop.permute.xlu1 %4011 }
0x1668   : > { %v12284_v24 = vpop.eup %12283 }
0x1669   : > { %v3894_v25 = vsel %vm2058_vm3, %v12284_v24, 0.0 }
0x166a   : > { %3895 = vadd.xlane.f32.xlu1 %v3894_v25 }
0x166c   : > { %v12286_v27 = vpop.eup %12285 }
0x166d   : > { %v3897_v35 = vsel %vm2058_vm3, %v12286_v27, 0.0  ;;  %v3902_v36 = vpack.c.bf16 %v12286_v27, %v12284_v24 }
0x166e   : > { %3898 = vadd.xlane.f32.xlu0 %v3897_v35 }
0x166f   : > { %10975 = vmatmul.mubr.msk.bf16.vlgmr.msra.gmra.mrb[56].mxu1 %vm2058_vm3, %v3902_v36 }
0x1670   : > { %10987 = vmatpush3.bf16.xpose.msra.mxu1 %v4019_v34  ;;  %10988 = vmatprep.mubr.msk.bf16.mxu1 %vm13425_vm0, %v13424_v1 }
0x1671   : > { %10998 = vmatprep.subr.bf16.mxu1 %v13424_v1 }
0x1677   : > { %10989 = vmatmul.mubr.msk.bf16.vlgmr.msra.gmra.mrb[60].mxu1 %vm2010_vm1, %v4012_v37  ;;  %v10156_v37 = vld [vmem:[#allocation7 + $0x1] ss:$0 sm:$0xff] }
0x1678   : > { %11002 = vmatprep.mubr.msk.bf16.mxu1 %vm13425_vm0, %v13424_v1  ;;  %10999 = vmatpush3.bf16.msra.mxu1 %v11913_v20 }
0x1679   : > { %11000 = vmatprep.subr.bf16.mxu1 %v13424_v1 }
0x167c   : > { %11001 = vmatpush3.bf16.msra.mxu1 %v11914_v53 }
0x16f7   : > { %v3896_v40 = vpop.xlane.xlu1 %3895 }
0x16f8   : > { %12287 = vrcp.f32 %v3896_v40 }
0x16fb   : > { %v3899_v41 = vpop.xlane.xlu0 %3898 }
0x16fc   : > { %12289 = vrcp.f32 %v3899_v41 }
0x1702   : > { %v12288_v43 = vpop.eup %12287 }
0x1706   : > { %v12290_v45 = vpop.eup %12289 }
0x1742   : > { %v3943_v42 = vpop.f32.mrb[56].mxu1 }
0x1743   : > { %v10976_v44 = vpop.f32.mrb[57].mxu1  ;;  %v3950_v50 = vmul.f32 %v12288_v43, %v3943_v42 }
0x1744   : > { %v3946_v48 = vpop.f32.mrb[58].mxu1 }
0x1745   : > { %v3951_v51 = vmul.f32 %v12290_v45, %v3946_v48  ;;  %v10977_v23 = vpop.f32.mrb[59].mxu1 }
0x1746   : > { %v11917_v23 = vld [vmem:[%s15334_s7 + $0x84] ss:$8 sps:$4 sm:$0xff]  }
0x1747   : > { %v3952_v26 = vpack.c.bf16 %v3951_v51, %v3950_v50  ;;  %v11915_v51 = vld [vmem:[%s15334_s7 + $0x80] ss:$8 sps:$4 sm:$0xff]  }
0x1749   : > { %10983 = vmatmul.mubr.msk.bf16.vlgmr.msra.gmra.mrb[44].mxu0 %vm2010_vm1, %v3952_v26  ;;  %v11920_v26 = vld [vmem:[%s15334_s7 + $0x94] ss:$8 sps:$4 sm:$0xff]  }
0x174a   : > { %v4055_v47 = vpop.f32.mrb[60].mxu1  ;;  %10994 = vmatprep.mubr.msk.bf16.mxu0 %vm13425_vm0, %v13424_v1 }
0x174b   : > { %v4056_v54 = vadd.f32 %v4055_v47, %v14254_v61  ;;  %v10990_v55 = vpop.f32.mrb[61].mxu1  ;;  %v11918_v47 = vld [vmem:[%s15334_s7 + $0x90] ss:$8 sps:$4 sm:$0xff]  }
0x174c   : > { %v4058_v56 = vpop.f32.mrb[62].mxu1 }
0x174d   : > { %v4059_v58 = vadd.f32 %v4058_v56, %v14254_v61  ;;  %v10991_v60 = vpop.f32.mrb[63].mxu1  ;;  %v4062_v62 = vsel %vm2058_vm3, %v4056_v54, -inf }
0x174e   : > { %4063 = vmax.xlane.f32.xlu0 %v4062_v62 }
0x174f   : > { %v4065_v46 = vsel %vm2058_vm3, %v4059_v58, -inf }
0x1750   : > { %4066 = vmax.xlane.f32.xlu1 %v4065_v46  ;;  %v11923_v46 = vld [vmem:[%s15334_s7 + $0xa4] ss:$8 sps:$4 sm:$0xff]  }
0x1764   : > { %4083 = vrot.lane.b32.xlu0 %v14434_v32, %s13429_s22 }
0x17db   : > { %v4064_v63 = vpop.xlane.xlu0 %4063 }
0x17dc   : > { %v4068_v2 = vsub.f32 %v4056_v54, %v4064_v63  ;;  %v11921_v63 = vld [vmem:[%s15334_s7 + $0xa0] ss:$8 sps:$4 sm:$0xff]  }
0x17dd   : > { %v4067_v3 = vpop.xlane.xlu1 %4066 }
0x17de   : > { %v4070_v5 = vmul.f32 1.442695, %v4068_v2  ;;  %v4069_v6 = vsub.f32 %v4059_v58, %v4067_v3  ;;  %v11926_v2 = vld [vmem:[%s15334_s7 + $0xb4] ss:$8 sps:$4 sm:$0xff]   ;;  %v11924_v3 = vld [vmem:[%s15334_s7 + $0xb0] ss:$8 sps:$4 sm:$0xff]  }
0x17df   : > { %v4084_v10 = vpop.permute.xlu0 %4083 }
0x17e0   : > { %12291 = vpow2.f32 %v4070_v5  ;;  %v4072_v57 = vmul.f32 1.442695, %v4069_v6  ;;  %10993 = vmatpush3.bf16.msra.mxu0 %v4084_v10  ;;  %v11929_v5 = vld [vmem:[%s15334_s7 + $0xc4] ss:$8 sps:$4 sm:$0xff]   ;;  %v11927_v6 = vld [vmem:[%s15334_s7 + $0xc0] ss:$8 sps:$4 sm:$0xff]  }
0x17e1   : > { %4331 = vmatprep.subr.bf16.mxu0 %v11917_v23  ;;  %v11932_v10 = vld [vmem:[%s15334_s7 + $0xd4] ss:$8 sps:$4 sm:$0xff]  }
0x17e2   : > { %12293 = vpow2.f32 %v4072_v57  ;;  %v11930_v57 = vld [vmem:[%s15334_s7 + $0xd0] ss:$8 sps:$4 sm:$0xff]   ;;  %v11960_v23 = vld [vmem:[#allocation19 + $0xa8] ss:$12 sps:$4 sm:$0xff]  }
0x17ea   : > { %v12292_v11 = vpop.eup %12291 }
0x17eb   : > { %v4074_v12 = vsel %vm2058_vm3, %v12292_v11, 0.0 }
0x17ec   : > { %v12294_v13 = vpop.eup %12293  ;;  %4075 = vadd.xlane.f32.xlu1 %v4074_v12  ;;  %v11933_v12 = vld [vmem:[%s15334_s7 + $0xe0] ss:$8 sps:$4 sm:$0xff]  }
0x17ed   : > { %v4082_v14 = vpack.c.bf16 %v12294_v13, %v12292_v11  ;;  %v4077_v32 = vsel %vm2058_vm3, %v12294_v13, 0.0  ;;  %v11935_v11 = vld [vmem:[%s15334_s7 + $0xe4] ss:$8 sps:$4 sm:$0xff]   ;;  %v11938_v13 = vld [vmem:[%s15334_s7 + $0xf4] ss:$8 sps:$4 sm:$0xff]  }
0x17ef   : > { %10995 = vmatmul.mubr.msk.bf16.vlgmr.msra.gmra.mrb[48].mxu0 %vm2058_vm3, %v4082_v14  ;;  %v11936_v14 = vld [vmem:[%s15334_s7 + $0xf0] ss:$8 sps:$4 sm:$0xff]  }
0x17f0   : > { %4078 = vadd.xlane.f32.xlu1 %v4077_v32  ;;  %4363 = vmatprep.mubr.bf16.mxu0 %v13423_v0  ;;  %v11941_v32 = vld [vmem:[#allocation19 + $0x4] ss:$12 sps:$4 sm:$0xff]  }
0x17f1   : > { %4332 = vmatpush1.bf16.msra.mxu0 %v11915_v51  ;;  %v11962_v51 = vld [vmem:[#allocation19 + $0xac] ss:$12 sps:$4 sm:$0xff]  }
0x17f2   : > { %4333 = vmatprep.subr.bf16.mxu0 %v11920_v26  ;;  %v14572_v26 = vld [vmem:[%s1647_s10] sm:$0xff]  ;;  %s10495_s10 = sshll.u32 %s13657_s28, 8 }
0x17f5   : > { %4334 = vmatpush1.bf16.msra.mxu0 %v11918_v47  ;;  %v14576_v47 = vpack.c.bf16 %v14572_v26, %v14572_v26 }
0x17f6   : > { %4335 = vmatprep.subr.bf16.mxu0 %v11923_v46  ;;  %v11971_v46 = vld [vmem:[#allocation13 + $0xe0] sm:$0xff]  }
0x17f9   : > { %4336 = vmatpush1.bf16.msra.mxu0 %v11921_v63  ;;  %v11972_v63 = vld [vmem:[#allocation13 + $0xa0] sm:$0xff]  }
0x17fa   : > { %4337 = vmatprep.subr.bf16.mxu0 %v11926_v2  ;;  %v11973_v2 = vld [vmem:[#allocation13 + $0xe8] sm:$0xff]  }
0x17fd   : > { %4338 = vmatpush1.bf16.msra.mxu0 %v11924_v3  ;;  %v11974_v3 = vld [vmem:[#allocation13 + $0xa8] sm:$0xff]  }
0x17fe   : > { %4339 = vmatprep.subr.bf16.mxu0 %v11929_v5  ;;  %v11975_v5 = vld [vmem:[#allocation13 + $0xf0] sm:$0xff]  }
0x1801   : > { %4340 = vmatpush1.bf16.msra.mxu0 %v11927_v6  ;;  %v11976_v6 = vld [vmem:[#allocation13 + $0xb0] sm:$0xff]  }
0x1802   : > { %4341 = vmatprep.subr.bf16.mxu0 %v11932_v10  ;;  %v11977_v10 = vld [vmem:[#allocation13 + $0xf8] sm:$0xff]  }
0x1805   : > { %4342 = vmatpush1.bf16.msra.mxu0 %v11930_v57  ;;  %v11978_v57 = vld [vmem:[#allocation13 + $0xb8] sm:$0xff]  }
0x1806   : > { %4343 = vmatprep.subr.bf16.mxu0 %v11935_v11  ;;  %v3205_v11 = vld [vmem:[#allocation11 + $0x2] sm:$0x3] }
0x1809   : > { %4344 = vmatpush1.bf16.msra.mxu0 %v11933_v12  ;;  %v4244_v12 = vrot.slane %v3205_v11, %v14220_v31 }
0x180a   : > { %4345 = vmatprep.subr.bf16.mxu0 %v11938_v13  ;;  %v4248_v13 = vrot.slane %v3205_v11, %v14223_v33 }
0x180d   : > { %4346 = vmatpush1.bf16.msra.mxu0 %v11936_v14 }
0x180e   : > { %4903 = vmatprep.subr.bf16.mxu0 %v11941_v32 }
0x181c   : > { %v4002_v15 = vpop.f32.mrb[44].mxu0 }
0x181d   : > { %v4009_v16 = vadd.f32 %v4002_v15, %v14500_v4  ;;  %v10984_v17 = vpop.f32.mrb[45].mxu0 }
0x181e   : > { %v4005_v18 = vpop.f32.mrb[46].mxu0 }
0x181f   : > { %v4010_v19 = vadd.f32 %v4005_v18, %v14502_v9  ;;  %v10985_v52 = vpop.f32.mrb[47].mxu0 }
0x1879   : > { %v4076_v21 = vpop.xlane.xlu1 %4075 }
0x187a   : > { %12295 = vrcp.f32 %v4076_v21  ;;  %v10157_v21 = vld [vmem:[#allocation8 + $0x1] ss:$0 sm:$0xff] }
0x187d   : > { %v4079_v22 = vpop.xlane.xlu1 %4078 }
0x187e   : > { %12297 = vrcp.f32 %v4079_v22 }
0x1884   : > { %v12296_v25 = vpop.eup %12295 }
0x1888   : > { %v12298_v28 = vpop.eup %12297 }
0x18c2   : > { %v4123_v24 = vpop.f32.mrb[48].mxu0 }
0x18c3   : > { %v10996_v27 = vpop.f32.mrb[49].mxu0  ;;  %v4130_v35 = vmul.f32 %v12296_v25, %v4123_v24 }
0x18c4   : > { %v4126_v4 = vpop.f32.mrb[50].mxu0  ;;  %v10158_v27 = vld [vmem:[#allocation10 + $0x1] ss:$0 sm:$0xff] }
0x18c5   : > { %v4131_v36 = vmul.f32 %v12298_v28, %v4126_v4  ;;  %v10997_v34 = vpop.f32.mrb[51].mxu0 }
0x18c7   : > { %v4132_v9 = vpack.c.bf16 %v4131_v36, %v4130_v35  ;;  %v11939_v36 = vld [vmem:[#allocation19] ss:$12 sps:$4 sm:$0xff]  }
0x18c9   : > { %11003 = vmatmul.mubr.msk.bf16.vlgmr.msra.gmra.mrb[64].mxu1 %vm2010_vm1, %v4132_v9  ;;  %v11944_v9 = vld [vmem:[#allocation19 + $0x1c] ss:$12 sps:$4 sm:$0xff]  }
0x199c   : > { %v4182_v38 = vpop.f32.mrb[64].mxu1 }
0x199d   : > { %v4189_v39 = vadd.f32 %v4182_v38, %v4009_v16  ;;  %v11004_v40 = vpop.f32.mrb[65].mxu1  ;;  %v11947_v38 = vld [vmem:[#allocation19 + $0x34] ss:$12 sps:$4 sm:$0xff]  }
0x199e   : > { %v4185_v41 = vpop.f32.mrb[66].mxu1  ;;  %v11950_v40 = vld [vmem:[#allocation19 + $0x4c] ss:$12 sps:$4 sm:$0xff]  }
0x199f   : > { %v4197_v42 = vadd.f32 %v10156_v37, %v4189_v39  ;;  %v4190_v43 = vadd.f32 %v4185_v41, %v4010_v19  ;;  %v11005_v44 = vpop.f32.mrb[67].mxu1  ;;  %v11945_v39 = vld [vmem:[#allocation19 + $0x30] ss:$12 sps:$4 sm:$0xff]   ;;  %v11948_v41 = vld [vmem:[#allocation19 + $0x48] ss:$12 sps:$4 sm:$0xff]  }
0x19a0   : > { %v11956_v44 = vld [vmem:[#allocation19 + $0x7c] ss:$12 sps:$4 sm:$0xff]  }
0x19a1   : > { %v4198_v45 = vadd.f32 %v10156_v37, %v4190_v43  ;;  %v4199_v48 = vadd.f32 %v4197_v42, %v14421_v7  ;;  %v11942_v37 = vld [vmem:[#allocation19 + $0x18] ss:$12 sps:$4 sm:$0xff]   ;;  %v11951_v43 = vld [vmem:[#allocation19 + $0x60] ss:$12 sps:$4 sm:$0xff]  }
0x19a2   : > { %v11953_v42 = vld [vmem:[#allocation19 + $0x64] ss:$12 sps:$4 sm:$0xff]  }
0x19a3   : > { %4201 = vadd.xlane.f32.xlu1 %v4199_v48  ;;  %v4200_v50 = vadd.f32 %v4198_v45, %v14423_v8  ;;  %v11954_v45 = vld [vmem:[#allocation19 + $0x78] ss:$12 sps:$4 sm:$0xff]  }
0x19a7   : > { %4203 = vadd.xlane.f32.xlu1 %v4200_v50 }
0x1a30   : > { %v4202_v54 = vpop.xlane.xlu1 %4201 }
0x1a31   : > { %v4205_v55 = vmul.f32 0.0078125, %v4202_v54  ;;  %v11963_v54 = vld [vmem:[#allocation13 + $0xc0] sm:$0xff]  }
0x1a32   : > { %10592 = vmatprep.subr.bf16.mxu1 %v11963_v54 }
0x1a33   : > { %v4207_v56 = vsub.f32 %v4199_v48, %v4205_v55  ;;  %v11959_v48 = vld [vmem:[#allocation19 + $0x94] ss:$12 sps:$4 sm:$0xff]  }
0x1a34   : > { %v4204_v7 = vpop.xlane.xlu1 %4203  ;;  %v11964_v55 = vld [vmem:[#allocation13 + $0x80] sm:$0xff]  }
0x1a35   : > { %v4206_v8 = vmul.f32 0.0078125, %v4204_v7  ;;  %v4209_v58 = vmul.f32 %v4207_v56, %v4207_v56  ;;  %10593 = vmatpush3.bf16.msra.mxu1 %v11964_v55  ;;  %v11966_v7 = vld [vmem:[#allocation13 + $0x88] sm:$0xff]  }
0x1a37   : > { %v4208_v60 = vsub.f32 %v4200_v50, %v4206_v8  ;;  %4211 = vadd.xlane.f32.xlu1 %v4209_v58  ;;  %v11957_v50 = vld [vmem:[#allocation19 + $0x90] ss:$12 sps:$4 sm:$0xff]  }
0x1a38   : > { %v11967_v8 = vld [vmem:[#allocation13 + $0xd0] sm:$0xff]  }
0x1a39   : > { %v4210_v62 = vmul.f32 %v4208_v60, %v4208_v60  ;;  %v11968_v58 = vld [vmem:[#allocation13 + $0x90] sm:$0xff]  }
0x1a3b   : > { %4213 = vadd.xlane.f32.xlu0 %v4210_v62  ;;  %v11970_v62 = vld [vmem:[#allocation13 + $0x98] sm:$0xff]  }
0x1ac4   : > { %v4212_v15 = vpop.xlane.xlu1 %4211 }
0x1ac5   : > { %v4215_v16 = vmul.f32 0.0078125, %v4212_v15 }
0x1ac7   : > { %v4217_v17 = vadd.f32 1e-05, %v4215_v16 }
0x1ac8   : > { %v4214_v18 = vpop.xlane.xlu0 %4213 }
0x1ac9   : > { %12299 = vrsqrt.f32 %v4217_v17  ;;  %v4216_v19 = vmul.f32 0.0078125, %v4214_v18 }
0x1acb   : > { %v4218_v52 = vadd.f32 1e-05, %v4216_v19 }
0x1acd   : > { %12301 = vrsqrt.f32 %v4218_v52 }
0x1ad3   : > { %v12300_v20 = vpop.eup %12299 }
0x1ad4   : > { %v4221_v53 = vmul.f32 %v12300_v20, %v4207_v56  ;;  %v11965_v56 = vld [vmem:[#allocation13 + $0xc8] sm:$0xff]  }
0x1ad5   : > { %10594 = vmatprep.subr.bf16.mxu1 %v11965_v56  ;;  %v14585_v56 = vld [vmem:[#allocation20] sm:$0x7] }
0x1ad6   : > { %v4229_v25 = vmul.f32 %v10157_v21, %v4221_v53  ;;  %10595 = vmatpush3.bf16.msra.mxu1 %v11966_v7 }
0x1ad7   : > { %v12302_v22 = vpop.eup %12301  ;;  %10596 = vmatprep.subr.bf16.mxu1 %v11967_v8 }
0x1ad8   : > { %v4222_v24 = vmul.f32 %v12302_v22, %v4208_v60  ;;  %v14560_v4 = vadd.f32 %v10158_v27, %v4229_v25  ;;  %v11969_v60 = vld [vmem:[#allocation13 + $0xd8] sm:$0xff]  }
0x1ada   : > { %v4230_v28 = vmul.f32 %v10157_v21, %v4222_v24  ;;  %10597 = vmatpush3.bf16.msra.mxu1 %v11968_v58 }
0x1adb   : > { %10598 = vmatprep.subr.bf16.mxu1 %v11969_v60 }
0x1adc   : > { %v14562_v35 = vadd.f32 %v10158_v27, %v4230_v28 }
0x1ade   : > { %v4239_v34 = vpack.c.bf16 %v14562_v35, %v14560_v4  ;;  %10599 = vmatpush3.bf16.msra.mxu1 %v11970_v62 }
0x1adf   : > { %10600 = vmatprep.subr.bf16.mxu1 %v11971_v46 }
0x1ae0   : > { %4364 = vmatmul.mubr.bf16.vlgmr.msra.gmra.mrb[52].mxu0 %v4239_v34 }
0x1ae1   : > { %4904 = vmatpush1.bf16.msra.mxu0 %v11939_v36  ;;  %4935 = vmatprep.mubr.bf16.mxu0 %v13423_v0 }
0x1ae2   : > { %4905 = vmatprep.subr.bf16.mxu0 %v11944_v9  ;;  %10601 = vmatpush3.bf16.msra.mxu1 %v11972_v63 }
0x1ae3   : > { %10602 = vmatprep.subr.bf16.mxu1 %v11973_v2 }
0x1ae5   : > { %4906 = vmatpush1.bf16.msra.mxu0 %v11942_v37 }
0x1ae6   : > { %4907 = vmatprep.subr.bf16.mxu0 %v11947_v38  ;;  %10603 = vmatpush3.bf16.msra.mxu1 %v11974_v3  ;;  %v4763_v3 = vrot.slane %v14585_v56, %v14220_v31 }
0x1ae7   : > { %10604 = vmatprep.subr.bf16.mxu1 %v11975_v5 }
0x1ae9   : > { %4908 = vmatpush1.bf16.msra.mxu0 %v11945_v39 }
0x1aea   : > { %4909 = vmatprep.subr.bf16.mxu0 %v11950_v40  ;;  %10605 = vmatpush3.bf16.msra.mxu1 %v11976_v6 }
0x1aeb   : > { %10606 = vmatprep.subr.bf16.mxu1 %v11977_v10  ;;  %v4767_v10 = vrot.slane %v14585_v56, %v14223_v33 }
0x1aed   : > { %4910 = vmatpush1.bf16.msra.mxu0 %v11948_v41 }
0x1aee   : > { %4911 = vmatprep.subr.bf16.mxu0 %v11953_v42  ;;  %10607 = vmatpush3.bf16.msra.mxu1 %v11978_v57 }
0x1aef   : > { %11006 = vmatprep.subr.bf16.mxu1 %v13424_v1 }
0x1af1   : > { %4912 = vmatpush1.bf16.msra.mxu0 %v11951_v43 }
0x1af2   : > { %4913 = vmatprep.subr.bf16.mxu0 %v11956_v44 }
0x1af5   : > { %4914 = vmatpush1.bf16.msra.mxu0 %v11954_v45 }
0x1af6   : > { %4915 = vmatprep.subr.bf16.mxu0 %v11959_v48 }
0x1af9   : > { %4916 = vmatpush1.bf16.msra.mxu0 %v11957_v50 }
0x1afa   : > { %4917 = vmatprep.subr.bf16.mxu0 %v11962_v51 }
0x1afd   : > { %4918 = vmatpush1.bf16.msra.mxu0 %v11960_v23 }
0x1afe   : > { %11026 = vmatprep.subr.bf16.mxu0 %v13424_v1 }
0x1b00   : > { %4936 = vmatmul.mubr.bf16.vlgmr.msra.gmra.mrb[56].mxu0 %v14576_v47 }
0x1b01   : > { %11028 = vmatprep.mubr.msk.bf16.mxu0 %vm13425_vm0, %v13424_v1 }
0x1bb3   : > { %v4365_v14 = vpop.f32.mrb[52].mxu0 }
0x1bb4   : > { %v4366_v32 = vadd.f32 %v4365_v14, %v4244_v12  ;;  %v4367_v15 = vpop.f32.mrb[53].mxu0 }
0x1bb5   : > { %v4368_v16 = vadd.f32 %v4367_v15, %v4248_v13  ;;  %v4369_v17 = vpop.f32.mrb[54].mxu0 }
0x1bb6   : > { %v4378_v18 = vmul.f32 0.044715, %v4366_v32  ;;  %v4370_v19 = vadd.f32 %v4369_v17, %v4244_v12  ;;  %v4371_v52 = vpop.f32.mrb[55].mxu0  ;;  %v4374_v7 = vmul.f32 0.5, %v4366_v32 }
0x1bb7   : > { %v4379_v20 = vmul.f32 0.044715, %v4368_v16  ;;  %v4372_v53 = vadd.f32 %v4371_v52, %v4248_v13  ;;  %v4375_v60 = vmul.f32 0.5, %v4368_v16 }
0x1bb8   : > { %v4382_v21 = vmul.f32 %v4378_v18, %v4366_v32  ;;  %v4380_v22 = vmul.f32 0.044715, %v4370_v19  ;;  %v4376_v8 = vmul.f32 0.5, %v4370_v19  ;;  %v11980_v18 = vld [vmem:[#allocation19 + $0x20] ss:$12 sps:$4 sm:$0xff]  }
0x1bb9   : > { %v4383_v24 = vmul.f32 %v4379_v20, %v4368_v16  ;;  %v4381_v25 = vmul.f32 0.044715, %v4372_v53  ;;  %v4377_v62 = vmul.f32 0.5, %v4372_v53 }
0x1bba   : > { %v4386_v27 = vmul.f32 %v4382_v21, %v4366_v32  ;;  %v4384_v28 = vmul.f32 %v4380_v22, %v4370_v19  ;;  %v11982_v22 = vld [vmem:[#allocation19 + $0x50] ss:$12 sps:$4 sm:$0xff]  }
0x1bbb   : > { %v4387_v36 = vmul.f32 %v4383_v24, %v4368_v16  ;;  %v4385_v34 = vmul.f32 %v4381_v25, %v4372_v53  ;;  %v11983_v24 = vld [vmem:[#allocation19 + $0x68] ss:$12 sps:$4 sm:$0xff]   ;;  %v11984_v25 = vld [vmem:[#allocation19 + $0x80] ss:$12 sps:$4 sm:$0xff]  }
0x1bbc   : > { %v4390_v9 = vadd.f32 %v4386_v27, %v4366_v32  ;;  %v4388_v37 = vmul.f32 %v4384_v28, %v4370_v19  ;;  %v11979_v32 = vld [vmem:[#allocation19 + $0x8] ss:$12 sps:$4 sm:$0xff]   ;;  %v11985_v27 = vld [vmem:[#allocation19 + $0x98] ss:$12 sps:$4 sm:$0xff]   ;;  %v11986_v28 = vld [vmem:[#allocation19 + $0xb0] ss:$12 sps:$4 sm:$0xff]  }
0x1bbd   : > { %v4389_v38 = vmul.f32 %v4385_v34, %v4372_v53  ;;  %v4391_v39 = vadd.f32 %v4387_v36, %v4368_v16 }
0x1bbe   : > { %v4394_v40 = vmul.f32 0.7978846, %v4390_v9  ;;  %v4392_v41 = vadd.f32 %v4388_v37, %v4370_v19 }
0x1bbf   : > { %v4393_v42 = vadd.f32 %v4389_v38, %v4372_v53  ;;  %v4395_v43 = vmul.f32 0.7978846, %v4391_v39  ;;  %v11981_v53 = vld [vmem:[#allocation19 + $0x38] ss:$12 sps:$4 sm:$0xff]  }
0x1bc0   : > { %12303 = vtanh.f32 %v4394_v40  ;;  %v4396_v44 = vmul.f32 0.7978846, %v4392_v41  ;;  %v14627_v41 = vand.u32 127, %v1772_v29 }
0x1bc1   : > { %v4397_v45 = vmul.f32 0.7978846, %v4393_v42  ;;  %12305 = vtanh.f32 %v4395_v43  ;;  %v14629_v43 = vld [vmem:[#allocation14 + $0x1] ss:$0 sm:$0xff] }
0x1bc2   : > { %12307 = vtanh.f32 %v4396_v44  ;;  %vm4599_vm4 = vcmp.le.s32.totalorder %v14627_v41, %v14217_v30 }
0x1bc3   : > { %12309 = vtanh.f32 %v4397_v45  ;;  %v14637_v45 = vsel %vm4599_vm4, 0.0, %v13427_v59 }
0x1bca   : > { %v12304_v48 = vpop.eup %12303 }
0x1bcb   : > { %v12306_v50 = vpop.eup %12305  ;;  %v4402_v51 = vadd.f32 1.0, %v12304_v48 }
0x1bcc   : > { %v12308_v23 = vpop.eup %12307  ;;  %v4403_v54 = vadd.f32 1.0, %v12306_v50 }
0x1bcd   : > { %v12310_v55 = vpop.eup %12309  ;;  %v4404_v58 = vadd.f32 1.0, %v12308_v23  ;;  %v4406_v63 = vmul.f32 %v4402_v51, %v4374_v7 }
0x1bce   : > { %v4405_v46 = vadd.f32 1.0, %v12310_v55  ;;  %v4407_v5 = vmul.f32 %v4403_v54, %v4375_v60  ;;  %v4771_v55 = vrot.slane %v14585_v56, %v14243_v49 }
0x1bcf   : > { %v4408_v2 = vmul.f32 %v4404_v58, %v4376_v8 }
0x1bd0   : > { %v4409_v6 = vmul.f32 %v4405_v46, %v4377_v62 }
0x1bd1   : > { %v4410_v57 = vpack.c.bf16 %v4408_v2, %v4406_v63 }
0x1bd2   : > { %v4411_v11 = vpack.c.bf16 %v4409_v6, %v4407_v5 }
0x1bd3   : > { %v4937_v12 = vpop.f32.mrb[56].mxu0 }
0x1bd4   : > { %v4938_v13 = vadd.f32 %v4937_v12, %v4763_v3  ;;  %v4939_v14 = vpop.f32.mrb[57].mxu0  ;;  %4546 = vmatprep.mubr.bf16.mxu1 %v4411_v11 }
0x1bd5   : > { %v4940_v15 = vadd.f32 %v4939_v14, %v4767_v10  ;;  %v4941_v16 = vpop.f32.mrb[58].mxu0  ;;  %4547 = vmatmul.mubr.bf16.vlgmr.msra.gmra.mrb[68].mxu1 %v4410_v57 }
0x1bd6   : > { %v4942_v17 = vpop.f32.mrb[59].mxu0  ;;  %11007 = vmatpush3.bf16.msra.mxu1 %v11979_v32  ;;  %11022 = vmatprep.mubr.msk.bf16.mxu1 %vm13425_vm0, %v13424_v1  ;;  %v4984_v19 = vmul.f32 0.17677669, %v4938_v13 }
0x1bd7   : > { %v14593_v52 = vpack.c.bf16 %v4940_v15, %v4940_v15  ;;  %11008 = vmatprep.subr.bf16.mxu1 %v13424_v1 }
0x1bd8   : > { %v14600_v21 = vpack.c.bf16 %v4984_v19, %v4984_v19  ;;  %v11987_v19 = vld [vmem:[#allocation22] sm:$0xff]  }
0x1bd9   : > { %5099 = vrot.lane.b32.xlu1 %v14593_v52, %s13426_s9  ;;  %v4992_v20 = vsel %vm2010_vm1, %v14593_v52, 0 }
0x1bda   : > { %11027 = vmatpush3.bf16.xpose.msra.mxu0 %v4992_v20  ;;  %11009 = vmatpush3.bf16.msra.mxu1 %v11980_v18 }
0x1bdb   : > { %11038 = vmatprep.subr.bf16.mxu0 %v13424_v1  ;;  %11010 = vmatprep.subr.bf16.mxu1 %v13424_v1 }
0x1bdd   : > { %5096 = vrot.lane.b32.xlu1 %v14600_v21, %s13426_s9 }
0x1bde   : > { %11011 = vmatpush3.bf16.msra.mxu1 %v11981_v53 }
0x1bdf   : > { %11012 = vmatprep.subr.bf16.mxu1 %v13424_v1 }
0x1be1   : > { %11029 = vmatmul.mubr.msk.bf16.vlgmr.msra.gmra.mrb[60].mxu0 %vm2010_vm1, %v14600_v21 }
0x1be2   : > { %11040 = vmatprep.mubr.msk.bf16.mxu0 %vm13425_vm0, %v13424_v1  ;;  %11013 = vmatpush3.bf16.msra.mxu1 %v11982_v22  ;;  %v11989_v22 = vld [vmem:[#allocation22 + $0x10] sm:$0xff]  }
0x1be3   : > { %11014 = vmatprep.subr.bf16.mxu1 %v13424_v1 }
0x1be6   : > { %11015 = vmatpush3.bf16.msra.mxu1 %v11983_v24  ;;  %v11990_v24 = vld [vmem:[#allocation22 + $0x18] sm:$0xff]  }
0x1be7   : > { %11016 = vmatprep.subr.bf16.mxu1 %v13424_v1 }
0x1bea   : > { %11017 = vmatpush3.bf16.msra.mxu1 %v11984_v25 }
0x1beb   : > { %11018 = vmatprep.subr.bf16.mxu1 %v13424_v1 }
0x1bee   : > { %11019 = vmatpush3.bf16.msra.mxu1 %v11985_v27 }
0x1bef   : > { %11020 = vmatprep.subr.bf16.mxu1 %v13424_v1 }
0x1bf2   : > { %11021 = vmatpush3.bf16.msra.mxu1 %v11986_v28 }
0x1bf3   : > { %11032 = vmatprep.subr.bf16.mxu1 %v13424_v1 }
0x1bf5   : > { %11023 = vmatmul.mubr.bf16.vlgmr.msra.gmra.mrb[72].mxu1 %v14576_v47 }
0x1bf6   : > { %11034 = vmatprep.mubr.msk.bf16.mxu1 %vm13425_vm0, %v13424_v1 }
0x1c4b   : > { %v5100_v36 = vpop.permute.xlu1 %5099 }
0x1c4c   : > { %v5105_v34 = vsel %vm2010_vm1, %v5100_v36, 0 }
0x1c4d   : > { %11039 = vmatpush3.bf16.xpose.msra.mxu0 %v5105_v34 }
0x1c4e   : > { %11050 = vmatprep.subr.bf16.mxu0 %v13424_v1 }
0x1c4f   : > { %v5097_v9 = vpop.permute.xlu1 %5096 }
0x1c54   : > { %11041 = vmatmul.mubr.msk.bf16.vlgmr.msra.gmra.mrb[64].mxu0 %vm2010_vm1, %v5097_v9 }
0x1c55   : > { %11054 = vmatprep.mubr.msk.bf16.mxu0 %vm13425_vm0, %v13424_v1  ;;  %11051 = vmatpush3.bf16.msra.mxu0 %v11989_v22  ;;  %v11991_v22 = vld [vmem:[#allocation22 + $0x20] sm:$0xff]  }
0x1c56   : > { %11052 = vmatprep.subr.bf16.mxu0 %v13424_v1 }
0x1c59   : > { %11053 = vmatpush3.bf16.msra.mxu0 %v11990_v24  ;;  %v11992_v24 = vld [vmem:[#allocation22 + $0x28] sm:$0xff]  }
0x1c5a   : > { %11066 = vmatprep.subr.bf16.mxu0 %v13424_v1 }
0x1ca8   : > { %v10608_v37 = vpop.f32.mrb[68].mxu1 }
0x1ca9   : > { %v10609_v38 = vpop.f32.mrb[69].mxu1 }
0x1caa   : > { %v14624_v39 = vadd.f32 %v10609_v38, %v10608_v37  ;;  %v10611_v47 = vpop.f32.mrb[70].mxu1 }
0x1cab   : > { %v10612_v40 = vpop.f32.mrb[71].mxu1 }
0x1cac   : > { %v10613_v42 = vadd.f32 %v10612_v40, %v10611_v47 }
0x1cae   : > { %v14632_v44 = vadd.f32 %v10613_v42, %v14629_v43 }
0x1cb4   : > { %v5028_v48 = vpop.f32.mrb[60].mxu0 }
0x1cb5   : > { %v5029_v50 = vadd.f32 %v5028_v48, %v14637_v45  ;;  %v11030_v51 = vpop.f32.mrb[61].mxu0 }
0x1cb6   : > { %v5031_v23 = vpop.f32.mrb[62].mxu0 }
0x1cb7   : > { %v11031_v29 = vpop.f32.mrb[63].mxu0  ;;  %v5035_v54 = vsel %vm5034_vm5, %v5029_v50, -inf }
0x1cb8   : > { %5036 = vmax.xlane.f32.xlu1 %v5035_v54 }
0x1cc8   : > { %v4978_v30 = vpop.f32.mrb[72].mxu1 }
0x1cc9   : > { %5321 = vrot.lane.b32.xlu1 %v14593_v52, %s13428_s14  ;;  %v11024_v7 = vpop.f32.mrb[73].mxu1  ;;  %v4979_v59 = vadd.f32 %v4978_v30, %v4771_v55 }
0x1cca   : > { %v4981_v8 = vpop.f32.mrb[74].mxu1 }
0x1ccb   : > { %v11025_v58 = vpop.f32.mrb[75].mxu1  ;;  %v14647_v60 = vpack.c.bf16 %v4979_v59, %v4979_v59 }
0x1ccd   : > { %5319 = vrot.lane.b32.xlu1 %v14600_v21, %s13428_s14  ;;  %v5051_v62 = vsel %vm5049_vm6, %v14647_v60, 0 }
0x1cce   : > { %11033 = vmatpush3.bf16.msra.mxu1 %v5051_v62 }
0x1ccf   : > { %11044 = vmatprep.subr.bf16.mxu1 %v13424_v1 }
0x1d27   : > { %v5141_v46 = vpop.f32.mrb[64].mxu0 }
0x1d28   : > { %v5142_v56 = vadd.f32 %v5141_v46, %v14637_v45  ;;  %v11042_v63 = vpop.f32.mrb[65].mxu0 }
0x1d29   : > { %v5144_v2 = vpop.f32.mrb[66].mxu0 }
0x1d2a   : > { %v11043_v3 = vpop.f32.mrb[67].mxu0  ;;  %v5147_v5 = vsel %vm5034_vm5, %v5142_v56, -inf }
0x1d2b   : > { %5148 = vmax.xlane.f32.xlu0 %v5147_v5 }
0x1d41   : > { %5159 = vrot.lane.b32.xlu0 %v14647_v60, %s13426_s9 }
0x1d45   : > { %v5037_v6 = vpop.xlane.xlu1 %5036 }
0x1d46   : > { %v5038_v10 = vsub.f32 %v5029_v50, %v5037_v6 }
0x1d48   : > { %v5039_v57 = vmul.f32 1.442695, %v5038_v10 }
0x1d49   : > { %v5322_v25 = vpop.permute.xlu1 %5321 }
0x1d4a   : > { %12311 = vpow2.f32 %v5039_v57  ;;  %v5327_v59 = vsel %vm2010_vm1, %v5322_v25, 0 }
0x1d4d   : > { %v5320_v27 = vpop.permute.xlu1 %5319 }
0x1d54   : > { %v12312_v11 = vpop.eup %12311 }
0x1d55   : > { %v5041_v12 = vsel %vm5034_vm5, %v12312_v11, 0.0  ;;  %v5045_v13 = vpack.c.bf16 %v12312_v11, %v12312_v11 }
0x1d56   : > { %5042 = vadd.xlane.f32.xlu1 %v5041_v12 }
0x1d57   : > { %11035 = vmatmul.mubr.msk.bf16.vlgmr.msra.gmra.mrb[76].mxu1 %vm5034_vm5, %v5045_v13 }
0x1d58   : > { %11046 = vmatprep.mubr.msk.bf16.mxu1 %vm13425_vm0, %v13424_v1 }
0x1d67   : > { %5486 = vrot.lane.b32.xlu1 %v14600_v21, %s13429_s22  ;;  %v11988_v21 = vld [vmem:[#allocation22 + $0x8] sm:$0xff]  }
0x1db8   : > { %v5149_v14 = vpop.xlane.xlu0 %5148 }
0x1db9   : > { %v5150_v32 = vsub.f32 %v5142_v56, %v5149_v14 }
0x1dbb   : > { %v5151_v15 = vmul.f32 1.442695, %v5150_v32 }
0x1dbc   : > { %v5160_v16 = vpop.permute.xlu0 %5159 }
0x1dbd   : > { %12313 = vpow2.f32 %v5151_v15  ;;  %v5165_v17 = vsel %vm5049_vm6, %v5160_v16, 0 }
0x1dbe   : > { %11045 = vmatpush3.bf16.msra.mxu1 %v5165_v17 }
0x1dbf   : > { %11058 = vmatprep.subr.bf16.mxu1 %v13424_v1 }
0x1dc7   : > { %v12314_v18 = vpop.eup %12313 }
0x1dc8   : > { %v5153_v20 = vsel %vm5034_vm5, %v12314_v18, 0.0  ;;  %v5157_v53 = vpack.c.bf16 %v12314_v18, %v12314_v18 }
0x1dc9   : > { %5154 = vadd.xlane.f32.xlu0 %v5153_v20 }
0x1dca   : > { %11047 = vmatmul.mubr.msk.bf16.vlgmr.msra.gmra.mrb[80].mxu1 %vm5034_vm5, %v5157_v53  ;;  %v4549_v53 = vadd.f32 %v14624_v39, %v14629_v43 }
0x1dcb   : > { %11059 = vmatpush3.bf16.msra.mxu1 %v11987_v19  ;;  %11062 = vmatprep.mubr.msk.bf16.mxu1 %vm13425_vm0, %v13424_v1 }
0x1dcc   : > { %11060 = vmatprep.subr.bf16.mxu1 %v13424_v1 }
0x1dcf   : > { %11061 = vmatpush3.bf16.msra.mxu1 %v11988_v21  ;;  %v14707_v21 = vadd.f32 %v4549_v53, %v14560_v4 }
0x1dd0   : > { %11072 = vmatprep.subr.bf16.mxu1 %v13424_v1 }
0x1ddf   : > { %5380 = vrot.lane.b32.xlu0 %v14647_v60, %s13428_s14 }
0x1de3   : > { %v5043_v28 = vpop.xlane.xlu1 %5042 }
0x1de4   : > { %12315 = vrcp.f32 %v5043_v28 }
0x1dee   : > { %v12316_v36 = vpop.eup %12315 }
0x1e2a   : > { %v5087_v34 = vpop.f32.mrb[76].mxu1 }
0x1e2b   : > { %v5093_v9 = vmul.f32 %v12316_v36, %v5087_v34  ;;  %v11036_v37 = vpop.f32.mrb[77].mxu1 }
0x1e2c   : > { %v5090_v38 = vpop.f32.mrb[78].mxu1 }
0x1e2d   : > { %v5094_v47 = vpack.c.bf16 %v5093_v9, %v5093_v9  ;;  %v11037_v40 = vpop.f32.mrb[79].mxu1 }
0x1e2f   : > { %11063 = vmatmul.mubr.msk.bf16.vlgmr.msra.gmra.mrb[84].mxu1 %vm2010_vm1, %v5094_v47 }
0x1e30   : > { %11074 = vmatprep.mubr.msk.bf16.mxu1 %vm13425_vm0, %v13424_v1 }
0x1e56   : > { %v5155_v42 = vpop.xlane.xlu0 %5154 }
0x1e57   : > { %12317 = vrcp.f32 %v5155_v42 }
0x1e5a   : > { %v5381_v48 = vpop.permute.xlu0 %5380 }
0x1e5b   : > { %v5386_v50 = vsel %vm5049_vm6, %v5381_v48, 0 }
0x1e5c   : > { %11073 = vmatpush3.bf16.msra.mxu1 %v5386_v50 }
0x1e5d   : > { %11086 = vmatprep.subr.bf16.mxu1 %v13424_v1 }
0x1e61   : > { %v12318_v51 = vpop.eup %12317 }
0x1e9d   : > { %v5201_v23 = vpop.f32.mrb[80].mxu1 }
0x1e9e   : > { %v5207_v29 = vmul.f32 %v12318_v51, %v5201_v23  ;;  %v11048_v54 = vpop.f32.mrb[81].mxu1 }
0x1e9f   : > { %v5204_v55 = vpop.f32.mrb[82].mxu1 }
0x1ea0   : > { %v5208_v30 = vpack.c.bf16 %v5207_v29, %v5207_v29  ;;  %v11049_v7 = vpop.f32.mrb[83].mxu1 }
0x1ea1   : > { %v11993_v7 = vld [vmem:[#allocation22 + $0x30] sm:$0xff]  }
0x1ea2   : > { %11055 = vmatmul.mubr.msk.bf16.vlgmr.msra.gmra.mrb[68].mxu0 %vm2010_vm1, %v5208_v30  ;;  %v4556_v30 = vadd.f32 %v14632_v44, %v14562_v35 }
0x1ea3   : > { %11067 = vmatpush3.bf16.xpose.msra.mxu0 %v5327_v59  ;;  %11068 = vmatprep.mubr.msk.bf16.mxu0 %vm13425_vm0, %v13424_v1 }
0x1ea4   : > { %11078 = vmatprep.subr.bf16.mxu0 %v13424_v1 }
0x1eaa   : > { %11069 = vmatmul.mubr.msk.bf16.vlgmr.msra.gmra.mrb[72].mxu0 %vm2010_vm1, %v5320_v27 }
0x1eab   : > { %11082 = vmatprep.mubr.msk.bf16.mxu0 %vm13425_vm0, %v13424_v1  ;;  %11079 = vmatpush3.bf16.msra.mxu0 %v11991_v22 }
0x1eac   : > { %11080 = vmatprep.subr.bf16.mxu0 %v13424_v1 }
0x1eaf   : > { %11081 = vmatpush3.bf16.msra.mxu0 %v11992_v24 }
0x1eb0   : > { %11092 = vmatprep.subr.bf16.mxu0 %v13424_v1 }
0x1f02   : > { %v5313_v8 = vpop.f32.mrb[84].mxu1 }
0x1f03   : > { %v11064_v58 = vpop.f32.mrb[85].mxu1 }
0x1f04   : > { %v5316_v62 = vpop.f32.mrb[86].mxu1 }
0x1f05   : > { %v11065_v46 = vpop.f32.mrb[87].mxu1 }
0x1f75   : > { %v5258_v56 = vpop.f32.mrb[68].mxu0 }
0x1f76   : > { %v14687_v63 = vadd.f32 %v5313_v8, %v5258_v56  ;;  %v11056_v2 = vpop.f32.mrb[69].mxu0  ;;  %v11994_v56 = vld [vmem:[#allocation22 + $0x38] sm:$0xff]  }
0x1f77   : > { %v5261_v3 = vpop.f32.mrb[70].mxu0 }
0x1f78   : > { %v11057_v5 = vpop.f32.mrb[71].mxu0 }
0x1f7d   : > { %v5363_v6 = vpop.f32.mrb[72].mxu0 }
0x1f7e   : > { %v5364_v10 = vadd.f32 %v5363_v6, %v14637_v45  ;;  %v11070_v57 = vpop.f32.mrb[73].mxu0 }
0x1f7f   : > { %v5366_v11 = vpop.f32.mrb[74].mxu0 }
0x1f80   : > { %v11071_v12 = vpop.f32.mrb[75].mxu0  ;;  %v5369_v13 = vsel %vm5034_vm5, %v5364_v10, -inf  ;;  %v11995_v11 = vld [vmem:[#allocation29] ss:$8 sps:$4 sm:$0xff]  }
0x1f81   : > { %5370 = vmax.xlane.f32.xlu0 %v5369_v13  ;;  %v10238_v13 = vld [vmem:[#allocation23] ss:$0 sm:$0xff] }
0x1f97   : > { %5488 = vrot.lane.b32.xlu0 %v14593_v52, %s13429_s22  ;;  %v5487_v52 = vpop.permute.xlu1 %5486 }
0x200e   : > { %v5371_v14 = vpop.xlane.xlu0 %5370 }
0x200f   : > { %v5372_v32 = vsub.f32 %v5364_v10, %v5371_v14 }
0x2011   : > { %v5373_v15 = vmul.f32 1.442695, %v5372_v32 }
0x2012   : > { %v5489_v17 = vpop.permute.xlu0 %5488 }
0x2013   : > { %12319 = vpow2.f32 %v5373_v15  ;;  %v5494_v20 = vsel %vm2010_vm1, %v5489_v17, 0 }
0x201d   : > { %v12320_v16 = vpop.eup %12319 }
0x201e   : > { %v5375_v18 = vsel %vm5034_vm5, %v12320_v16, 0.0  ;;  %v5379_v19 = vpack.c.bf16 %v12320_v16, %v12320_v16 }
0x201f   : > { %5376 = vadd.xlane.f32.xlu0 %v5375_v18 }
0x2020   : > { %11075 = vmatmul.mubr.msk.bf16.vlgmr.msra.gmra.mrb[88].mxu1 %vm5034_vm5, %v5379_v19 }
0x2021   : > { %11087 = vmatpush3.bf16.xpose.msra.mxu1 %v5494_v20  ;;  %11088 = vmatprep.mubr.msk.bf16.mxu1 %vm13425_vm0, %v13424_v1 }
0x2022   : > { %11098 = vmatprep.subr.bf16.mxu1 %v13424_v1 }
0x2028   : > { %11089 = vmatmul.mubr.msk.bf16.vlgmr.msra.gmra.mrb[92].mxu1 %vm2010_vm1, %v5487_v52 }
0x2029   : > { %11102 = vmatprep.mubr.msk.bf16.mxu1 %vm13425_vm0, %v13424_v1  ;;  %11099 = vmatpush3.bf16.msra.mxu1 %v11993_v7 }
0x202a   : > { %11100 = vmatprep.subr.bf16.mxu1 %v13424_v1 }
0x202d   : > { %11101 = vmatpush3.bf16.msra.mxu1 %v11994_v56  ;;  %v10192_v56 = vld [vmem:[#allocation16 + $0x1] ss:$0 sm:$0xff] }
0x2035   : > { %5547 = vrot.lane.b32.xlu0 %v14647_v60, %s13429_s22 }
0x2054   : > { %4557 = vadd.xlane.f32.xlu0 %v14707_v21 }
0x20ac   : > { %v5377_v25 = vpop.xlane.xlu0 %5376 }
0x20ad   : > { %12321 = vrcp.f32 %v5377_v25 }
0x20b0   : > { %v5548_v39 = vpop.permute.xlu0 %5547 }
0x20b1   : > { %v5553_v9 = vsel %vm5049_vm6, %v5548_v39, 0  ;;  %v12001_v39 = vld [vmem:[#allocation29 + $0x20] ss:$8 sps:$4 sm:$0xff]  }
0x20b7   : > { %v12322_v27 = vpop.eup %12321 }
0x20e1   : > { %v4558_v12 = vpop.xlane.xlu0 %4557 }
0x20e2   : > { %v4561_v32 = vmul.f32 0.0078125, %v4558_v12  ;;  %v12024_v12 = vld [vmem:[%s15336_s18 + $0x28] sm:$0xff]  }
0x20e4   : > { %v4563_v52 = vsub.f32 %v14707_v21, %v4561_v32  ;;  %v12009_v21 = vld [vmem:[#allocation29 + $0x44] ss:$8 sps:$4 sm:$0xff]  }
0x20e6   : > { %v4565_v25 = vmul.f32 %v4563_v52, %v4563_v52 }
0x20f3   : > { %v5422_v60 = vpop.f32.mrb[88].mxu1 }
0x20f4   : > { %v5428_v28 = vmul.f32 %v12322_v27, %v5422_v60  ;;  %v11076_v36 = vpop.f32.mrb[89].mxu1  ;;  %v11998_v60 = vld [vmem:[#allocation29 + $0x10] ss:$8 sps:$4 sm:$0xff]  }
0x20f5   : > { %v5425_v43 = vpop.f32.mrb[90].mxu1  ;;  %v12003_v36 = vld [vmem:[#allocation29 + $0x24] ss:$8 sps:$4 sm:$0xff]  }
0x20f6   : > { %v5429_v4 = vpack.c.bf16 %v5428_v28, %v5428_v28  ;;  %v11077_v34 = vpop.f32.mrb[91].mxu1  ;;  %v12000_v28 = vld [vmem:[#allocation29 + $0x14] ss:$8 sps:$4 sm:$0xff]  }
0x20f7   : > { %v12006_v43 = vld [vmem:[#allocation29 + $0x34] ss:$8 sps:$4 sm:$0xff]  }
0x20f8   : > { %11083 = vmatmul.mubr.msk.bf16.vlgmr.msra.gmra.mrb[76].mxu0 %vm2010_vm1, %v5429_v4  ;;  %v12004_v4 = vld [vmem:[#allocation29 + $0x30] ss:$8 sps:$4 sm:$0xff]   ;;  %v12012_v34 = vld [vmem:[#allocation29 + $0x54] ss:$8 sps:$4 sm:$0xff]  }
0x20f9   : > { %11093 = vmatpush3.bf16.msra.mxu0 %v5553_v9  ;;  %11094 = vmatprep.mubr.msk.bf16.mxu0 %vm13425_vm0, %v13424_v1  ;;  %v12010_v9 = vld [vmem:[#allocation29 + $0x50] ss:$8 sps:$4 sm:$0xff]  }
0x20fa   : > { %11106 = vmatprep.subr.bf16.mxu0 %v13424_v1 }
0x20fb   : > { %v5530_v37 = vpop.f32.mrb[92].mxu1 }
0x20fc   : > { %v5531_v38 = vadd.f32 %v5530_v37, %v14637_v45  ;;  %v11090_v47 = vpop.f32.mrb[93].mxu1  ;;  %v12015_v37 = vld [vmem:[#allocation29 + $0x64] ss:$8 sps:$4 sm:$0xff]  }
0x20fd   : > { %v5533_v40 = vpop.f32.mrb[94].mxu1  ;;  %v12018_v47 = vld [vmem:[#allocation29 + $0x74] ss:$8 sps:$4 sm:$0xff]  }
0x20fe   : > { %v11091_v42 = vpop.f32.mrb[95].mxu1  ;;  %v5536_v48 = vsel %vm5034_vm5, %v5531_v38, -inf  ;;  %v12016_v40 = vld [vmem:[#allocation29 + $0x70] ss:$8 sps:$4 sm:$0xff]  }
0x20ff   : > { %5537 = vmax.xlane.f32.xlu1 %v5536_v48  ;;  %v12019_v42 = vld [vmem:[%s15336_s18] sm:$0xff]   ;;  %v12020_v48 = vld [vmem:[%s15336_s18 + $0x8] sm:$0xff]  }
0x218c   : > { %v5538_v50 = vpop.xlane.xlu1 %5537 }
0x218d   : > { %v5539_v51 = vsub.f32 %v5531_v38, %v5538_v50  ;;  %v12013_v38 = vld [vmem:[#allocation29 + $0x60] ss:$8 sps:$4 sm:$0xff]  }
0x218f   : > { %v5540_v23 = vmul.f32 1.442695, %v5539_v51 }
0x2191   : > { %12323 = vpow2.f32 %v5540_v23 }
0x219b   : > { %v12324_v29 = vpop.eup %12323 }
0x219c   : > { %v5542_v54 = vsel %vm5034_vm5, %v12324_v29, 0.0  ;;  %v5546_v55 = vpack.c.bf16 %v12324_v29, %v12324_v29 }
0x219d   : > { %5543 = vadd.xlane.f32.xlu1 %v5542_v54 }
0x219e   : > { %11095 = vmatmul.mubr.msk.bf16.vlgmr.msra.gmra.mrb[80].mxu0 %vm5034_vm5, %v5546_v55 }
0x219f   : > { %11122 = vmatprep.mubr.msk.bf16.mxu0 %vm13425_vm0, %v13424_v1  ;;  %11107 = vmatpush3.bf16.msra.mxu0 %v12019_v42 }
0x21a0   : > { %11108 = vmatprep.subr.bf16.mxu0 %v13424_v1 }
0x21a1   : > { %4559 = vadd.xlane.f32.xlu1 %v4556_v30 }
0x21a3   : > { %11109 = vmatpush3.bf16.msra.mxu0 %v12020_v48 }
0x21a4   : > { %11110 = vmatprep.subr.bf16.mxu0 %v13424_v1 }
0x21cb   : > { %v5479_v59 = vpop.f32.mrb[76].mxu0 }
0x21cc   : > { %v5485_v8 = vadd.f32 %v5479_v59, %v14687_v63  ;;  %v11084_v58 = vpop.f32.mrb[77].mxu0  ;;  %v11997_v63 = vld [vmem:[#allocation29 + $0x4] ss:$8 sps:$4 sm:$0xff]  }
0x21cd   : > { %v5482_v62 = vpop.f32.mrb[78].mxu0  ;;  %5873 = vmatprep.subr.bf16.mxu1 %v11997_v63 }
0x21ce   : > { %v11085_v46 = vpop.f32.mrb[79].mxu0 }
0x21cf   : > { %v12021_v46 = vld [vmem:[%s15336_s18 + $0x10] sm:$0xff]  }
0x21d0   : > { %11111 = vmatpush3.bf16.msra.mxu0 %v12021_v46 }
0x21d1   : > { %11112 = vmatprep.subr.bf16.mxu0 %v13424_v1 }
0x222a   : > { %v5544_v2 = vpop.xlane.xlu1 %5543 }
0x222b   : > { %12325 = vrcp.f32 %v5544_v2 }
0x222e   : > { %v4560_v17 = vpop.xlane.xlu1 %4559 }
0x222f   : > { %v4562_v53 = vmul.f32 0.0078125, %v4560_v17 }
0x2231   : > { %v4564_v24 = vsub.f32 %v4556_v30, %v4562_v53 }
0x2233   : > { %v4566_v27 = vmul.f32 %v4564_v24, %v4564_v24 }
0x2235   : > { %v12326_v3 = vpop.eup %12325 }
0x2271   : > { %v5589_v35 = vpop.f32.mrb[80].mxu0 }
0x2272   : > { %v5595_v44 = vmul.f32 %v12326_v3, %v5589_v35  ;;  %v11096_v5 = vpop.f32.mrb[81].mxu0 }
0x2273   : > { %v5592_v6 = vpop.f32.mrb[82].mxu0  ;;  %v10193_v5 = vld [vmem:[#allocation17 + $0x1] ss:$0 sm:$0xff] }
0x2274   : > { %v5596_v10 = vpack.c.bf16 %v5595_v44, %v5595_v44  ;;  %v11097_v57 = vpop.f32.mrb[83].mxu0  ;;  %v12022_v44 = vld [vmem:[%s15336_s18 + $0x18] sm:$0xff]  }
0x2275   : > { %11113 = vmatpush3.bf16.msra.mxu0 %v12022_v44 }
0x2276   : > { %11103 = vmatmul.mubr.msk.bf16.vlgmr.msra.gmra.mrb[96].mxu1 %vm2010_vm1, %v5596_v10  ;;  %11114 = vmatprep.subr.bf16.mxu0 %v13424_v1 }
0x2277   : > { %5905 = vmatprep.mubr.bf16.mxu1 %v13423_v0  ;;  %5874 = vmatpush1.bf16.msra.mxu1 %v11995_v11  ;;  %v12023_v11 = vld [vmem:[%s15336_s18 + $0x20] sm:$0xff]  }
0x2278   : > { %5875 = vmatprep.subr.bf16.mxu1 %v12000_v28 }
0x2279   : > { %11115 = vmatpush3.bf16.msra.mxu0 %v12023_v11 }
0x227a   : > { %11116 = vmatprep.subr.bf16.mxu0 %v13424_v1 }
0x227b   : > { %5876 = vmatpush1.bf16.msra.mxu1 %v11998_v60 }
0x227c   : > { %5877 = vmatprep.subr.bf16.mxu1 %v12003_v36 }
0x227d   : > { %11117 = vmatpush3.bf16.msra.mxu0 %v12024_v12 }
0x227e   : > { %11118 = vmatprep.subr.bf16.mxu0 %v13424_v1 }
0x227f   : > { %5878 = vmatpush1.bf16.msra.mxu1 %v12001_v39 }
0x2280   : > { %5879 = vmatprep.subr.bf16.mxu1 %v12006_v43 }
0x2283   : > { %5880 = vmatpush1.bf16.msra.mxu1 %v12004_v4 }
0x2284   : > { %5881 = vmatprep.subr.bf16.mxu1 %v12009_v21 }
0x2349   : > { %v5646_v14 = vpop.f32.mrb[96].mxu1 }
0x234a   : > { %v5652_v15 = vadd.f32 %v5646_v14, %v5485_v8  ;;  %v11104_v16 = vpop.f32.mrb[97].mxu1  ;;  %v12026_v14 = vld [vmem:[%s15336_s18 + $0x38] sm:$0xff]  }
0x234b   : > { %v5649_v18 = vpop.f32.mrb[98].mxu1 }
0x234c   : > { %v5659_v19 = vadd.f32 %v10238_v13, %v5652_v15  ;;  %v11105_v20 = vpop.f32.mrb[99].mxu1  ;;  %v12025_v13 = vld [vmem:[%s15336_s18 + $0x30] sm:$0xff]   ;;  %v10239_v18 = vld [vmem:[#allocation25] ss:$0 sm:$0xff] }
0x234d   : > { %11119 = vmatpush3.bf16.msra.mxu0 %v12025_v13  ;;  %v10240_v20 = vld [vmem:[#allocation26] ss:$0 sm:$0xff] }
0x234e   : > { %v5660_v22 = vadd.f32 %v5659_v19, %v14572_v26  ;;  %v12007_v26 = vld [vmem:[#allocation29 + $0x40] ss:$8 sps:$4 sm:$0xff]   ;;  %11120 = vmatprep.subr.bf16.mxu0 %v13424_v1 }
0x234f   : > { %5882 = vmatpush1.bf16.msra.mxu1 %v12007_v26 }
0x2350   : > { %5661 = vadd.xlane.f32.xlu1 %v5660_v22  ;;  %5883 = vmatprep.subr.bf16.mxu1 %v12012_v34 }
0x2351   : > { %11121 = vmatpush3.bf16.msra.mxu0 %v12026_v14 }
0x2352   : > { %11126 = vmatprep.subr.bf16.mxu0 %v13424_v1 }
0x2353   : > { %5884 = vmatpush1.bf16.msra.mxu1 %v12010_v9 }
0x2354   : > { %4567 = vadd.xlane.f32.xlu1 %v4565_v25  ;;  %5885 = vmatprep.subr.bf16.mxu1 %v12015_v37 }
0x2357   : > { %5886 = vmatpush1.bf16.msra.mxu1 %v12013_v38  ;;  %v10241_v38 = vld [vmem:[#allocation28] ss:$0 sm:$0xff] }
0x2358   : > { %4569 = vadd.xlane.f32.xlu1 %v4566_v27  ;;  %5887 = vmatprep.subr.bf16.mxu1 %v12018_v47 }
0x235b   : > { %5888 = vmatpush1.bf16.msra.mxu1 %v12016_v40 }
0x235c   : > { %11132 = vmatprep.subr.bf16.mxu1 %v13424_v1 }
0x23dd   : > { %v5662_v50 = vpop.xlane.xlu1 %5661 }
0x23de   : > { %v5663_v51 = vmul.f32 0.0078125, %v5662_v50 }
0x23e0   : > { %v5664_v23 = vsub.f32 %v5660_v22, %v5663_v51 }
0x23e1   : > { %v4568_v29 = vpop.xlane.xlu1 %4567 }
0x23e2   : > { %v4571_v54 = vmul.f32 0.0078125, %v4568_v29  ;;  %v5665_v55 = vmul.f32 %v5664_v23, %v5664_v23 }
0x23e4   : > { %v4573_v30 = vadd.f32 1e-05, %v4571_v54  ;;  %5666 = vadd.xlane.f32.xlu1 %v5665_v55 }
0x23e5   : > { %v4570_v7 = vpop.xlane.xlu1 %4569 }
0x23e6   : > { %12327 = vrsqrt.f32 %v4573_v30  ;;  %v4572_v59 = vmul.f32 0.0078125, %v4570_v7 }
0x23e8   : > { %v4574_v8 = vadd.f32 1e-05, %v4572_v59 }
0x23ea   : > { %12329 = vrsqrt.f32 %v4574_v8 }
0x23f0   : > { %v12328_v58 = vpop.eup %12327 }
0x23f1   : > { %v4577_v62 = vmul.f32 %v12328_v58, %v4563_v52 }
0x23f3   : > { %v4585_v35 = vmul.f32 %v10192_v56, %v4577_v62 }
0x23f4   : > { %v12330_v2 = vpop.eup %12329 }
0x23f5   : > { %v4578_v3 = vmul.f32 %v12330_v2, %v4564_v24  ;;  %v4593_v10 = vadd.f32 %v10193_v5, %v4585_v35  ;;  %v4686_v24 = vld [vmem:[#allocation31] sm:$0x3] }
0x23f6   : > { %v5786_v25 = vrot.slane %v4686_v24, %v14220_v31  ;;  %v5790_v60 = vrot.slane %v4686_v24, %v14223_v33 }
0x23f7   : > { %v4586_v6 = vmul.f32 %v10192_v56, %v4578_v3 }
0x23f9   : > { %v4594_v57 = vadd.f32 %v10193_v5, %v4586_v6 }
0x23fb   : > { %v14741_v63 = vpack.c.bf16 %v4594_v57, %v4593_v10 }
0x23fd   : > { %5906 = vmatmul.mubr.bf16.vlgmr.msra.gmra.mrb[100].mxu1 %v14741_v63 }
0x23fe   : > { %11134 = vmatprep.mubr.msk.bf16.mxu1 %vm13425_vm0, %v13424_v1 }
0x2471   : > { %v5667_v32 = vpop.xlane.xlu1 %5666 }
0x2472   : > { %v5668_v15 = vmul.f32 0.0078125, %v5667_v32 }
0x2474   : > { %v5669_v16 = vadd.f32 1e-05, %v5668_v15 }
0x2476   : > { %12331 = vrsqrt.f32 %v5669_v16 }
0x2480   : > { %v12332_v17 = vpop.eup %12331 }
0x2481   : > { %v5671_v19 = vmul.f32 %v12332_v17, %v5664_v23  ;;  %v12027_v17 = vld [vmem:[#allocation32] sm:$0xff]  }
0x2483   : > { %v5678_v52 = vmul.f32 %v10239_v18, %v5671_v19 }
0x2485   : > { %v14753_v53 = vadd.f32 %v10240_v20, %v5678_v52  ;;  %v12028_v20 = vld [vmem:[#allocation32 + $0x8] sm:$0xff]   ;;  %v12029_v52 = vld [vmem:[#allocation32 + $0x10] sm:$0xff]  }
0x2487   : > { %v5686_v22 = vpack.c.bf16 %v14753_v53, %v14753_v53 }
0x2489   : > { %11123 = vmatmul.mubr.bf16.vlgmr.msra.gmra.mrb[84].mxu0 %v5686_v22  ;;  %v12030_v22 = vld [vmem:[#allocation32 + $0x18] sm:$0xff]  }
0x248a   : > { %11128 = vmatprep.mubr.msk.bf16.mxu0 %vm13425_vm0, %v13424_v1 }
0x24d0   : > { %v5907_v27 = vpop.f32.mrb[100].mxu1 }
0x24d1   : > { %v5909_v28 = vpop.f32.mrb[101].mxu1  ;;  %v5908_v39 = vadd.f32 %v5907_v27, %v5786_v25 }
0x24d2   : > { %v5911_v36 = vpop.f32.mrb[102].mxu1  ;;  %v5910_v21 = vadd.f32 %v5909_v28, %v5790_v60 }
0x24d3   : > { %v5912_v43 = vadd.f32 %v5911_v36, %v5786_v25  ;;  %v5913_v4 = vpop.f32.mrb[103].mxu1 }
0x24d4   : > { %v5914_v26 = vadd.f32 %v5913_v4, %v5790_v60 }
0x24d5   : > { %v14761_v34 = vpack.c.bf16 %v5912_v43, %v5908_v39 }
0x24d6   : > { %v14763_v9 = vpack.c.bf16 %v5914_v26, %v5910_v21 }
0x24d7   : > { %6026 = vrot.lane.b32.xlu1 %v14761_v34, %s13426_s9  ;;  %v5924_v37 = vsel %vm2010_vm1, %v14761_v34, 0 }
0x24d8   : > { %11127 = vmatpush3.bf16.xpose.msra.mxu0 %v5924_v37  ;;  %11133 = vmatpush3.bf16.msra.mxu1 %v14763_v9 }
0x24d9   : > { %11138 = vmatprep.subr.bf16.mxu0 %v13424_v1  ;;  %11144 = vmatprep.subr.bf16.mxu1 %v13424_v1 }
0x2549   : > { %v6027_v23 = vpop.permute.xlu1 %6026 }
0x254a   : > { %v6032_v54 = vsel %vm2010_vm1, %v6027_v23, 0 }
0x255c   : > { %v5775_v47 = vpop.f32.mrb[84].mxu0 }
0x255d   : > { %v5776_v40 = vadd.f32 %v10241_v38, %v5775_v47  ;;  %v11124_v42 = vpop.f32.mrb[85].mxu0 }
0x255e   : > { %v5778_v48 = vpop.f32.mrb[86].mxu0 }
0x255f   : > { %v5916_v50 = vmul.f32 0.17677669, %v5776_v40  ;;  %v11125_v51 = vpop.f32.mrb[87].mxu0 }
0x2561   : > { %v5917_v29 = vpack.c.bf16 %v5916_v50, %v5916_v50 }
0x2563   : > { %6023 = vrot.lane.b32.xlu0 %v5917_v29, %s13426_s9  ;;  %11129 = vmatmul.mubr.msk.bf16.vlgmr.msra.gmra.mrb[88].mxu0 %vm2010_vm1, %v5917_v29 }
0x2564   : > { %11139 = vmatpush3.bf16.xpose.msra.mxu0 %v6032_v54  ;;  %11140 = vmatprep.mubr.msk.bf16.mxu0 %vm13425_vm0, %v13424_v1 }
0x2565   : > { %11150 = vmatprep.subr.bf16.mxu0 %v13424_v1 }
0x25d5   : > { %v6024_v55 = vpop.permute.xlu0 %6023 }
0x25d6   : > { %11141 = vmatmul.mubr.msk.bf16.vlgmr.msra.gmra.mrb[92].mxu0 %vm2010_vm1, %v6024_v55 }
0x25d7   : > { %11154 = vmatprep.mubr.msk.bf16.mxu0 %vm13425_vm0, %v13424_v1  ;;  %11151 = vmatpush3.bf16.msra.mxu0 %v12029_v52 }
0x25d8   : > { %11152 = vmatprep.subr.bf16.mxu0 %v13424_v1 }
0x25db   : > { %11153 = vmatpush3.bf16.msra.mxu0 %v12030_v22 }
0x25dc   : > { %11166 = vmatprep.subr.bf16.mxu0 %v13424_v1 }
0x2636   : > { %v5960_v30 = vpop.f32.mrb[88].mxu0 }
0x2637   : > { %v5961_v7 = vadd.f32 %v5960_v30, %v14254_v61  ;;  %v11130_v59 = vpop.f32.mrb[89].mxu0 }
0x2638   : > { %v5963_v8 = vpop.f32.mrb[90].mxu0 }
0x2639   : > { %v11131_v58 = vpop.f32.mrb[91].mxu0  ;;  %v5966_v62 = vsel %vm2058_vm3, %v5961_v7, -inf }
0x263a   : > { %5967 = vmax.xlane.f32.xlu1 %v5966_v62 }
0x264b   : > { %6086 = vrot.lane.b32.xlu1 %v14763_v9, %s13426_s9 }
0x264f   : > { %6244 = vrot.lane.b32.xlu1 %v5917_v29, %s13428_s14 }
0x26a9   : > { %v6068_v46 = vpop.f32.mrb[92].mxu0 }
0x26aa   : > { %v6069_v56 = vadd.f32 %v6068_v46, %v14254_v61  ;;  %v11142_v2 = vpop.f32.mrb[93].mxu0 }
0x26ab   : > { %v6071_v3 = vpop.f32.mrb[94].mxu0 }
0x26ac   : > { %v11143_v35 = vpop.f32.mrb[95].mxu0  ;;  %v6074_v44 = vsel %vm2058_vm3, %v6069_v56, -inf }
0x26ad   : > { %6075 = vmax.xlane.f32.xlu0 %v6074_v44 }
0x26c7   : > { %v5968_v5 = vpop.xlane.xlu1 %5967 }
0x26c8   : > { %v5969_v6 = vsub.f32 %v5961_v7, %v5968_v5 }
0x26ca   : > { %v5970_v10 = vmul.f32 1.442695, %v5969_v6 }
0x26cb   : > { %v6087_v13 = vpop.permute.xlu1 %6086 }
0x26cc   : > { %12333 = vpow2.f32 %v5970_v10 }
0x26cf   : > { %v6245_v24 = vpop.permute.xlu1 %6244 }
0x26d6   : > { %v12334_v57 = vpop.eup %12333 }
0x26d7   : > { %v5972_v11 = vsel %vm2058_vm3, %v12334_v57, 0.0  ;;  %v5976_v12 = vpack.c.bf16 %v12334_v57, %v12334_v57 }
0x26d8   : > { %5973 = vadd.xlane.f32.xlu1 %v5972_v11 }
0x26d9   : > { %11135 = vmatmul.mubr.msk.bf16.vlgmr.msra.gmra.mrb[104].mxu1 %vm2058_vm3, %v5976_v12 }
0x26da   : > { %11145 = vmatpush3.bf16.msra.mxu1 %v6087_v13  ;;  %11146 = vmatprep.mubr.msk.bf16.mxu1 %vm13425_vm0, %v13424_v1 }
0x26db   : > { %11158 = vmatprep.subr.bf16.mxu1 %v13424_v1 }
0x26e9   : > { %6305 = vrot.lane.b32.xlu1 %v14763_v9, %s13428_s14 }
0x26ed   : > { %6409 = vrot.lane.b32.xlu1 %v5917_v29, %s13429_s22 }
0x273a   : > { %v6076_v14 = vpop.xlane.xlu0 %6075 }
0x273b   : > { %v6077_v32 = vsub.f32 %v6069_v56, %v6076_v14 }
0x273d   : > { %v6078_v15 = vmul.f32 1.442695, %v6077_v32  ;;  %v12031_v32 = vld [vmem:[#allocation32 + $0x20] sm:$0xff]  }
0x273f   : > { %12335 = vpow2.f32 %v6078_v15  ;;  %v12032_v15 = vld [vmem:[#allocation32 + $0x28] sm:$0xff]  }
0x2749   : > { %v12336_v16 = vpop.eup %12335 }
0x274a   : > { %v6080_v18 = vsel %vm2058_vm3, %v12336_v16, 0.0  ;;  %v6084_v19 = vpack.c.bf16 %v12336_v16, %v12336_v16 }
0x274b   : > { %6081 = vadd.xlane.f32.xlu0 %v6080_v18 }
0x274c   : > { %11147 = vmatmul.mubr.msk.bf16.vlgmr.msra.gmra.mrb[108].mxu1 %vm2058_vm3, %v6084_v19 }
0x274d   : > { %11159 = vmatpush3.bf16.msra.mxu1 %v12027_v17  ;;  %11162 = vmatprep.mubr.msk.bf16.mxu1 %vm13425_vm0, %v13424_v1 }
0x274e   : > { %11160 = vmatprep.subr.bf16.mxu1 %v13424_v1 }
0x2751   : > { %11161 = vmatpush3.bf16.msra.mxu1 %v12028_v20 }
0x2752   : > { %11172 = vmatprep.subr.bf16.mxu1 %v13424_v1 }
0x2761   : > { %6246 = vrot.lane.b32.xlu0 %v14761_v34, %s13428_s14 }
0x2765   : > { %v5974_v25 = vpop.xlane.xlu1 %5973 }
0x2766   : > { %12337 = vrcp.f32 %v5974_v25 }
0x2769   : > { %v6306_v21 = vpop.permute.xlu1 %6305 }
0x2770   : > { %v12338_v27 = vpop.eup %12337 }
0x27ac   : > { %v6014_v60 = vpop.f32.mrb[104].mxu1 }
0x27ad   : > { %v6020_v28 = vmul.f32 %v12338_v27, %v6014_v60  ;;  %v11136_v36 = vpop.f32.mrb[105].mxu1 }
0x27ae   : > { %v6017_v39 = vpop.f32.mrb[106].mxu1 }
0x27af   : > { %v6021_v43 = vpack.c.bf16 %v6020_v28, %v6020_v28  ;;  %v11137_v4 = vpop.f32.mrb[107].mxu1 }
0x27b1   : > { %11163 = vmatmul.mubr.msk.bf16.vlgmr.msra.gmra.mrb[112].mxu1 %vm2010_vm1, %v6021_v43 }
0x27b2   : > { %11173 = vmatpush3.bf16.msra.mxu1 %v6306_v21  ;;  %11174 = vmatprep.mubr.msk.bf16.mxu1 %vm13425_vm0, %v13424_v1 }
0x27b3   : > { %11186 = vmatprep.subr.bf16.mxu1 %v13424_v1 }
0x27d8   : > { %v6082_v26 = vpop.xlane.xlu0 %6081 }
0x27d9   : > { %12339 = vrcp.f32 %v6082_v26 }
0x27dc   : > { %v6247_v42 = vpop.permute.xlu0 %6246 }
0x27dd   : > { %v6252_v23 = vsel %vm2010_vm1, %v6247_v42, 0 }
0x27e3   : > { %v12340_v37 = vpop.eup %12339 }
0x281f   : > { %v6126_v38 = vpop.f32.mrb[108].mxu1 }
0x2820   : > { %v6132_v47 = vmul.f32 %v12340_v37, %v6126_v38  ;;  %v11148_v40 = vpop.f32.mrb[109].mxu1 }
0x2821   : > { %v6129_v48 = vpop.f32.mrb[110].mxu1 }
0x2822   : > { %v6133_v50 = vpack.c.bf16 %v6132_v47, %v6132_v47  ;;  %v11149_v51 = vpop.f32.mrb[111].mxu1  ;;  %v12033_v47 = vld [vmem:[#allocation32 + $0x30] sm:$0xff]  }
0x2824   : > { %11155 = vmatmul.mubr.msk.bf16.vlgmr.msra.gmra.mrb[96].mxu0 %vm2010_vm1, %v6133_v50 }
0x2825   : > { %11167 = vmatpush3.bf16.xpose.msra.mxu0 %v6252_v23  ;;  %11168 = vmatprep.mubr.msk.bf16.mxu0 %vm13425_vm0, %v13424_v1  ;;  %v12034_v23 = vld [vmem:[#allocation32 + $0x38] sm:$0xff]  }
0x2826   : > { %11178 = vmatprep.subr.bf16.mxu0 %v13424_v1 }
0x282c   : > { %11169 = vmatmul.mubr.msk.bf16.vlgmr.msra.gmra.mrb[100].mxu0 %vm2010_vm1, %v6245_v24 }
0x282d   : > { %11182 = vmatprep.mubr.msk.bf16.mxu0 %vm13425_vm0, %v13424_v1  ;;  %11179 = vmatpush3.bf16.msra.mxu0 %v12031_v32 }
0x282e   : > { %11180 = vmatprep.subr.bf16.mxu0 %v13424_v1 }
0x2831   : > { %11181 = vmatpush3.bf16.msra.mxu0 %v12032_v15 }
0x2832   : > { %11192 = vmatprep.subr.bf16.mxu0 %v13424_v1 }
0x2884   : > { %v6238_v29 = vpop.f32.mrb[112].mxu1 }
0x2885   : > { %v11164_v54 = vpop.f32.mrb[113].mxu1 }
0x2886   : > { %v6241_v55 = vpop.f32.mrb[114].mxu1 }
0x2887   : > { %v11165_v30 = vpop.f32.mrb[115].mxu1 }
0x28f7   : > { %v6183_v7 = vpop.f32.mrb[96].mxu0 }
0x28f8   : > { %v14818_v59 = vadd.f32 %v6238_v29, %v6183_v7  ;;  %v11156_v8 = vpop.f32.mrb[97].mxu0 }
0x28f9   : > { %v6186_v58 = vpop.f32.mrb[98].mxu0 }
0x28fa   : > { %v11157_v62 = vpop.f32.mrb[99].mxu0 }
0x28ff   : > { %v6288_v46 = vpop.f32.mrb[100].mxu0 }
0x2900   : > { %v6289_v56 = vadd.f32 %v6288_v46, %v14254_v61  ;;  %v11170_v2 = vpop.f32.mrb[101].mxu0  ;;  %v10286_v46 = vld [vmem:[#allocation34] ss:$0 sm:$0xff] }
0x2901   : > { %v6291_v3 = vpop.f32.mrb[102].mxu0 }
0x2902   : > { %v11171_v35 = vpop.f32.mrb[103].mxu0  ;;  %v6294_v44 = vsel %vm2058_vm3, %v6289_v56, -inf }
0x2903   : > { %6295 = vmax.xlane.f32.xlu0 %v6294_v44 }
0x2919   : > { %6411 = vrot.lane.b32.xlu0 %v14761_v34, %s13429_s22  ;;  %v6410_v34 = vpop.permute.xlu1 %6409 }
0x2990   : > { %v6296_v5 = vpop.xlane.xlu0 %6295 }
0x2991   : > { %v6297_v6 = vsub.f32 %v6289_v56, %v6296_v5 }
0x2993   : > { %v6298_v10 = vmul.f32 1.442695, %v6297_v6  ;;  %v12035_v6 = vld [vmem:[#allocation38] ss:$8 sps:$4 sm:$0xff]  }
0x2994   : > { %v6412_v11 = vpop.permute.xlu0 %6411 }
0x2995   : > { %12341 = vpow2.f32 %v6298_v10  ;;  %v6417_v14 = vsel %vm2010_vm1, %v6412_v11, 0  ;;  %v12037_v10 = vld [vmem:[#allocation38 + $0x4] ss:$8 sps:$4 sm:$0xff]   ;;  %v12038_v11 = vld [vmem:[#allocation38 + $0x10] ss:$8 sps:$4 sm:$0xff]  }
0x299f   : > { %v12342_v57 = vpop.eup %12341 }
0x29a0   : > { %v6300_v12 = vsel %vm2058_vm3, %v12342_v57, 0.0  ;;  %v6304_v13 = vpack.c.bf16 %v12342_v57, %v12342_v57  ;;  %v12040_v57 = vld [vmem:[#allocation38 + $0x14] ss:$8 sps:$4 sm:$0xff]  }
0x29a1   : > { %6301 = vadd.xlane.f32.xlu1 %v6300_v12  ;;  %v12043_v12 = vld [vmem:[#allocation38 + $0x24] ss:$8 sps:$4 sm:$0xff]  }
0x29a2   : > { %11175 = vmatmul.mubr.msk.bf16.vlgmr.msra.gmra.mrb[116].mxu1 %vm2058_vm3, %v6304_v13  ;;  %v12041_v13 = vld [vmem:[#allocation38 + $0x20] ss:$8 sps:$4 sm:$0xff]  }
0x29a3   : > { %11187 = vmatpush3.bf16.xpose.msra.mxu1 %v6417_v14  ;;  %11188 = vmatprep.mubr.msk.bf16.mxu1 %vm13425_vm0, %v13424_v1 }
0x29a4   : > { %11198 = vmatprep.subr.bf16.mxu1 %v13424_v1 }
0x29aa   : > { %11189 = vmatmul.mubr.msk.bf16.vlgmr.msra.gmra.mrb[120].mxu1 %vm2010_vm1, %v6410_v34 }
0x29ab   : > { %11202 = vmatprep.mubr.msk.bf16.mxu1 %vm13425_vm0, %v13424_v1  ;;  %11199 = vmatpush3.bf16.msra.mxu1 %v12033_v47  ;;  %v12061_v47 = vld [vmem:[#allocation40 + $0x48] sm:$0xff]  }
0x29ac   : > { %11200 = vmatprep.subr.bf16.mxu1 %v13424_v1 }
0x29af   : > { %11201 = vmatpush3.bf16.msra.mxu1 %v12034_v23  ;;  %v12067_v23 = vld [vmem:[#allocation40 + $0x60] sm:$0xff]  }
0x29b2   : > { %6470 = vrot.lane.b32.xlu1 %v14763_v9, %s13429_s22 }
0x2a2e   : > { %v6302_v16 = vpop.xlane.xlu1 %6301 }
0x2a2f   : > { %12343 = vrcp.f32 %v6302_v16  ;;  %v12046_v16 = vld [vmem:[#allocation38 + $0x34] ss:$8 sps:$4 sm:$0xff]  }
0x2a32   : > { %v6471_v25 = vpop.permute.xlu1 %6470 }
0x2a39   : > { %v12344_v17 = vpop.eup %12343 }
0x2a75   : > { %v6345_v18 = vpop.f32.mrb[116].mxu1 }
0x2a76   : > { %v6351_v19 = vmul.f32 %v12344_v17, %v6345_v18  ;;  %v11176_v20 = vpop.f32.mrb[117].mxu1  ;;  %v12049_v17 = vld [vmem:[#allocation38 + $0x44] ss:$8 sps:$4 sm:$0xff]   ;;  %v12047_v18 = vld [vmem:[#allocation38 + $0x40] ss:$8 sps:$4 sm:$0xff]  }
0x2a77   : > { %v6348_v52 = vpop.f32.mrb[118].mxu1  ;;  %v12050_v20 = vld [vmem:[#allocation38 + $0x50] ss:$8 sps:$4 sm:$0xff]  }
0x2a78   : > { %v6352_v22 = vpack.c.bf16 %v6351_v19, %v6351_v19  ;;  %v11177_v24 = vpop.f32.mrb[119].mxu1  ;;  %v12052_v19 = vld [vmem:[#allocation38 + $0x54] ss:$8 sps:$4 sm:$0xff]   ;;  %v12055_v52 = vld [vmem:[#allocation38 + $0x64] ss:$8 sps:$4 sm:$0xff]  }
0x2a79   : > { %v12058_v24 = vld [vmem:[#allocation38 + $0x74] ss:$8 sps:$4 sm:$0xff]  }
0x2a7a   : > { %11183 = vmatmul.mubr.msk.bf16.vlgmr.msra.gmra.mrb[104].mxu0 %vm2010_vm1, %v6352_v22  ;;  %v12053_v22 = vld [vmem:[#allocation38 + $0x60] ss:$8 sps:$4 sm:$0xff]  }
0x2a7b   : > { %11193 = vmatpush3.bf16.msra.mxu0 %v6471_v25  ;;  %11194 = vmatprep.mubr.msk.bf16.mxu0 %vm13425_vm0, %v13424_v1  ;;  %v12056_v25 = vld [vmem:[#allocation38 + $0x70] ss:$8 sps:$4 sm:$0xff]  }
0x2a7c   : > { %6699 = vmatprep.subr.bf16.mxu0 %v12037_v10 }
0x2a7d   : > { %v6453_v9 = vpop.f32.mrb[120].mxu1 }
0x2a7e   : > { %v6454_v27 = vadd.f32 %v6453_v9, %v14254_v61  ;;  %v11190_v60 = vpop.f32.mrb[121].mxu1 }
0x2a7f   : > { %v6456_v28 = vpop.f32.mrb[122].mxu1 }
0x2a80   : > { %v11191_v36 = vpop.f32.mrb[123].mxu1  ;;  %v6459_v39 = vsel %vm2058_vm3, %v6454_v27, -inf }
0x2a81   : > { %6460 = vmax.xlane.f32.xlu0 %v6459_v39  ;;  %v10287_v36 = vld [vmem:[#allocation35] ss:$0 sm:$0xff] }
0x2b0e   : > { %v6461_v43 = vpop.xlane.xlu0 %6460 }
0x2b0f   : > { %v6462_v4 = vsub.f32 %v6454_v27, %v6461_v43  ;;  %v10288_v43 = vld [vmem:[#allocation37] ss:$0 sm:$0xff] }
0x2b11   : > { %v6463_v21 = vmul.f32 1.442695, %v6462_v4 }
0x2b13   : > { %12345 = vpow2.f32 %v6463_v21 }
0x2b1d   : > { %v12346_v26 = vpop.eup %12345 }
0x2b1e   : > { %v6465_v37 = vsel %vm2058_vm3, %v12346_v26, 0.0  ;;  %v6469_v38 = vpack.c.bf16 %v12346_v26, %v12346_v26 }
0x2b1f   : > { %6466 = vadd.xlane.f32.xlu0 %v6465_v37  ;;  %v12059_v37 = vld [vmem:[#allocation40 + $0x40] sm:$0xff]  }
0x2b20   : > { %11195 = vmatmul.mubr.msk.bf16.vlgmr.msra.gmra.mrb[108].mxu0 %vm2058_vm3, %v6469_v38  ;;  %v12060_v38 = vld [vmem:[#allocation40] sm:$0xff]   ;;  %10688 = vmatprep.subr.bf16.mxu1 %v12059_v37  ;;  %v12077_v37 = vld [vmem:[#allocation19 + $0xc4] ss:$12 sps:$4 sm:$0xff]  }
0x2b21   : > { %6731 = vmatprep.mubr.bf16.mxu0 %v13423_v0  ;;  %6700 = vmatpush1.bf16.msra.mxu0 %v12035_v6 }
0x2b22   : > { %6701 = vmatprep.subr.bf16.mxu0 %v12040_v57 }
0x2b25   : > { %6702 = vmatpush1.bf16.msra.mxu0 %v12038_v11 }
0x2b26   : > { %6703 = vmatprep.subr.bf16.mxu0 %v12043_v12 }
0x2b29   : > { %6704 = vmatpush1.bf16.msra.mxu0 %v12041_v13 }
0x2b2a   : > { %6705 = vmatprep.subr.bf16.mxu0 %v12046_v16 }
0x2b4d   : > { %v6402_v40 = vpop.f32.mrb[104].mxu0 }
0x2b4e   : > { %v6408_v42 = vadd.f32 %v6402_v40, %v14818_v59  ;;  %v11184_v48 = vpop.f32.mrb[105].mxu0  ;;  %v12062_v40 = vld [vmem:[#allocation40 + $0x8] sm:$0xff]  }
0x2b4f   : > { %v6405_v50 = vpop.f32.mrb[106].mxu0  ;;  %v12064_v48 = vld [vmem:[#allocation40 + $0x10] sm:$0xff]  }
0x2b50   : > { %v11185_v51 = vpop.f32.mrb[107].mxu0  ;;  %v12065_v50 = vld [vmem:[#allocation40 + $0x58] sm:$0xff]  }
0x2b51   : > { %v12066_v51 = vld [vmem:[#allocation40 + $0x18] sm:$0xff]  }
0x2bac   : > { %v6467_v29 = vpop.xlane.xlu0 %6466 }
0x2bad   : > { %12347 = vrcp.f32 %v6467_v29  ;;  %v12068_v29 = vld [vmem:[#allocation40 + $0x20] sm:$0xff]  }
0x2bb7   : > { %v12348_v54 = vpop.eup %12347 }
0x2bf3   : > { %v6510_v55 = vpop.f32.mrb[108].mxu0 }
0x2bf4   : > { %v6516_v30 = vmul.f32 %v12348_v54, %v6510_v55  ;;  %v11196_v7 = vpop.f32.mrb[109].mxu0  ;;  %v12069_v54 = vld [vmem:[#allocation40 + $0x68] sm:$0xff]  }
0x2bf5   : > { %v6513_v8 = vpop.f32.mrb[110].mxu0  ;;  %v12070_v55 = vld [vmem:[#allocation40 + $0x28] sm:$0xff]   ;;  %v12072_v7 = vld [vmem:[#allocation40 + $0x30] sm:$0xff]  }
0x2bf6   : > { %v6517_v58 = vpack.c.bf16 %v6516_v30, %v6516_v30  ;;  %v11197_v62 = vpop.f32.mrb[111].mxu0  ;;  %v12071_v30 = vld [vmem:[#allocation40 + $0x70] sm:$0xff]   ;;  %v12073_v8 = vld [vmem:[#allocation40 + $0x78] sm:$0xff]  }
0x2bf7   : > { %v4722_v62 = vld [vmem:[%s15337_s26] sm:$0x3] }
0x2bf8   : > { %11203 = vmatmul.mubr.msk.bf16.vlgmr.msra.gmra.mrb[124].mxu1 %vm2010_vm1, %v6517_v58  ;;  %v12074_v58 = vld [vmem:[#allocation40 + $0x38] sm:$0xff]  }
0x2bf9   : > { %10689 = vmatpush3.bf16.msra.mxu1 %v12060_v38  ;;  %v12078_v38 = vld [vmem:[#allocation19 + $0xc8] ss:$12 sps:$4 sm:$0xff]  }
0x2bfa   : > { %10690 = vmatprep.subr.bf16.mxu1 %v12061_v47  ;;  %v12081_v47 = vld [vmem:[#allocation19 + $0xdc] ss:$12 sps:$4 sm:$0xff]  }
0x2bfd   : > { %10691 = vmatpush3.bf16.msra.mxu1 %v12062_v40  ;;  %v12082_v40 = vld [vmem:[#allocation19 + $0xe0] ss:$12 sps:$4 sm:$0xff]  }
0x2ccb   : > { %v6567_v56 = vpop.f32.mrb[124].mxu1 }
0x2ccc   : > { %v6573_v2 = vadd.f32 %v6567_v56, %v6408_v42  ;;  %v11204_v59 = vpop.f32.mrb[125].mxu1  ;;  %v12063_v42 = vld [vmem:[#allocation40 + $0x50] sm:$0xff]   ;;  %v6616_v56 = vrot.slane %v4722_v62, %v14223_v33 }
0x2ccd   : > { %v6570_v3 = vpop.f32.mrb[126].mxu1  ;;  %10692 = vmatprep.subr.bf16.mxu1 %v12063_v42  ;;  %v12079_v42 = vld [vmem:[#allocation19 + $0xd8] ss:$12 sps:$4 sm:$0xff]  }
0x2cce   : > { %v6580_v35 = vadd.f32 %v10286_v46, %v6573_v2  ;;  %v11205_v44 = vpop.f32.mrb[127].mxu1  ;;  %10693 = vmatpush3.bf16.msra.mxu1 %v12064_v48  ;;  %v6612_v46 = vrot.slane %v4722_v62, %v14220_v31  ;;  %v12085_v48 = vld [vmem:[#allocation19 + $0xf4] ss:$12 sps:$4 sm:$0xff]  }
0x2ccf   : > { %10694 = vmatprep.subr.bf16.mxu1 %v12065_v50  ;;  %v12083_v50 = vld [vmem:[#allocation19 + $0xf0] ss:$12 sps:$4 sm:$0xff]   ;;  %v12094_v62 = vld [vmem:[#allocation19 + $0x128] ss:$12 sps:$4 sm:$0xff]  }
0x2cd0   : > { %v6581_v5 = vadd.f32 %v6580_v35, %v14753_v53  ;;  %v12044_v53 = vld [vmem:[#allocation38 + $0x30] ss:$8 sps:$4 sm:$0xff]  }
0x2cd1   : > { %6706 = vmatpush1.bf16.msra.mxu0 %v12044_v53 }
0x2cd2   : > { %6582 = vadd.xlane.f32.xlu0 %v6581_v5  ;;  %6707 = vmatprep.subr.bf16.mxu0 %v12049_v17 }
0x2cd3   : > { %10695 = vmatpush3.bf16.msra.mxu1 %v12066_v51 }
0x2cd4   : > { %10696 = vmatprep.subr.bf16.mxu1 %v12067_v23 }
0x2cd5   : > { %6708 = vmatpush1.bf16.msra.mxu0 %v12047_v18 }
0x2cd6   : > { %6709 = vmatprep.subr.bf16.mxu0 %v12052_v19 }
0x2cd7   : > { %10697 = vmatpush3.bf16.msra.mxu1 %v12068_v29 }
0x2cd8   : > { %10698 = vmatprep.subr.bf16.mxu1 %v12069_v54  ;;  %v12086_v54 = vld [vmem:[#allocation19 + $0xf8] ss:$12 sps:$4 sm:$0xff]  }
0x2cd9   : > { %6710 = vmatpush1.bf16.msra.mxu0 %v12050_v20 }
0x2cda   : > { %6711 = vmatprep.subr.bf16.mxu0 %v12055_v52 }
0x2cdb   : > { %10699 = vmatpush3.bf16.msra.mxu1 %v12070_v55  ;;  %v12089_v55 = vld [vmem:[#allocation19 + $0x10c] ss:$12 sps:$4 sm:$0xff]  }
0x2cdc   : > { %10700 = vmatprep.subr.bf16.mxu1 %v12071_v30  ;;  %v12087_v30 = vld [vmem:[#allocation19 + $0x108] ss:$12 sps:$4 sm:$0xff]  }
0x2cdd   : > { %6712 = vmatpush1.bf16.msra.mxu0 %v12053_v22 }
0x2cde   : > { %6713 = vmatprep.subr.bf16.mxu0 %v12058_v24 }
0x2cdf   : > { %10701 = vmatpush3.bf16.msra.mxu1 %v12072_v7  ;;  %v12090_v7 = vld [vmem:[#allocation19 + $0x110] ss:$12 sps:$4 sm:$0xff]  }
0x2ce0   : > { %10702 = vmatprep.subr.bf16.mxu1 %v12073_v8  ;;  %v12093_v8 = vld [vmem:[#allocation19 + $0x124] ss:$12 sps:$4 sm:$0xff]  }
0x2ce1   : > { %6714 = vmatpush1.bf16.msra.mxu0 %v12056_v25 }
0x2ce2   : > { %7250 = vmatprep.subr.bf16.mxu0 %v12077_v37 }
0x2ce3   : > { %10703 = vmatpush3.bf16.msra.mxu1 %v12074_v58  ;;  %v12091_v58 = vld [vmem:[#allocation19 + $0x120] ss:$12 sps:$4 sm:$0xff]  }
0x2ce4   : > { %11206 = vmatprep.subr.bf16.mxu1 %v13424_v1 }
0x2d5f   : > { %v6583_v14 = vpop.xlane.xlu0 %6582 }
0x2d60   : > { %v6584_v34 = vmul.f32 0.0078125, %v6583_v14 }
0x2d62   : > { %v6585_v32 = vsub.f32 %v6581_v5, %v6584_v34 }
0x2d64   : > { %v6586_v15 = vmul.f32 %v6585_v32, %v6585_v32 }
0x2d66   : > { %6587 = vadd.xlane.f32.xlu0 %v6586_v15 }
0x2df3   : > { %v6588_v9 = vpop.xlane.xlu0 %6587 }
0x2df4   : > { %v6589_v27 = vmul.f32 0.0078125, %v6588_v9 }
0x2df6   : > { %v6590_v60 = vadd.f32 1e-05, %v6589_v27  ;;  %v10305_v27 = vld [vmem:[%s15339_s6] ss:$0 sm:$0xff] }
0x2df8   : > { %12349 = vrsqrt.f32 %v6590_v60 }
0x2e02   : > { %v12350_v28 = vpop.eup %12349 }
0x2e03   : > { %v6592_v39 = vmul.f32 %v12350_v28, %v6585_v32 }
0x2e05   : > { %v6599_v4 = vmul.f32 %v10287_v36, %v6592_v39 }
0x2e07   : > { %v14849_v21 = vadd.f32 %v10288_v43, %v6599_v4 }
0x2e09   : > { %v6607_v26 = vpack.c.bf16 %v14849_v21, %v14849_v21 }
0x2e0b   : > { %6732 = vmatmul.mubr.bf16.vlgmr.msra.gmra.mrb[112].mxu0 %v6607_v26  ;;  %v12075_v26 = vld [vmem:[#allocation19 + $0xc0] ss:$12 sps:$4 sm:$0xff]  }
0x2e0c   : > { %7282 = vmatprep.mubr.bf16.mxu0 %v13423_v0  ;;  %7251 = vmatpush1.bf16.msra.mxu0 %v12075_v26 }
0x2e0d   : > { %7252 = vmatprep.subr.bf16.mxu0 %v12081_v47 }
0x2e10   : > { %7253 = vmatpush1.bf16.msra.mxu0 %v12079_v42 }
0x2e11   : > { %7254 = vmatprep.subr.bf16.mxu0 %v12085_v48 }
0x2e14   : > { %7255 = vmatpush1.bf16.msra.mxu0 %v12083_v50 }
0x2e15   : > { %7256 = vmatprep.subr.bf16.mxu0 %v12089_v55 }
0x2e18   : > { %7257 = vmatpush1.bf16.msra.mxu0 %v12087_v30 }
0x2e19   : > { %7258 = vmatprep.subr.bf16.mxu0 %v12093_v8 }
0x2e1c   : > { %7259 = vmatpush1.bf16.msra.mxu0 %v12091_v58 }
0x2ede   : > { %v6733_v2 = vpop.f32.mrb[112].mxu0 }
0x2edf   : > { %v6734_v59 = vadd.f32 %v6733_v2, %v6612_v46  ;;  %v6735_v3 = vpop.f32.mrb[113].mxu0  ;;  %v12097_v46 = vld [vmem:[#allocation19 + $0x13c] ss:$12 sps:$4 sm:$0xff]   ;;  %v12098_v2 = vld [vmem:[#allocation19 + $0x140] ss:$12 sps:$4 sm:$0xff]  }
0x2ee0   : > { %v6736_v35 = vadd.f32 %v6735_v3, %v6616_v56  ;;  %v6737_v44 = vpop.f32.mrb[114].mxu0  ;;  %v12095_v56 = vld [vmem:[#allocation19 + $0x138] ss:$12 sps:$4 sm:$0xff]   ;;  %7260 = vmatprep.subr.bf16.mxu0 %v12097_v46  ;;  %v12099_v3 = vld [vmem:[#allocation19 + $0x150] ss:$12 sps:$4 sm:$0xff]  }
0x2ee1   : > { %v6742_v5 = vmul.f32 0.044715, %v6734_v59  ;;  %v6738_v6 = vpop.f32.mrb[115].mxu0  ;;  %v6740_v17 = vmul.f32 0.5, %v6734_v59  ;;  %7261 = vmatpush1.bf16.msra.mxu0 %v12095_v56  ;;  %v12105_v44 = vld [vmem:[#allocation19 + $0x16c] ss:$12 sps:$4 sm:$0xff]  }
0x2ee2   : > { %v6743_v10 = vmul.f32 0.044715, %v6736_v35  ;;  %v6741_v19 = vmul.f32 0.5, %v6736_v35  ;;  %v12106_v6 = vld [vmem:[#allocation19 + $0x170] ss:$12 sps:$4 sm:$0xff]  }
0x2ee3   : > { %v6744_v57 = vmul.f32 %v6742_v5, %v6734_v59  ;;  %v12103_v5 = vld [vmem:[#allocation19 + $0x168] ss:$12 sps:$4 sm:$0xff]  }
0x2ee4   : > { %v6745_v11 = vmul.f32 %v6743_v10, %v6736_v35 }
0x2ee5   : > { %v6746_v12 = vmul.f32 %v6744_v57, %v6734_v59 }
0x2ee6   : > { %v6747_v13 = vmul.f32 %v6745_v11, %v6736_v35 }
0x2ee7   : > { %v6748_v14 = vadd.f32 %v6746_v12, %v6734_v59  ;;  %v12101_v59 = vld [vmem:[#allocation19 + $0x154] ss:$12 sps:$4 sm:$0xff]  }
0x2ee8   : > { %v6749_v34 = vadd.f32 %v6747_v13, %v6736_v35  ;;  %v12102_v35 = vld [vmem:[#allocation19 + $0x158] ss:$12 sps:$4 sm:$0xff]   ;;  %7262 = vmatprep.subr.bf16.mxu0 %v12101_v59 }
0x2ee9   : > { %v6750_v32 = vmul.f32 0.7978846, %v6748_v14  ;;  %7263 = vmatpush1.bf16.msra.mxu0 %v12099_v3  ;;  %v10322_v13 = vld [vmem:[#allocation41] ss:$0 sm:$0xff] }
0x2eea   : > { %v6751_v15 = vmul.f32 0.7978846, %v6749_v34  ;;  %7264 = vmatprep.subr.bf16.mxu0 %v12105_v44  ;;  %v10323_v34 = vld [vmem:[#allocation43] ss:$0 sm:$0xff] }
0x2eeb   : > { %12351 = vtanh.f32 %v6750_v32 }
0x2eec   : > { %12353 = vtanh.f32 %v6751_v15 }
0x2eed   : > { %7265 = vmatpush1.bf16.msra.mxu0 %v12103_v5 }
0x2eee   : > { %11226 = vmatprep.subr.bf16.mxu0 %v13424_v1 }
0x2ef5   : > { %v12352_v16 = vpop.eup %12351 }
0x2ef6   : > { %v12354_v53 = vpop.eup %12353  ;;  %v6754_v18 = vadd.f32 1.0, %v12352_v16 }
0x2ef7   : > { %v6755_v20 = vadd.f32 1.0, %v12354_v53  ;;  %v6962_v53 = vld [vmem:[#allocation20 + $0x3] sm:$0x7] }
0x2ef8   : > { %v6756_v52 = vmul.f32 %v6754_v18, %v6740_v17  ;;  %v7110_v17 = vrot.slane %v6962_v53, %v14220_v31  ;;  %v7118_v18 = vrot.slane %v6962_v53, %v14243_v49 }
0x2ef9   : > { %v6757_v22 = vmul.f32 %v6755_v20, %v6741_v19  ;;  %v7114_v19 = vrot.slane %v6962_v53, %v14223_v33 }
0x2efa   : > { %v6758_v25 = vpack.c.bf16 %v6756_v52, %v6756_v52 }
0x2efb   : > { %v6759_v24 = vpack.c.bf16 %v6757_v22, %v6757_v22 }
0x2efd   : > { %6894 = vmatprep.mubr.bf16.mxu1 %v6759_v24 }
0x2efe   : > { %6895 = vmatmul.mubr.bf16.vlgmr.msra.gmra.mrb[128].mxu1 %v6758_v25 }
0x2eff   : > { %11222 = vmatprep.mubr.msk.bf16.mxu1 %vm13425_vm0, %v13424_v1  ;;  %11207 = vmatpush3.bf16.msra.mxu1 %v12078_v38 }
0x2f00   : > { %11208 = vmatprep.subr.bf16.mxu1 %v13424_v1 }
0x2f03   : > { %11209 = vmatpush3.bf16.msra.mxu1 %v12082_v40 }
0x2f04   : > { %11210 = vmatprep.subr.bf16.mxu1 %v13424_v1 }
0x2f07   : > { %11211 = vmatpush3.bf16.msra.mxu1 %v12086_v54 }
0x2f08   : > { %11212 = vmatprep.subr.bf16.mxu1 %v13424_v1 }
0x2f0b   : > { %11213 = vmatpush3.bf16.msra.mxu1 %v12090_v7 }
0x2f0c   : > { %11214 = vmatprep.subr.bf16.mxu1 %v13424_v1 }
0x2f0f   : > { %11215 = vmatpush3.bf16.msra.mxu1 %v12094_v62 }
0x2f10   : > { %11216 = vmatprep.subr.bf16.mxu1 %v13424_v1 }
0x2f13   : > { %11217 = vmatpush3.bf16.msra.mxu1 %v12098_v2 }
0x2f14   : > { %11218 = vmatprep.subr.bf16.mxu1 %v13424_v1 }
0x2f17   : > { %11219 = vmatpush3.bf16.msra.mxu1 %v12102_v35 }
0x2f18   : > { %11220 = vmatprep.subr.bf16.mxu1 %v13424_v1 }
0x2f1b   : > { %11221 = vmatpush3.bf16.msra.mxu1 %v12106_v6 }
0x2f1c   : > { %11232 = vmatprep.subr.bf16.mxu1 %v13424_v1 }
0x2fd1   : > { %v10704_v9 = vpop.f32.mrb[128].mxu1 }
0x2fd2   : > { %v10705_v60 = vpop.f32.mrb[129].mxu1 }
0x2fd3   : > { %v10706_v28 = vadd.f32 %v10705_v60, %v10704_v9  ;;  %v10707_v36 = vpop.f32.mrb[130].mxu1 }
0x2fd4   : > { %v10708_v39 = vpop.f32.mrb[131].mxu1 }
0x2fd5   : > { %v6897_v43 = vadd.f32 %v10706_v28, %v10305_v27 }
0x2fd7   : > { %v6902_v4 = vadd.f32 %v6897_v43, %v14849_v21 }
0x2fd9   : > { %6903 = vadd.xlane.f32.xlu1 %v6902_v4 }
0x3066   : > { %v6904_v21 = vpop.xlane.xlu1 %6903 }
0x3067   : > { %v6905_v51 = vmul.f32 0.0078125, %v6904_v21 }
0x3069   : > { %v6906_v23 = vsub.f32 %v6902_v4, %v6905_v51 }
0x306b   : > { %v6907_v29 = vmul.f32 %v6906_v23, %v6906_v23 }
0x306d   : > { %6908 = vadd.xlane.f32.xlu0 %v6907_v29 }
0x30fa   : > { %v6909_v10 = vpop.xlane.xlu0 %6908 }
0x30fb   : > { %v6910_v57 = vmul.f32 0.0078125, %v6909_v10 }
0x30fd   : > { %v6911_v11 = vadd.f32 1e-05, %v6910_v57 }
0x30ff   : > { %12355 = vrsqrt.f32 %v6911_v11  ;;  %v12107_v11 = vld [vmem:[#allocation22 + $0x40] sm:$0xff]  }
0x3109   : > { %v12356_v12 = vpop.eup %12355 }
0x310a   : > { %v6913_v14 = vmul.f32 %v12356_v12, %v6906_v23 }
0x310c   : > { %v6920_v32 = vmul.f32 %v10322_v13, %v6913_v14  ;;  %v12108_v14 = vld [vmem:[#allocation22 + $0x48] sm:$0xff]  }
0x310e   : > { %v14871_v15 = vadd.f32 %v10323_v34, %v6920_v32  ;;  %v12109_v34 = vld [vmem:[#allocation22 + $0x50] sm:$0xff]   ;;  %v12110_v32 = vld [vmem:[#allocation22 + $0x58] sm:$0xff]  }
0x3110   : > { %v7105_v16 = vpack.c.bf16 %v14871_v15, %v14871_v15 }
0x3112   : > { %7283 = vmatmul.mubr.bf16.vlgmr.msra.gmra.mrb[116].mxu0 %v7105_v16  ;;  %11223 = vmatmul.mubr.bf16.vlgmr.msra.gmra.mrb[132].mxu1 %v7105_v16 }
0x3113   : > { %11228 = vmatprep.mubr.msk.bf16.mxu0 %vm13425_vm0, %v13424_v1  ;;  %11234 = vmatprep.mubr.msk.bf16.mxu1 %vm13425_vm0, %v13424_v1 }
0x31e5   : > { %v7284_v20 = vpop.f32.mrb[116].mxu0  ;;  %v7325_v52 = vpop.f32.mrb[132].mxu1 }
0x31e6   : > { %v7285_v22 = vadd.f32 %v7284_v20, %v7110_v17  ;;  %v7326_v24 = vadd.f32 %v7325_v52, %v7118_v18  ;;  %v7286_v25 = vpop.f32.mrb[117].mxu0  ;;  %v11224_v9 = vpop.f32.mrb[133].mxu1 }
0x31e7   : > { %v7287_v27 = vadd.f32 %v7286_v25, %v7114_v19  ;;  %v7288_v60 = vpop.f32.mrb[118].mxu0  ;;  %v7328_v28 = vpop.f32.mrb[134].mxu1 }
0x31e8   : > { %v14882_v36 = vpack.c.bf16 %v7326_v24, %v7326_v24  ;;  %v7289_v39 = vpop.f32.mrb[119].mxu0  ;;  %v11225_v43 = vpop.f32.mrb[135].mxu1  ;;  %v7331_v4 = vmul.f32 0.17677669, %v7285_v22 }
0x31e9   : > { %v14884_v26 = vpack.c.bf16 %v7287_v27, %v7287_v27 }
0x31ea   : > { %v7396_v49 = vsel %vm5049_vm6, %v14882_v36, 0  ;;  %v14893_v38 = vpack.c.bf16 %v7331_v4, %v7331_v4 }
0x31eb   : > { %11233 = vmatpush3.bf16.msra.mxu1 %v7396_v49  ;;  %7444 = vrot.lane.b32.xlu0 %v14884_v26, %s13426_s9  ;;  %v7339_v37 = vsel %vm2010_vm1, %v14884_v26, 0 }
0x31ec   : > { %11227 = vmatpush3.bf16.xpose.msra.mxu0 %v7339_v37  ;;  %11244 = vmatprep.subr.bf16.mxu1 %v13424_v1 }
0x31ed   : > { %11238 = vmatprep.subr.bf16.mxu0 %v13424_v1 }
0x31ef   : > { %7441 = vrot.lane.b32.xlu0 %v14893_v38, %s13426_s9 }
0x31f3   : > { %11229 = vmatmul.mubr.msk.bf16.vlgmr.msra.gmra.mrb[120].mxu0 %vm2010_vm1, %v14893_v38 }
0x31f4   : > { %11240 = vmatprep.mubr.msk.bf16.mxu0 %vm13425_vm0, %v13424_v1 }
0x325d   : > { %v7445_v47 = vpop.permute.xlu0 %7444 }
0x325e   : > { %v7450_v40 = vsel %vm2010_vm1, %v7445_v47, 0 }
0x325f   : > { %11239 = vmatpush3.bf16.xpose.msra.mxu0 %v7450_v40 }
0x3260   : > { %11250 = vmatprep.subr.bf16.mxu0 %v13424_v1 }
0x3261   : > { %v7442_v42 = vpop.permute.xlu0 %7441 }
0x3266   : > { %11241 = vmatmul.mubr.msk.bf16.vlgmr.msra.gmra.mrb[124].mxu0 %vm2010_vm1, %v7442_v42 }
0x3267   : > { %11254 = vmatprep.mubr.msk.bf16.mxu0 %vm13425_vm0, %v13424_v1  ;;  %11251 = vmatpush3.bf16.msra.mxu0 %v12109_v34 }
0x3268   : > { %11252 = vmatprep.subr.bf16.mxu0 %v13424_v1 }
0x326b   : > { %11253 = vmatpush3.bf16.msra.mxu0 %v12110_v32 }
0x326c   : > { %11266 = vmatprep.subr.bf16.mxu0 %v13424_v1 }
0x32c6   : > { %v7375_v48 = vpop.f32.mrb[120].mxu0 }
0x32c7   : > { %v7376_v50 = vadd.f32 %v7375_v48, %v14637_v45  ;;  %v11230_v21 = vpop.f32.mrb[121].mxu0 }
0x32c8   : > { %v7378_v51 = vpop.f32.mrb[122].mxu0 }
0x32c9   : > { %v11231_v23 = vpop.f32.mrb[123].mxu0  ;;  %v7381_v29 = vsel %vm5034_vm5, %v7376_v50, -inf }
0x32ca   : > { %7382 = vmax.xlane.f32.xlu0 %v7381_v29 }
0x32e0   : > { %7666 = vrot.lane.b32.xlu0 %v14884_v26, %s13428_s14 }
0x32e4   : > { %7664 = vrot.lane.b32.xlu0 %v14893_v38, %s13428_s14 }
0x3339   : > { %v7486_v54 = vpop.f32.mrb[124].mxu0 }
0x333a   : > { %v7487_v55 = vadd.f32 %v7486_v54, %v14637_v45  ;;  %v11242_v30 = vpop.f32.mrb[125].mxu0 }
0x333b   : > { %v7489_v7 = vpop.f32.mrb[126].mxu0 }
0x333c   : > { %v11243_v8 = vpop.f32.mrb[127].mxu0  ;;  %v7492_v58 = vsel %vm5034_vm5, %v7487_v55, -inf }
0x333d   : > { %7493 = vmax.xlane.f32.xlu1 %v7492_v58 }
0x334e   : > { %7504 = vrot.lane.b32.xlu1 %v14882_v36, %s13426_s9 }
0x3357   : > { %v7383_v62 = vpop.xlane.xlu0 %7382 }
0x3358   : > { %v7384_v46 = vsub.f32 %v7376_v50, %v7383_v62 }
0x335a   : > { %v7385_v56 = vmul.f32 1.442695, %v7384_v46 }
0x335b   : > { %v7667_v16 = vpop.permute.xlu0 %7666 }
0x335c   : > { %12357 = vpow2.f32 %v7385_v56  ;;  %v7672_v40 = vsel %vm2010_vm1, %v7667_v16, 0 }
0x335f   : > { %v7665_v53 = vpop.permute.xlu0 %7664 }
0x3366   : > { %v12358_v2 = vpop.eup %12357 }
0x3367   : > { %v7387_v59 = vsel %vm5034_vm5, %v12358_v2, 0.0  ;;  %v7391_v3 = vpack.c.bf16 %v12358_v2, %v12358_v2 }
0x3368   : > { %7388 = vadd.xlane.f32.xlu0 %v7387_v59 }
0x3369   : > { %11235 = vmatmul.mubr.msk.bf16.vlgmr.msra.gmra.mrb[136].mxu1 %vm5034_vm5, %v7391_v3 }
0x336a   : > { %11246 = vmatprep.mubr.msk.bf16.mxu1 %vm13425_vm0, %v13424_v1 }
0x33ca   : > { %v7494_v35 = vpop.xlane.xlu1 %7493 }
0x33cb   : > { %v7495_v44 = vsub.f32 %v7487_v55, %v7494_v35 }
0x33cd   : > { %v7496_v5 = vmul.f32 1.442695, %v7495_v44 }
0x33ce   : > { %v7505_v6 = vpop.permute.xlu1 %7504 }
0x33cf   : > { %12359 = vpow2.f32 %v7496_v5  ;;  %v7510_v10 = vsel %vm5049_vm6, %v7505_v6, 0 }
0x33d0   : > { %11245 = vmatpush3.bf16.msra.mxu1 %v7510_v10  ;;  %v12112_v10 = vld [vmem:[#allocation22 + $0x68] sm:$0xff]  }
0x33d1   : > { %11258 = vmatprep.subr.bf16.mxu1 %v13424_v1 }
0x33d9   : > { %v12360_v57 = vpop.eup %12359 }
0x33da   : > { %v7498_v12 = vsel %vm5034_vm5, %v12360_v57, 0.0  ;;  %v7502_v13 = vpack.c.bf16 %v12360_v57, %v12360_v57 }
0x33db   : > { %7499 = vadd.xlane.f32.xlu1 %v7498_v12 }
0x33dc   : > { %11247 = vmatmul.mubr.msk.bf16.vlgmr.msra.gmra.mrb[140].mxu1 %vm5034_vm5, %v7502_v13 }
0x33dd   : > { %11259 = vmatpush3.bf16.msra.mxu1 %v12107_v11  ;;  %11262 = vmatprep.mubr.msk.bf16.mxu1 %vm13425_vm0, %v13424_v1 }
0x33de   : > { %11260 = vmatprep.subr.bf16.mxu1 %v13424_v1 }
0x33e1   : > { %11261 = vmatpush3.bf16.msra.mxu1 %v12108_v14 }
0x33e2   : > { %11272 = vmatprep.subr.bf16.mxu1 %v13424_v1 }
0x33ec   : > { %7725 = vrot.lane.b32.xlu1 %v14882_v36, %s13428_s14 }
0x33f5   : > { %v7389_v17 = vpop.xlane.xlu0 %7388 }
0x33f6   : > { %12361 = vrcp.f32 %v7389_v17 }
0x3400   : > { %v12362_v18 = vpop.eup %12361 }
0x343c   : > { %v7432_v19 = vpop.f32.mrb[136].mxu1 }
0x343d   : > { %v7438_v20 = vmul.f32 %v12362_v18, %v7432_v19  ;;  %v11236_v52 = vpop.f32.mrb[137].mxu1 }
0x343e   : > { %v7435_v22 = vpop.f32.mrb[138].mxu1 }
0x343f   : > { %v7439_v24 = vpack.c.bf16 %v7438_v20, %v7438_v20  ;;  %v11237_v25 = vpop.f32.mrb[139].mxu1 }
0x3441   : > { %11263 = vmatmul.mubr.msk.bf16.vlgmr.msra.gmra.mrb[144].mxu1 %vm2010_vm1, %v7439_v24 }
0x3442   : > { %11274 = vmatprep.mubr.msk.bf16.mxu1 %vm13425_vm0, %v13424_v1 }
0x3468   : > { %v7500_v9 = vpop.xlane.xlu1 %7499 }
0x3469   : > { %12363 = vrcp.f32 %v7500_v9 }
0x346c   : > { %v7726_v27 = vpop.permute.xlu1 %7725 }
0x346d   : > { %v7731_v60 = vsel %vm5049_vm6, %v7726_v27, 0 }
0x346e   : > { %11273 = vmatpush3.bf16.msra.mxu1 %v7731_v60 }
0x346f   : > { %11286 = vmatprep.subr.bf16.mxu1 %v13424_v1 }
0x3473   : > { %v12364_v28 = vpop.eup %12363 }
0x34af   : > { %v7546_v39 = vpop.f32.mrb[140].mxu1 }
0x34b0   : > { %v7552_v43 = vmul.f32 %v12364_v28, %v7546_v39  ;;  %v11248_v4 = vpop.f32.mrb[141].mxu1 }
0x34b1   : > { %v7549_v49 = vpop.f32.mrb[142].mxu1 }
0x34b2   : > { %v7553_v37 = vpack.c.bf16 %v7552_v43, %v7552_v43  ;;  %v11249_v47 = vpop.f32.mrb[143].mxu1 }
0x34b3   : > { %v12114_v47 = vld [vmem:[#allocation22 + $0x78] sm:$0xff]  }
0x34b4   : > { %11255 = vmatmul.mubr.msk.bf16.vlgmr.msra.gmra.mrb[128].mxu0 %vm2010_vm1, %v7553_v37 }
0x34b5   : > { %11267 = vmatpush3.bf16.xpose.msra.mxu0 %v7672_v40  ;;  %11268 = vmatprep.mubr.msk.bf16.mxu0 %vm13425_vm0, %v13424_v1  ;;  %v12117_v40 = vld [vmem:[#allocation29 + $0x84] ss:$8 sps:$4 sm:$0xff]  }
0x34b6   : > { %11278 = vmatprep.subr.bf16.mxu0 %v13424_v1 }
0x34bc   : > { %11269 = vmatmul.mubr.msk.bf16.vlgmr.msra.gmra.mrb[132].mxu0 %vm2010_vm1, %v7665_v53 }
0x34bd   : > { %11282 = vmatprep.mubr.msk.bf16.mxu0 %vm13425_vm0, %v13424_v1 }
0x3514   : > { %v7658_v42 = vpop.f32.mrb[144].mxu1 }
0x3515   : > { %v11264_v48 = vpop.f32.mrb[145].mxu1 }
0x3516   : > { %v7661_v50 = vpop.f32.mrb[146].mxu1 }
0x3517   : > { %v11265_v21 = vpop.f32.mrb[147].mxu1 }
0x3587   : > { %v7603_v51 = vpop.f32.mrb[128].mxu0 }
0x3588   : > { %v14946_v23 = vadd.f32 %v7658_v42, %v7603_v51  ;;  %v11256_v29 = vpop.f32.mrb[129].mxu0 }
0x3589   : > { %v7606_v54 = vpop.f32.mrb[130].mxu0 }
0x358a   : > { %v11257_v55 = vpop.f32.mrb[131].mxu0  ;;  %v12115_v54 = vld [vmem:[#allocation29 + $0x80] ss:$8 sps:$4 sm:$0xff]  }
0x358f   : > { %v7708_v30 = vpop.f32.mrb[132].mxu0 }
0x3590   : > { %v7709_v7 = vadd.f32 %v7708_v30, %v14637_v45  ;;  %v11270_v8 = vpop.f32.mrb[133].mxu0 }
0x3591   : > { %v7711_v58 = vpop.f32.mrb[134].mxu0  ;;  %v12123_v8 = vld [vmem:[#allocation29 + $0xa4] ss:$8 sps:$4 sm:$0xff]  }
0x3592   : > { %v11271_v62 = vpop.f32.mrb[135].mxu0  ;;  %v7714_v46 = vsel %vm5034_vm5, %v7709_v7, -inf  ;;  %v12121_v58 = vld [vmem:[#allocation29 + $0xa0] ss:$8 sps:$4 sm:$0xff]  }
0x3593   : > { %7715 = vmax.xlane.f32.xlu1 %v7714_v46  ;;  %v12126_v62 = vld [vmem:[#allocation29 + $0xb4] ss:$8 sps:$4 sm:$0xff]   ;;  %v12124_v46 = vld [vmem:[#allocation29 + $0xb0] ss:$8 sps:$4 sm:$0xff]  }
0x35a4   : > { %7833 = vrot.lane.b32.xlu1 %v14884_v26, %s13429_s22 }
0x35a8   : > { %7831 = vrot.lane.b32.xlu1 %v14893_v38, %s13429_s22  ;;  %v12111_v38 = vld [vmem:[#allocation22 + $0x60] sm:$0xff]  }
0x35a9   : > { %11279 = vmatpush3.bf16.msra.mxu0 %v12111_v38 }
0x35aa   : > { %11280 = vmatprep.subr.bf16.mxu0 %v13424_v1 }
0x35ad   : > { %11281 = vmatpush3.bf16.msra.mxu0 %v12112_v10 }
0x35ae   : > { %11292 = vmatprep.subr.bf16.mxu0 %v13424_v1 }
0x3620   : > { %v7716_v56 = vpop.xlane.xlu1 %7715 }
0x3621   : > { %v7717_v2 = vsub.f32 %v7709_v7, %v7716_v56  ;;  %v12120_v7 = vld [vmem:[#allocation29 + $0x94] ss:$8 sps:$4 sm:$0xff]   ;;  %v12129_v56 = vld [vmem:[#allocation29 + $0xc4] ss:$8 sps:$4 sm:$0xff]  }
0x3623   : > { %v7718_v59 = vmul.f32 1.442695, %v7717_v2  ;;  %v12127_v2 = vld [vmem:[#allocation29 + $0xc0] ss:$8 sps:$4 sm:$0xff]  }
0x3624   : > { %v7834_v35 = vpop.permute.xlu1 %7833 }
0x3625   : > { %12365 = vpow2.f32 %v7718_v59  ;;  %v7839_v6 = vsel %vm2010_vm1, %v7834_v35, 0  ;;  %v12132_v59 = vld [vmem:[#allocation29 + $0xd4] ss:$8 sps:$4 sm:$0xff]   ;;  %v12135_v35 = vld [vmem:[#allocation29 + $0xe4] ss:$8 sps:$4 sm:$0xff]  }
0x3628   : > { %v7832_v26 = vpop.permute.xlu1 %7831 }
0x362f   : > { %v12366_v3 = vpop.eup %12365 }
0x3630   : > { %v7720_v44 = vsel %vm5034_vm5, %v12366_v3, 0.0  ;;  %v7724_v5 = vpack.c.bf16 %v12366_v3, %v12366_v3  ;;  %v12130_v3 = vld [vmem:[#allocation29 + $0xd0] ss:$8 sps:$4 sm:$0xff]  }
0x3631   : > { %7721 = vadd.xlane.f32.xlu0 %v7720_v44  ;;  %v12133_v44 = vld [vmem:[#allocation29 + $0xe0] ss:$8 sps:$4 sm:$0xff]  }
0x3632   : > { %11275 = vmatmul.mubr.msk.bf16.vlgmr.msra.gmra.mrb[148].mxu1 %vm5034_vm5, %v7724_v5  ;;  %v12138_v5 = vld [vmem:[#allocation29 + $0xf4] ss:$8 sps:$4 sm:$0xff]  }
0x3633   : > { %11287 = vmatpush3.bf16.xpose.msra.mxu1 %v7839_v6  ;;  %11288 = vmatprep.mubr.msk.bf16.mxu1 %vm13425_vm0, %v13424_v1  ;;  %v12136_v6 = vld [vmem:[#allocation29 + $0xf0] ss:$8 sps:$4 sm:$0xff]  }
0x3634   : > { %11298 = vmatprep.subr.bf16.mxu1 %v13424_v1 }
0x363a   : > { %11289 = vmatmul.mubr.msk.bf16.vlgmr.msra.gmra.mrb[152].mxu1 %vm2010_vm1, %v7832_v26  ;;  %v10386_v26 = vld [vmem:[#allocation23 + $0x1] ss:$0 sm:$0xff] }
0x363b   : > { %11302 = vmatprep.mubr.msk.bf16.mxu1 %vm13425_vm0, %v13424_v1 }
0x3647   : > { %7892 = vrot.lane.b32.xlu0 %v14882_v36, %s13429_s22 }
0x36be   : > { %v7722_v57 = vpop.xlane.xlu0 %7721 }
0x36bf   : > { %12367 = vrcp.f32 %v7722_v57 }
0x36c2   : > { %v7893_v34 = vpop.permute.xlu0 %7892 }
0x36c3   : > { %v7898_v17 = vsel %vm5049_vm6, %v7893_v34, 0  ;;  %v7023_v34 = vld [vmem:[#allocation31 + $0x2] sm:$0x3] }
0x36c9   : > { %v12368_v11 = vpop.eup %12367 }
0x3705   : > { %v7767_v12 = vpop.f32.mrb[148].mxu1 }
0x3706   : > { %v7773_v13 = vmul.f32 %v12368_v11, %v7767_v12  ;;  %v11276_v14 = vpop.f32.mrb[149].mxu1 }
0x3707   : > { %v7770_v32 = vpop.f32.mrb[150].mxu1 }
0x3708   : > { %v7774_v16 = vpack.c.bf16 %v7773_v13, %v7773_v13  ;;  %v11277_v53 = vpop.f32.mrb[151].mxu1  ;;  %v8130_v32 = vrot.slane %v7023_v34, %v14220_v31 }
0x370a   : > { %11283 = vmatmul.mubr.msk.bf16.vlgmr.msra.gmra.mrb[136].mxu0 %vm2010_vm1, %v7774_v16 }
0x370b   : > { %11293 = vmatpush3.bf16.msra.mxu0 %v7898_v17  ;;  %11294 = vmatprep.mubr.msk.bf16.mxu0 %vm13425_vm0, %v13424_v1 }
0x370c   : > { %11306 = vmatprep.subr.bf16.mxu0 %v13424_v1 }
0x370d   : > { %v7875_v36 = vpop.f32.mrb[152].mxu1 }
0x370e   : > { %v7876_v18 = vadd.f32 %v7875_v36, %v14637_v45  ;;  %v11290_v19 = vpop.f32.mrb[153].mxu1  ;;  %v12113_v45 = vld [vmem:[#allocation22 + $0x70] sm:$0xff]  }
0x370f   : > { %v7878_v20 = vpop.f32.mrb[154].mxu1  ;;  %11299 = vmatpush3.bf16.msra.mxu1 %v12113_v45 }
0x3710   : > { %v11291_v52 = vpop.f32.mrb[155].mxu1  ;;  %v7881_v22 = vsel %vm5034_vm5, %v7876_v18, -inf  ;;  %11300 = vmatprep.subr.bf16.mxu1 %v13424_v1 }
0x3711   : > { %7882 = vmax.xlane.f32.xlu1 %v7881_v22 }
0x3713   : > { %11301 = vmatpush3.bf16.msra.mxu1 %v12114_v47 }
0x3714   : > { %8217 = vmatprep.subr.bf16.mxu1 %v12117_v40 }
0x379e   : > { %v7883_v24 = vpop.xlane.xlu1 %7882 }
0x379f   : > { %v7884_v25 = vsub.f32 %v7876_v18, %v7883_v24  ;;  %v12139_v24 = vld [vmem:[%s15336_s18 + $0x40] sm:$0xff]  }
0x37a1   : > { %v7885_v9 = vmul.f32 1.442695, %v7884_v25  ;;  %v12140_v25 = vld [vmem:[%s15336_s18 + $0x48] sm:$0xff]  }
0x37a3   : > { %12369 = vpow2.f32 %v7885_v9  ;;  %v12141_v9 = vld [vmem:[%s15336_s18 + $0x50] sm:$0xff]  }
0x37ad   : > { %v12370_v27 = vpop.eup %12369 }
0x37ae   : > { %v7887_v60 = vsel %vm5034_vm5, %v12370_v27, 0.0  ;;  %v7891_v28 = vpack.c.bf16 %v12370_v27, %v12370_v27  ;;  %v12142_v27 = vld [vmem:[%s15336_s18 + $0x58] sm:$0xff]  }
0x37af   : > { %7888 = vadd.xlane.f32.xlu0 %v7887_v60 }
0x37b0   : > { %11295 = vmatmul.mubr.msk.bf16.vlgmr.msra.gmra.mrb[140].mxu0 %vm5034_vm5, %v7891_v28 }
0x37b1   : > { %11322 = vmatprep.mubr.msk.bf16.mxu0 %vm13425_vm0, %v13424_v1  ;;  %11307 = vmatpush3.bf16.msra.mxu0 %v12139_v24 }
0x37b2   : > { %11308 = vmatprep.subr.bf16.mxu0 %v13424_v1 }
0x37b5   : > { %11309 = vmatpush3.bf16.msra.mxu0 %v12140_v25  ;;  %v12147_v25 = vld [vmem:[#allocation32 + $0x40] sm:$0xff]  }
0x37b6   : > { %11310 = vmatprep.subr.bf16.mxu0 %v13424_v1 }
0x37b9   : > { %11311 = vmatpush3.bf16.msra.mxu0 %v12141_v9 }
0x37ba   : > { %11312 = vmatprep.subr.bf16.mxu0 %v13424_v1 }
0x37bd   : > { %11313 = vmatpush3.bf16.msra.mxu0 %v12142_v27 }
0x37be   : > { %11314 = vmatprep.subr.bf16.mxu0 %v13424_v1 }
0x37dd   : > { %v7824_v39 = vpop.f32.mrb[136].mxu0 }
0x37de   : > { %v7830_v43 = vadd.f32 %v7824_v39, %v14946_v23  ;;  %v11284_v4 = vpop.f32.mrb[137].mxu0  ;;  %v12118_v23 = vld [vmem:[#allocation29 + $0x90] ss:$8 sps:$4 sm:$0xff]  }
0x37df   : > { %v7827_v49 = vpop.f32.mrb[138].mxu0  ;;  %v12144_v4 = vld [vmem:[%s15336_s18 + $0x68] sm:$0xff]  }
0x37e0   : > { %v11285_v37 = vpop.f32.mrb[139].mxu0  ;;  %v12145_v49 = vld [vmem:[%s15336_s18 + $0x70] sm:$0xff]  }
0x37e1   : > { %v12146_v37 = vld [vmem:[%s15336_s18 + $0x78] sm:$0xff]  }
0x383c   : > { %v7889_v42 = vpop.xlane.xlu0 %7888 }
0x383d   : > { %12371 = vrcp.f32 %v7889_v42 }
0x3847   : > { %v12372_v48 = vpop.eup %12371 }
0x3883   : > { %v7934_v50 = vpop.f32.mrb[140].mxu0 }
0x3884   : > { %v7940_v21 = vmul.f32 %v12372_v48, %v7934_v50  ;;  %v11296_v51 = vpop.f32.mrb[141].mxu0  ;;  %v10387_v50 = vld [vmem:[#allocation25 + $0x1] ss:$0 sm:$0xff] }
0x3885   : > { %v7937_v29 = vpop.f32.mrb[142].mxu0  ;;  %v10388_v51 = vld [vmem:[#allocation26 + $0x1] ss:$0 sm:$0xff] }
0x3886   : > { %v7941_v55 = vpack.c.bf16 %v7940_v21, %v7940_v21  ;;  %v11297_v30 = vpop.f32.mrb[143].mxu0 }
0x3888   : > { %11303 = vmatmul.mubr.msk.bf16.vlgmr.msra.gmra.mrb[156].mxu1 %vm2010_vm1, %v7941_v55 }
0x3889   : > { %8218 = vmatpush1.bf16.msra.mxu1 %v12115_v54  ;;  %8249 = vmatprep.mubr.bf16.mxu1 %v13423_v0 }
0x388a   : > { %8219 = vmatprep.subr.bf16.mxu1 %v12120_v7  ;;  %v10389_v7 = vld [vmem:[#allocation28 + $0x1] ss:$0 sm:$0xff] }
0x388d   : > { %8220 = vmatpush1.bf16.msra.mxu1 %v12118_v23 }
0x388e   : > { %8221 = vmatprep.subr.bf16.mxu1 %v12123_v8 }
0x3891   : > { %8222 = vmatpush1.bf16.msra.mxu1 %v12121_v58 }
0x3892   : > { %8223 = vmatprep.subr.bf16.mxu1 %v12126_v62 }
0x3895   : > { %8224 = vmatpush1.bf16.msra.mxu1 %v12124_v46 }
0x3896   : > { %8225 = vmatprep.subr.bf16.mxu1 %v12129_v56 }
0x3899   : > { %8226 = vmatpush1.bf16.msra.mxu1 %v12127_v2 }
0x389a   : > { %8227 = vmatprep.subr.bf16.mxu1 %v12132_v59 }
0x389d   : > { %8228 = vmatpush1.bf16.msra.mxu1 %v12130_v3 }
0x389e   : > { %8229 = vmatprep.subr.bf16.mxu1 %v12135_v35 }
0x38a1   : > { %8230 = vmatpush1.bf16.msra.mxu1 %v12133_v44 }
0x38a2   : > { %8231 = vmatprep.subr.bf16.mxu1 %v12138_v5 }
0x38a5   : > { %8232 = vmatpush1.bf16.msra.mxu1 %v12136_v6 }
0x38a6   : > { %11332 = vmatprep.subr.bf16.mxu1 %v13424_v1 }
0x38a8   : > { %8250 = vmatmul.mubr.bf16.vlgmr.msra.gmra.mrb[160].mxu1 %v14741_v63  ;;  %v8134_v63 = vrot.slane %v7023_v34, %v14223_v33 }
0x38a9   : > { %11334 = vmatprep.mubr.msk.bf16.mxu1 %vm13425_vm0, %v13424_v1 }
0x395b   : > { %v7991_v38 = vpop.f32.mrb[156].mxu1 }
0x395c   : > { %v7997_v10 = vadd.f32 %v7991_v38, %v7830_v43  ;;  %v11304_v57 = vpop.f32.mrb[157].mxu1  ;;  %v12143_v43 = vld [vmem:[%s15336_s18 + $0x60] sm:$0xff]  }
0x395d   : > { %v7994_v11 = vpop.f32.mrb[158].mxu1  ;;  %11315 = vmatpush3.bf16.msra.mxu0 %v12143_v43 }
0x395e   : > { %v8004_v12 = vadd.f32 %v10386_v26, %v7997_v10  ;;  %v11305_v13 = vpop.f32.mrb[159].mxu1  ;;  %11316 = vmatprep.subr.bf16.mxu0 %v13424_v1 }
0x3960   : > { %v8005_v14 = vadd.f32 %v8004_v12, %v14871_v15 }
0x3961   : > { %11317 = vmatpush3.bf16.msra.mxu0 %v12144_v4 }
0x3962   : > { %8006 = vadd.xlane.f32.xlu1 %v8005_v14  ;;  %11318 = vmatprep.subr.bf16.mxu0 %v13424_v1 }
0x3965   : > { %11319 = vmatpush3.bf16.msra.mxu0 %v12145_v49 }
0x3966   : > { %11320 = vmatprep.subr.bf16.mxu0 %v13424_v1 }
0x3969   : > { %11321 = vmatpush3.bf16.msra.mxu0 %v12146_v37 }
0x396a   : > { %11326 = vmatprep.subr.bf16.mxu0 %v13424_v1 }
0x397b   : > { %v8251_v16 = vpop.f32.mrb[160].mxu1 }
0x397c   : > { %v8252_v53 = vadd.f32 %v8251_v16, %v8130_v32  ;;  %v8253_v17 = vpop.f32.mrb[161].mxu1 }
0x397d   : > { %v8255_v36 = vpop.f32.mrb[162].mxu1  ;;  %v8254_v20 = vadd.f32 %v8253_v17, %v8134_v63 }
0x397e   : > { %v8256_v18 = vadd.f32 %v8255_v36, %v8130_v32  ;;  %v8257_v19 = vpop.f32.mrb[163].mxu1 }
0x397f   : > { %v8258_v52 = vadd.f32 %v8257_v19, %v8134_v63 }
0x3980   : > { %v14989_v22 = vpack.c.bf16 %v8256_v18, %v8252_v53 }
0x3981   : > { %v14991_v15 = vpack.c.bf16 %v8258_v52, %v8254_v20 }
0x3982   : > { %v8268_v30 = vsel %vm2010_vm1, %v14989_v22, 0 }
0x3983   : > { %11333 = vmatpush3.bf16.msra.mxu1 %v14991_v15 }
0x3984   : > { %11344 = vmatprep.subr.bf16.mxu1 %v13424_v1 }
0x39ef   : > { %v8007_v60 = vpop.xlane.xlu1 %8006 }
0x39f0   : > { %v8008_v28 = vmul.f32 0.0078125, %v8007_v60  ;;  %v12148_v60 = vld [vmem:[#allocation32 + $0x48] sm:$0xff]  }
0x39f2   : > { %v8009_v45 = vsub.f32 %v8005_v14, %v8008_v28  ;;  %v12149_v28 = vld [vmem:[#allocation32 + $0x50] sm:$0xff]  }
0x39f4   : > { %v8010_v39 = vmul.f32 %v8009_v45, %v8009_v45 }
0x39f6   : > { %8011 = vadd.xlane.f32.xlu1 %v8010_v39 }
0x3a07   : > { %8370 = vrot.lane.b32.xlu1 %v14989_v22, %s13426_s9 }
0x3a83   : > { %v8012_v47 = vpop.xlane.xlu1 %8011 }
0x3a84   : > { %v8013_v40 = vmul.f32 0.0078125, %v8012_v47 }
0x3a86   : > { %v8014_v42 = vadd.f32 1e-05, %v8013_v40 }
0x3a87   : > { %v8371_v2 = vpop.permute.xlu1 %8370 }
0x3a88   : > { %12373 = vrsqrt.f32 %v8014_v42  ;;  %v8376_v3 = vsel %vm2010_vm1, %v8371_v2, 0 }
0x3a92   : > { %v12374_v48 = vpop.eup %12373 }
0x3a93   : > { %v8016_v21 = vmul.f32 %v12374_v48, %v8009_v45  ;;  %v12150_v45 = vld [vmem:[#allocation32 + $0x58] sm:$0xff]  }
0x3a95   : > { %v8023_v29 = vmul.f32 %v10387_v50, %v8016_v21 }
0x3a97   : > { %v15013_v54 = vadd.f32 %v10388_v51, %v8023_v29 }
0x3a99   : > { %v8031_v55 = vpack.c.bf16 %v15013_v54, %v15013_v54 }
0x3a9b   : > { %11323 = vmatmul.mubr.bf16.vlgmr.msra.gmra.mrb[144].mxu0 %v8031_v55 }
0x3a9c   : > { %11327 = vmatpush3.bf16.xpose.msra.mxu0 %v8268_v30  ;;  %11328 = vmatprep.mubr.msk.bf16.mxu0 %vm13425_vm0, %v13424_v1 }
0x3a9d   : > { %11338 = vmatprep.subr.bf16.mxu0 %v13424_v1 }
0x3b6e   : > { %v8120_v23 = vpop.f32.mrb[144].mxu0 }
0x3b6f   : > { %v8121_v8 = vadd.f32 %v10389_v7, %v8120_v23  ;;  %v11324_v58 = vpop.f32.mrb[145].mxu0 }
0x3b70   : > { %v8123_v62 = vpop.f32.mrb[146].mxu0 }
0x3b71   : > { %v8260_v46 = vmul.f32 0.17677669, %v8121_v8  ;;  %v11325_v56 = vpop.f32.mrb[147].mxu0 }
0x3b73   : > { %v8261_v59 = vpack.c.bf16 %v8260_v46, %v8260_v46 }
0x3b75   : > { %8367 = vrot.lane.b32.xlu0 %v8261_v59, %s13426_s9  ;;  %11329 = vmatmul.mubr.msk.bf16.vlgmr.msra.gmra.mrb[148].mxu0 %vm2010_vm1, %v8261_v59 }
0x3b76   : > { %11339 = vmatpush3.bf16.xpose.msra.mxu0 %v8376_v3  ;;  %11340 = vmatprep.mubr.msk.bf16.mxu0 %vm13425_vm0, %v13424_v1 }
0x3b77   : > { %11350 = vmatprep.subr.bf16.mxu0 %v13424_v1 }
0x3be7   : > { %v8368_v35 = vpop.permute.xlu0 %8367 }
0x3be8   : > { %11341 = vmatmul.mubr.msk.bf16.vlgmr.msra.gmra.mrb[152].mxu0 %vm2010_vm1, %v8368_v35 }
0x3be9   : > { %11354 = vmatprep.mubr.msk.bf16.mxu0 %vm13425_vm0, %v13424_v1  ;;  %11351 = vmatpush3.bf16.msra.mxu0 %v12149_v28 }
0x3bea   : > { %11352 = vmatprep.subr.bf16.mxu0 %v13424_v1 }
0x3bed   : > { %11353 = vmatpush3.bf16.msra.mxu0 %v12150_v45 }
0x3bee   : > { %11366 = vmatprep.subr.bf16.mxu0 %v13424_v1 }
0x3c48   : > { %v8304_v44 = vpop.f32.mrb[148].mxu0 }
0x3c49   : > { %v8305_v5 = vadd.f32 %v8304_v44, %v14254_v61  ;;  %v11330_v6 = vpop.f32.mrb[149].mxu0 }
0x3c4a   : > { %v8307_v26 = vpop.f32.mrb[150].mxu0 }
0x3c4b   : > { %v11331_v38 = vpop.f32.mrb[151].mxu0  ;;  %v8310_v10 = vsel %vm2058_vm3, %v8305_v5, -inf }
0x3c4c   : > { %8311 = vmax.xlane.f32.xlu1 %v8310_v10 }
0x3c5d   : > { %8430 = vrot.lane.b32.xlu1 %v14991_v15, %s13426_s9  ;;  %s15340_s9 = sld [smem:[#allocation67_spill]] }
0x3c61   : > { %8588 = vrot.lane.b32.xlu1 %v8261_v59, %s13428_s14 }
0x3c63   : > { %s1654_s1 = scalar_lea.vmem %s15340_s9, %s14568_s2  ;;  %s15126_s9 = scalar_lea.hbm %s13629_s3, %s10495_s10 }
0x3cbb   : > { %v8412_v57 = vpop.f32.mrb[152].mxu0 }
0x3cbc   : > { %v8413_v11 = vadd.f32 %v8412_v57, %v14254_v61  ;;  %v11342_v12 = vpop.f32.mrb[153].mxu0 }
0x3cbd   : > { %v8415_v13 = vpop.f32.mrb[154].mxu0 }
0x3cbe   : > { %v11343_v14 = vpop.f32.mrb[155].mxu0  ;;  %v8418_v34 = vsel %vm2058_vm3, %v8413_v11, -inf }
0x3cbf   : > { %8419 = vmax.xlane.f32.xlu0 %v8418_v34 }
0x3cd9   : > { %v8312_v32 = vpop.xlane.xlu1 %8311 }
0x3cda   : > { %v8313_v16 = vsub.f32 %v8305_v5, %v8312_v32 }
0x3cdc   : > { %v8314_v63 = vmul.f32 1.442695, %v8313_v16 }
0x3cdd   : > { %v8431_v18 = vpop.permute.xlu1 %8430 }
0x3cde   : > { %12375 = vpow2.f32 %v8314_v63 }
0x3ce1   : > { %v8589_v39 = vpop.permute.xlu1 %8588 }
0x3ce8   : > { %v12376_v53 = vpop.eup %12375 }
0x3ce9   : > { %v8316_v17 = vsel %vm2058_vm3, %v12376_v53, 0.0  ;;  %v8320_v36 = vpack.c.bf16 %v12376_v53, %v12376_v53 }
0x3cea   : > { %8317 = vadd.xlane.f32.xlu1 %v8316_v17 }
0x3ceb   : > { %11335 = vmatmul.mubr.msk.bf16.vlgmr.msra.gmra.mrb[164].mxu1 %vm2058_vm3, %v8320_v36  ;;  %v12151_v36 = vld [vmem:[#allocation32 + $0x60] sm:$0xff]  }
0x3cec   : > { %11345 = vmatpush3.bf16.msra.mxu1 %v8431_v18  ;;  %11346 = vmatprep.mubr.msk.bf16.mxu1 %vm13425_vm0, %v13424_v1  ;;  %v12152_v18 = vld [vmem:[#allocation32 + $0x68] sm:$0xff]  }
0x3ced   : > { %11358 = vmatprep.subr.bf16.mxu1 %v13424_v1 }
0x3cfb   : > { %8649 = vrot.lane.b32.xlu1 %v14991_v15, %s13428_s14 }
0x3cff   : > { %8753 = vrot.lane.b32.xlu1 %v8261_v59, %s13429_s22 }
0x3d4c   : > { %v8420_v19 = vpop.xlane.xlu0 %8419 }
0x3d4d   : > { %v8421_v20 = vsub.f32 %v8413_v11, %v8420_v19 }
0x3d4f   : > { %v8422_v52 = vmul.f32 1.442695, %v8421_v20 }
0x3d51   : > { %12377 = vpow2.f32 %v8422_v52 }
0x3d5b   : > { %v12378_v24 = vpop.eup %12377 }
0x3d5c   : > { %v8424_v9 = vsel %vm2058_vm3, %v12378_v24, 0.0  ;;  %v8428_v27 = vpack.c.bf16 %v12378_v24, %v12378_v24 }
0x3d5d   : > { %8425 = vadd.xlane.f32.xlu0 %v8424_v9 }
0x3d5e   : > { %11347 = vmatmul.mubr.msk.bf16.vlgmr.msra.gmra.mrb[168].mxu1 %vm2058_vm3, %v8428_v27 }
0x3d5f   : > { %11359 = vmatpush3.bf16.msra.mxu1 %v12147_v25  ;;  %11362 = vmatprep.mubr.msk.bf16.mxu1 %vm13425_vm0, %v13424_v1 }
0x3d60   : > { %11360 = vmatprep.subr.bf16.mxu1 %v13424_v1 }
0x3d63   : > { %11361 = vmatpush3.bf16.msra.mxu1 %v12148_v60 }
0x3d64   : > { %11372 = vmatprep.subr.bf16.mxu1 %v13424_v1 }
0x3d73   : > { %8590 = vrot.lane.b32.xlu0 %v14989_v22, %s13428_s14  ;;  %s9976_s14 = sshll.u32 %s1630_s23, 4 }
0x3d77   : > { %v8318_v43 = vpop.xlane.xlu1 %8317 }
0x3d78   : > { %12379 = vrcp.f32 %v8318_v43 }
0x3d7b   : > { %v8650_v50 = vpop.permute.xlu1 %8649 }
0x3d82   : > { %v12380_v4 = vpop.eup %12379 }
0x3dbe   : > { %v8358_v49 = vpop.f32.mrb[164].mxu1 }
0x3dbf   : > { %v8364_v37 = vmul.f32 %v12380_v4, %v8358_v49  ;;  %v11336_v47 = vpop.f32.mrb[165].mxu1 }
0x3dc0   : > { %v8361_v40 = vpop.f32.mrb[166].mxu1 }
0x3dc1   : > { %v8365_v42 = vpack.c.bf16 %v8364_v37, %v8364_v37  ;;  %v11337_v48 = vpop.f32.mrb[167].mxu1 }
0x3dc3   : > { %11363 = vmatmul.mubr.msk.bf16.vlgmr.msra.gmra.mrb[172].mxu1 %vm2010_vm1, %v8365_v42 }
0x3dc4   : > { %11373 = vmatpush3.bf16.msra.mxu1 %v8650_v50  ;;  %11374 = vmatprep.mubr.msk.bf16.mxu1 %vm13425_vm0, %v13424_v1 }
0x3dc5   : > { %11386 = vmatprep.subr.bf16.mxu1 %v13424_v1 }
0x3dea   : > { %v8426_v21 = vpop.xlane.xlu0 %8425 }
0x3deb   : > { %12381 = vrcp.f32 %v8426_v21 }
0x3dee   : > { %v8591_v7 = vpop.permute.xlu0 %8590 }
0x3def   : > { %v8596_v62 = vsel %vm2010_vm1, %v8591_v7, 0  ;;  %v12154_v7 = vld [vmem:[#allocation32 + $0x78] sm:$0xff]  }
0x3df5   : > { %v12382_v51 = vpop.eup %12381 }
0x3e31   : > { %v8470_v29 = vpop.f32.mrb[168].mxu1 }
0x3e32   : > { %v8476_v55 = vmul.f32 %v12382_v51, %v8470_v29  ;;  %v11348_v30 = vpop.f32.mrb[169].mxu1 }
0x3e33   : > { %v8473_v23 = vpop.f32.mrb[170].mxu1 }
0x3e34   : > { %v8477_v8 = vpack.c.bf16 %v8476_v55, %v8476_v55  ;;  %v11349_v58 = vpop.f32.mrb[171].mxu1 }
0x3e36   : > { %11355 = vmatmul.mubr.msk.bf16.vlgmr.msra.gmra.mrb[156].mxu0 %vm2010_vm1, %v8477_v8 }
0x3e37   : > { %11367 = vmatpush3.bf16.xpose.msra.mxu0 %v8596_v62  ;;  %11368 = vmatprep.mubr.msk.bf16.mxu0 %vm13425_vm0, %v13424_v1 }
0x3e38   : > { %11378 = vmatprep.subr.bf16.mxu0 %v13424_v1 }
0x3e3e   : > { %11369 = vmatmul.mubr.msk.bf16.vlgmr.msra.gmra.mrb[160].mxu0 %vm2010_vm1, %v8589_v39 }
0x3e3f   : > { %11382 = vmatprep.mubr.msk.bf16.mxu0 %vm13425_vm0, %v13424_v1  ;;  %11379 = vmatpush3.bf16.msra.mxu0 %v12151_v36  ;;  %v12167_v36 = vld [vmem:[#allocation38 + $0xc0] ss:$8 sps:$4 sm:$0xff]  }
0x3e40   : > { %11380 = vmatprep.subr.bf16.mxu0 %v13424_v1 }
0x3e43   : > { %11381 = vmatpush3.bf16.msra.mxu0 %v12152_v18  ;;  %v12172_v18 = vld [vmem:[#allocation38 + $0xd4] ss:$8 sps:$4 sm:$0xff]  }
0x3e44   : > { %11392 = vmatprep.subr.bf16.mxu0 %v13424_v1 }
0x3e96   : > { %v8582_v46 = vpop.f32.mrb[172].mxu1 }
0x3e97   : > { %v11364_v56 = vpop.f32.mrb[173].mxu1 }
0x3e98   : > { %v8585_v2 = vpop.f32.mrb[174].mxu1 }
0x3e99   : > { %v11365_v59 = vpop.f32.mrb[175].mxu1 }
0x3f09   : > { %v8527_v3 = vpop.f32.mrb[156].mxu0 }
0x3f0a   : > { %v15068_v35 = vadd.f32 %v8582_v46, %v8527_v3  ;;  %v11356_v44 = vpop.f32.mrb[157].mxu0  ;;  %v10434_v3 = vld [vmem:[#allocation34 + $0x1] ss:$0 sm:$0xff] }
0x3f0b   : > { %v8530_v5 = vpop.f32.mrb[158].mxu0 }
0x3f0c   : > { %v11357_v6 = vpop.f32.mrb[159].mxu0 }
0x3f11   : > { %v8632_v26 = vpop.f32.mrb[160].mxu0 }
0x3f12   : > { %v8633_v38 = vadd.f32 %v8632_v26, %v14254_v61  ;;  %v11370_v10 = vpop.f32.mrb[161].mxu0 }
0x3f13   : > { %v8635_v57 = vpop.f32.mrb[162].mxu0 }
0x3f14   : > { %v11371_v11 = vpop.f32.mrb[163].mxu0  ;;  %v8638_v12 = vsel %vm2058_vm3, %v8633_v38, -inf  ;;  %v12155_v57 = vld [vmem:[#allocation38 + $0x80] ss:$8 sps:$4 sm:$0xff]  }
0x3f15   : > { %8639 = vmax.xlane.f32.xlu0 %v8638_v12  ;;  %v12157_v11 = vld [vmem:[#allocation38 + $0x84] ss:$8 sps:$4 sm:$0xff]   ;;  %v12160_v12 = vld [vmem:[#allocation38 + $0x94] ss:$8 sps:$4 sm:$0xff]  }
0x3f2b   : > { %8755 = vrot.lane.b32.xlu0 %v14989_v22, %s13429_s22  ;;  %v8754_v22 = vpop.permute.xlu1 %8753 }
0x3fa2   : > { %v8640_v13 = vpop.xlane.xlu0 %8639 }
0x3fa3   : > { %v8641_v14 = vsub.f32 %v8633_v38, %v8640_v13  ;;  %v12158_v13 = vld [vmem:[#allocation38 + $0x90] ss:$8 sps:$4 sm:$0xff]  }
0x3fa5   : > { %v8642_v34 = vmul.f32 1.442695, %v8641_v14  ;;  %v12163_v14 = vld [vmem:[#allocation38 + $0xa4] ss:$8 sps:$4 sm:$0xff]  }
0x3fa6   : > { %v8756_v16 = vpop.permute.xlu0 %8755 }
0x3fa7   : > { %12383 = vpow2.f32 %v8642_v34  ;;  %v8761_v17 = vsel %vm2010_vm1, %v8756_v16, 0  ;;  %v12161_v34 = vld [vmem:[#allocation38 + $0xa0] ss:$8 sps:$4 sm:$0xff]  }
0x3fb1   : > { %v12384_v32 = vpop.eup %12383 }
0x3fb2   : > { %v8644_v63 = vsel %vm2058_vm3, %v12384_v32, 0.0  ;;  %v8648_v53 = vpack.c.bf16 %v12384_v32, %v12384_v32 }
0x3fb3   : > { %8645 = vadd.xlane.f32.xlu1 %v8644_v63 }
0x3fb4   : > { %11375 = vmatmul.mubr.msk.bf16.vlgmr.msra.gmra.mrb[176].mxu1 %vm2058_vm3, %v8648_v53 }
0x3fb5   : > { %11387 = vmatpush3.bf16.xpose.msra.mxu1 %v8761_v17  ;;  %11388 = vmatprep.mubr.msk.bf16.mxu1 %vm13425_vm0, %v13424_v1  ;;  %v12166_v17 = vld [vmem:[#allocation38 + $0xb4] ss:$8 sps:$4 sm:$0xff]  }
0x3fb6   : > { %11398 = vmatprep.subr.bf16.mxu1 %v13424_v1 }
0x3fbc   : > { %11389 = vmatmul.mubr.msk.bf16.vlgmr.msra.gmra.mrb[180].mxu1 %vm2010_vm1, %v8754_v22  ;;  %v12169_v22 = vld [vmem:[#allocation38 + $0xc4] ss:$8 sps:$4 sm:$0xff]  }
0x3fbd   : > { %11402 = vmatprep.mubr.msk.bf16.mxu1 %vm13425_vm0, %v13424_v1 }
0x3fc4   : > { %8814 = vrot.lane.b32.xlu1 %v14991_v15, %s13429_s22  ;;  %s15114_s22 = scalar_lea.vmem [#allocation47], %s9976_s14  ;;  %s9460_s14 = scalar_lea.sflag [#allocation4], %s1630_s23 }
0x3fc5   : > { %s9478_s26 = sshll.u32 %s15114_s22, 4  ;;  %s9479_s26 = int_to_ptr.vmem [resolvable:$true] %s9478_s26 }
0x3fc6   : > { %p13226_p2 = scmp.lt.s32.totalorder %s9479_s26, %s13224_s5 }
0x4040   : > { %v8646_v19 = vpop.xlane.xlu1 %8645 }
0x4041   : > { %12385 = vrcp.f32 %v8646_v19  ;;  %v12170_v19 = vld [vmem:[#allocation38 + $0xd0] ss:$8 sps:$4 sm:$0xff]  }
0x4044   : > { %v8815_v28 = vpop.permute.xlu1 %8814 }
0x404b   : > { %v12386_v20 = vpop.eup %12385 }
0x4087   : > { %v8689_v52 = vpop.f32.mrb[176].mxu1 }
0x4088   : > { %v8695_v24 = vmul.f32 %v12386_v20, %v8689_v52  ;;  %v11376_v25 = vpop.f32.mrb[177].mxu1  ;;  %v12175_v20 = vld [vmem:[#allocation38 + $0xe4] ss:$8 sps:$4 sm:$0xff]   ;;  %v12173_v52 = vld [vmem:[#allocation38 + $0xe0] ss:$8 sps:$4 sm:$0xff]  }
0x4089   : > { %v8692_v9 = vpop.f32.mrb[178].mxu1  ;;  %v12176_v25 = vld [vmem:[#allocation38 + $0xf0] ss:$8 sps:$4 sm:$0xff]  }
0x408a   : > { %v8696_v27 = vpack.c.bf16 %v8695_v24, %v8695_v24  ;;  %v11377_v60 = vpop.f32.mrb[179].mxu1  ;;  %v12178_v24 = vld [vmem:[#allocation38 + $0xf4] ss:$8 sps:$4 sm:$0xff]  }
0x408c   : > { %11383 = vmatmul.mubr.msk.bf16.vlgmr.msra.gmra.mrb[164].mxu0 %vm2010_vm1, %v8696_v27 }
0x408d   : > { %11393 = vmatpush3.bf16.msra.mxu0 %v8815_v28  ;;  %11394 = vmatprep.mubr.msk.bf16.mxu0 %vm13425_vm0, %v13424_v1 }
0x408e   : > { %9043 = vmatprep.subr.bf16.mxu0 %v12157_v11 }
0x408f   : > { %v8797_v15 = vpop.f32.mrb[180].mxu1 }
0x4090   : > { %v8798_v45 = vadd.f32 %v8797_v15, %v14254_v61  ;;  %v11390_v39 = vpop.f32.mrb[181].mxu1  ;;  %v12153_v61 = vld [vmem:[#allocation32 + $0x70] sm:$0xff]   ;;  %v10435_v15 = vld [vmem:[#allocation35 + $0x1] ss:$0 sm:$0xff] }
0x4091   : > { %v8800_v43 = vpop.f32.mrb[182].mxu1  ;;  %11399 = vmatpush3.bf16.msra.mxu1 %v12153_v61  ;;  %v10436_v39 = vld [vmem:[#allocation37 + $0x1] ss:$0 sm:$0xff] }
0x4092   : > { %v11391_v4 = vpop.f32.mrb[183].mxu1  ;;  %v8803_v49 = vsel %vm2058_vm3, %v8798_v45, -inf  ;;  %11400 = vmatprep.subr.bf16.mxu1 %v13424_v1  ;;  %v12185_v61 = vld [vmem:[#allocation40 + $0xd8] sm:$0xff]  }
0x4093   : > { %8804 = vmax.xlane.f32.xlu0 %v8803_v49 }
0x4095   : > { %11401 = vmatpush3.bf16.msra.mxu1 %v12154_v7  ;;  %v12192_v7 = vld [vmem:[#allocation40 + $0xb0] sm:$0xff]  }
0x4120   : > { %v8805_v37 = vpop.xlane.xlu0 %8804 }
0x4121   : > { %v8806_v47 = vsub.f32 %v8798_v45, %v8805_v37  ;;  %v12179_v37 = vld [vmem:[#allocation40 + $0xc0] sm:$0xff]  }
0x4122   : > { %10784 = vmatprep.subr.bf16.mxu1 %v12179_v37 }
0x4123   : > { %v8807_v40 = vmul.f32 1.442695, %v8806_v47  ;;  %v12180_v47 = vld [vmem:[#allocation40 + $0x80] sm:$0xff]  }
0x4125   : > { %12387 = vpow2.f32 %v8807_v40  ;;  %v12181_v40 = vld [vmem:[#allocation40 + $0xc8] sm:$0xff]  }
0x412f   : > { %v12388_v42 = vpop.eup %12387 }
0x4130   : > { %v8809_v48 = vsel %vm2058_vm3, %v12388_v42, 0.0  ;;  %v8813_v50 = vpack.c.bf16 %v12388_v42, %v12388_v42  ;;  %v12182_v42 = vld [vmem:[#allocation40 + $0x88] sm:$0xff]  }
0x4131   : > { %8810 = vadd.xlane.f32.xlu0 %v8809_v48  ;;  %v12183_v48 = vld [vmem:[#allocation40 + $0xd0] sm:$0xff]  }
0x4132   : > { %11395 = vmatmul.mubr.msk.bf16.vlgmr.msra.gmra.mrb[168].mxu0 %vm2058_vm3, %v8813_v50  ;;  %v12184_v50 = vld [vmem:[#allocation40 + $0x90] sm:$0xff]  }
0x4133   : > { %9075 = vmatprep.mubr.bf16.mxu0 %v13423_v0  ;;  %9044 = vmatpush1.bf16.msra.mxu0 %v12155_v57 }
0x4134   : > { %9045 = vmatprep.subr.bf16.mxu0 %v12160_v12 }
0x4137   : > { %9046 = vmatpush1.bf16.msra.mxu0 %v12158_v13 }
0x4138   : > { %9047 = vmatprep.subr.bf16.mxu0 %v12163_v14 }
0x413b   : > { %9048 = vmatpush1.bf16.msra.mxu0 %v12161_v34 }
0x413c   : > { %9049 = vmatprep.subr.bf16.mxu0 %v12166_v17 }
0x415f   : > { %v8746_v21 = vpop.f32.mrb[164].mxu0 }
0x4160   : > { %v8752_v51 = vadd.f32 %v8746_v21, %v15068_v35  ;;  %v11384_v29 = vpop.f32.mrb[165].mxu0  ;;  %v12186_v21 = vld [vmem:[#allocation40 + $0x98] sm:$0xff]  }
0x4161   : > { %v8749_v55 = vpop.f32.mrb[166].mxu0  ;;  %v12188_v29 = vld [vmem:[#allocation40 + $0xa0] sm:$0xff]  }
0x4162   : > { %v11385_v30 = vpop.f32.mrb[167].mxu0  ;;  %v12190_v55 = vld [vmem:[#allocation40 + $0xa8] sm:$0xff]  }
0x4163   : > { %v12191_v30 = vld [vmem:[#allocation40 + $0xf0] sm:$0xff]  }
0x41be   : > { %v8811_v23 = vpop.xlane.xlu0 %8810 }
0x41bf   : > { %12389 = vrcp.f32 %v8811_v23  ;;  %v12193_v23 = vld [vmem:[#allocation40 + $0xf8] sm:$0xff]  }
0x41c9   : > { %v12390_v8 = vpop.eup %12389 }
0x4205   : > { %v8854_v58 = vpop.f32.mrb[168].mxu0 }
0x4206   : > { %v8860_v62 = vmul.f32 %v12390_v8, %v8854_v58  ;;  %v11396_v46 = vpop.f32.mrb[169].mxu0  ;;  %v12194_v8 = vld [vmem:[#allocation40 + $0xb8] sm:$0xff]   ;;  %v10340_v58 = vld [vmem:[%s15338_s11 + $0x2] sm:$0x3] }
0x4207   : > { %v8857_v56 = vpop.f32.mrb[170].mxu0  ;;  %v8960_v46 = vrot.slane %v10340_v58, %v14223_v33 }
0x4208   : > { %v8861_v2 = vpack.c.bf16 %v8860_v62, %v8860_v62  ;;  %v11397_v59 = vpop.f32.mrb[171].mxu0  ;;  %v8956_v62 = vrot.slane %v10340_v58, %v14220_v31 }
0x420a   : > { %11403 = vmatmul.mubr.msk.bf16.vlgmr.msra.gmra.mrb[184].mxu1 %vm2010_vm1, %v8861_v2 }
0x420b   : > { %10785 = vmatpush3.bf16.msra.mxu1 %v12180_v47 }
0x420c   : > { %10786 = vmatprep.subr.bf16.mxu1 %v12181_v40 }
0x420f   : > { %10787 = vmatpush3.bf16.msra.mxu1 %v12182_v42 }
0x4210   : > { %10788 = vmatprep.subr.bf16.mxu1 %v12183_v48  ;;  %v12206_v48 = vld [vmem:[#allocation44 + $0x34] ss:$8 sps:$4 sm:$0xff]  }
0x4213   : > { %10789 = vmatpush3.bf16.msra.mxu1 %v12184_v50  ;;  %v12209_v50 = vld [vmem:[#allocation44 + $0x44] ss:$8 sps:$4 sm:$0xff]  }
0x4214   : > { %10790 = vmatprep.subr.bf16.mxu1 %v12185_v61  ;;  %v12207_v61 = vld [vmem:[#allocation44 + $0x40] ss:$8 sps:$4 sm:$0xff]  }
0x4217   : > { %10791 = vmatpush3.bf16.msra.mxu1 %v12186_v21  ;;  %v12212_v21 = vld [vmem:[#allocation44 + $0x54] ss:$8 sps:$4 sm:$0xff]  }
0x42dd   : > { %v8911_v44 = vpop.f32.mrb[184].mxu1 }
0x42de   : > { %v8917_v5 = vadd.f32 %v8911_v44, %v8752_v51  ;;  %v11404_v35 = vpop.f32.mrb[185].mxu1  ;;  %v12187_v51 = vld [vmem:[#allocation40 + $0xe0] sm:$0xff]  }
0x42df   : > { %v8914_v6 = vpop.f32.mrb[186].mxu1  ;;  %10792 = vmatprep.subr.bf16.mxu1 %v12187_v51  ;;  %v12210_v51 = vld [vmem:[#allocation44 + $0x50] ss:$8 sps:$4 sm:$0xff]  }
0x42e0   : > { %v8924_v26 = vadd.f32 %v10434_v3, %v8917_v5  ;;  %v11405_v38 = vpop.f32.mrb[187].mxu1  ;;  %10793 = vmatpush3.bf16.msra.mxu1 %v12188_v29  ;;  %v12215_v29 = vld [vmem:[#allocation44 + $0x64] ss:$8 sps:$4 sm:$0xff]  }
0x42e2   : > { %v8925_v10 = vadd.f32 %v8924_v26, %v15013_v54  ;;  %v12164_v54 = vld [vmem:[#allocation38 + $0xb0] ss:$8 sps:$4 sm:$0xff]  }
0x42e3   : > { %9050 = vmatpush1.bf16.msra.mxu0 %v12164_v54 }
0x42e4   : > { %8926 = vadd.xlane.f32.xlu0 %v8925_v10  ;;  %9051 = vmatprep.subr.bf16.mxu0 %v12169_v22 }
0x42e7   : > { %9052 = vmatpush1.bf16.msra.mxu0 %v12167_v36 }
0x42e8   : > { %9053 = vmatprep.subr.bf16.mxu0 %v12172_v18 }
0x42eb   : > { %9054 = vmatpush1.bf16.msra.mxu0 %v12170_v19 }
0x42ec   : > { %9055 = vmatprep.subr.bf16.mxu0 %v12175_v20  ;;  %v10453_v20 = vld [vmem:[%s15339_s6 + $0x1] ss:$0 sm:$0xff]  ;;  %s13225_s6 = scalar_lea.vmem %s13224_s5, 512 }
0x42ef   : > { %9056 = vmatpush1.bf16.msra.mxu0 %v12173_v52 }
0x42f0   : > { %9057 = vmatprep.subr.bf16.mxu0 %v12178_v24 }
0x42f3   : > { %9058 = vmatpush1.bf16.msra.mxu0 %v12176_v25 }
0x4371   : > { %v8927_v32 = vpop.xlane.xlu0 %8926 }
0x4372   : > { %v8928_v16 = vmul.f32 0.0078125, %v8927_v32 }
0x4374   : > { %v8929_v63 = vsub.f32 %v8925_v10, %v8928_v16 }
0x4376   : > { %v8930_v53 = vmul.f32 %v8929_v63, %v8929_v63 }
0x4378   : > { %8931 = vadd.xlane.f32.xlu0 %v8930_v53 }
0x4405   : > { %v8932_v9 = vpop.xlane.xlu0 %8931 }
0x4406   : > { %v8933_v27 = vmul.f32 0.0078125, %v8932_v9 }
0x4408   : > { %v8934_v60 = vadd.f32 1e-05, %v8933_v27 }
0x440a   : > { %12391 = vrsqrt.f32 %v8934_v60 }
0x4414   : > { %v12392_v28 = vpop.eup %12391 }
0x4415   : > { %v8936_v45 = vmul.f32 %v12392_v28, %v8929_v63  ;;  %v12195_v28 = vld [vmem:[#allocation44] ss:$8 sps:$4 sm:$0xff]  }
0x4417   : > { %v8943_v43 = vmul.f32 %v10435_v15, %v8936_v45  ;;  %v12197_v15 = vld [vmem:[#allocation44 + $0x4] ss:$8 sps:$4 sm:$0xff]   ;;  %v12200_v45 = vld [vmem:[#allocation44 + $0x14] ss:$8 sps:$4 sm:$0xff]  }
0x4418   : > { %9381 = vmatprep.subr.bf16.mxu0 %v12197_v15 }
0x4419   : > { %v15099_v4 = vadd.f32 %v10436_v39, %v8943_v43  ;;  %v12198_v39 = vld [vmem:[#allocation44 + $0x10] ss:$8 sps:$4 sm:$0xff]   ;;  %v12203_v43 = vld [vmem:[#allocation44 + $0x24] ss:$8 sps:$4 sm:$0xff]  }
0x441b   : > { %v8951_v49 = vpack.c.bf16 %v15099_v4, %v15099_v4 }
0x441d   : > { %9076 = vmatmul.mubr.bf16.vlgmr.msra.gmra.mrb[172].mxu0 %v8951_v49  ;;  %v12201_v49 = vld [vmem:[#allocation44 + $0x20] ss:$8 sps:$4 sm:$0xff]  }
0x441e   : > { %9413 = vmatprep.mubr.bf16.mxu0 %v13423_v0  ;;  %v12189_v0 = vld [vmem:[#allocation40 + $0xe8] sm:$0xff]   ;;  %9382 = vmatpush1.bf16.msra.mxu0 %v12195_v28 }
0x441f   : > { %10794 = vmatprep.subr.bf16.mxu1 %v12189_v0  ;;  %9383 = vmatprep.subr.bf16.mxu0 %v12200_v45  ;;  %v12213_v0 = vld [vmem:[#allocation44 + $0x60] ss:$8 sps:$4 sm:$0xff]  }
0x4420   : > { %10795 = vmatpush3.bf16.msra.mxu1 %v12190_v55  ;;  %v12218_v55 = vld [vmem:[#allocation44 + $0x74] ss:$8 sps:$4 sm:$0xff]  }
0x4421   : > { %10796 = vmatprep.subr.bf16.mxu1 %v12191_v30  ;;  %v12216_v30 = vld [vmem:[#allocation44 + $0x70] ss:$8 sps:$4 sm:$0xff]  }
0x4422   : > { %9384 = vmatpush1.bf16.msra.mxu0 %v12198_v39 }
0x4423   : > { %9385 = vmatprep.subr.bf16.mxu0 %v12203_v43 }
0x4424   : > { %10797 = vmatpush3.bf16.msra.mxu1 %v12192_v7 }
0x4425   : > { %10798 = vmatprep.subr.bf16.mxu1 %v12193_v23 }
0x4426   : > { %9386 = vmatpush1.bf16.msra.mxu0 %v12201_v49 }
0x4427   : > { %9387 = vmatprep.subr.bf16.mxu0 %v12206_v48 }
0x4428   : > { %10799 = vmatpush3.bf16.msra.mxu1 %v12194_v8 }
0x44f0   : > { %v9077_v56 = vpop.f32.mrb[172].mxu0 }
0x44f1   : > { %v9078_v2 = vadd.f32 %v9077_v56, %v8956_v62  ;;  %v9079_v59 = vpop.f32.mrb[173].mxu0  ;;  %v10470_v62 = vld [vmem:[#allocation41 + $0x1] ss:$0 sm:$0xff]  ;;  %v10471_v56 = vld [vmem:[#allocation43 + $0x1] ss:$0 sm:$0xff] }
0x44f2   : > { %v9080_v3 = vadd.f32 %v9079_v59, %v8960_v46  ;;  %v9081_v44 = vpop.f32.mrb[174].mxu0 }
0x44f3   : > { %v9086_v5 = vmul.f32 0.044715, %v9078_v2  ;;  %v9082_v35 = vpop.f32.mrb[175].mxu0  ;;  %v9084_v16 = vmul.f32 0.5, %v9078_v2  ;;  %v9288_v44 = vld [vmem:[#allocation46] sm:$0x3] }
0x44f4   : > { %v9087_v6 = vmul.f32 0.044715, %v9080_v3  ;;  %v9085_v53 = vmul.f32 0.5, %v9080_v3  ;;  %v9298_v35 = vrot.slane %v9288_v44, %v14223_v33 }
0x44f5   : > { %v9088_v26 = vmul.f32 %v9086_v5, %v9078_v2  ;;  %v9294_v5 = vrot.slane %v9288_v44, %v14220_v31  ;;  %v9424_v31 = vld [vmem:[%s1654_s1] sm:$0xff]  ;;  %s13219_s1 = scalar_lea.vmem %s9479_s26, 256 }
0x44f6   : > { %v9089_v38 = vmul.f32 %v9087_v6, %v9080_v3  ;;  %vm9425_vm7 = vcmp.ne.s32.totalorder %v9424_v31, 4294967196  ;;  %p13220_p10 = scmp.ne.s32.totalorder %s9479_s26, %s13219_s1  ;;  %p13227_p3 = scmp.lt.s32.totalorder %s13225_s6, %s13219_s1 }
0x44f7   : > { %v9090_v10 = vmul.f32 %v9088_v26, %v9078_v2 }
0x44f8   : > { %v9091_v57 = vmul.f32 %v9089_v38, %v9080_v3  ;;  %p13221_p12 = pnand %p13220_p10, %p15341_p13  ;;  %p13228_p4 = por %p13227_p3, %p13226_p2 }
0x44f9   : > { %v9092_v11 = vadd.f32 %v9090_v10, %v9078_v2 }
0x44fa   : > { %v9093_v12 = vadd.f32 %v9091_v57, %v9080_v3  ;;  %p13222_p1 = pneg %p13221_p12 }
0x44fb   : > { %v9094_v13 = vmul.f32 0.7978846, %v9092_v11 }
0x44fc   : > { %v9095_v14 = vmul.f32 0.7978846, %v9093_v12  ;;  %p13229_p7 = pnand %p13228_p4, %p13222_p1 }
0x44fd   : > { %12393 = vtanh.f32 %v9094_v13  ;;  %v9426_v13 = vsel %vm9425_vm7, %v9424_v31, 0 }
0x44fe   : > { %12395 = vtanh.f32 %v9095_v14 }
0x4507   : > { %v12394_v34 = vpop.eup %12393 }
0x4508   : > { %v12396_v32 = vpop.eup %12395  ;;  %v9098_v63 = vadd.f32 1.0, %v12394_v34 }
0x4509   : > { %v9099_v17 = vadd.f32 1.0, %v12396_v32 }
0x450a   : > { %v9100_v54 = vmul.f32 %v9098_v63, %v9084_v16  ;;  %v9442_v63 = vadd.s32 128, %v14627_v41 }
0x450b   : > { %v9101_v22 = vmul.f32 %v9099_v17, %v9085_v53 }
0x450c   : > { %v9102_v18 = vpack.c.bf16 %v9100_v54, %v9100_v54 }
0x450d   : > { %v9103_v36 = vpack.c.bf16 %v9101_v22, %v9101_v22 }
0x450f   : > { %9238 = vmatprep.mubr.bf16.mxu1 %v9103_v36 }
0x4510   : > { %9239 = vmatmul.mubr.bf16.vlgmr.msra.gmra.mrb[188].mxu1 %v9102_v18 }
0x45e3   : > { %v10800_v19 = vpop.f32.mrb[188].mxu1 }
0x45e4   : > { %v10801_v52 = vpop.f32.mrb[189].mxu1 }
0x45e5   : > { %v10802_v24 = vadd.f32 %v10801_v52, %v10800_v19  ;;  %v10803_v25 = vpop.f32.mrb[190].mxu1 }
0x45e6   : > { %v10804_v9 = vpop.f32.mrb[191].mxu1 }
0x45e7   : > { %v9241_v27 = vadd.f32 %v10802_v24, %v10453_v20 }
0x45e9   : > { %v9246_v60 = vadd.f32 %v9241_v27, %v15099_v4  ;;  %v12204_v4 = vld [vmem:[#allocation44 + $0x30] ss:$8 sps:$4 sm:$0xff]  }
0x45ea   : > { %9388 = vmatpush1.bf16.msra.mxu0 %v12204_v4 }
0x45eb   : > { %9247 = vadd.xlane.f32.xlu1 %v9246_v60  ;;  %9389 = vmatprep.subr.bf16.mxu0 %v12209_v50 }
0x45ee   : > { %9390 = vmatpush1.bf16.msra.mxu0 %v12207_v61 }
0x45ef   : > { %9391 = vmatprep.subr.bf16.mxu0 %v12212_v21 }
0x45f2   : > { %9392 = vmatpush1.bf16.msra.mxu0 %v12210_v51 }
0x45f3   : > { %9393 = vmatprep.subr.bf16.mxu0 %v12215_v29 }
0x45f6   : > { %9394 = vmatpush1.bf16.msra.mxu0 %v12213_v0 }
0x45f7   : > { %9395 = vmatprep.subr.bf16.mxu0 %v12218_v55 }
0x45fa   : > { %9396 = vmatpush1.bf16.msra.mxu0 %v12216_v30 }
0x4678   : > { %v9248_v37 = vpop.xlane.xlu1 %9247 }
0x4679   : > { %v9249_v47 = vmul.f32 0.0078125, %v9248_v37 }
0x467b   : > { %v9250_v40 = vsub.f32 %v9246_v60, %v9249_v47 }
0x467d   : > { %v9251_v42 = vmul.f32 %v9250_v40, %v9250_v40 }
0x467f   : > { %9252 = vadd.xlane.f32.xlu0 %v9251_v42 }
0x470c   : > { %v9253_v7 = vpop.xlane.xlu0 %9252 }
0x470d   : > { %v9254_v23 = vmul.f32 0.0078125, %v9253_v7 }
0x470f   : > { %v9255_v8 = vadd.f32 1e-05, %v9254_v23 }
0x4711   : > { %12397 = vrsqrt.f32 %v9255_v8 }
0x471b   : > { %v12398_v58 = vpop.eup %12397 }
0x471c   : > { %v9257_v46 = vmul.f32 %v12398_v58, %v9250_v40 }
0x471e   : > { %v9264_v2 = vmul.f32 %v10470_v62, %v9257_v46 }
0x4720   : > { %v9271_v59 = vadd.f32 %v10471_v56, %v9264_v2 }
0x4722   : > { %v9289_v3 = vpack.c.bf16 %v9271_v59, %v9271_v59 }
0x4724   : > { %9414 = vmatmul.mubr.bf16.vlgmr.msra.gmra.mrb[176].mxu0 %v9289_v3 }
0x47f7   : > { %v9415_v6 = vpop.f32.mrb[176].mxu0 }
0x47f8   : > { %v9416_v26 = vadd.f32 %v9415_v6, %v9294_v5  ;;  %v9417_v38 = vpop.f32.mrb[177].mxu0 }
0x47f9   : > { %v9418_v10 = vadd.f32 %v9417_v38, %v9298_v35  ;;  %v9419_v57 = vpop.f32.mrb[178].mxu0 }
0x47fa   : > { %v9420_v11 = vpop.f32.mrb[179].mxu0  ;;  %9422 = vst [vmem:[%s15114_s22] sm:$0xff] %v9416_v26 }
0x47fb   : > { %v9427_v12 = vmax.f32 %v9416_v26, %v9418_v10  ;;  %9423 = vst [vmem:[%s15114_s22 + $0x8] sm:$0xff] %v9418_v10 }
0x47fd   : > { %9428 = vmax.xlane.f32.xlu0 %v9427_v12 }
0x4813   : > { %9444 = vperm.xlu0 %11794, %v9426_v13  }
0x488a   : > { %v9429_v33 = vpop.xlane.xlu0 %9428 }
0x488b   : > { %v9430_v14 = vsub.f32 %v9416_v26, %v9429_v33  ;;  %v9431_v34 = vsub.f32 %v9418_v10, %v9429_v33 }
0x488d   : > { %v9432_v32 = vmul.f32 1.442695, %v9430_v14  ;;  %v9434_v16 = vmul.f32 1.442695, %v9431_v34 }
0x488f   : > { %12399 = vpow2.f32 %v9432_v32 }
0x4890   : > { %12401 = vpow2.f32 %v9434_v16 }
0x4892   : > { %v9445_v53 = vpop.permute.xlu0 %9444 }
0x4893   : > { %vm9446_vm8 = vcmp.eq.s32.totalorder %v14627_v41, %v9445_v53  ;;  %vm9447_vm9 = vcmp.eq.s32.totalorder %v9442_v63, %v9445_v53 }
0x4894   : > { %v9448_v36 = vsel %vm9446_vm8, %v9416_v26, 0.0  ;;  %v9449_v18 = vsel %vm9447_vm9, %v9418_v10, 0.0 }
0x4895   : > { %v9450_v19 = vadd.f32 %v9449_v18, %v9448_v36 }
0x4899   : > { %v12400_v17 = vpop.eup %12399 }
0x489a   : > { %v12402_v54 = vpop.eup %12401 }
0x489b   : > { %v9436_v22 = vadd.f32 %v12402_v54, %v12400_v17 }
0x489d   : > { %9437 = vadd.xlane.f32.xlu1 %v9436_v22 }
0x48a1   : > { %9451 = vadd.xlane.f32.xlu1 %v9450_v19 }
0x48a2   : > { %13232 = shalt.err (!%p13229_p7)
}
0x48a3   : > { %s13233_s28 = scalar_lea.hbm %s15126_s9, 256  ;;  %s13237_s4 = scalar_lea.hbm %s13629_s3, 512 }
0x48a4   : > { %p13234_p8 = scmp.ne.s32.totalorder %s15126_s9, %s13233_s28  ;;  %p13238_p5 = scmp.lt.u32.totalorder %s15126_s9, %s13629_s3 }
0x48a5   : > { %p13239_p9 = scmp.lt.u32.totalorder %s13237_s4, %s13233_s28  ;;  %p13241_p10 = scmp.lt.u32.totalorder %s13233_s28, %s15126_s9 }
0x48a6   : > { %p13235_p11 = pnand %p13234_p8, %p15341_p13 }
0x48a7   : > { %p13240_p0 = por %p13239_p9, %p13238_p5 }
0x48a8   : > { %p13236_p6 = pneg %p13235_p11 }
0x48a9   : > { %p13242_p12 = por %p13241_p10, %p13240_p0 }
0x48ab   : > { %p13243_p1 = pnand %p13242_p12, %p13236_p6 }
0x48ad   : > { %13246 = shalt.err (!%p13243_p1)
}
0x48ae   : > { %s15342_s5 = sld [smem:[#allocation94_spill]]  ;;  %v10488_v25 = vsel %vm9425_vm7, 1.0, %v13424_v1  ;;  %vm9457_vm10 = vcmask 7168  }
0x48af   : > { %11522 = dma.vmem_to_hbm [thread:$0]  (%p15341_p13), %s9479_s26, 256, %s15126_s9, %s9460_s14  }
0x48b4   : > { %s1658_s6 = scalar_lea.vmem %s15342_s5, %s14568_s2 }
0x492a   : > { %v9438_v41 = vpop.xlane.xlu1 %9437 }
0x492b   : > { %12403 = vlog2.f32 %v9438_v41 }
0x492e   : > { %v9452_v9 = vpop.xlane.xlu1 %9451 }
0x4935   : > { %v12404_v20 = vpop.eup %12403 }
0x4936   : > { %v9440_v52 = vmul.f32 0.6931472, %v12404_v20 }
0x4938   : > { %v9441_v24 = vadd.f32 %v9440_v52, %v9429_v33 }
0x493a   : > { %v9453_v27 = vsub.f32 %v9441_v24, %v9452_v9 }
0x493c   : > { %v9456_v60 = vmul.f32 %v10488_v25, %v9453_v27 }
0x493e   : > { %9458 = vst.msk [vmem:[%s1658_s6] sm:$0xff] %vm9457_vm10, %v9456_v60 }
0x493f PF: > { %s15343_s15 = sld [smem:[#allocation97_spill]]  ;;  %s15344_s23 = sld [smem:[#allocation95_spill]] }
0x4940   : > { %s15345_s22 = sld [smem:[#allocation100_spill]] }
0x4945   : > { %p11674_p2 = scmp.ge.s32.totalorder %s15343_s15, 2  ;;  %s9493_s10 = sand.u32 1, %s15344_s23  }
0x4946   : > { %p15346_p13 = scmp.ne.s32.totalorder %s15345_s22, 0  ;;  %s9494_s26 = scalar_lea.sflag [#allocation4], %s9493_s10 }
0x4948   : > { %p11613_p3 = pnand %p11674_p2, %p15346_p13 }
0x494a   : > { %13324 = dma.done.wait (!%p11613_p3), %s9494_s26, 256  }
0x494b   : > { %13326 = vsyncadd (!%p11613_p3), %s9494_s26, 4294967040  ;;  %s15347_s26 = sld [smem:[#allocation98_spill]]  ;;  %s15348_s9 = sld [smem:[#allocation96_spill]] }
0x494c   : > { %s15349_s23 = sld [smem:[#allocation99_spill]]  ;;  %s15350_s22 = smov %s13333_s0 }
0x4951   : > { %p105_p4 = scmp.ge.s32.totalorder %s15347_s26, 4   ;;  %s15351_s0 = smov %s15348_s9 }
0x4953   :  { %107 = sbr.rel (!%p105_p4) target bundleno = 95 (0x5f), region = 416 }
0x495a   :  { %9506 = vsyncpa [#allocation3], 1 }
0x495b   :  { %9508 = vsyncpa [#allocation3 + $0x1], 1 }
0x495c   :  { %9509 = vsyncpa [#allocation6], 1 }
0x495d   :  { %9510 = vsyncpa [#allocation9], 1 }
0x495e   :  { %9511 = vsyncpa [#allocation12], 1 }
0x495f   :  { %9512 = vsyncpa [#allocation15], 1 }
0x4960   :  { %9513 = vsyncpa [#allocation18], 1 }
0x4961   :  { %9514 = vsyncpa [#allocation21], 1 }
0x4962   :  { %9515 = vsyncpa [#allocation24], 1 }
0x4963   :  { %9516 = vsyncpa [#allocation27], 1 }
0x4964   :  { %9517 = vsyncpa [#allocation30], 1 }
0x4965   :  { %9518 = vsyncpa [#allocation33], 1 }
0x4966   :  { %9519 = vsyncpa [#allocation36], 1 }
0x4967   :  { %9520 = vsyncpa [#allocation39], 1 }
0x4968   :  { %9521 = vsyncpa [#allocation42], 1 }
0x4969   :  { %9522 = vsyncpa [#allocation45], 1 }
0x496a   :  { %9523 = vsyncpa [#allocation4], 1 }
0x496b   :  { %9525 = vsyncpa [#allocation4 + $0x1], 1 }

</bundles_post_ra>
